<compile_context>
chip_gen: v7x
topology: tpu7x:2x2x1
jax: 0.10.0
libtpu: 0.0.40
codegen_flags: <defaults>
</compile_context>

<pallas_src>
import jax
import jax.numpy as jnp
from jax import lax
from jax.experimental import pallas as pl
from jax.experimental.pallas import tpu as pltpu

KH = KW = 3     # conv256_3 kernel size
PAD = 1         # conv256_3 padding
EPS = 1e-5      # PyTorch BatchNorm default eps


def _fp_kernel(x_ref, wconv_ref, wg_ref, vec_ref, o_ref, xpad_ref, patch_ref):
    # x_ref    : (1, H, W, C)      input tile (NHWC, one batch element)
    # wconv_ref: (KH*KW*C, C)      im2col conv weight (BN2d folded in)
    # wg_ref   : (C, C)            GCN conv_wg weight, (in, out), bn_wg folded in
    # vec_ref  : (4, C)            rows: [conv bias | a_adj | b_adj | bn_wg bias]
    # o_ref    : (1, H, W, C)      output tile
    # xpad_ref : (H+2, W+2, C)     VMEM scratch: zero-padded input (in-kernel halo)
    # patch_ref: (H*W, KH*KW*C)    VMEM scratch: im2col patch slab
    H, W, C = x_ref.shape[1], x_ref.shape[2], x_ref.shape[3]
    HW = H * W

    x = x_ref[0]                                               # (H, W, C)

    # ---- in-kernel halo (pad=1): zero border + interior copy -----------------
    xpad_ref[...] = jnp.zeros(xpad_ref.shape, xpad_ref.dtype)
    xpad_ref[PAD:PAD + H, PAD:PAD + W, :] = x

    # ---- im2col: 9 shifted views written into one (HW, 9*C) slab -------------
    for t in range(KH * KW):
        ky, kx = t // KW, t % KW
        patch_ref[:, t * C:(t + 1) * C] = (
            xpad_ref[ky:ky + H, kx:kx + W, :].reshape(HW, C))

    # ---- conv 3x3 + folded BN + ReLU: one K = 9*C MXU contraction ------------
    acc = jnp.dot(patch_ref[...], wconv_ref[...],
                  preferred_element_type=jnp.float32)          # (HW, C)
    bias1 = vec_ref[0:1, :]                                    # (1, C)
    x1 = jnp.maximum(acc + bias1, 0.0)                         # (HW, C)

    # ---- global average pool over spatial ------------------------------------
    pooled = jnp.sum(x1, axis=0, keepdims=True) * (1.0 / HW)   # (1, C)

    # ---- GCN adj branch (node_num=1): folded scalar affine + ReLU + residual -
    a_adj = vec_ref[1:2, :]
    b_adj = vec_ref[2:3, :]
    z = jnp.maximum(pooled * a_adj + b_adj, 0.0) + pooled      # (1, C)

    # ---- GCN conv_wg (1x1 Conv1d over 256 feats) + folded bn_wg + ReLU -------
    # Broadcast to 8 sublane rows so the MXU sees an (8, C) x (C, C) matmul.
    z8 = jnp.broadcast_to(z, (8, C))
    y8 = jnp.dot(z8, wg_ref[...], preferred_element_type=jnp.float32)
    y = jnp.maximum(y8[0:1, :] + vec_ref[3:4, :], 0.0)         # (1, C)

    # ---- channel softmax ------------------------------------------------------
    m = jnp.max(y, axis=1, keepdims=True)
    e = jnp.exp(y - m)
    attn = e / jnp.sum(e, axis=1, keepdims=True)               # (1, C)

    # ---- residual: out = x + x1 * attn ---------------------------------------
    out = x.reshape(HW, C) + x1 * attn
    o_ref[0] = out.reshape(H, W, C).astype(o_ref.dtype)


def fp_module_pallas(x_nchw, params):
    """x_nchw: (B, C, H, W) float32; params: dict of FPModule parameters."""
    B, C, H, W = x_nchw.shape

    # ---- fold BatchNorms (eval mode) into the adjacent linear ops ------------
    s1 = params["bn1_gamma"] * lax.rsqrt(params["bn1_var"] + EPS)
    w_eff = params["conv_w"] * s1[:, None, None, None]          # OIHW, scaled per out-ch
    b_eff = params["bn1_beta"] - params["bn1_mean"] * s1        # (C,)
    # OIHW -> (ky, kx, Cin, Cout) -> (9*Cin, Cout) im2col ordering.
    w_im2col = jnp.transpose(w_eff, (2, 3, 1, 0)).reshape(KH * KW * C, C)

    s_adj = params["bn_adj_gamma"][0] * lax.rsqrt(params["bn_adj_var"][0] + EPS)
    a_adj = params["w_adj"][0, 0, 0] * s_adj                    # scalar
    b_adj = params["bn_adj_beta"][0] - params["bn_adj_mean"][0] * s_adj

    s_wg = params["bn_wg_gamma"] * lax.rsqrt(params["bn_wg_var"] + EPS)
    w_wg_t = (params["w_wg"][:, :, 0] * s_wg[:, None]).T        # (Cin, Cout)
    b_wg = params["bn_wg_beta"] - params["bn_wg_mean"] * s_wg   # (C,)

    vecs = jnp.stack([b_eff,
                      jnp.full((C,), a_adj, jnp.float32),
                      jnp.full((C,), b_adj, jnp.float32),
                      b_wg], axis=0).astype(jnp.float32)        # (4, C)

    # NCHW -> NHWC: C=256 on lanes (lane-dense compute/store inside the kernel).
    # TODO(synk): a channels-last end-to-end pipeline would drop these two
    #             wrapper transposes (extra HBM passes) entirely.
    x_nhwc = jnp.transpose(x_nchw, (0, 2, 3, 1)).astype(jnp.float32)

    flops = 2 * B * H * W * C * (KH * KW * C) + 2 * B * C * C
    bytes_accessed = 4 * (2 * x_nhwc.size + w_im2col.size + w_wg_t.size + vecs.size)
    cost = pl.CostEstimate(flops=flops, transcendentals=B * C,
                           bytes_accessed=bytes_accessed)

    out_nhwc = pl.pallas_call(
        _fp_kernel,
        out_shape=jax.ShapeDtypeStruct((B, H, W, C), x_nchw.dtype),
        grid_spec=pltpu.PrefetchScalarGridSpec(
            num_scalar_prefetch=0,
            grid=(B,),
            in_specs=[
                pl.BlockSpec((1, H, W, C), lambda n: (n, 0, 0, 0)),
                pl.BlockSpec((KH * KW * C, C), lambda n: (0, 0)),
                pl.BlockSpec((C, C), lambda n: (0, 0)),
                pl.BlockSpec((4, C), lambda n: (0, 0)),
            ],
            out_specs=pl.BlockSpec((1, H, W, C), lambda n: (n, 0, 0, 0)),
            scratch_shapes=[
                pltpu.VMEM((H + 2 * PAD, W + 2 * PAD, C), jnp.float32),
                pltpu.VMEM((H * W, KH * KW * C), jnp.float32),
            ]),
        compiler_params=pltpu.CompilerParams(
            dimension_semantics=("parallel",)),
        cost_estimate=cost,
    )(x_nhwc, w_im2col.astype(jnp.float32), w_wg_t.astype(jnp.float32), vecs)

    return jnp.transpose(out_nhwc, (0, 3, 1, 2))


def _reference(x, params):
    """Pure-JAX reference of FPModule.forward (BatchNorm in eval mode)."""
    w = params["conv_w"]
    dn = lax.conv_dimension_numbers(x.shape, w.shape, ("NCHW", "OIHW", "NCHW"))
    y = lax.conv_general_dilated(x, w, (1, 1), [(1, 1), (1, 1)],
                                 dimension_numbers=dn,
                                 precision=lax.Precision.HIGHEST)
    y = ((y - params["bn1_mean"][None, :, None, None])
         * lax.rsqrt(params["bn1_var"] + EPS)[None, :, None, None]
         * params["bn1_gamma"][None, :, None, None]
         + params["bn1_beta"][None, :, None, None])
    x1 = jnp.maximum(y, 0.0)

    pooled = jnp.mean(x1, axis=(2, 3))                           # (B, C)

    # GCN, node_num=1: conv_adj is a scalar multiply; BN1d(1) is a scalar affine.
    z = params["w_adj"][0, 0, 0] * pooled
    z = ((z - params["bn_adj_mean"][0]) * lax.rsqrt(params["bn_adj_var"][0] + EPS)
         * params["bn_adj_gamma"][0] + params["bn_adj_beta"][0])
    z = jnp.maximum(z, 0.0) + pooled

    y2 = jnp.dot(z, params["w_wg"][:, :, 0].T, precision=lax.Precision.HIGHEST)
    y2 = ((y2 - params["bn_wg_mean"]) * lax.rsqrt(params["bn_wg_var"] + EPS)
          * params["bn_wg_gamma"] + params["bn_wg_beta"])
    y2 = jnp.maximum(y2, 0.0)

    attn = jax.nn.softmax(y2, axis=1)                            # (B, C)
    return x + x1 * attn[:, :, None, None]


if __name__ == "__main__":
    key = jax.random.PRNGKey(0)
    ks = jax.random.split(key, 16)
    B, C, H, W = 2, 256, 16, 16   # channels must be 256 (module hard-codes GCN(1, 256))

    x = jax.random.normal(ks[0], (B, C, H, W), jnp.float32)

    params = dict(
        conv_w=jax.random.normal(ks[1], (C, C, 3, 3), jnp.float32) * 0.05,
        bn1_gamma=1.0 + 0.1 * jax.random.normal(ks[2], (C,), jnp.float32),
        bn1_beta=0.1 * jax.random.normal(ks[3], (C,), jnp.float32),
        bn1_mean=0.1 * jax.random.normal(ks[4], (C,), jnp.float32),
        bn1_var=jax.random.uniform(ks[5], (C,), jnp.float32, 0.5, 1.5),
        w_adj=jax.random.normal(ks[6], (1, 1, 1), jnp.float32) * 0.5,
        bn_adj_gamma=1.0 + 0.1 * jax.random.normal(ks[7], (1,), jnp.float32),
        bn_adj_beta=0.1 * jax.random.normal(ks[8], (1,), jnp.float32),
        bn_adj_mean=0.1 * jax.random.normal(ks[9], (1,), jnp.float32),
        bn_adj_var=jax.random.uniform(ks[10], (1,), jnp.float32, 0.5, 1.5),
        w_wg=jax.random.normal(ks[11], (C, C, 1), jnp.float32) * 0.05,
        bn_wg_gamma=1.0 + 0.1 * jax.random.normal(ks[12], (C,), jnp.float32),
        bn_wg_beta=0.1 * jax.random.normal(ks[13], (C,), jnp.float32),
        bn_wg_mean=0.1 * jax.random.normal(ks[14], (C,), jnp.float32),
        bn_wg_var=jax.random.uniform(ks[15], (C,), jnp.float32, 0.5, 1.5),
    )

    out = jax.block_until_ready(fp_module_pallas(x, params))
    ref = jax.block_until_ready(_reference(x, params))

    assert out.shape == (B, C, H, W)
    max_err = float(jnp.max(jnp.abs(out - ref)))
    assert jnp.allclose(out, ref, atol=2e-3, rtol=2e-3), max_err
    print("KERNEL_OK")
</pallas_src>

<mosaic_0001>
module attributes {stable_mosaic.version = 11 : i64} {
  func.func @_fp_kernel(%arg0: i32, %arg1: memref<1x16x16x256xf32, #tpu.memory_space<vmem>>, %arg2: memref<2304x256xf32, #tpu.memory_space<vmem>>, %arg3: memref<256x256xf32, #tpu.memory_space<vmem>>, %arg4: memref<4x256xf32, #tpu.memory_space<vmem>>, %arg5: memref<1x16x16x256xf32, #tpu.memory_space<vmem>>, %arg6: memref<18x18x256xf32, #tpu.memory_space<vmem>>, %arg7: memref<256x2304xf32, #tpu.memory_space<vmem>>) attributes {dimension_semantics = [#tpu.dimension_semantics<parallel>], iteration_bounds = array<i64: 2>, scalar_prefetch = 0 : i64, scratch_operands = 2 : i64, tpu.core_type = #tpu.core_type<tc>, window_params = [{transform_indices = @transform_0, window_bounds = array<i64: 1, 16, 16, 256>}, {pipeline_mode = #tpu.pipeline_mode<synchronous>, transform_indices = @transform_1, window_bounds = array<i64: 2304, 256>}, {pipeline_mode = #tpu.pipeline_mode<synchronous>, transform_indices = @transform_2, window_bounds = array<i64: 256, 256>}, {pipeline_mode = #tpu.pipeline_mode<synchronous>, transform_indices = @transform_3, window_bounds = array<i64: 4, 256>}, {transform_indices = @transform_4, window_bounds = array<i64: 1, 16, 16, 256>}]} {
    %c0 = arith.constant 0 : index
    %c0_0 = arith.constant 0 : index
    %c0_1 = arith.constant 0 : index
    %c0_2 = arith.constant 0 : index
    %0 = vector.load %arg1[%c0, %c0_0, %c0_1, %c0_2] : memref<1x16x16x256xf32, #tpu.memory_space<vmem>>, vector<1x16x16x256xf32>
    %1 = vector.shape_cast %0 : vector<1x16x16x256xf32> to vector<16x16x256xf32>
    %cst = arith.constant 0.000000e+00 : f32
    %2 = vector.broadcast %cst : f32 to vector<18x18x256xf32>
    %c0_3 = arith.constant 0 : index
    %c0_4 = arith.constant 0 : index
    %c0_5 = arith.constant 0 : index
    %3 = vector.load %arg6[%c0_3, %c0_4, %c0_5] : memref<18x18x256xf32, #tpu.memory_space<vmem>>, vector<18x18x256xf32>
    tpu.vector_store %arg6[%c0_3, %c0_4, %c0_5], %2 {strides = array<i32>} : memref<18x18x256xf32, #tpu.memory_space<vmem>>, vector<18x18x256xf32>,
    %c1 = arith.constant 1 : index
    %c1_6 = arith.constant 1 : index
    %c0_7 = arith.constant 0 : index
    %4 = vector.load %arg6[%c1, %c1_6, %c0_7] : memref<18x18x256xf32, #tpu.memory_space<vmem>>, vector<16x16x256xf32>
    tpu.vector_store %arg6[%c1, %c1_6, %c0_7], %1 {strides = array<i32>} : memref<18x18x256xf32, #tpu.memory_space<vmem>>, vector<16x16x256xf32>,
    %c0_8 = arith.constant 0 : index
    %c0_9 = arith.constant 0 : index
    %c0_10 = arith.constant 0 : index
    %5 = vector.load %arg6[%c0_8, %c0_9, %c0_10] : memref<18x18x256xf32, #tpu.memory_space<vmem>>, vector<16x16x256xf32>
    %6 = vector.shape_cast %5 : vector<16x16x256xf32> to vector<256x256xf32>
    %c0_11 = arith.constant 0 : index
    %c0_12 = arith.constant 0 : index
    %7 = vector.load %arg7[%c0_11, %c0_12] : memref<256x2304xf32, #tpu.memory_space<vmem>>, vector<256x256xf32>
    tpu.vector_store %arg7[%c0_11, %c0_12], %6 {strides = array<i32>} : memref<256x2304xf32, #tpu.memory_space<vmem>>, vector<256x256xf32>,
    %c0_13 = arith.constant 0 : index
    %c1_14 = arith.constant 1 : index
    %c0_15 = arith.constant 0 : index
    %8 = vector.load %arg6[%c0_13, %c1_14, %c0_15] : memref<18x18x256xf32, #tpu.memory_space<vmem>>, vector<16x16x256xf32>
    %9 = vector.shape_cast %8 : vector<16x16x256xf32> to vector<256x256xf32>
    %c0_16 = arith.constant 0 : index
    %c256 = arith.constant 256 : index
    %10 = vector.load %arg7[%c0_16, %c256] : memref<256x2304xf32, #tpu.memory_space<vmem>>, vector<256x256xf32>
    tpu.vector_store %arg7[%c0_16, %c256], %9 {strides = array<i32>} : memref<256x2304xf32, #tpu.memory_space<vmem>>, vector<256x256xf32>,
    %c0_17 = arith.constant 0 : index
    %c2 = arith.constant 2 : index
    %c0_18 = arith.constant 0 : index
    %11 = vector.load %arg6[%c0_17, %c2, %c0_18] : memref<18x18x256xf32, #tpu.memory_space<vmem>>, vector<16x16x256xf32>
    %12 = vector.shape_cast %11 : vector<16x16x256xf32> to vector<256x256xf32>
    %c0_19 = arith.constant 0 : index
    %c512 = arith.constant 512 : index
    %13 = vector.load %arg7[%c0_19, %c512] : memref<256x2304xf32, #tpu.memory_space<vmem>>, vector<256x256xf32>
    tpu.vector_store %arg7[%c0_19, %c512], %12 {strides = array<i32>} : memref<256x2304xf32, #tpu.memory_space<vmem>>, vector<256x256xf32>,
    %c1_20 = arith.constant 1 : index
    %c0_21 = arith.constant 0 : index
    %c0_22 = arith.constant 0 : index
    %14 = vector.load %arg6[%c1_20, %c0_21, %c0_22] : memref<18x18x256xf32, #tpu.memory_space<vmem>>, vector<16x16x256xf32>
    %15 = vector.shape_cast %14 : vector<16x16x256xf32> to vector<256x256xf32>
    %c0_23 = arith.constant 0 : index
    %c768 = arith.constant 768 : index
    %16 = vector.load %arg7[%c0_23, %c768] : memref<256x2304xf32, #tpu.memory_space<vmem>>, vector<256x256xf32>
    tpu.vector_store %arg7[%c0_23, %c768], %15 {strides = array<i32>} : memref<256x2304xf32, #tpu.memory_space<vmem>>, vector<256x256xf32>,
    %c1_24 = arith.constant 1 : index
    %c1_25 = arith.constant 1 : index
    %c0_26 = arith.constant 0 : index
    %17 = vector.load %arg6[%c1_24, %c1_25, %c0_26] : memref<18x18x256xf32, #tpu.memory_space<vmem>>, vector<16x16x256xf32>
    %18 = vector.shape_cast %17 : vector<16x16x256xf32> to vector<256x256xf32>
    %c0_27 = arith.constant 0 : index
    %c1024 = arith.constant 1024 : index
    %19 = vector.load %arg7[%c0_27, %c1024] : memref<256x2304xf32, #tpu.memory_space<vmem>>, vector<256x256xf32>
    tpu.vector_store %arg7[%c0_27, %c1024], %18 {strides = array<i32>} : memref<256x2304xf32, #tpu.memory_space<vmem>>, vector<256x256xf32>,
    %c1_28 = arith.constant 1 : index
    %c2_29 = arith.constant 2 : index
    %c0_30 = arith.constant 0 : index
    %20 = vector.load %arg6[%c1_28, %c2_29, %c0_30] : memref<18x18x256xf32, #tpu.memory_space<vmem>>, vector<16x16x256xf32>
    %21 = vector.shape_cast %20 : vector<16x16x256xf32> to vector<256x256xf32>
    %c0_31 = arith.constant 0 : index
    %c1280 = arith.constant 1280 : index
    %22 = vector.load %arg7[%c0_31, %c1280] : memref<256x2304xf32, #tpu.memory_space<vmem>>, vector<256x256xf32>
    tpu.vector_store %arg7[%c0_31, %c1280], %21 {strides = array<i32>} : memref<256x2304xf32, #tpu.memory_space<vmem>>, vector<256x256xf32>,
    %c2_32 = arith.constant 2 : index
    %c0_33 = arith.constant 0 : index
    %c0_34 = arith.constant 0 : index
    %23 = vector.load %arg6[%c2_32, %c0_33, %c0_34] : memref<18x18x256xf32, #tpu.memory_space<vmem>>, vector<16x16x256xf32>
    %24 = vector.shape_cast %23 : vector<16x16x256xf32> to vector<256x256xf32>
    %c0_35 = arith.constant 0 : index
    %c1536 = arith.constant 1536 : index
    %25 = vector.load %arg7[%c0_35, %c1536] : memref<256x2304xf32, #tpu.memory_space<vmem>>, vector<256x256xf32>
    tpu.vector_store %arg7[%c0_35, %c1536], %24 {strides = array<i32>} : memref<256x2304xf32, #tpu.memory_space<vmem>>, vector<256x256xf32>,
    %c2_36 = arith.constant 2 : index
    %c1_37 = arith.constant 1 : index
    %c0_38 = arith.constant 0 : index
    %26 = vector.load %arg6[%c2_36, %c1_37, %c0_38] : memref<18x18x256xf32, #tpu.memory_space<vmem>>, vector<16x16x256xf32>
    %27 = vector.shape_cast %26 : vector<16x16x256xf32> to vector<256x256xf32>
    %c0_39 = arith.constant 0 : index
    %c1792 = arith.constant 1792 : index
    %28 = vector.load %arg7[%c0_39, %c1792] : memref<256x2304xf32, #tpu.memory_space<vmem>>, vector<256x256xf32>
    tpu.vector_store %arg7[%c0_39, %c1792], %27 {strides = array<i32>} : memref<256x2304xf32, #tpu.memory_space<vmem>>, vector<256x256xf32>,
    %c2_40 = arith.constant 2 : index
    %c2_41 = arith.constant 2 : index
    %c0_42 = arith.constant 0 : index
    %29 = vector.load %arg6[%c2_40, %c2_41, %c0_42] : memref<18x18x256xf32, #tpu.memory_space<vmem>>, vector<16x16x256xf32>
    %30 = vector.shape_cast %29 : vector<16x16x256xf32> to vector<256x256xf32>
    %c0_43 = arith.constant 0 : index
    %c2048 = arith.constant 2048 : index
    %31 = vector.load %arg7[%c0_43, %c2048] : memref<256x2304xf32, #tpu.memory_space<vmem>>, vector<256x256xf32>
    tpu.vector_store %arg7[%c0_43, %c2048], %30 {strides = array<i32>} : memref<256x2304xf32, #tpu.memory_space<vmem>>, vector<256x256xf32>,
    %c0_44 = arith.constant 0 : index
    %c0_45 = arith.constant 0 : index
    %32 = vector.load %arg7[%c0_44, %c0_45] : memref<256x2304xf32, #tpu.memory_space<vmem>>, vector<256x2304xf32>
    %c0_46 = arith.constant 0 : index
    %c0_47 = arith.constant 0 : index
    %33 = vector.load %arg2[%c0_46, %c0_47] : memref<2304x256xf32, #tpu.memory_space<vmem>>, vector<2304x256xf32>
    %cst_48 = arith.constant dense<0.000000e+00> : vector<256x256xf32>
    %34 = tpu.matmul %32, %33, %cst_48 {dimension_numbers = #tpu.dot_dimension_numbers<[1], [0], [0], [1], [0, 0, 1, 1], [], []>} : vector<256x2304xf32>, vector<2304x256xf32>, vector<256x256xf32> -> vector<256x256xf32>
    %c0_49 = arith.constant 0 : index
    %c0_50 = arith.constant 0 : index
    %35 = vector.load %arg4[%c0_49, %c0_50] : memref<4x256xf32, #tpu.memory_space<vmem>>, vector<1x256xf32>
    %36 = vector.broadcast %35 : vector<1x256xf32> to vector<256x256xf32>
    %37 = arith.addf %34, %36 : vector<256x256xf32>
    %cst_51 = arith.constant 0.000000e+00 : f32
    %38 = vector.broadcast %cst_51 : f32 to vector<256x256xf32>
    %39 = arith.maximumf %37, %38 : vector<256x256xf32>
    %cst_52 = arith.constant dense<0.000000e+00> : vector<256xf32>
    %40 = vector.multi_reduction <add>, %39, %cst_52 [0] : vector<256x256xf32> to vector<256xf32>
    %41 = vector.shape_cast %40 : vector<256xf32> to vector<1x256xf32>
    %cst_53 = arith.constant 3.906250e-03 : f32
    %42 = vector.broadcast %cst_53 : f32 to vector<1x256xf32>
    %43 = arith.mulf %41, %42 : vector<1x256xf32>
    %c1_54 = arith.constant 1 : index
    %c0_55 = arith.constant 0 : index
    %44 = vector.load %arg4[%c1_54, %c0_55] : memref<4x256xf32, #tpu.memory_space<vmem>>, vector<1x256xf32>
    %c2_56 = arith.constant 2 : index
    %c0_57 = arith.constant 0 : index
    %45 = vector.load %arg4[%c2_56, %c0_57] : memref<4x256xf32, #tpu.memory_space<vmem>>, vector<1x256xf32>
    %46 = arith.mulf %43, %44 : vector<1x256xf32>
    %47 = arith.addf %46, %45 : vector<1x256xf32>
    %cst_58 = arith.constant 0.000000e+00 : f32
    %48 = vector.broadcast %cst_58 : f32 to vector<1x256xf32>
    %49 = arith.maximumf %47, %48 : vector<1x256xf32>
    %50 = arith.addf %49, %43 : vector<1x256xf32>
    %51 = vector.shape_cast %50 : vector<1x256xf32> to vector<1x256xf32>
    %52 = vector.broadcast %51 : vector<1x256xf32> to vector<8x256xf32>
    %c0_59 = arith.constant 0 : index
    %c0_60 = arith.constant 0 : index
    %53 = vector.load %arg3[%c0_59, %c0_60] : memref<256x256xf32, #tpu.memory_space<vmem>>, vector<256x256xf32>
    %cst_61 = arith.constant dense<0.000000e+00> : vector<8x256xf32>
    %54 = tpu.matmul %52, %53, %cst_61 {dimension_numbers = #tpu.dot_dimension_numbers<[1], [0], [0], [1], [0, 0, 1, 1], [], []>} : vector<8x256xf32>, vector<256x256xf32>, vector<8x256xf32> -> vector<8x256xf32>
    %55 = vector.extract_strided_slice %54 {offsets = [0, 0], sizes = [1, 256], strides = [1, 1]} : vector<8x256xf32> to vector<1x256xf32>
    %c3 = arith.constant 3 : index
    %c0_62 = arith.constant 0 : index
    %56 = vector.load %arg4[%c3, %c0_62] : memref<4x256xf32, #tpu.memory_space<vmem>>, vector<1x256xf32>
    %57 = arith.addf %55, %56 : vector<1x256xf32>
    %cst_63 = arith.constant 0.000000e+00 : f32
    %58 = vector.broadcast %cst_63 : f32 to vector<1x256xf32>
    %59 = arith.maximumf %57, %58 : vector<1x256xf32>
    %cst_64 = arith.constant dense<0xFF800000> : vector<1xf32>
    %60 = vector.multi_reduction <maximumf>, %59, %cst_64 [1] : vector<1x256xf32> to vector<1xf32>
    %61 = vector.shape_cast %60 : vector<1xf32> to vector<1x1xf32>
    %62 = vector.broadcast %61 : vector<1x1xf32> to vector<1x256xf32>
    %63 = arith.subf %59, %62 : vector<1x256xf32>
    %64 = math.exp %63 : vector<1x256xf32>
    %cst_65 = arith.constant dense<0.000000e+00> : vector<1xf32>
    %65 = vector.multi_reduction <add>, %64, %cst_65 [1] : vector<1x256xf32> to vector<1xf32>
    %66 = vector.shape_cast %65 : vector<1xf32> to vector<1x1xf32>
    %67 = vector.broadcast %66 : vector<1x1xf32> to vector<1x256xf32>
    %68 = arith.divf %64, %67 : vector<1x256xf32>
    %69 = vector.shape_cast %1 : vector<16x16x256xf32> to vector<256x256xf32>
    %70 = vector.broadcast %68 : vector<1x256xf32> to vector<256x256xf32>
    %71 = arith.mulf %39, %70 : vector<256x256xf32>
    %72 = arith.addf %69, %71 : vector<256x256xf32>
    %73 = vector.shape_cast %72 : vector<256x256xf32> to vector<16x16x256xf32>
    %c0_66 = arith.constant 0 : index
    %c0_67 = arith.constant 0 : index
    %c0_68 = arith.constant 0 : index
    %c0_69 = arith.constant 0 : index
    %74 = vector.load %arg5[%c0_66, %c0_67, %c0_68, %c0_69] : memref<1x16x16x256xf32, #tpu.memory_space<vmem>>, vector<1x16x16x256xf32>
    %75 = vector.shape_cast %74 : vector<1x16x16x256xf32> to vector<16x16x256xf32>
    %76 = vector.shape_cast %73 : vector<16x16x256xf32> to vector<1x16x16x256xf32>
    tpu.vector_store %arg5[%c0_66, %c0_67, %c0_68, %c0_69], %76 {strides = array<i32>} : memref<1x16x16x256xf32, #tpu.memory_space<vmem>>, vector<1x16x16x256xf32>,
    return
  }
  func.func @transform_0(%arg0: i32) -> (i32, i32, i32, i32) {
    %c0_i32 = arith.constant 0 : i32
    %c0_i32_0 = arith.constant 0 : i32
    %c0_i32_1 = arith.constant 0 : i32
    %c0_i32_2 = arith.constant 0 : i32
    return %arg0, %c0_i32, %c0_i32_0, %c0_i32_1 : i32, i32, i32, i32
  }
  func.func @transform_1(%arg0: i32) -> (i32, i32) {
    %c0_i32 = arith.constant 0 : i32
    %c0_i32_0 = arith.constant 0 : i32
    %c0_i32_1 = arith.constant 0 : i32
    return %c0_i32, %c0_i32_0 : i32, i32
  }
  func.func @transform_2(%arg0: i32) -> (i32, i32) {
    %c0_i32 = arith.constant 0 : i32
    %c0_i32_0 = arith.constant 0 : i32
    %c0_i32_1 = arith.constant 0 : i32
    return %c0_i32, %c0_i32_0 : i32, i32
  }
  func.func @transform_3(%arg0: i32) -> (i32, i32) {
    %c0_i32 = arith.constant 0 : i32
    %c0_i32_0 = arith.constant 0 : i32
    %c0_i32_1 = arith.constant 0 : i32
    return %c0_i32, %c0_i32_0 : i32, i32
  }
  func.func @transform_4(%arg0: i32) -> (i32, i32, i32, i32) {
    %c0_i32 = arith.constant 0 : i32
    %c0_i32_0 = arith.constant 0 : i32
    %c0_i32_1 = arith.constant 0 : i32
    %c0_i32_2 = arith.constant 0 : i32
    return %arg0, %c0_i32, %c0_i32_0, %c0_i32_1 : i32, i32, i32, i32
  }
}

</mosaic_0001>

<bundles_post_ra>
// kernel: tpu_custom_call.1
= control target key start
LH: loop header
LB: loop body
LE: loop exit
PB: predicated region body
PF: predicated region fallthrough
CT: control target
= control target key end

     0   :  { %9 = vsyncpa [#allocation5], 0  ;;  %s12910_s0 = inlined_call_operand.hbm [shape: f32[2,16,16,256], index: 0, kind: input, shape index: {}]   ;;  %s12911_s1 = inlined_call_operand.hbm [shape: f32[2304,256], index: 1, kind: input, shape index: {}]   ;;  %s12912_s2 = inlined_call_operand.hbm [shape: f32[256,256], index: 2, kind: input, shape index: {}]   ;;  %s12913_s3 = inlined_call_operand.hbm [shape: f32[4,256], index: 3, kind: input, shape index: {}]   ;;  %s12914_s4 = inlined_call_operand.hbm [shape: f32[2,16,16,256], index: 4, kind: output, shape index: {}]  }
   0x1   :  { %11 = vsyncpa [#allocation5 + $0x1], 0 }
   0x2   :  { %12 = vsyncpa [#allocation8], 0 }
   0x3   :  { %13 = vsyncpa [#allocation11], 0 }
   0x4   :  { %14 = vsyncpa [#allocation6], 0 }
   0x5   :  { %16 = vsyncpa [#allocation6 + $0x1], 0  ;;  %s9865_s15 = smov 0   ;;  %s9867_s16 = smov 0  }
   0x6   :  { %s9869_s17 = smov 0   ;;  %s9871_s18 = smov 0  }
   0x7 LB: > { %s9886_s19 = sadd.s32 4294967295, %s9828_s18   ;;  %s8197_s20 = sadd.s32 4294967294, %s9828_s18   ;;  %s9828_s18 = sphi %s9871_s18, %s13250_s18   ;;  %s9824_s17 = sphi %s9869_s17, %s13249_s17   ;;  %s9820_s16 = sphi %s9867_s16, %s13248_s16   ;;  %s9816_s15 = sphi %s9865_s15, %s13247_s15  }
   0x8   : > { %p42_p0 = scmp.ne.s32.totalorder %s9820_s16, %s9816_s15  ;;  %p12915_p1 = scmp.eq.s32.totalorder %s9886_s19, 0 }
   0x9   : > { %p135_p3 = scmp.eq.s32.totalorder %s8197_s20, 1  ;;  %p8198_p5 = scmp.ge.s32.totalorder %s9828_s18, 1 }
   0xa   : > { %p9895_p4 = por %p12915_p1, %p42_p0  ;;  %p142_p7 = scmp.lt.s32.totalorder %s9828_s18, 3 }
   0xb   : > { %p9900_p6 = por %p135_p3, %p42_p0  ;;  %s9830_s24 = smov [#allocation7]  }
   0xc   : > { %s12989_s21 = scalar_select %p9895_p4, 1, 0 }
   0xd   : > { %s12990_s22 = scalar_select %p9900_p6, 1, 0 }
   0xe   : > { %p9905_p8 = pnand %p8198_p5, %p142_p7  ;;  %s154_s25 = sshll.u32 %s9830_s24, 4  ;;  %s9909_s25 = int_to_ptr.vmem [resolvable:$true] %s154_s25 }
   0xf   : > { %s9831_s27 = smov [#allocation9]   ;;  %s9832_s29 = smov [#allocation10]  }
  0x10   : > { %s12991_s23 = scalar_select %p9905_p8, 1, 0 }
  0x11   : > { %p9483_p9 = pneg %p9905_p8  ;;  %s167_s28 = sshll.u32 %s9831_s27, 4  ;;  %s9920_s28 = int_to_ptr.vmem [resolvable:$true] %s167_s28 }
  0x12   : > { %s9922_s30 = sshll.u32 %s9832_s29, 4  ;;  %s9640_s7 = scalar_lea.hbm %s12911_s1, 73728  ;;  %s182_s30 = int_to_ptr.vmem [resolvable:$true] %s9922_s30 }
  0x13   : > { %p9916_p11 = pnand %p9483_p9, %p12915_p1  ;;  %p9641_p12 = scmp.ne.s32.totalorder %s12911_s1, %s9640_s7 }
  0x14   : > { %p9647_p5 = scmp.lt.u32.totalorder %s9640_s7, %s12911_s1 }
  0x15   : > { %p9932_p13 = pneg %p9916_p11 }
  0x17   : > { %p9643_p0 = pnand %p9932_p13, %p9641_p12 }
  0x19   : > { %p9644_p3 = pneg %p9643_p0 }
  0x1b   : > { %p9649_p7 = pnand %p9647_p5, %p9644_p3 }
  0x1d   : > { %9652 = shalt.err (!%p9649_p7)
}
  0x1e   : > { %s9653_s13 = scalar_lea.vmem %s9909_s25, 73728  ;;  %p9661_p2 = scmp.lt.s32.totalorder %s9909_s25, %s9909_s25 }
  0x1f   : > { %p9654_p9 = scmp.ne.s32.totalorder %s9909_s25, %s9653_s13  ;;  %p9662_p6 = scmp.lt.s32.totalorder %s9653_s13, %s9653_s13 }
  0x21   : > { %p9656_p10 = pnand %p9654_p9, %p9932_p13  ;;  %p9663_p12 = por %p9662_p6, %p9661_p2 }
  0x23   : > { %p9657_p1 = pneg %p9656_p10 }
  0x25   : > { %p9664_p0 = pnand %p9663_p12, %p9657_p1 }
  0x27   : > { %9667 = shalt.err (!%p9664_p0)
}
  0x28   : > { %s9833_s14 = smov 256   ;;  %s9834_s20 = smov 16  }
  0x29   : > { %9486 = dma.hbm_to_vmem [thread:$0]  (!%p9916_p11), %s12911_s1, 73728, %s9909_s25, [#allocation8], %s9833_s14, %s9833_s14, %s9834_s20  }
  0x2a   : > { %s9668_s6 = scalar_lea.hbm %s12912_s2, 8192 }
  0x2b   : > { %p9669_p1 = scmp.ne.s32.totalorder %s12912_s2, %s9668_s6  ;;  %p9675_p10 = scmp.lt.u32.totalorder %s9668_s6, %s12912_s2 }
  0x2d   : > { %p9671_p2 = pnand %p9669_p1, %p9932_p13 }
  0x2f   : > { %p9672_p6 = pneg %p9671_p2 }
  0x31   : > { %p9677_p3 = pnand %p9675_p10, %p9672_p6 }
  0x33   : > { %9680 = shalt.err (!%p9677_p3)
}
  0x34   : > { %s9681_s25 = scalar_lea.vmem %s9920_s28, 8192  ;;  %p9689_p12 = scmp.lt.s32.totalorder %s9920_s28, %s9920_s28 }
  0x35   : > { %p9682_p5 = scmp.ne.s32.totalorder %s9920_s28, %s9681_s25  ;;  %p9690_p0 = scmp.lt.s32.totalorder %s9681_s25, %s9681_s25 }
  0x37   : > { %p9684_p7 = pnand %p9682_p5, %p9932_p13  ;;  %p9691_p1 = por %p9690_p0, %p9689_p12 }
  0x39   : > { %p9685_p9 = pneg %p9684_p7 }
  0x3b   : > { %p9692_p2 = pnand %p9691_p1, %p9685_p9 }
  0x3d   : > { %9695 = shalt.err (!%p9692_p2)
}
  0x3e   : > { %9489 = dma.hbm_to_vmem [thread:$0]  (!%p9916_p11), %s12912_s2, 8192, %s9920_s28, [#allocation8], %s9833_s14, %s9833_s14, %s9834_s20  }
  0x3f   : > { %s9696_s29 = scalar_lea.hbm %s12913_s3, 128 }
  0x40   : > { %p9697_p6 = scmp.ne.s32.totalorder %s12913_s3, %s9696_s29  ;;  %p9703_p5 = scmp.lt.u32.totalorder %s9696_s29, %s12913_s3 }
  0x42   : > { %p9699_p10 = pnand %p9697_p6, %p9932_p13 }
  0x44   : > { %p9700_p3 = pneg %p9699_p10 }
  0x46   : > { %p9705_p7 = pnand %p9703_p5, %p9700_p3 }
  0x48   : > { %9708 = shalt.err (!%p9705_p7)
}
  0x49   : > { %s9709_s9 = scalar_lea.vmem %s182_s30, 128  ;;  %p9717_p1 = scmp.lt.s32.totalorder %s182_s30, %s182_s30 }
  0x4a   : > { %p9710_p9 = scmp.ne.s32.totalorder %s182_s30, %s9709_s9  ;;  %p9718_p2 = scmp.lt.s32.totalorder %s9709_s9, %s9709_s9 }
  0x4c   : > { %p9712_p12 = pnand %p9710_p9, %p9932_p13  ;;  %p9719_p4 = por %p9718_p2, %p9717_p1 }
  0x4e   : > { %p9713_p0 = pneg %p9712_p12 }
  0x50   : > { %p9720_p8 = pnand %p9719_p4, %p9713_p0 }
  0x52   : > { %9723 = shalt.err (!%p9720_p8)
}
  0x53   : > { %9492 = dma.hbm_to_vmem [thread:$0]  (!%p9916_p11), %s12913_s3, 128, %s182_s30, [#allocation11]  }
  0x54   : > { %s10002_s10 = sadd.s32 1, %s9828_s18   ;;  %s29_s26 = sadd.s32 1, %s9824_s17 }
  0x55   : > { %s26_s25 = ssub.s32 %s9828_s18, %s10002_s10  ;;  %p36_p8 = scmp.ne.s32.totalorder %s9824_s17, %s9820_s16 }
  0x56   : > { %p27_p4 = scmp.eq.s32.totalorder %s26_s25, 0  ;;  %p37_p13 = scmp.eq.s32.totalorder %s9828_s18, 0 }
  0x57   : > { %p9504_p6 = scmp.lt.s32.totalorder %s9828_s18, 2  ;;  %p12994_p3 = scmp.eq.s32.totalorder %s9886_s19, 1 }
  0x58   : > { %s10012_s12 = scalar_select %p27_p4, %s9824_s17, %s29_s26  }
  0x59   : > { %p38_p10 = por %p37_p13, %p36_p8  ;;  %p10016_p5 = por %p12994_p3, %p36_p8 }
  0x5a   : > { %s192_s24 = sand.u32 1, %s9824_s17   ;;  %s8217_s27 = sshll.u32 %s9828_s18, 13 }
  0x5b   : > { %s8203_s30 = sshll.u32 %s192_s24, 9  ;;  %s10025_s6 = scalar_lea.hbm %s12910_s0, %s8217_s27 }
  0x5c   : > { %s196_s7 = scalar_lea.vmem [#allocation4], %s8203_s30  ;;  %p10027_p11 = pnand %p9504_p6, %p38_p10 }
  0x5d   : > { %s203_s8 = sshll.u32 %s196_s7, 4  ;;  %s10033_s28 = scalar_lea.sflag [#allocation5], %s192_s24  ;;  %s10031_s8 = int_to_ptr.vmem [resolvable:$true] %s203_s8 }
  0x5e   : > { %s9724_s11 = scalar_lea.hbm %s10025_s6, 8192  ;;  %p9726_p9 = pneg %p10027_p11 }
  0x5f   : > { %p9725_p7 = scmp.ne.s32.totalorder %s10025_s6, %s9724_s11  ;;  %s9729_s27 = scalar_lea.hbm %s12910_s0, 16384 }
  0x60   : > { %p9730_p1 = scmp.lt.u32.totalorder %s10025_s6, %s12910_s0  ;;  %p9731_p2 = scmp.lt.u32.totalorder %s9729_s27, %s9724_s11 }
  0x61   : > { %p9727_p12 = pnand %p9726_p9, %p9725_p7  ;;  %p9733_p8 = scmp.lt.u32.totalorder %s9724_s11, %s10025_s6 }
  0x62   : > { %p9732_p4 = por %p9731_p2, %p9730_p1 }
  0x63   : > { %p9728_p0 = pneg %p9727_p12 }
  0x64   : > { %p9734_p13 = por %p9733_p8, %p9732_p4 }
  0x66   : > { %p9735_p6 = pnand %p9734_p13, %p9728_p0 }
  0x68   : > { %9738 = shalt.err (!%p9735_p6)
}
  0x69   : > { %s9739_s24 = scalar_lea.vmem %s10031_s8, 8192  ;;  %s9835_s5 = smov [#allocation4]  }
  0x6a   : > { %p9740_p10 = scmp.ne.s32.totalorder %s10031_s8, %s9739_s24  ;;  %s9744_s7 = sshll.u32 %s9835_s5, 4  ;;  %s9745_s7 = int_to_ptr.vmem [resolvable:$false] %s9744_s7 }
  0x6b   : > { %s9746_s25 = scalar_lea.vmem %s9745_s7, 16384  ;;  %p9747_p12 = scmp.lt.s32.totalorder %s10031_s8, %s9745_s7 }
  0x6c   : > { %p9742_p3 = pnand %p9740_p10, %p9726_p9  ;;  %p9748_p1 = scmp.lt.s32.totalorder %s9746_s25, %s9739_s24 }
  0x6e   : > { %p9743_p7 = pneg %p9742_p3  ;;  %p9749_p2 = por %p9748_p1, %p9747_p12 }
  0x70   : > { %p9750_p4 = pnand %p9749_p2, %p9743_p7 }
  0x72   : > { %9753 = shalt.err (!%p9750_p4)
}
  0x73   : > { %9496 = dma.hbm_to_vmem [thread:$0]  (!%p10027_p11), %s10025_s6, 8192, %s10031_s8, %s10033_s28, %s9833_s14, %s9833_s14, %s9834_s20  }
  0x74   : > { %p12997_p9 = scmp.ne.s32.totalorder %s12991_s23, 0 }
  0x76   : > { %215 = sbr.rel (%p12997_p9) target bundleno = 1648 (0x670), region = 36 }
  0x7d   : > { %s10067_s11 = sand.u32 1, %s9820_s16   ;;  %p12998_p0 = scmp.ne.s32.totalorder %s12989_s21, 0 }
  0x7e   : > { %s8207_s26 = sshll.u32 %s10067_s11, 9  ;;  %s218_s27 = scalar_lea.sflag [#allocation5], %s10067_s11 }
  0x7f   : > { %s10073_s9 = scalar_lea.vmem [#allocation4], %s8207_s26 }
  0x80   : > { %9799 = dma.done.wait (%p12998_p0), %s218_s27, 8192  }
  0x81   : > { %9801 = vsyncadd (%p12998_p0), %s218_s27, 4294959104  ;;  %p12999_p11 = scmp.eq.s32.totalorder %s9886_s19, 0 }
  0x83   : > { %9803 = dma.done.wait (%p12999_p11), [#allocation8], 81920   ;;  %p13000_p8 = pmov %p12999_p11 }
  0x85   : > { %9805 = vsyncadd (%p13000_p8), [#allocation8], 4294885376  ;;  %p13001_p13 = pmov %p13000_p8 }
  0x86   : > { %p13002_p6 = pmov %p13000_p8 }
  0x87   : > { %9807 = dma.done.wait (%p13001_p13), [#allocation11], 128  }
  0x88   : > { %9809 = vsyncadd (%p13002_p6), [#allocation11], 4294967168  ;;  %v12919_v0 = vmov 0.0   ;;  %v4628_v1 = vld [vmem:[#allocation7 + $0x8] sm:$0xff]  ;;  %v4630_v2 = vld [vmem:[#allocation7 + $0x18] sm:$0xff]  ;;  %vm494_vm0 = vcmask 1040384  }
  0x89   : > { %323 = vst [vmem:[#allocation2 + $0x8] sm:$0xff] %v12919_v0  ;;  %5279 = vmatprep.mubr.f32.mxu1 %v12919_v0  ;;  %322 = vst [vmem:[#allocation2] sm:$0xff] %v12919_v0  ;;  %v4884_v3 = vld [vmem:[#allocation7 + $0x808] sm:$0xff]  ;;  %v8219_v4 = vpack.c.bf16 %v4630_v2, %v4628_v1  ;;  %v4886_v5 = vld [vmem:[#allocation7 + $0x818] sm:$0xff]  ;;  %vm1104_vm1 = vcmask 1046528   ;;  %vm1585_vm2 = vcmask 1045504  }
  0x8a   : > { %326 = vst [vmem:[#allocation2 + $0x20] sm:$0x3] %v12919_v0  ;;  %327 = vst [vmem:[#allocation2 + $0x28] sm:$0x3] %v12919_v0  ;;  %v4627_v6 = vld [vmem:[#allocation7] sm:$0xff]  ;;  %v4629_v7 = vld [vmem:[#allocation7 + $0x10] sm:$0xff]  ;;  %v10160_v8 = vpack.c.bf16 %v4886_v5, %v4884_v3 }
  0x8b   : > { %328 = vst [vmem:[#allocation2 + $0x30] sm:$0xff] %v12919_v0  ;;  %329 = vst [vmem:[#allocation2 + $0x38] sm:$0xff] %v12919_v0  ;;  %v8221_v9 = vpack.c.bf16 %v4629_v7, %v4627_v6  ;;  %v4883_v10 = vld [vmem:[#allocation7 + $0x800] sm:$0xff]  ;;  %v4885_v11 = vld [vmem:[#allocation7 + $0x810] sm:$0xff]  ;;  %8220 = vmatprep.subr.bf16.mxu1 %v8219_v4  ;;  %s12685_s21 = scalar_lea.vmem [#allocation12], %s8207_s26  ;;  %s8218_s23 = sshll.u32 %s9886_s19, 13 }
  0x8c   : > { %332 = vst [vmem:[#allocation2 + $0x50] sm:$0x3] %v12919_v0  ;;  %333 = vst [vmem:[#allocation2 + $0x58] sm:$0x3] %v12919_v0  ;;  %v4632_v12 = vld [vmem:[#allocation7 + $0x28] sm:$0xff]  ;;  %v10162_v13 = vpack.c.bf16 %v4885_v11, %v4883_v10  ;;  %v4634_v14 = vld [vmem:[#allocation7 + $0x38] sm:$0xff]  ;;  %8476 = vmatprep.subr.bf16.mxu0 %v10160_v8  ;;  %s12842_s8 = scalar_lea.hbm %s12914_s4, %s8218_s23 }
  0x8d   : > { %334 = vst [vmem:[#allocation2 + $0x60] sm:$0xff] %v12919_v0  ;;  %335 = vst [vmem:[#allocation2 + $0x68] sm:$0xff] %v12919_v0  ;;  %v4888_v15 = vld [vmem:[#allocation7 + $0x828] sm:$0xff]  ;;  %v4890_v16 = vld [vmem:[#allocation7 + $0x838] sm:$0xff]  ;;  %8222 = vmatpush1.bf16.msra.mxu1 %v8221_v9  ;;  %v8223_v17 = vpack.c.bf16 %v4634_v14, %v4632_v12  ;;  %s8095_s14 = sshll.u32 %s12685_s21, 4  ;;  %s8082_s19 = scalar_lea.sflag [#allocation6], %s10067_s11  ;;  %s12846_s14 = int_to_ptr.vmem [resolvable:$true] %s8095_s14 }
  0x8e   : > { %338 = vst [vmem:[#allocation2 + $0x80] sm:$0x3] %v12919_v0  ;;  %339 = vst [vmem:[#allocation2 + $0x88] sm:$0x3] %v12919_v0  ;;  %v10165_v18 = vpack.c.bf16 %v4890_v16, %v4888_v15  ;;  %v4631_v19 = vld [vmem:[#allocation7 + $0x20] sm:$0xff]  ;;  %v4633_v20 = vld [vmem:[#allocation7 + $0x30] sm:$0xff]  ;;  %8478 = vmatpush1.bf16.msra.mxu0 %v10162_v13 }
  0x8f   : > { %340 = vst [vmem:[#allocation2 + $0x90] sm:$0xff] %v12919_v0  ;;  %341 = vst [vmem:[#allocation2 + $0x98] sm:$0xff] %v12919_v0  ;;  %v4887_v21 = vld [vmem:[#allocation7 + $0x820] sm:$0xff]  ;;  %v8225_v22 = vpack.c.bf16 %v4633_v20, %v4631_v19  ;;  %v4889_v23 = vld [vmem:[#allocation7 + $0x830] sm:$0xff]  ;;  %8224 = vmatprep.subr.bf16.mxu1 %v8223_v17  ;;  %s9754_s28 = scalar_lea.vmem %s12846_s14, 8192  ;;  %s9837_s30 = smov [#allocation12]  }
  0x90   : > { %344 = vst [vmem:[#allocation2 + $0xb0] sm:$0x3] %v12919_v0  ;;  %345 = vst [vmem:[#allocation2 + $0xb8] sm:$0x3] %v12919_v0  ;;  %v4636_v24 = vld [vmem:[#allocation7 + $0x48] sm:$0xff]  ;;  %v4638_v25 = vld [vmem:[#allocation7 + $0x58] sm:$0xff]  ;;  %8480 = vmatprep.subr.bf16.mxu0 %v10165_v18  ;;  %v10169_v26 = vpack.c.bf16 %v4889_v23, %v4887_v21  ;;  %p9755_p10 = scmp.ne.s32.totalorder %s12846_s14, %s9754_s28 }
  0x91   : > { %346 = vst [vmem:[#allocation2 + $0xc0] sm:$0xff] %v12919_v0  ;;  %347 = vst [vmem:[#allocation2 + $0xc8] sm:$0xff] %v12919_v0  ;;  %v8227_v27 = vpack.c.bf16 %v4638_v25, %v4636_v24  ;;  %v4892_v28 = vld [vmem:[#allocation7 + $0x848] sm:$0xff]  ;;  %v4894_v29 = vld [vmem:[#allocation7 + $0x858] sm:$0xff]  ;;  %8226 = vmatpush1.bf16.msra.mxu1 %v8225_v22  ;;  %s9758_s29 = sshll.u32 %s9837_s30, 4  ;;  %s9759_s29 = int_to_ptr.vmem [resolvable:$false] %s9758_s29 }
  0x92   : > { %350 = vst [vmem:[#allocation2 + $0xe0] sm:$0x3] %v12919_v0  ;;  %351 = vst [vmem:[#allocation2 + $0xe8] sm:$0x3] %v12919_v0  ;;  %v4635_v30 = vld [vmem:[#allocation7 + $0x40] sm:$0xff]  ;;  %v10171_v31 = vpack.c.bf16 %v4894_v29, %v4892_v28  ;;  %v4637_v32 = vld [vmem:[#allocation7 + $0x50] sm:$0xff]  ;;  %8482 = vmatpush1.bf16.msra.mxu0 %v10169_v26  ;;  %p9756_p3 = pnand %p9755_p10, %p10016_p5  ;;  %p9761_p12 = scmp.lt.s32.totalorder %s12846_s14, %s9759_s29 }
  0x93   : > { %352 = vst [vmem:[#allocation2 + $0xf0] sm:$0xff] %v12919_v0  ;;  %353 = vst [vmem:[#allocation2 + $0xf8] sm:$0xff] %v12919_v0  ;;  %v4891_v33 = vld [vmem:[#allocation7 + $0x840] sm:$0xff]  ;;  %v4893_v34 = vld [vmem:[#allocation7 + $0x850] sm:$0xff]  ;;  %v8229_v35 = vpack.c.bf16 %v4637_v32, %v4635_v30  ;;  %8228 = vmatprep.subr.bf16.mxu1 %v8227_v27  ;;  %s9760_s24 = scalar_lea.vmem %s9759_s29, 16384 }
  0x94   : > { %356 = vst [vmem:[#allocation2 + $0x110] sm:$0x3] %v12919_v0  ;;  %357 = vst [vmem:[#allocation2 + $0x118] sm:$0x3] %v12919_v0  ;;  %v4640_v36 = vld [vmem:[#allocation7 + $0x68] sm:$0xff]  ;;  %v4642_v37 = vld [vmem:[#allocation7 + $0x78] sm:$0xff]  ;;  %v10174_v39 = vpack.c.bf16 %v4893_v34, %v4891_v33  ;;  %8484 = vmatprep.subr.bf16.mxu0 %v10171_v31  ;;  %p9757_p7 = pneg %p9756_p3  ;;  %p9762_p1 = scmp.lt.s32.totalorder %s9760_s24, %s9754_s28 }
  0x95   : > { %358 = vst [vmem:[#allocation2 + $0x120] sm:$0xff] %v12919_v0  ;;  %359 = vst [vmem:[#allocation2 + $0x128] sm:$0xff] %v12919_v0  ;;  %v4896_v38 = vld [vmem:[#allocation7 + $0x868] sm:$0xff]  ;;  %v8231_v40 = vpack.c.bf16 %v4642_v37, %v4640_v36  ;;  %v4898_v41 = vld [vmem:[#allocation7 + $0x878] sm:$0xff]  ;;  %8230 = vmatpush1.bf16.msra.mxu1 %v8229_v35 }
  0x96   : > { %362 = vst [vmem:[#allocation2 + $0x140] sm:$0x3] %v12919_v0  ;;  %363 = vst [vmem:[#allocation2 + $0x148] sm:$0x3] %v12919_v0  ;;  %v4639_v42 = vld [vmem:[#allocation7 + $0x60] sm:$0xff]  ;;  %v4641_v43 = vld [vmem:[#allocation7 + $0x70] sm:$0xff]  ;;  %v10177_v44 = vpack.c.bf16 %v4898_v41, %v4896_v38  ;;  %8486 = vmatpush1.bf16.msra.mxu0 %v10174_v39  ;;  %p9763_p2 = por %p9762_p1, %p9761_p12 }
  0x97   : > { %364 = vst [vmem:[#allocation2 + $0x150] sm:$0xff] %v12919_v0  ;;  %365 = vst [vmem:[#allocation2 + $0x158] sm:$0xff] %v12919_v0  ;;  %v4895_v45 = vld [vmem:[#allocation7 + $0x860] sm:$0xff]  ;;  %v4897_v46 = vld [vmem:[#allocation7 + $0x870] sm:$0xff]  ;;  %v8233_v51 = vpack.c.bf16 %v4641_v43, %v4639_v42  ;;  %8232 = vmatprep.subr.bf16.mxu1 %v8231_v40 }
  0x98   : > { %368 = vst [vmem:[#allocation2 + $0x170] sm:$0x3] %v12919_v0  ;;  %369 = vst [vmem:[#allocation2 + $0x178] sm:$0x3] %v12919_v0  ;;  %v4644_v47 = vld [vmem:[#allocation7 + $0x88] sm:$0xff]  ;;  %v4646_v48 = vld [vmem:[#allocation7 + $0x98] sm:$0xff]  ;;  %v10180_v52 = vpack.c.bf16 %v4897_v46, %v4895_v45  ;;  %8488 = vmatprep.subr.bf16.mxu0 %v10177_v44  ;;  %p9764_p4 = pnand %p9763_p2, %p9757_p7 }
  0x99   : > { %370 = vst [vmem:[#allocation2 + $0x180] sm:$0xff] %v12919_v0  ;;  %371 = vst [vmem:[#allocation2 + $0x188] sm:$0xff] %v12919_v0  ;;  %v4900_v49 = vld [vmem:[#allocation7 + $0x888] sm:$0xff]  ;;  %v4902_v50 = vld [vmem:[#allocation7 + $0x898] sm:$0xff]  ;;  %v8235_v53 = vpack.c.bf16 %v4646_v48, %v4644_v47  ;;  %8234 = vmatpush1.bf16.msra.mxu1 %v8233_v51 }
  0x9a   : > { %374 = vst [vmem:[#allocation2 + $0x1a0] sm:$0x3] %v12919_v0  ;;  %375 = vst [vmem:[#allocation2 + $0x1a8] sm:$0x3] %v12919_v0  ;;  %v4643_v54 = vld [vmem:[#allocation7 + $0x80] sm:$0xff]  ;;  %v4645_v55 = vld [vmem:[#allocation7 + $0x90] sm:$0xff]  ;;  %v10183_v57 = vpack.c.bf16 %v4902_v50, %v4900_v49  ;;  %8490 = vmatpush1.bf16.msra.mxu0 %v10180_v52 }
  0x9b   : > { %376 = vst [vmem:[#allocation2 + $0x1b0] sm:$0xff] %v12919_v0  ;;  %377 = vst [vmem:[#allocation2 + $0x1b8] sm:$0xff] %v12919_v0  ;;  %v4899_v56 = vld [vmem:[#allocation7 + $0x880] sm:$0xff]  ;;  %v4901_v58 = vld [vmem:[#allocation7 + $0x890] sm:$0xff]  ;;  %v8237_v63 = vpack.c.bf16 %v4645_v55, %v4643_v54  ;;  %8236 = vmatprep.subr.bf16.mxu1 %v8235_v53 }
  0x9c   : > { %380 = vst [vmem:[#allocation2 + $0x1d0] sm:$0x3] %v12919_v0  ;;  %381 = vst [vmem:[#allocation2 + $0x1d8] sm:$0x3] %v12919_v0  ;;  %v4648_v59 = vld [vmem:[#allocation7 + $0xa8] sm:$0xff]  ;;  %v4650_v60 = vld [vmem:[#allocation7 + $0xb8] sm:$0xff]  ;;  %v10186_v1 = vpack.c.bf16 %v4901_v58, %v4899_v56  ;;  %8492 = vmatprep.subr.bf16.mxu0 %v10183_v57 }
  0x9d   : > { %382 = vst [vmem:[#allocation2 + $0x1e0] sm:$0xff] %v12919_v0  ;;  %383 = vst [vmem:[#allocation2 + $0x1e8] sm:$0xff] %v12919_v0  ;;  %v4904_v61 = vld [vmem:[#allocation7 + $0x8a8] sm:$0xff]  ;;  %v4906_v62 = vld [vmem:[#allocation7 + $0x8b8] sm:$0xff]  ;;  %v8239_v2 = vpack.c.bf16 %v4650_v60, %v4648_v59  ;;  %8238 = vmatpush1.bf16.msra.mxu1 %v8237_v63 }
  0x9e   : > { %386 = vst [vmem:[#allocation2 + $0x200] sm:$0x3] %v12919_v0  ;;  %387 = vst [vmem:[#allocation2 + $0x208] sm:$0x3] %v12919_v0  ;;  %v4647_v3 = vld [vmem:[#allocation7 + $0xa0] sm:$0xff]  ;;  %v4649_v4 = vld [vmem:[#allocation7 + $0xb0] sm:$0xff]  ;;  %v10189_v6 = vpack.c.bf16 %v4906_v62, %v4904_v61  ;;  %8494 = vmatpush1.bf16.msra.mxu0 %v10186_v1 }
  0x9f   : > { %388 = vst [vmem:[#allocation2 + $0x210] sm:$0xff] %v12919_v0  ;;  %389 = vst [vmem:[#allocation2 + $0x218] sm:$0xff] %v12919_v0  ;;  %v4903_v5 = vld [vmem:[#allocation7 + $0x8a0] sm:$0xff]  ;;  %v4905_v7 = vld [vmem:[#allocation7 + $0x8b0] sm:$0xff]  ;;  %v8241_v14 = vpack.c.bf16 %v4649_v4, %v4647_v3  ;;  %8240 = vmatprep.subr.bf16.mxu1 %v8239_v2 }
  0xa0   : > { %392 = vst [vmem:[#allocation2 + $0x230] sm:$0x3] %v12919_v0  ;;  %393 = vst [vmem:[#allocation2 + $0x238] sm:$0x3] %v12919_v0  ;;  %v4652_v9 = vld [vmem:[#allocation7 + $0xc8] sm:$0xff]  ;;  %v4654_v10 = vld [vmem:[#allocation7 + $0xd8] sm:$0xff]  ;;  %v10192_v15 = vpack.c.bf16 %v4905_v7, %v4903_v5  ;;  %8496 = vmatprep.subr.bf16.mxu0 %v10189_v6 }
  0xa1   : > { %394 = vst [vmem:[#allocation2 + $0x240] sm:$0xff] %v12919_v0  ;;  %395 = vst [vmem:[#allocation2 + $0x248] sm:$0xff] %v12919_v0  ;;  %v4908_v11 = vld [vmem:[#allocation7 + $0x8c8] sm:$0xff]  ;;  %v4910_v12 = vld [vmem:[#allocation7 + $0x8d8] sm:$0xff]  ;;  %v8243_v16 = vpack.c.bf16 %v4654_v10, %v4652_v9  ;;  %8242 = vmatpush1.bf16.msra.mxu1 %v8241_v14 }
  0xa2   : > { %398 = vst [vmem:[#allocation2 + $0x260] sm:$0x3] %v12919_v0  ;;  %399 = vst [vmem:[#allocation2 + $0x268] sm:$0x3] %v12919_v0  ;;  %v4651_v17 = vld [vmem:[#allocation7 + $0xc0] sm:$0xff]  ;;  %v4653_v19 = vld [vmem:[#allocation7 + $0xd0] sm:$0xff]  ;;  %v10195_v21 = vpack.c.bf16 %v4910_v12, %v4908_v11  ;;  %8498 = vmatpush1.bf16.msra.mxu0 %v10192_v15 }
  0xa3   : > { %400 = vst [vmem:[#allocation2 + $0x270] sm:$0xff] %v12919_v0  ;;  %401 = vst [vmem:[#allocation2 + $0x278] sm:$0xff] %v12919_v0  ;;  %v4907_v20 = vld [vmem:[#allocation7 + $0x8c0] sm:$0xff]  ;;  %v4909_v22 = vld [vmem:[#allocation7 + $0x8d0] sm:$0xff]  ;;  %v8245_v28 = vpack.c.bf16 %v4653_v19, %v4651_v17  ;;  %8244 = vmatprep.subr.bf16.mxu1 %v8243_v16 }
  0xa4   : > { %404 = vst [vmem:[#allocation2 + $0x290] sm:$0x3] %v12919_v0  ;;  %405 = vst [vmem:[#allocation2 + $0x298] sm:$0x3] %v12919_v0  ;;  %v4656_v23 = vld [vmem:[#allocation7 + $0xe8] sm:$0xff]  ;;  %v4658_v24 = vld [vmem:[#allocation7 + $0xf8] sm:$0xff]  ;;  %v10198_v29 = vpack.c.bf16 %v4909_v22, %v4907_v20  ;;  %8500 = vmatprep.subr.bf16.mxu0 %v10195_v21 }
  0xa5   : > { %406 = vst [vmem:[#allocation2 + $0x2a0] sm:$0xff] %v12919_v0  ;;  %407 = vst [vmem:[#allocation2 + $0x2a8] sm:$0xff] %v12919_v0  ;;  %v4912_v25 = vld [vmem:[#allocation7 + $0x8e8] sm:$0xff]  ;;  %v4914_v27 = vld [vmem:[#allocation7 + $0x8f8] sm:$0xff]  ;;  %v8247_v30 = vpack.c.bf16 %v4658_v24, %v4656_v23  ;;  %8246 = vmatpush1.bf16.msra.mxu1 %v8245_v28 }
  0xa6   : > { %410 = vst [vmem:[#allocation2 + $0x2c0] sm:$0x3] %v12919_v0  ;;  %411 = vst [vmem:[#allocation2 + $0x2c8] sm:$0x3] %v12919_v0  ;;  %v4655_v32 = vld [vmem:[#allocation7 + $0xe0] sm:$0xff]  ;;  %v4657_v33 = vld [vmem:[#allocation7 + $0xf0] sm:$0xff]  ;;  %v10201_v35 = vpack.c.bf16 %v4914_v27, %v4912_v25  ;;  %8502 = vmatpush1.bf16.msra.mxu0 %v10198_v29 }
  0xa7   : > { %412 = vst [vmem:[#allocation2 + $0x2d0] sm:$0xff] %v12919_v0  ;;  %413 = vst [vmem:[#allocation2 + $0x2d8] sm:$0xff] %v12919_v0  ;;  %v4911_v34 = vld [vmem:[#allocation7 + $0x8e0] sm:$0xff]  ;;  %v4913_v36 = vld [vmem:[#allocation7 + $0x8f0] sm:$0xff]  ;;  %v8249_v42 = vpack.c.bf16 %v4657_v33, %v4655_v32  ;;  %8248 = vmatprep.subr.bf16.mxu1 %v8247_v30 }
  0xa8   : > { %416 = vst [vmem:[#allocation2 + $0x2f0] sm:$0x3] %v12919_v0  ;;  %417 = vst [vmem:[#allocation2 + $0x2f8] sm:$0x3] %v12919_v0  ;;  %v4660_v37 = vld [vmem:[#allocation7 + $0x108] sm:$0xff]  ;;  %v4662_v38 = vld [vmem:[#allocation7 + $0x118] sm:$0xff]  ;;  %v10204_v43 = vpack.c.bf16 %v4913_v36, %v4911_v34  ;;  %8504 = vmatprep.subr.bf16.mxu0 %v10201_v35 }
  0xa9   : > { %418 = vst [vmem:[#allocation2 + $0x300] sm:$0xff] %v12919_v0  ;;  %419 = vst [vmem:[#allocation2 + $0x308] sm:$0xff] %v12919_v0  ;;  %v4916_v40 = vld [vmem:[#allocation7 + $0x908] sm:$0xff]  ;;  %v4918_v41 = vld [vmem:[#allocation7 + $0x918] sm:$0xff]  ;;  %v8251_v45 = vpack.c.bf16 %v4662_v38, %v4660_v37  ;;  %8250 = vmatpush1.bf16.msra.mxu1 %v8249_v42 }
  0xaa   : > { %422 = vst [vmem:[#allocation2 + $0x320] sm:$0x3] %v12919_v0  ;;  %423 = vst [vmem:[#allocation2 + $0x328] sm:$0x3] %v12919_v0  ;;  %v4659_v46 = vld [vmem:[#allocation7 + $0x100] sm:$0xff]  ;;  %v4661_v47 = vld [vmem:[#allocation7 + $0x110] sm:$0xff]  ;;  %v10207_v49 = vpack.c.bf16 %v4918_v41, %v4916_v40  ;;  %8506 = vmatpush1.bf16.msra.mxu0 %v10204_v43 }
  0xab   : > { %424 = vst [vmem:[#allocation2 + $0x330] sm:$0xff] %v12919_v0  ;;  %425 = vst [vmem:[#allocation2 + $0x338] sm:$0xff] %v12919_v0  ;;  %v4915_v48 = vld [vmem:[#allocation7 + $0x900] sm:$0xff]  ;;  %v4917_v50 = vld [vmem:[#allocation7 + $0x910] sm:$0xff]  ;;  %v8253_v56 = vpack.c.bf16 %v4661_v47, %v4659_v46  ;;  %8252 = vmatprep.subr.bf16.mxu1 %v8251_v45 }
  0xac   : > { %428 = vst [vmem:[#allocation2 + $0x350] sm:$0x3] %v12919_v0  ;;  %429 = vst [vmem:[#allocation2 + $0x358] sm:$0x3] %v12919_v0  ;;  %v4664_v51 = vld [vmem:[#allocation7 + $0x128] sm:$0xff]  ;;  %v4666_v53 = vld [vmem:[#allocation7 + $0x138] sm:$0xff]  ;;  %v10210_v58 = vpack.c.bf16 %v4917_v50, %v4915_v48  ;;  %8508 = vmatprep.subr.bf16.mxu0 %v10207_v49 }
  0xad   : > { %v4920_v54 = vld [vmem:[#allocation7 + $0x928] sm:$0xff]  ;;  %v4922_v55 = vld [vmem:[#allocation7 + $0x938] sm:$0xff]  ;;  %v8255_v59 = vpack.c.bf16 %v4666_v53, %v4664_v51  ;;  %v4663_v60 = vld [vmem:[#allocation7 + $0x120] sm:$0xff]  ;;  %8254 = vmatpush1.bf16.msra.mxu1 %v8253_v56 }
  0xae   : > { %v4665_v61 = vld [vmem:[#allocation7 + $0x130] sm:$0xff]  ;;  %v4919_v62 = vld [vmem:[#allocation7 + $0x920] sm:$0xff]  ;;  %v10213_v63 = vpack.c.bf16 %v4922_v55, %v4920_v54  ;;  %v4668_v3 = vld [vmem:[#allocation7 + $0x148] sm:$0xff]  ;;  %8510 = vmatpush1.bf16.msra.mxu0 %v10210_v58 }
  0xaf   : > { %v4921_v2 = vld [vmem:[#allocation7 + $0x930] sm:$0xff]  ;;  %v4670_v4 = vld [vmem:[#allocation7 + $0x158] sm:$0xff]  ;;  %v4924_v5 = vld [vmem:[#allocation7 + $0x948] sm:$0xff]  ;;  %v8257_v9 = vpack.c.bf16 %v4665_v61, %v4663_v60  ;;  %8256 = vmatprep.subr.bf16.mxu1 %v8255_v59 }
  0xb0   : > { %13003 = vst [vmem:[#allocation17_spill] sm:$0xff] %v10213_v63  ;;  %v4926_v7 = vld [vmem:[#allocation7 + $0x958] sm:$0xff]  ;;  %v10216_v10 = vpack.c.bf16 %v4921_v2, %v4919_v62  ;;  %v8259_v11 = vpack.c.bf16 %v4670_v4, %v4668_v3  ;;  %v4667_v12 = vld [vmem:[#allocation7 + $0x140] sm:$0xff]  ;;  %v4669_v14 = vld [vmem:[#allocation7 + $0x150] sm:$0xff]  ;;  %8512 = vmatprep.subr.bf16.mxu0 %v10213_v63 }
  0xb1   : > { %v4923_v16 = vld [vmem:[#allocation7 + $0x940] sm:$0xff]  ;;  %v10219_v17 = vpack.c.bf16 %v4926_v7, %v4924_v5  ;;  %v4925_v19 = vld [vmem:[#allocation7 + $0x950] sm:$0xff]  ;;  %v4672_v20 = vld [vmem:[#allocation7 + $0x168] sm:$0xff]  ;;  %8258 = vmatpush1.bf16.msra.mxu1 %v8257_v9  ;;  %v8261_v25 = vpack.c.bf16 %v4669_v14, %v4667_v12 }
  0xb2   : > { %13004 = vst [vmem:[#allocation18_spill] sm:$0xff] %v10216_v10  ;;  %v4674_v22 = vld [vmem:[#allocation7 + $0x178] sm:$0xff]  ;;  %v4928_v23 = vld [vmem:[#allocation7 + $0x968] sm:$0xff]  ;;  %v4671_v27 = vld [vmem:[#allocation7 + $0x160] sm:$0xff]  ;;  %8514 = vmatpush1.bf16.msra.mxu0 %v10216_v10  ;;  %8260 = vmatprep.subr.bf16.mxu1 %v8259_v11  ;;  %v10222_v28 = vpack.c.bf16 %v4925_v19, %v4923_v16 }
  0xb3   : > { %13005 = vst [vmem:[#allocation19_spill] sm:$0xff] %v10219_v17  ;;  %v4930_v24 = vld [vmem:[#allocation7 + $0x978] sm:$0xff]  ;;  %v8263_v30 = vpack.c.bf16 %v4674_v22, %v4672_v20  ;;  %v4673_v32 = vld [vmem:[#allocation7 + $0x170] sm:$0xff]  ;;  %v4927_v33 = vld [vmem:[#allocation7 + $0x960] sm:$0xff]  ;;  %8516 = vmatprep.subr.bf16.mxu0 %v10219_v17 }
  0xb4   : > { %13006 = vst [vmem:[#allocation20_spill] sm:$0xff] %v10222_v28  ;;  %v4929_v34 = vld [vmem:[#allocation7 + $0x970] sm:$0xff]  ;;  %v10225_v36 = vpack.c.bf16 %v4930_v24, %v4928_v23  ;;  %v4676_v37 = vld [vmem:[#allocation7 + $0x188] sm:$0xff]  ;;  %v4678_v38 = vld [vmem:[#allocation7 + $0x198] sm:$0xff]  ;;  %v8265_v47 = vpack.c.bf16 %v4673_v32, %v4671_v27 }
  0xb5   : > { %v259_v40 = vld [vmem:[%s10073_s9 + $0x8] sm:$0xff]  ;;  %v4934_v42 = vld [vmem:[#allocation7 + $0x998] sm:$0xff]  ;;  %8262 = vmatpush1.bf16.msra.mxu1 %v8261_v25  ;;  %v258_v50 = vld [vmem:[%s10073_s9] sm:$0xff]  ;;  %v10232_v53 = vpack.c.bf16 %v4929_v34, %v4927_v33  ;;  %v8267_v54 = vpack.c.bf16 %v4678_v38, %v4676_v37 }
  0xb6   : > { %13007 = vst [vmem:[#allocation21_spill] sm:$0xff] %v10225_v36  ;;  %v4932_v41 = vld [vmem:[#allocation7 + $0x988] sm:$0xff]  ;;  %v261_v45 = vld [vmem:[%s10073_s9 + $0x18] sm:$0xff]  ;;  %v496_v46 = vrot.slane %v259_v40, 7  ;;  %v260_v51 = vld [vmem:[%s10073_s9 + $0x10] sm:$0xff]  ;;  %8518 = vmatpush1.bf16.msra.mxu0 %v10222_v28  ;;  %8264 = vmatprep.subr.bf16.mxu1 %v8263_v30  ;;  %v495_v60 = vrot.slane %v258_v50, 7 }
  0xb7   : > { %v499_v48 = vrot.slane %v261_v45, 7  ;;  %13008 = vst [vmem:[#allocation22_spill] sm:$0xff] %v10232_v53  ;;  %v4675_v55 = vld [vmem:[#allocation7 + $0x180] sm:$0xff]  ;;  %v4677_v56 = vld [vmem:[#allocation7 + $0x190] sm:$0xff]  ;;  %v497_v61 = vrot.slane %v260_v51, 7  ;;  %8520 = vmatprep.subr.bf16.mxu0 %v10225_v36  ;;  %v10235_v62 = vpack.c.bf16 %v4934_v42, %v4932_v41  ;;  %v4680_v3 = vld [vmem:[#allocation7 + $0x1a8] sm:$0xff] }
  0xb8   : > { %v4931_v59 = vld [vmem:[#allocation7 + $0x980] sm:$0xff]  ;;  %689 = vst [vmem:[#allocation2 + $0x38] sm:$0xfe] %v496_v46  ;;  %v4933_v2 = vld [vmem:[#allocation7 + $0x990] sm:$0xff]  ;;  %v4682_v4 = vld [vmem:[#allocation7 + $0x1b8] sm:$0xff]  ;;  %v8269_v14 = vpack.c.bf16 %v4677_v56, %v4675_v55 }
  0xb9   : > { %13009 = vst [vmem:[#allocation23_spill] sm:$0xff] %v10235_v62  ;;  %v10238_v5 = vsel %vm494_vm0, %v496_v46, %v499_v48  ;;  %693 = vst [vmem:[#allocation2 + $0x58] sm:$0x1] %v499_v48  ;;  %v4936_v7 = vld [vmem:[#allocation7 + $0x9a8] sm:$0xff]  ;;  %v4938_v9 = vld [vmem:[#allocation7 + $0x9b8] sm:$0xff]  ;;  %v10242_v12 = vsel %vm494_vm0, %v495_v60, %v497_v61  ;;  %8266 = vmatpush1.bf16.msra.mxu1 %v8265_v47  ;;  %v10248_v22 = vpack.c.bf16 %v4933_v2, %v4931_v59 }
  0xba   : > { %v4679_v11 = vld [vmem:[#allocation7 + $0x1a0] sm:$0xff]  ;;  %691 = vst [vmem:[#allocation2 + $0x48] sm:$0xff] %v10238_v5  ;;  %688 = vst [vmem:[#allocation2 + $0x30] sm:$0xfe] %v495_v60  ;;  %v4681_v16 = vld [vmem:[#allocation7 + $0x1b0] sm:$0xff]  ;;  %8522 = vmatpush1.bf16.msra.mxu0 %v10232_v53  ;;  %8268 = vmatprep.subr.bf16.mxu1 %v8267_v54  ;;  %v8271_v23 = vpack.c.bf16 %v4682_v4, %v4680_v3  ;;  %v10253_v33 = vpack.c.bf16 %v4938_v9, %v4936_v7  ;;  %v12918_v46 = vrot.slane %v10238_v5, 1 }
  0xbb   : > { %692 = vst [vmem:[#allocation2 + $0x50] sm:$0x1] %v497_v61  ;;  %690 = vst [vmem:[#allocation2 + $0x40] sm:$0xff] %v10242_v12  ;;  %v263_v19 = vld [vmem:[%s10073_s9 + $0x28] sm:$0xff]  ;;  %v265_v20 = vld [vmem:[%s10073_s9 + $0x38] sm:$0xff]  ;;  %8524 = vmatprep.subr.bf16.mxu0 %v10235_v62  ;;  %v8273_v48 = vpack.c.bf16 %v4681_v16, %v4679_v11 }
  0xbc   : > { %13010 = vst [vmem:[#allocation24_spill] sm:$0xff] %v10248_v22  ;;  %v4935_v24 = vld [vmem:[#allocation7 + $0x9a0] sm:$0xff]  ;;  %v502_v25 = vrot.slane %v263_v19, 7  ;;  %v505_v27 = vrot.slane %v265_v20, 7  ;;  %v264_v32 = vld [vmem:[%s10073_s9 + $0x30] sm:$0xff]  ;;  %13011 = vst [vmem:[#allocation25_spill] sm:$0xff] %v10253_v33 }
  0xbd   : > { %v262_v30 = vld [vmem:[%s10073_s9 + $0x20] sm:$0xff]  ;;  %v4937_v34 = vld [vmem:[#allocation7 + $0x9b0] sm:$0xff]  ;;  %v4684_v37 = vld [vmem:[#allocation7 + $0x1c8] sm:$0xff]  ;;  %v503_v41 = vrot.slane %v264_v32, 7  ;;  %8270 = vmatpush1.bf16.msra.mxu1 %v8269_v14 }
  0xbe   : > { %v4686_v38 = vld [vmem:[#allocation7 + $0x1d8] sm:$0xff]  ;;  %v501_v40 = vrot.slane %v262_v30, 7  ;;  %v4940_v42 = vld [vmem:[#allocation7 + $0x9c8] sm:$0xff]  ;;  %v10257_v47 = vsel %vm494_vm0, %v502_v25, %v505_v27  ;;  %695 = vst [vmem:[#allocation2 + $0x68] sm:$0xfe] %v502_v25  ;;  %v4683_v50 = vld [vmem:[#allocation7 + $0x1c0] sm:$0xff]  ;;  %8526 = vmatpush1.bf16.msra.mxu0 %v10248_v22  ;;  %8272 = vmatprep.subr.bf16.mxu1 %v8271_v23  ;;  %v10264_v55 = vpack.c.bf16 %v4937_v34, %v4935_v24 }
  0xbf   : > { %v4942_v45 = vld [vmem:[#allocation7 + $0x9d8] sm:$0xff]  ;;  %699 = vst [vmem:[#allocation2 + $0x88] sm:$0x1] %v505_v27  ;;  %697 = vst [vmem:[#allocation2 + $0x78] sm:$0xff] %v10257_v47  ;;  %v8275_v56 = vpack.c.bf16 %v4686_v38, %v4684_v37  ;;  %v4685_v59 = vld [vmem:[#allocation7 + $0x1d0] sm:$0xff]  ;;  %8528 = vmatprep.subr.bf16.mxu0 %v10253_v33 }
  0xc0   : > { %v2003_v51 = vld [vmem:[#allocation2 + $0x38] sm:$0xfe]  ;;  %v10261_v54 = vsel %vm494_vm0, %v501_v40, %v503_v41  ;;  %694 = vst [vmem:[#allocation2 + $0x60] sm:$0xfe] %v501_v40  ;;  %698 = vst [vmem:[#allocation2 + $0x80] sm:$0x1] %v503_v41  ;;  %v10268_v3 = vpack.c.bf16 %v4942_v45, %v4940_v42  ;;  %v8277_v20 = vpack.c.bf16 %v4685_v59, %v4683_v50 }
  0xc1   : > { %13012 = vst [vmem:[#allocation26_spill] sm:$0xff] %v10264_v55  ;;  %v4939_v60 = vld [vmem:[#allocation7 + $0x9c0] sm:$0xff]  ;;  %v4941_v61 = vld [vmem:[#allocation7 + $0x9d0] sm:$0xff]  ;;  %v2197_v2 = vrot.slane %v2003_v51, 1  ;;  %696 = vst [vmem:[#allocation2 + $0x70] sm:$0xff] %v10261_v54  ;;  %8274 = vmatpush1.bf16.msra.mxu1 %v8273_v48 }
  0xc2   : > { %13013 = vst [vmem:[#allocation27_spill] sm:$0xff] %v10268_v3  ;;  %v4688_v4 = vld [vmem:[#allocation7 + $0x1e8] sm:$0xff]  ;;  %v4690_v7 = vld [vmem:[#allocation7 + $0x1f8] sm:$0xff]  ;;  %v4687_v23 = vld [vmem:[#allocation7 + $0x1e0] sm:$0xff]  ;;  %8530 = vmatpush1.bf16.msra.mxu0 %v10264_v55  ;;  %8276 = vmatprep.subr.bf16.mxu1 %v8275_v56  ;;  %v10277_v32 = vpack.c.bf16 %v4941_v61, %v4939_v60 }
  0xc3   : > { %v4944_v9 = vld [vmem:[#allocation7 + $0x9e8] sm:$0xff]  ;;  %v4946_v11 = vld [vmem:[#allocation7 + $0x9f8] sm:$0xff]  ;;  %v2199_v14 = vsel %vm1104_vm1, %v2197_v2, %v12918_v46  ;;  %v4689_v24 = vld [vmem:[#allocation7 + $0x1f0] sm:$0xff]  ;;  %v8279_v34 = vpack.c.bf16 %v4690_v7, %v4688_v4  ;;  %8532 = vmatprep.subr.bf16.mxu0 %v10268_v3  ;;  %v13018_v3 = vrot.slane %v10238_v5, 1 }
  0xc4   : > { %v267_v16 = vld [vmem:[%s10073_s9 + $0x48] sm:$0xff]  ;;  %v269_v19 = vld [vmem:[%s10073_s9 + $0x58] sm:$0xff]  ;;  %6307 = vmatprep.mubr.f32.mxu0 %v2199_v14  ;;  %v266_v30 = vld [vmem:[%s10073_s9 + $0x40] sm:$0xff]  ;;  %13014 = vst [vmem:[#allocation28_spill] sm:$0xff] %v10277_v32  ;;  %v10281_v42 = vpack.c.bf16 %v4946_v11, %v4944_v9  ;;  %v8281_v61 = vpack.c.bf16 %v4689_v24, %v4687_v23 }
  0xc5   : > { %v508_v25 = vrot.slane %v267_v16, 7  ;;  %v511_v27 = vrot.slane %v269_v19, 7  ;;  %v4943_v37 = vld [vmem:[#allocation7 + $0x9e0] sm:$0xff]  ;;  %v4945_v38 = vld [vmem:[#allocation7 + $0x9f0] sm:$0xff]  ;;  %v507_v41 = vrot.slane %v266_v30, 7  ;;  %v4692_v45 = vld [vmem:[#allocation7 + $0x208] sm:$0xff]  ;;  %8278 = vmatpush1.bf16.msra.mxu1 %v8277_v20 }
  0xc6   : > { %v268_v40 = vld [vmem:[%s10073_s9 + $0x50] sm:$0xff]  ;;  %13015 = vst [vmem:[#allocation29_spill] sm:$0xff] %v10281_v42  ;;  %v4694_v48 = vld [vmem:[#allocation7 + $0x218] sm:$0xff]  ;;  %v4948_v59 = vld [vmem:[#allocation7 + $0xa08] sm:$0xff]  ;;  %8534 = vmatpush1.bf16.msra.mxu0 %v10277_v32  ;;  %8280 = vmatprep.subr.bf16.mxu1 %v8279_v34  ;;  %v10291_v11 = vpack.c.bf16 %v4945_v38, %v4943_v37  ;;  %v2195_v19 = vrot.slane %v10242_v12, 1 }
  0xc7   : > { %v2002_v50 = vld [vmem:[#allocation2 + $0x30] sm:$0xfe]  ;;  %v10284_v51 = vsel %vm494_vm0, %v508_v25, %v511_v27  ;;  %701 = vst [vmem:[#allocation2 + $0x98] sm:$0xfe] %v508_v25  ;;  %705 = vst [vmem:[#allocation2 + $0xb8] sm:$0x1] %v511_v27  ;;  %v8283_v14 = vpack.c.bf16 %v4694_v48, %v4692_v45  ;;  %8536 = vmatprep.subr.bf16.mxu0 %v10281_v42 }
  0xc8   : > { %v509_v56 = vrot.slane %v268_v40, 7  ;;  %v4950_v60 = vld [vmem:[#allocation7 + $0xa18] sm:$0xff]  ;;  %703 = vst [vmem:[#allocation2 + $0xa8] sm:$0xff] %v10284_v51  ;;  %700 = vst [vmem:[#allocation2 + $0x90] sm:$0xfe] %v507_v41  ;;  %v4691_v2 = vld [vmem:[#allocation7 + $0x200] sm:$0xff] }
  0xc9   : > { %v4693_v4 = vld [vmem:[#allocation7 + $0x210] sm:$0xff]  ;;  %v2007_v7 = vld [vmem:[#allocation2 + $0x58] sm:$0x1]  ;;  %13016 = vst [vmem:[#allocation30_spill] sm:$0xff] %v10291_v11  ;;  %v2194_v16 = vrot.slane %v2002_v50, 1  ;;  %v4947_v20 = vld [vmem:[#allocation7 + $0xa00] sm:$0xff]  ;;  %v8539_v25 = vpack.c.bf16 %v4950_v60, %v4948_v59  ;;  %8282 = vmatpush1.bf16.msra.mxu1 %v8281_v61 }
  0xca   : > { %v10288_v9 = vsel %vm494_vm0, %v507_v41, %v509_v56  ;;  %704 = vst [vmem:[#allocation2 + $0xb0] sm:$0x1] %v509_v56  ;;  %v4949_v23 = vld [vmem:[#allocation7 + $0xa10] sm:$0xff]  ;;  %v10294_v24 = vld [vmem:[#allocation7 + $0xa28] sm:$0xff]  ;;  %v4954_v30 = vld [vmem:[#allocation7 + $0xa38] sm:$0xff]  ;;  %v2202_v37 = vrot.slane %v2007_v7, 1  ;;  %v8285_v50 = vpack.c.bf16 %v4693_v4, %v4691_v2  ;;  %8538 = vmatpush1.bf16.msra.mxu0 %v10291_v11  ;;  %8284 = vmatprep.subr.bf16.mxu1 %v8283_v14 }
  0xcb   : > { %702 = vst [vmem:[#allocation2 + $0xa0] sm:$0xff] %v10288_v9  ;;  %v2006_v27 = vld [vmem:[#allocation2 + $0x50] sm:$0x1]  ;;  %v10298_v34 = vld [vmem:[#allocation7 + $0x228] sm:$0xff]  ;;  %v10300_v38 = vld [vmem:[#allocation7 + $0xa20] sm:$0xff]  ;;  %v8541_v56 = vpack.c.bf16 %v4949_v23, %v4947_v20  ;;  %v2196_v7 = vsel %vm1104_vm1, %v2194_v16, %v2195_v19  ;;  %8540 = vmatprep.subr.bf16.mxu0 %v8539_v25  ;;  %v8543_v20 = vpack.c.bf16 %v4954_v30, %v10294_v24 }
  0xcc   : > { %v10302_v40 = vld [vmem:[#allocation7 + $0xa30] sm:$0xff]  ;;  %v2009_v41 = vld [vmem:[#allocation2 + $0x68] sm:$0xfe]  ;;  %v273_v48 = vld [vmem:[%s10073_s9 + $0x78] sm:$0xff]  ;;  %v2200_v32 = vrot.slane %v2006_v27, 1  ;;  %v2203_v11 = vsel %vm1104_vm1, %v13018_v3, %v2202_v37 }
  0xcd   : > { %v271_v45 = vld [vmem:[%s10073_s9 + $0x68] sm:$0xff]  ;;  %v4698_v46 = vld [vmem:[#allocation7 + $0x238] sm:$0xff]  ;;  %v517_v59 = vrot.slane %v273_v48, 7  ;;  %v270_v60 = vld [vmem:[%s10073_s9 + $0x60] sm:$0xff]  ;;  %v2207_v23 = vrot.slane %v2009_v41, 1  ;;  %v13017_v48 = vmov 0.0   ;;  %6308 = vmatmul.mubr.f32.vlgmr.msra.gmra.mrb[0].mxu0 %v2196_v7 }
  0xce   : > { %v514_v0 = vrot.slane %v271_v45, 7  ;;  %v272_v42 = vld [vmem:[%s10073_s9 + $0x70] sm:$0xff]  ;;  %v10311_v55 = vld [vmem:[#allocation7 + $0xa48] sm:$0xff]  ;;  %v10313_v33 = vld [vmem:[#allocation7 + $0xa58] sm:$0xff]  ;;  %v513_v4 = vrot.slane %v270_v60, 7  ;;  %5280 = vmatmul.mubr.f32.vlgmr.msra.gmra.mrb[0].mxu1 %v13017_v48  ;;  %v8287_v25 = vpack.c.bf16 %v4698_v46, %v10298_v34  ;;  %8542 = vmatpush1.bf16.msra.mxu0 %v8541_v56  ;;  %v2201_v46 = vsel %vm1104_vm1, %v2195_v19, %v2200_v32 }
  0xcf   : > { %v10315_v61 = vld [vmem:[#allocation7 + $0x220] sm:$0xff]  ;;  %v10317_v2 = vld [vmem:[#allocation7 + $0x230] sm:$0xff]  ;;  %v2013_v14 = vld [vmem:[#allocation2 + $0x88] sm:$0x1]  ;;  %711 = vst [vmem:[#allocation2 + $0xe8] sm:$0x1] %v517_v59  ;;  %8286 = vmatpush1.bf16.msra.mxu1 %v8285_v50  ;;  %5285 = vmatprep.mubr.f32.mxu1 %v13017_v48  ;;  %v8547_v32 = vpack.c.bf16 %v10313_v33, %v10311_v55 }
  0xd0   : > { %v2008_v45 = vld [vmem:[#allocation2 + $0x60] sm:$0xfe]  ;;  %v10321_v16 = vsel %vm494_vm0, %v514_v0, %v517_v59  ;;  %707 = vst [vmem:[#allocation2 + $0xc8] sm:$0xfe] %v514_v0  ;;  %v515_v27 = vrot.slane %v272_v42, 7  ;;  %v789_v22 = vld [vmem:[#allocation2 + $0x38] sm:$0xff]  ;;  %v8545_v0 = vpack.c.bf16 %v10302_v40, %v10300_v38  ;;  %6313 = vmatprep.mubr.f32.mxu0 %v2203_v11  ;;  %8544 = vmatprep.subr.bf16.mxu0 %v8543_v20 }
  0xd1   : > { %v10328_v60 = vld [vmem:[#allocation7 + $0xa40] sm:$0xff]  ;;  %v10330_v24 = vld [vmem:[#allocation7 + $0xa50] sm:$0xff]  ;;  %709 = vst [vmem:[#allocation2 + $0xd8] sm:$0xff] %v10321_v16  ;;  %706 = vst [vmem:[#allocation2 + $0xc0] sm:$0xfe] %v513_v4  ;;  %v2204_v34 = vrot.slane %v2008_v45, 1  ;;  %v8289_v19 = vpack.c.bf16 %v10317_v2, %v10315_v61  ;;  %8288 = vmatprep.subr.bf16.mxu1 %v8287_v25  ;;  %6314 = vmatmul.mubr.f32.gmra.mrb[2].mxu0 %v2201_v46 }
  0xd2   : > { %v10335_v42 = vld [vmem:[#allocation7 + $0xa68] sm:$0xff]  ;;  %v4702_v41 = vld [vmem:[#allocation7 + $0x258] sm:$0xff]  ;;  %v10338_v3 = vsel %vm494_vm0, %v513_v4, %v515_v27  ;;  %710 = vst [vmem:[#allocation2 + $0xe0] sm:$0x1] %v515_v27  ;;  %v2212_v50 = vrot.slane %v2013_v14, 1  ;;  %v13019_v40 = vrot.slane %v10257_v47, 1  ;;  %5286 = vmatmul.mubr.f32.gmra.mrb[2].mxu1 %v13017_v48  ;;  %v8549_v55 = vpack.c.bf16 %v10330_v24, %v10328_v60  ;;  %8546 = vmatpush1.bf16.msra.mxu0 %v8545_v0 }
  0xd3   : > { %v4700_v30 = vld [vmem:[#allocation7 + $0x248] sm:$0xff]  ;;  %v10343_v59 = vld [vmem:[#allocation2 + $0x80] sm:$0x1]  ;;  %v10345_v38 = vld [vmem:[#allocation7 + $0xa78] sm:$0xff]  ;;  %708 = vst [vmem:[#allocation2 + $0xd0] sm:$0xff] %v10338_v3  ;;  %5291 = vmatprep.mubr.f32.mxu1 %v789_v22  ;;  %v13021_v22 = vrot.slane %v10257_v47, 1  ;;  %8548 = vmatprep.subr.bf16.mxu0 %v8547_v32 }
  0xd4   : > { %v2209_v56 = vsel %vm1104_vm1, %v2207_v23, %v13019_v40  ;;  %v788_v7 = vld [vmem:[#allocation2 + $0x30] sm:$0xff]  ;;  %v10355_v4 = vld [vmem:[#allocation7 + $0x240] sm:$0xff]  ;;  %v275_v14 = vld [vmem:[%s10073_s9 + $0x88] sm:$0xff]  ;;  %v8291_v20 = vpack.c.bf16 %v4702_v41, %v4700_v30  ;;  %v2210_v61 = vrot.slane %v10343_v59, 1  ;;  %v8551_v2 = vpack.c.bf16 %v10345_v38, %v10335_v42  ;;  %8290 = vmatpush1.bf16.msra.mxu1 %v8289_v19 }
  0xd5   : > { %v10357_v45 = vld [vmem:[#allocation7 + $0x250] sm:$0xff]  ;;  %v10361_v11 = vld [vmem:[#allocation2 + $0x98] sm:$0xfe]  ;;  %v10363_v23 = vld [vmem:[#allocation7 + $0x268] sm:$0xff]  ;;  %v520_v33 = vrot.slane %v275_v14, 7  ;;  %6319 = vmatprep.mubr.f32.mxu0 %v2209_v56  ;;  %v13020_v30 = vrot.slane %v10261_v54, 1  ;;  %v2213_v46 = vsel %vm1104_vm1, %v13021_v22, %v2212_v50 }
  0xd6   : > { %v277_v27 = vld [vmem:[%s10073_s9 + $0x98] sm:$0xff]  ;;  %v274_v25 = vld [vmem:[%s10073_s9 + $0x80] sm:$0xff]  ;;  %v276_v37 = vld [vmem:[%s10073_s9 + $0x90] sm:$0xff]  ;;  %v12928_v42 = vrot.slane %v10284_v51, 1  ;;  %v2217_v0 = vrot.slane %v10361_v11, 1  ;;  %v8293_v50 = vpack.c.bf16 %v10357_v45, %v10355_v4  ;;  %5292 = vmatmul.mubr.f32.gmra.mrb[4].mxu1 %v788_v7  ;;  %8292 = vmatprep.subr.bf16.mxu1 %v8291_v20  ;;  %v13022_v20 = vrot.slane %v10261_v54, 1 }
  0xd7   : > { %v4706_v40 = vld [vmem:[#allocation7 + $0x278] sm:$0xff]  ;;  %v523_v48 = vrot.slane %v277_v27, 7  ;;  %v2206_v41 = vsel %vm1104_vm1, %v2204_v34, %v13020_v30  ;;  %v10379_v60 = vld [vmem:[#allocation7 + $0xa60] sm:$0xff]  ;;  %v10381_v24 = vld [vmem:[#allocation7 + $0xa70] sm:$0xff]  ;;  %713 = vst [vmem:[#allocation2 + $0xf8] sm:$0xfe] %v520_v33  ;;  %5297 = vmatprep.mubr.f32.mxu1 %v10238_v5  ;;  %8550 = vmatpush1.bf16.msra.mxu0 %v8549_v55 }
  0xd8   : > { %v519_v59 = vrot.slane %v274_v25, 7  ;;  %v10385_v38 = vld [vmem:[#allocation2 + $0x90] sm:$0xfe]  ;;  %v10387_v56 = vld [vmem:[#allocation7 + $0xa88] sm:$0xff]  ;;  %v10389_v34 = vld [vmem:[#allocation7 + $0xa98] sm:$0xff]  ;;  %v521_v27 = vrot.slane %v276_v37, 7  ;;  %v8295_v11 = vpack.c.bf16 %v4706_v40, %v10363_v23  ;;  %6320 = vmatmul.mubr.f32.gmra.mrb[4].mxu0 %v2206_v41  ;;  %v2211_v23 = vsel %vm1104_vm1, %v13022_v20, %v2210_v61  ;;  %8552 = vmatprep.subr.bf16.mxu0 %v8551_v2 }
  0xd9   : > { %v10394_v14 = vsel %vm494_vm0, %v520_v33, %v523_v48  ;;  %717 = vst [vmem:[#allocation2 + $0x118] sm:$0x1] %v523_v48  ;;  %v793_v25 = vld [vmem:[#allocation2 + $0x68] sm:$0xff]  ;;  %v10396_v32 = vld [vmem:[#allocation7 + $0xa80] sm:$0xff]  ;;  %v2019_v19 = vld [vmem:[#allocation2 + $0xb8] sm:$0x1]  ;;  %6325 = vmatprep.mubr.f32.mxu0 %v2213_v46  ;;  %v8553_v33 = vpack.c.bf16 %v10381_v24, %v10379_v60  ;;  %v2219_v55 = vsel %vm1104_vm1, %v2217_v0, %v12928_v42 }
  0xda   : > { %v10399_v30 = vld [vmem:[#allocation7 + $0x260] sm:$0xff]  ;;  %v10401_v22 = vld [vmem:[#allocation7 + $0x270] sm:$0xff]  ;;  %715 = vst [vmem:[#allocation2 + $0x108] sm:$0xff] %v10394_v14  ;;  %712 = vst [vmem:[#allocation2 + $0xf0] sm:$0xfe] %v519_v59  ;;  %v10410_v45 = vsel %vm494_vm0, %v519_v59, %v521_v27  ;;  %v2214_v5 = vrot.slane %v10385_v38, 1  ;;  %v8555_v46 = vpack.c.bf16 %v10389_v34, %v10387_v56  ;;  %8294 = vmatpush1.bf16.msra.mxu1 %v8293_v50 }
  0xdb   : > { %v10405_v4 = vld [vmem:[#allocation7 + $0xa90] sm:$0xff]  ;;  %v10407_v37 = vld [vmem:[#allocation7 + $0x288] sm:$0xff]  ;;  %v4710_v7 = vld [vmem:[#allocation7 + $0x298] sm:$0xff]  ;;  %716 = vst [vmem:[#allocation2 + $0x110] sm:$0x1] %v521_v27  ;;  %v2222_v60 = vrot.slane %v2019_v19, 1  ;;  %v8297_v38 = vpack.c.bf16 %v10401_v22, %v10399_v30  ;;  %5298 = vmatmul.mubr.f32.gmra.mrb[6].mxu1 %v10242_v12  ;;  %8296 = vmatprep.subr.bf16.mxu1 %v8295_v11 }
  0xdc   : > { %v10419_v48 = vld [vmem:[#allocation2 + $0xb0] sm:$0x1]  ;;  %v10421_v41 = vld [vmem:[#allocation7 + $0xaa8] sm:$0xff]  ;;  %v10423_v59 = vld [vmem:[#allocation7 + $0xab8] sm:$0xff]  ;;  %714 = vst [vmem:[#allocation2 + $0x100] sm:$0xff] %v10410_v45  ;;  %v8299_v2 = vpack.c.bf16 %v4710_v7, %v10407_v37  ;;  %6326 = vmatmul.mubr.f32.gmra.mrb[6].mxu0 %v2211_v23  ;;  %5303 = vmatprep.mubr.f32.mxu1 %v793_v25  ;;  %v8557_v34 = vpack.c.bf16 %v10405_v4, %v10396_v32  ;;  %v13023_v11 = vrot.slane %v10288_v9, 1 }
  0xdd   : > { %v792_v61 = vld [vmem:[#allocation2 + $0x60] sm:$0xff]  ;;  %v10431_v24 = vld [vmem:[#allocation2 + $0xc8] sm:$0xfe]  ;;  %v281_v20 = vld [vmem:[%s10073_s9 + $0xb8] sm:$0xff]  ;;  %v8559_v50 = vpack.c.bf16 %v10423_v59, %v10421_v41  ;;  %8554 = vmatpush1.bf16.msra.mxu0 %v8553_v33  ;;  %6331 = vmatprep.mubr.f32.mxu0 %v2219_v55  ;;  %v2220_v7 = vrot.slane %v10419_v48, 1  ;;  %v13024_v33 = vrot.slane %v10284_v51, 1 }
  0xde   : > { %v279_v27 = vld [vmem:[%s10073_s9 + $0xa8] sm:$0xff]  ;;  %v4707_v0 = vld [vmem:[#allocation7 + $0x280] sm:$0xff]  ;;  %v4709_v42 = vld [vmem:[#allocation7 + $0x290] sm:$0xff]  ;;  %v529_v62 = vrot.slane %v281_v20, 7  ;;  %v2216_v37 = vsel %vm1104_vm1, %v2214_v5, %v13023_v11  ;;  %8556 = vmatprep.subr.bf16.mxu0 %v8555_v46  ;;  %v2227_v59 = vrot.slane %v10431_v24, 1  ;;  %v2228_v5 = vrot.slane %v10321_v16, 1  ;;  %8298 = vmatpush1.bf16.msra.mxu1 %v8297_v38 }
  0xdf   : > { %v526_v40 = vrot.slane %v279_v27, 7  ;;  %v278_v56 = vld [vmem:[%s10073_s9 + $0xa0] sm:$0xff]  ;;  %v4712_v19 = vld [vmem:[#allocation7 + $0x2a8] sm:$0xff]  ;;  %v4714_v30 = vld [vmem:[#allocation7 + $0x2b8] sm:$0xff]  ;;  %v2223_v41 = vsel %vm1104_vm1, %v13024_v33, %v2222_v60  ;;  %v8301_v20 = vpack.c.bf16 %v4709_v42, %v4707_v0  ;;  %5304 = vmatmul.mubr.f32.gmra.mrb[8].mxu1 %v792_v61  ;;  %8300 = vmatprep.subr.bf16.mxu1 %v8299_v2  ;;  %v13025_v2 = vmov %v13023_v11 }
  0xe0   : > { %v280_v22 = vld [vmem:[%s10073_s9 + $0xb0] sm:$0xff]  ;;  %v525_v12 = vrot.slane %v278_v56, 7  ;;  %v10449_v23 = vld [vmem:[#allocation7 + $0xaa0] sm:$0xff]  ;;  %723 = vst [vmem:[#allocation2 + $0x148] sm:$0x1] %v529_v62  ;;  %v10461_v55 = vld [vmem:[#allocation7 + $0xac8] sm:$0xff]  ;;  %6332 = vmatmul.mubr.f32.gmra.mrb[8].mxu0 %v2216_v37  ;;  %5309 = vmatprep.mubr.f32.mxu1 %v10257_v47  ;;  %v2221_v56 = vsel %vm1104_vm1, %v13025_v2, %v2220_v7 }
  0xe1   : > { %v10451_v25 = vld [vmem:[#allocation7 + $0xab0] sm:$0xff]  ;;  %v10454_v32 = vsel %vm494_vm0, %v526_v40, %v529_v62  ;;  %719 = vst [vmem:[#allocation2 + $0x128] sm:$0xfe] %v526_v40  ;;  %v527_v4 = vrot.slane %v280_v22, 7  ;;  %v2020_v48 = vld [vmem:[#allocation2 + $0xc0] sm:$0xfe]  ;;  %v8303_v40 = vpack.c.bf16 %v4714_v30, %v4712_v19  ;;  %8558 = vmatpush1.bf16.msra.mxu0 %v8557_v34  ;;  %6337 = vmatprep.mubr.f32.mxu0 %v2223_v41 }
  0xe2   : > { %v4974_v27 = vld [vmem:[#allocation7 + $0xad8] sm:$0xff]  ;;  %721 = vst [vmem:[#allocation2 + $0x138] sm:$0xff] %v10454_v32  ;;  %718 = vst [vmem:[#allocation2 + $0x120] sm:$0xfe] %v525_v12  ;;  %v2025_v62 = vld [vmem:[#allocation2 + $0xe8] sm:$0x1]  ;;  %v8561_v42 = vpack.c.bf16 %v10451_v25, %v10449_v23  ;;  %8560 = vmatprep.subr.bf16.mxu0 %v8559_v50  ;;  %v2229_v34 = vsel %vm1104_vm1, %v2227_v59, %v2228_v5  ;;  %8302 = vmatpush1.bf16.msra.mxu1 %v8301_v20 }
  0xe3   : > { %v10465_v46 = vsel %vm494_vm0, %v525_v12, %v527_v4  ;;  %722 = vst [vmem:[#allocation2 + $0x140] sm:$0x1] %v527_v4  ;;  %v4711_v60 = vld [vmem:[#allocation7 + $0x2a0] sm:$0xff]  ;;  %v4713_v24 = vld [vmem:[#allocation7 + $0x2b0] sm:$0xff]  ;;  %v797_v38 = vld [vmem:[#allocation2 + $0x98] sm:$0xff]  ;;  %v2224_v19 = vrot.slane %v2020_v48, 1  ;;  %v8563_v30 = vpack.c.bf16 %v4974_v27, %v10461_v55  ;;  %5310 = vmatmul.mubr.f32.gmra.mrb[10].mxu1 %v10261_v54  ;;  %8304 = vmatprep.subr.bf16.mxu1 %v8303_v40 }
  0xe4   : > { %v10470_v0 = vld [vmem:[#allocation7 + $0xac0] sm:$0xff]  ;;  %v10472_v61 = vld [vmem:[#allocation7 + $0xad0] sm:$0xff]  ;;  %720 = vst [vmem:[#allocation2 + $0x130] sm:$0xff] %v10465_v46  ;;  %v10482_v12 = vld [vmem:[#allocation7 + $0xae8] sm:$0xff]  ;;  %v2232_v7 = vrot.slane %v2025_v62, 1  ;;  %v8305_v23 = vpack.c.bf16 %v4713_v24, %v4711_v60  ;;  %6338 = vmatmul.mubr.f32.gmra.mrb[10].mxu0 %v2221_v56  ;;  %5315 = vmatprep.mubr.f32.mxu1 %v797_v38  ;;  %v13026_v62 = vrot.slane %v10338_v3, 1 }
  0xe5   : > { %v10480_v22 = vld [vmem:[#allocation2 + $0xe0] sm:$0x1]  ;;  %v10484_v11 = vld [vmem:[#allocation7 + $0xaf8] sm:$0xff]  ;;  %v283_v37 = vld [vmem:[%s10073_s9 + $0xc8] sm:$0xff]  ;;  %v8565_v59 = vpack.c.bf16 %v10472_v61, %v10470_v0  ;;  %8562 = vmatpush1.bf16.msra.mxu0 %v8561_v42  ;;  %6343 = vmatprep.mubr.f32.mxu0 %v2229_v34 }
  0xe6   : > { %v285_v25 = vld [vmem:[%s10073_s9 + $0xd8] sm:$0xff]  ;;  %v532_v4 = vrot.slane %v283_v37, 7  ;;  %v4716_v33 = vld [vmem:[#allocation7 + $0x2c8] sm:$0xff]  ;;  %v282_v2 = vld [vmem:[%s10073_s9 + $0xc0] sm:$0xff]  ;;  %v2226_v54 = vsel %vm1104_vm1, %v2224_v19, %v13026_v62  ;;  %v2230_v40 = vrot.slane %v10480_v22, 1  ;;  %8564 = vmatprep.subr.bf16.mxu0 %v8563_v30  ;;  %v2233_v42 = vsel %vm1104_vm1, %v2228_v5, %v2232_v7  ;;  %8306 = vmatpush1.bf16.msra.mxu1 %v8305_v23 }
  0xe7   : > { %v4718_v41 = vld [vmem:[#allocation7 + $0x2d8] sm:$0xff]  ;;  %v535_v55 = vrot.slane %v285_v25, 7  ;;  %v284_v47 = vld [vmem:[%s10073_s9 + $0xd0] sm:$0xff]  ;;  %v531_v20 = vrot.slane %v282_v2, 7  ;;  %v10500_v60 = vld [vmem:[#allocation7 + $0xae0] sm:$0xff]  ;;  %v8567_v61 = vpack.c.bf16 %v10484_v11, %v10482_v12  ;;  %v2238_v19 = vrot.slane %v10394_v14, 1 }
  0xe8   : > { %v2027_v48 = vld [vmem:[#allocation2 + $0xf8] sm:$0xfe]  ;;  %v8307_v27 = vpack.c.bf16 %v4718_v41, %v4716_v33  ;;  %v796_v50 = vld [vmem:[#allocation2 + $0x90] sm:$0xff]  ;;  %725 = vst [vmem:[#allocation2 + $0x158] sm:$0xfe] %v532_v4  ;;  %v10502_v37 = vld [vmem:[#allocation7 + $0xb08] sm:$0xff]  ;;  %6344 = vmatmul.mubr.f32.gmra.mrb[12].mxu0 %v2226_v54 }
  0xe9   : > { %v4977_v24 = vld [vmem:[#allocation7 + $0xaf0] sm:$0xff]  ;;  %v10505_v38 = vsel %vm494_vm0, %v532_v4, %v535_v55  ;;  %729 = vst [vmem:[#allocation2 + $0x178] sm:$0x1] %v535_v55  ;;  %v533_v0 = vrot.slane %v284_v47, 7  ;;  %v2237_v56 = vrot.slane %v2027_v48, 1  ;;  %v4982_v34 = vld [vmem:[#allocation7 + $0xb18] sm:$0xff]  ;;  %5316 = vmatmul.mubr.f32.gmra.mrb[12].mxu1 %v796_v50  ;;  %8566 = vmatpush1.bf16.msra.mxu0 %v8565_v59  ;;  %v13027_v48 = vmov %v13026_v62 }
  0xea   : > { %v2026_v22 = vld [vmem:[#allocation2 + $0xf0] sm:$0xfe]  ;;  %727 = vst [vmem:[#allocation2 + $0x168] sm:$0xff] %v10505_v38  ;;  %724 = vst [vmem:[#allocation2 + $0x150] sm:$0xfe] %v531_v20  ;;  %v4715_v25 = vld [vmem:[#allocation7 + $0x2c0] sm:$0xff]  ;;  %8308 = vmatprep.subr.bf16.mxu1 %v8307_v27  ;;  %5321 = vmatprep.mubr.f32.mxu1 %v10284_v51  ;;  %v8569_v12 = vpack.c.bf16 %v4977_v24, %v10500_v60  ;;  %v2231_v51 = vsel %vm1104_vm1, %v13027_v48, %v2230_v40 }
  0xeb   : > { %v801_v47 = vld [vmem:[#allocation2 + $0xc8] sm:$0xff]  ;;  %v2031_v30 = vld [vmem:[#allocation2 + $0x118] sm:$0x1]  ;;  %v10515_v4 = vsel %vm494_vm0, %v531_v20, %v533_v0  ;;  %728 = vst [vmem:[#allocation2 + $0x170] sm:$0x1] %v533_v0  ;;  %v4717_v5 = vld [vmem:[#allocation7 + $0x2d0] sm:$0xff]  ;;  %6349 = vmatprep.mubr.f32.mxu0 %v2233_v42  ;;  %v8571_v2 = vpack.c.bf16 %v4982_v34, %v10502_v37  ;;  %8568 = vmatprep.subr.bf16.mxu0 %v8567_v61 }
  0xec   : > { %v10519_v11 = vld [vmem:[#allocation7 + $0xb00] sm:$0xff]  ;;  %v10521_v7 = vld [vmem:[#allocation7 + $0xb10] sm:$0xff]  ;;  %v10523_v23 = vld [vmem:[#allocation7 + $0xb28] sm:$0xff]  ;;  %726 = vst [vmem:[#allocation2 + $0x160] sm:$0xff] %v10515_v4  ;;  %v8309_v41 = vpack.c.bf16 %v4717_v5, %v4715_v25  ;;  %v2234_v55 = vrot.slane %v2026_v22, 1  ;;  %v2235_v27 = vrot.slane %v10410_v45, 1  ;;  %v2239_v59 = vsel %vm1104_vm1, %v2237_v56, %v2238_v19  ;;  %6350 = vmatmul.mubr.f32.gmra.mrb[14].mxu0 %v2231_v51 }
  0xed   : > { %v10525_v33 = vld [vmem:[#allocation7 + $0xb38] sm:$0xff]  ;;  %v2030_v50 = vld [vmem:[#allocation2 + $0x110] sm:$0x1]  ;;  %v287_v20 = vld [vmem:[%s10073_s9 + $0xe8] sm:$0xff]  ;;  %v2242_v54 = vrot.slane %v2031_v30, 1  ;;  %5322 = vmatmul.mubr.f32.gmra.mrb[14].mxu1 %v10288_v9  ;;  %8570 = vmatpush1.bf16.msra.mxu0 %v8569_v12  ;;  %v8573_v9 = vpack.c.bf16 %v10521_v7, %v10519_v11 }
  0xee   : > { %v289_v62 = vld [vmem:[%s10073_s9 + $0xf8] sm:$0xff]  ;;  %8310 = vmatpush1.bf16.msra.mxu1 %v8309_v41  ;;  %v538_v60 = vrot.slane %v287_v20, 7  ;;  %v4720_v0 = vld [vmem:[#allocation7 + $0x2e8] sm:$0xff]  ;;  %v286_v42 = vld [vmem:[%s10073_s9 + $0xe0] sm:$0xff]  ;;  %5327 = vmatprep.mubr.f32.mxu1 %v801_v47  ;;  %v2236_v30 = vsel %vm1104_vm1, %v2234_v55, %v2235_v27  ;;  %v2240_v41 = vrot.slane %v2030_v50, 1  ;;  %v8575_v48 = vpack.c.bf16 %v10525_v33, %v10523_v23 }
  0xef   : > { %v541_v24 = vrot.slane %v289_v62, 7  ;;  %v4722_v40 = vld [vmem:[#allocation7 + $0x2f8] sm:$0xff]  ;;  %v2033_v22 = vld [vmem:[#allocation2 + $0x128] sm:$0xfe]  ;;  %v288_v34 = vld [vmem:[%s10073_s9 + $0xf0] sm:$0xff]  ;;  %v537_v25 = vrot.slane %v286_v42, 7  ;;  %6355 = vmatprep.mubr.f32.mxu0 %v2239_v59  ;;  %8572 = vmatprep.subr.bf16.mxu0 %v8571_v2  ;;  %v2243_v12 = vsel %vm1104_vm1, %v2238_v19, %v2242_v54 }
  0xf0   : > { %v8311_v37 = vpack.c.bf16 %v4722_v40, %v4720_v0  ;;  %v800_v61 = vld [vmem:[#allocation2 + $0xc0] sm:$0xff]  ;;  %731 = vst [vmem:[#allocation2 + $0x188] sm:$0xfe] %v538_v60  ;;  %v539_v56 = vrot.slane %v288_v34, 7  ;;  %v4985_v20 = vld [vmem:[#allocation7 + $0xb30] sm:$0xff]  ;;  %v2247_v62 = vrot.slane %v2033_v22, 1  ;;  %6356 = vmatmul.mubr.f32.gmra.mrb[16].mxu0 %v2236_v30  ;;  %v2241_v19 = vsel %vm1104_vm1, %v2235_v27, %v2240_v41 }
  0xf1   : > { %v10542_v5 = vsel %vm494_vm0, %v538_v60, %v541_v24  ;;  %735 = vst [vmem:[#allocation2 + $0x1a8] sm:$0x1] %v541_v24  ;;  %v4983_v51 = vld [vmem:[#allocation7 + $0xb20] sm:$0xff]  ;;  %730 = vst [vmem:[#allocation2 + $0x180] sm:$0xfe] %v537_v25  ;;  %v2248_v55 = vrot.slane %v10454_v32, 1  ;;  %5328 = vmatmul.mubr.f32.gmra.mrb[16].mxu1 %v800_v61  ;;  %8574 = vmatpush1.bf16.msra.mxu0 %v8573_v9 }
  0xf2   : > { %733 = vst [vmem:[#allocation2 + $0x198] sm:$0xff] %v10542_v5  ;;  %v4719_v47 = vld [vmem:[#allocation7 + $0x2e0] sm:$0xff]  ;;  %8312 = vmatprep.subr.bf16.mxu1 %v8311_v37  ;;  %v10555_v11 = vsel %vm494_vm0, %v537_v25, %v539_v56  ;;  %734 = vst [vmem:[#allocation2 + $0x1a0] sm:$0x1] %v539_v56  ;;  %v4721_v7 = vld [vmem:[#allocation7 + $0x2f0] sm:$0xff]  ;;  %5333 = vmatprep.mubr.f32.mxu1 %v10321_v16  ;;  %v8577_v54 = vpack.c.bf16 %v4985_v20, %v4983_v51  ;;  %v2245_v0 = vrot.slane %v10465_v46, 1 }
  0xf3   : > { %v2032_v59 = vld [vmem:[#allocation2 + $0x120] sm:$0xfe]  ;;  %v4988_v23 = vld [vmem:[#allocation7 + $0xb48] sm:$0xff]  ;;  %v4990_v33 = vld [vmem:[#allocation7 + $0xb58] sm:$0xff]  ;;  %732 = vst [vmem:[#allocation2 + $0x190] sm:$0xff] %v10555_v11  ;;  %v8313_v2 = vpack.c.bf16 %v4721_v7, %v4719_v47  ;;  %6361 = vmatprep.mubr.f32.mxu0 %v2243_v12  ;;  %8576 = vmatprep.subr.bf16.mxu0 %v8575_v48  ;;  %v2249_v22 = vsel %vm1104_vm1, %v2247_v62, %v2248_v55 }
  0xf4   : > { %v2037_v50 = vld [vmem:[#allocation2 + $0x148] sm:$0x1]  ;;  %v805_v60 = vld [vmem:[#allocation2 + $0xf8] sm:$0xff]  ;;  %v2244_v24 = vrot.slane %v2032_v59, 1  ;;  %v8579_v37 = vpack.c.bf16 %v4990_v33, %v4988_v23  ;;  %v4987_v34 = vld [vmem:[#allocation7 + $0xb40] sm:$0xff]  ;;  %6362 = vmatmul.mubr.f32.gmra.mrb[18].mxu0 %v2241_v19 }
  0xf5   : > { %v4724_v40 = vld [vmem:[#allocation7 + $0x308] sm:$0xff]  ;;  %v4726_v42 = vld [vmem:[#allocation7 + $0x318] sm:$0xff]  ;;  %v4989_v25 = vld [vmem:[#allocation7 + $0xb50] sm:$0xff]  ;;  %v2252_v61 = vrot.slane %v2037_v50, 1  ;;  %8314 = vmatpush1.bf16.msra.mxu1 %v8313_v2  ;;  %8578 = vmatpush1.bf16.msra.mxu0 %v8577_v54  ;;  %v2258_v50 = vrot.slane %v10505_v38, 1 }
  0xf6   : > { %v2036_v56 = vld [vmem:[#allocation2 + $0x140] sm:$0x1]  ;;  %v8315_v16 = vpack.c.bf16 %v4726_v42, %v4724_v40  ;;  %5334 = vmatmul.mubr.f32.gmra.mrb[18].mxu1 %v10338_v3  ;;  %v4992_v27 = vld [vmem:[#allocation7 + $0xb68] sm:$0xff]  ;;  %v4994_v30 = vld [vmem:[#allocation7 + $0xb78] sm:$0xff]  ;;  %6367 = vmatprep.mubr.f32.mxu0 %v2249_v22  ;;  %v2246_v47 = vsel %vm1104_vm1, %v2244_v24, %v2245_v0  ;;  %v8581_v12 = vpack.c.bf16 %v4989_v25, %v4987_v34  ;;  %v2255_v22 = vrot.slane %v10515_v4, 1 }
  0xf7   : > { %v2039_v9 = vld [vmem:[#allocation2 + $0x158] sm:$0xfe]  ;;  %5339 = vmatprep.mubr.f32.mxu1 %v805_v60  ;;  %v804_v41 = vld [vmem:[#allocation2 + $0xf0] sm:$0xff]  ;;  %v10563_v51 = vld [vmem:[#allocation7 + $0xb60] sm:$0xff]  ;;  %v2250_v20 = vrot.slane %v2036_v56, 1  ;;  %8580 = vmatprep.subr.bf16.mxu0 %v8579_v37  ;;  %v2253_v7 = vsel %vm1104_vm1, %v2248_v55, %v2252_v61  ;;  %v8583_v23 = vpack.c.bf16 %v4994_v30, %v4992_v27 }
  0xf8   : > { %v4723_v48 = vld [vmem:[#allocation7 + $0x300] sm:$0xff]  ;;  %v4993_v62 = vld [vmem:[#allocation7 + $0xb70] sm:$0xff]  ;;  %v10566_v59 = vld [vmem:[#allocation7 + $0xb88] sm:$0xff]  ;;  %v2257_v33 = vrot.slane %v2039_v9, 1  ;;  %8316 = vmatprep.subr.bf16.mxu1 %v8315_v16  ;;  %6368 = vmatmul.mubr.f32.gmra.mrb[20].mxu0 %v2246_v47 }
  0xf9   : > { %v4725_v3 = vld [vmem:[#allocation7 + $0x310] sm:$0xff]  ;;  %v2043_v19 = vld [vmem:[#allocation2 + $0x178] sm:$0x1]  ;;  %v809_v54 = vld [vmem:[#allocation2 + $0x128] sm:$0xff]  ;;  %v8585_v55 = vpack.c.bf16 %v4993_v62, %v10563_v51  ;;  %8582 = vmatpush1.bf16.msra.mxu0 %v8581_v12  ;;  %6373 = vmatprep.mubr.f32.mxu0 %v2253_v7  ;;  %v2251_v56 = vsel %vm1104_vm1, %v2245_v0, %v2250_v20 }
  0xfa   : > { %v2038_v2 = vld [vmem:[#allocation2 + $0x150] sm:$0xfe]  ;;  %5340 = vmatmul.mubr.f32.gmra.mrb[20].mxu1 %v804_v41  ;;  %v4998_v60 = vld [vmem:[#allocation7 + $0xb98] sm:$0xff]  ;;  %v10570_v24 = vld [vmem:[#allocation7 + $0xb80] sm:$0xff]  ;;  %v8317_v40 = vpack.c.bf16 %v4725_v3, %v4723_v48  ;;  %v2262_v27 = vrot.slane %v2043_v19, 1  ;;  %8584 = vmatprep.subr.bf16.mxu0 %v8583_v23  ;;  %v2259_v51 = vsel %vm1104_vm1, %v2257_v33, %v2258_v50 }
  0xfb   : > { %v291_v42 = vld [vmem:[%s10073_s9 + $0x108] sm:$0xff]  ;;  %5345 = vmatprep.mubr.f32.mxu1 %v10394_v14  ;;  %v10576_v37 = vld [vmem:[#allocation7 + $0xb90] sm:$0xff]  ;;  %v10581_v61 = vld [vmem:[%s10073_s9 + $0x100] sm:$0xff]  ;;  %v2254_v16 = vrot.slane %v2038_v2, 1  ;;  %v8587_v47 = vpack.c.bf16 %v4998_v60, %v10566_v59 }
  0xfc   : > { %v10578_v34 = vld [vmem:[#allocation7 + $0xba8] sm:$0xff]  ;;  %v544_v25 = vrot.slane %v291_v42, 7  ;;  %v10584_v30 = vld [vmem:[#allocation7 + $0xbb8] sm:$0xff]  ;;  %v543_v14 = vrot.slane %v10581_v61, 7  ;;  %v808_v48 = vld [vmem:[#allocation2 + $0x120] sm:$0xff]  ;;  %8318 = vmatpush1.bf16.msra.mxu1 %v8317_v40  ;;  %6374 = vmatmul.mubr.f32.gmra.mrb[22].mxu0 %v2251_v56  ;;  %v8589_v59 = vpack.c.bf16 %v10576_v37, %v10570_v24  ;;  %v2263_v24 = vsel %vm1104_vm1, %v2258_v50, %v2262_v27 }
  0xfd   : > { %v4728_v9 = vld [vmem:[#allocation7 + $0x328] sm:$0xff]  ;;  %v4730_v41 = vld [vmem:[#allocation7 + $0x338] sm:$0xff]  ;;  %v2042_v62 = vld [vmem:[#allocation2 + $0x170] sm:$0x1]  ;;  %v8591_v23 = vpack.c.bf16 %v10584_v30, %v10578_v34  ;;  %8586 = vmatpush1.bf16.msra.mxu0 %v8585_v55  ;;  %6379 = vmatprep.mubr.f32.mxu0 %v2259_v51 }
  0xfe   : > { %v10589_v12 = vld [vmem:[#allocation2 + $0x188] sm:$0xfe]  ;;  %737 = vst [vmem:[#allocation2 + $0x1b8] sm:$0xfe] %v544_v25  ;;  %v8319_v0 = vpack.c.bf16 %v4730_v41, %v4728_v9  ;;  %5346 = vmatmul.mubr.f32.gmra.mrb[22].mxu1 %v10410_v45  ;;  %736 = vst [vmem:[#allocation2 + $0x1b0] sm:$0xfe] %v543_v14  ;;  %8588 = vmatprep.subr.bf16.mxu0 %v8587_v47 }
  0xff   : > { %v10592_v20 = vld [vmem:[#allocation7 + $0x320] sm:$0xff]  ;;  %v10594_v3 = vld [vmem:[#allocation7 + $0x330] sm:$0xff]  ;;  %v293_v7 = vld [vmem:[%s10073_s9 + $0x118] sm:$0xff]  ;;  %5351 = vmatprep.mubr.f32.mxu1 %v809_v54  ;;  %v2268_v45 = vrot.slane %v10542_v5, 1  ;;  %v2256_v54 = vsel %vm1104_vm1, %v2254_v16, %v2255_v22  ;;  %v2260_v40 = vrot.slane %v2042_v62, 1  ;;  %v2267_v42 = vrot.slane %v10589_v12, 1 }
 0x100   : > { %v10601_v33 = vld [vmem:[#allocation7 + $0xba0] sm:$0xff]  ;;  %v10603_v2 = vld [vmem:[#allocation7 + $0xbb0] sm:$0xff]  ;;  %v10606_v19 = vld [vmem:[#allocation7 + $0xbc8] sm:$0xff]  ;;  %v547_v60 = vrot.slane %v293_v7, 7  ;;  %8320 = vmatprep.subr.bf16.mxu1 %v8319_v0  ;;  %v8321_v50 = vpack.c.bf16 %v10594_v3, %v10592_v20  ;;  %6380 = vmatmul.mubr.f32.gmra.mrb[24].mxu0 %v2256_v54 }
 0x101   : > { %v10613_v37 = vld [vmem:[#allocation7 + $0xbd8] sm:$0xff]  ;;  %v292_v34 = vld [vmem:[%s10073_s9 + $0x110] sm:$0xff]  ;;  %v10617_v61 = vld [vmem:[%s10073_s9 + $0x128] sm:$0xff]  ;;  %8590 = vmatpush1.bf16.msra.mxu0 %v8589_v59  ;;  %6385 = vmatprep.mubr.f32.mxu0 %v2263_v24 }
 0x102   : > { %v10619_v56 = vld [vmem:[#allocation2 + $0x180] sm:$0xfe]  ;;  %v10623_v30 = vld [vmem:[#allocation7 + $0xbd0] sm:$0xff]  ;;  %v10628_v16 = vsel %vm494_vm0, %v544_v25, %v547_v60  ;;  %741 = vst [vmem:[#allocation2 + $0x1d8] sm:$0x1] %v547_v60  ;;  %v545_v27 = vrot.slane %v292_v34, 7  ;;  %5352 = vmatmul.mubr.f32.gmra.mrb[24].mxu1 %v808_v48  ;;  %v8593_v25 = vpack.c.bf16 %v10603_v2, %v10601_v33  ;;  %8592 = vmatprep.subr.bf16.mxu0 %v8591_v23 }
 0x103   : > { %v10621_v55 = vld [vmem:[#allocation7 + $0xbc0] sm:$0xff]  ;;  %v550_v9 = vrot.slane %v10617_v61, 7  ;;  %v813_v51 = vld [vmem:[#allocation2 + $0x158] sm:$0xff]  ;;  %v10634_v47 = vld [vmem:[#allocation2 + $0x1a8] sm:$0x1]  ;;  %739 = vst [vmem:[#allocation2 + $0x1c8] sm:$0xff] %v10628_v16  ;;  %5357 = vmatprep.mubr.f32.mxu1 %v10454_v32  ;;  %v2261_v32 = vsel %vm1104_vm1, %v2255_v22, %v2260_v40  ;;  %v2269_v22 = vsel %vm1104_vm1, %v2267_v42, %v2268_v45  ;;  %8322 = vmatpush1.bf16.msra.mxu1 %v8321_v50 }
 0x104   : > { %v10632_v41 = vld [vmem:[%s10073_s9 + $0x120] sm:$0xff]  ;;  %v10636_v62 = vld [vmem:[#allocation7 + $0xbe8] sm:$0xff]  ;;  %v4734_v20 = vld [vmem:[#allocation7 + $0x358] sm:$0xff]  ;;  %v10646_v48 = vsel %vm494_vm0, %v543_v14, %v545_v27  ;;  %740 = vst [vmem:[#allocation2 + $0x1d0] sm:$0x1] %v545_v27  ;;  %v2264_v54 = vrot.slane %v10619_v56, 1  ;;  %v8595_v14 = vpack.c.bf16 %v10613_v37, %v10606_v19  ;;  %v8597_v27 = vpack.c.bf16 %v10623_v30, %v10621_v55  ;;  %6386 = vmatmul.mubr.f32.gmra.mrb[26].mxu0 %v2261_v32 }
 0x105   : > { %v549_v12 = vrot.slane %v10632_v41, 7  ;;  %v4732_v0 = vld [vmem:[#allocation7 + $0x348] sm:$0xff]  ;;  %v10643_v3 = vld [vmem:[#allocation2 + $0x38] sm:$0xfc]  ;;  %743 = vst [vmem:[#allocation2 + $0x1e8] sm:$0xfe] %v550_v9  ;;  %8594 = vmatpush1.bf16.msra.mxu0 %v8593_v25  ;;  %6391 = vmatprep.mubr.f32.mxu0 %v2269_v22 }
 0x106   : > { %v8323_v7 = vpack.c.bf16 %v4734_v20, %v4732_v0  ;;  %v4731_v60 = vld [vmem:[#allocation7 + $0x340] sm:$0xff]  ;;  %v4733_v34 = vld [vmem:[#allocation7 + $0x350] sm:$0xff]  ;;  %v2265_v33 = vrot.slane %v10555_v11, 1  ;;  %v10655_v2 = vld [vmem:[#allocation7 + $0xbf8] sm:$0xff]  ;;  %738 = vst [vmem:[#allocation2 + $0x1c0] sm:$0xff] %v10646_v48  ;;  %v2272_v40 = vrot.slane %v10634_v47, 1  ;;  %5358 = vmatmul.mubr.f32.gmra.mrb[26].mxu1 %v10465_v46  ;;  %8596 = vmatprep.subr.bf16.mxu0 %v8595_v14 }
 0x107   : > { %v10657_v61 = vld [vmem:[#allocation2 + $0x48] sm:$0xff]  ;;  %742 = vst [vmem:[#allocation2 + $0x1e0] sm:$0xfe] %v549_v12  ;;  %v297_v59 = vld [vmem:[%s10073_s9 + $0x138] sm:$0xff]  ;;  %v812_v24 = vld [vmem:[#allocation2 + $0x150] sm:$0xff]  ;;  %v8325_v37 = vpack.c.bf16 %v4733_v34, %v4731_v60  ;;  %v2677_v42 = vrot.slane %v10643_v3, 2  ;;  %5363 = vmatprep.mubr.f32.mxu1 %v813_v51  ;;  %v8599_v50 = vpack.c.bf16 %v10655_v2, %v10636_v62 }
 0x108   : > { %v2048_v19 = vld [vmem:[#allocation2 + $0x1a0] sm:$0x1]  ;;  %v553_v56 = vrot.slane %v297_v59, 7  ;;  %v10672_v23 = vld [vmem:[#allocation7 + $0xbf0] sm:$0xff]  ;;  %8324 = vmatprep.subr.bf16.mxu1 %v8323_v7  ;;  %v12930_v47 = vrot.slane %v10657_v61, 2  ;;  %v299_v30 = vld [vmem:[%s10073_s9 + $0x148] sm:$0xff]  ;;  %v2266_v51 = vsel %vm1104_vm1, %v2264_v54, %v2265_v33  ;;  %v2273_v25 = vsel %vm1104_vm1, %v2268_v45, %v2272_v40 }
 0x109   : > { %v10670_v0 = vld [vmem:[#allocation7 + $0xbe0] sm:$0xff]  ;;  %v296_v20 = vld [vmem:[%s10073_s9 + $0x130] sm:$0xff]  ;;  %v2270_v3 = vrot.slane %v2048_v19, 1  ;;  %v556_v7 = vrot.slane %v299_v30, 7  ;;  %v4736_v32 = vld [vmem:[#allocation7 + $0x368] sm:$0xff]  ;;  %8326 = vmatpush1.bf16.msra.mxu1 %v8325_v37  ;;  %6392 = vmatmul.mubr.f32.gmra.mrb[28].mxu0 %v2266_v51 }
 0x10a   : > { %v10679_v46 = vld [vmem:[#allocation2 + $0x30] sm:$0xfc]  ;;  %v10682_v60 = vsel %vm494_vm0, %v550_v9, %v553_v56  ;;  %747 = vst [vmem:[#allocation2 + $0x208] sm:$0x1] %v553_v56  ;;  %v551_v55 = vrot.slane %v296_v20, 7  ;;  %v10686_v34 = vld [vmem:[%s10073_s9 + $0x140] sm:$0xff]  ;;  %5364 = vmatmul.mubr.f32.gmra.mrb[28].mxu1 %v812_v24  ;;  %v8601_v41 = vpack.c.bf16 %v10672_v23, %v10670_v0  ;;  %8598 = vmatpush1.bf16.msra.mxu0 %v8597_v27 }
 0x10b   : > { %v10691_v62 = vld [vmem:[#allocation2 + $0x40] sm:$0xff]  ;;  %745 = vst [vmem:[#allocation2 + $0x1f8] sm:$0xff] %v10682_v60  ;;  %v12931_v9 = vrot.slane %v10686_v34, 7  ;;  %v4738_v2 = vld [vmem:[#allocation7 + $0x378] sm:$0xff]  ;;  %v10698_v59 = vld [vmem:[#allocation7 + $0xc08] sm:$0xff]  ;;  %v2674_v45 = vrot.slane %v10679_v46, 2  ;;  %5369 = vmatprep.mubr.f32.mxu1 %v10505_v38  ;;  %6397 = vmatprep.mubr.f32.mxu0 %v2273_v25  ;;  %v2271_v51 = vsel %vm1104_vm1, %v2265_v33, %v2270_v3  ;;  %v2679_v38 = vsel %vm1585_vm2, %v2677_v42, %v12930_v47 }
 0x10c   : > { %v10700_v54 = vld [vmem:[#allocation7 + $0xc18] sm:$0xff]  ;;  %v10707_v19 = vsel %vm494_vm0, %v549_v12, %v551_v55  ;;  %746 = vst [vmem:[#allocation2 + $0x200] sm:$0x1] %v551_v55  ;;  %v8327_v14 = vpack.c.bf16 %v4738_v2, %v4736_v32  ;;  %v817_v56 = vld [vmem:[#allocation2 + $0x188] sm:$0xff]  ;;  %749 = vst [vmem:[#allocation2 + $0x218] sm:$0xfe] %v556_v7  ;;  %8600 = vmatprep.subr.bf16.mxu0 %v8599_v50 }
 0x10d   : > { %v10702_v22 = vld [vmem:[#allocation2 + $0x58] sm:$0x3]  ;;  %744 = vst [vmem:[#allocation2 + $0x1f0] sm:$0xff] %v10707_v19  ;;  %748 = vst [vmem:[#allocation2 + $0x210] sm:$0xfe] %v12931_v9  ;;  %v10713_v40 = vld [vmem:[#allocation7 + $0x360] sm:$0xff]  ;;  %v8603_v23 = vpack.c.bf16 %v10700_v54, %v10698_v59  ;;  %6398 = vmatmul.mubr.f32.gmra.mrb[30].mxu0 %v2271_v51 }
 0x10e   : > { %v4737_v37 = vld [vmem:[#allocation7 + $0x370] sm:$0xff]  ;;  %v301_v20 = vld [vmem:[%s10073_s9 + $0x158] sm:$0xff]  ;;  %v10719_v12 = vld [vmem:[#allocation7 + $0xc00] sm:$0xff]  ;;  %v2675_v0 = vrot.slane %v10691_v62, 2  ;;  %v2682_v25 = vrot.slane %v10702_v22, 2  ;;  %8328 = vmatprep.subr.bf16.mxu1 %v8327_v14  ;;  %5370 = vmatmul.mubr.f32.gmra.mrb[30].mxu1 %v10515_v4  ;;  %v13028_v4 = vrot.slane %v10686_v34, 7 }
 0x10f   : > { %v10721_v24 = vld [vmem:[#allocation7 + $0xc10] sm:$0xff]  ;;  %v10723_v55 = vld [vmem:[#allocation2 + $0x68] sm:$0xfc]  ;;  %v559_v30 = vrot.slane %v301_v20, 7  ;;  %v10734_v32 = vld [vmem:[#allocation2 + $0x78] sm:$0xff]  ;;  %v8329_v33 = vpack.c.bf16 %v4737_v37, %v10713_v40  ;;  %5375 = vmatprep.mubr.f32.mxu1 %v817_v56  ;;  %8602 = vmatpush1.bf16.msra.mxu0 %v8601_v41 }
 0x110   : > { %v2486_v46 = vld [vmem:[#allocation2 + $0x50] sm:$0x3]  ;;  %v10736_v2 = vld [vmem:[#allocation7 + $0xc28] sm:$0xff]  ;;  %v10740_v20 = vld [vmem:[#allocation7 + $0xc38] sm:$0xff]  ;;  %v2687_v40 = vrot.slane %v10723_v55, 2  ;;  %v12932_v37 = vrot.slane %v10734_v32, 2  ;;  %6564 = vmatprep.mubr.f32.mxu0 %v2679_v38  ;;  %v2676_v56 = vsel %vm1585_vm2, %v2674_v45, %v2675_v0  ;;  %v8605_v51 = vpack.c.bf16 %v10721_v24, %v10719_v12  ;;  %8604 = vmatprep.subr.bf16.mxu0 %v8603_v23 }
 0x111   : > { %v300_v27 = vld [vmem:[%s10073_s9 + $0x150] sm:$0xff]  ;;  %v10744_v42 = vsel %vm494_vm0, %v556_v7, %v559_v30  ;;  %753 = vst [vmem:[#allocation2 + $0x238] sm:$0x1] %v559_v30  ;;  %v303_v62 = vld [vmem:[%s10073_s9 + $0x168] sm:$0xff]  ;;  %v10748_v59 = vld [vmem:[%s10073_s9 + $0x160] sm:$0xff]  ;;  %v2680_v54 = vrot.slane %v2486_v46, 2  ;;  %v8607_v45 = vpack.c.bf16 %v10740_v20, %v10736_v2  ;;  %8330 = vmatpush1.bf16.msra.mxu1 %v8329_v33 }
 0x112   : > { %v557_v3 = vrot.slane %v300_v27, 7  ;;  %751 = vst [vmem:[#allocation2 + $0x228] sm:$0xff] %v10744_v42  ;;  %v562_v50 = vrot.slane %v303_v62, 7  ;;  %v561_v22 = vrot.slane %v10748_v59, 7  ;;  %v4740_v47 = vld [vmem:[#allocation7 + $0x388] sm:$0xff]  ;;  %v4742_v14 = vld [vmem:[#allocation7 + $0x398] sm:$0xff]  ;;  %6565 = vmatmul.mubr.f32.vlgmr.msra.gmra.mrb[0].mxu0 %v2676_v56 }
 0x113   : > { %v10753_v9 = vld [vmem:[#allocation7 + $0x380] sm:$0xff]  ;;  %v10757_v30 = vld [vmem:[#allocation2 + $0x70] sm:$0xff]  ;;  %v8331_v27 = vpack.c.bf16 %v4742_v14, %v4740_v47  ;;  %v305_v34 = vld [vmem:[%s10073_s9 + $0x178] sm:$0xff]  ;;  %v13029_v47 = vrot.slane %v10657_v61, 2  ;;  %8606 = vmatpush1.bf16.msra.mxu0 %v8605_v51 }
 0x114   : > { %v816_v7 = vld [vmem:[#allocation2 + $0x180] sm:$0xff]  ;;  %v10762_v46 = vsel %vm494_vm0, %v13028_v4, %v557_v3  ;;  %752 = vst [vmem:[#allocation2 + $0x230] sm:$0x1] %v557_v3  ;;  %v4741_v62 = vld [vmem:[#allocation7 + $0x390] sm:$0xff]  ;;  %755 = vst [vmem:[#allocation2 + $0x248] sm:$0xfe] %v562_v50  ;;  %v2681_v4 = vsel %vm1585_vm2, %v2675_v0, %v2680_v54  ;;  %8608 = vmatprep.subr.bf16.mxu0 %v8607_v45 }
 0x115   : > { %v10767_v55 = vld [vmem:[#allocation2 + $0x60] sm:$0xfc]  ;;  %750 = vst [vmem:[#allocation2 + $0x220] sm:$0xff] %v10762_v46  ;;  %754 = vst [vmem:[#allocation2 + $0x240] sm:$0xfe] %v561_v22  ;;  %v2683_v41 = vsel %vm1585_vm2, %v13029_v47, %v2682_v25  ;;  %v5017_v24 = vld [vmem:[#allocation7 + $0xc30] sm:$0xff]  ;;  %v8333_v3 = vpack.c.bf16 %v4741_v62, %v10753_v9  ;;  %5376 = vmatmul.mubr.f32.gmra.mrb[32].mxu1 %v816_v7  ;;  %8332 = vmatprep.subr.bf16.mxu1 %v8331_v27 }
 0x116   : > { %v10778_v38 = vld [vmem:[#allocation2 + $0x88] sm:$0x3]  ;;  %v5015_v12 = vld [vmem:[#allocation7 + $0xc20] sm:$0xff]  ;;  %v565_v14 = vrot.slane %v305_v34, 7  ;;  %v5022_v25 = vld [vmem:[#allocation7 + $0xc58] sm:$0xff]  ;;  %5381 = vmatprep.mubr.f32.mxu1 %v10542_v5  ;;  %v2689_v9 = vsel %vm1585_vm2, %v2687_v40, %v12932_v37  ;;  %v2684_v20 = vrot.slane %v10767_v55, 2  ;;  %6570 = vmatprep.mubr.f32.mxu0 %v2683_v41 }
 0x117   : > { %v5020_v61 = vld [vmem:[#allocation7 + $0xc48] sm:$0xff]  ;;  %v304_v47 = vld [vmem:[%s10073_s9 + $0x170] sm:$0xff]  ;;  %v821_v2 = vld [vmem:[#allocation2 + $0x1b8] sm:$0xff]  ;;  %v2692_v5 = vrot.slane %v10778_v38, 2  ;;  %v8609_v56 = vpack.c.bf16 %v5017_v24, %v5015_v12  ;;  %8334 = vmatpush1.bf16.msra.mxu1 %v8333_v3  ;;  %6571 = vmatmul.mubr.f32.gmra.mrb[2].mxu0 %v2681_v4 }
 0x118   : > { %v10789_v33 = vld [vmem:[#allocation2 + $0x80] sm:$0x3]  ;;  %v10791_v0 = vld [vmem:[#allocation2 + $0x98] sm:$0xfc]  ;;  %v10794_v54 = vsel %vm494_vm0, %v562_v50, %v565_v14  ;;  %759 = vst [vmem:[#allocation2 + $0x268] sm:$0x1] %v565_v14  ;;  %v8611_v14 = vpack.c.bf16 %v5022_v25, %v5020_v61  ;;  %6576 = vmatprep.mubr.f32.mxu0 %v2689_v9 }
 0x119   : > { %v563_v7 = vrot.slane %v304_v47, 7  ;;  %v307_v27 = vld [vmem:[%s10073_s9 + $0x188] sm:$0xff]  ;;  %v10798_v62 = vld [vmem:[%s10073_s9 + $0x180] sm:$0xff]  ;;  %757 = vst [vmem:[#allocation2 + $0x258] sm:$0xff] %v10794_v54  ;;  %v4746_v50 = vld [vmem:[#allocation7 + $0x3b8] sm:$0xff]  ;;  %5382 = vmatmul.mubr.f32.gmra.mrb[34].mxu1 %v10555_v11  ;;  %8610 = vmatpush1.bf16.msra.mxu0 %v8609_v56  ;;  %v2690_v4 = vrot.slane %v10789_v33, 2 }
 0x11a   : > { %v10801_v40 = vld [vmem:[#allocation7 + $0xc40] sm:$0xff]  ;;  %v568_v55 = vrot.slane %v307_v27, 7  ;;  %v567_v34 = vrot.slane %v10798_v62, 7  ;;  %v4744_v37 = vld [vmem:[#allocation7 + $0x3a8] sm:$0xff]  ;;  %v10805_v47 = vld [vmem:[#allocation7 + $0xc50] sm:$0xff]  ;;  %5387 = vmatprep.mubr.f32.mxu1 %v821_v2  ;;  %v13031_v27 = vrot.slane %v10734_v32, 2  ;;  %8612 = vmatprep.subr.bf16.mxu0 %v8611_v14 }
 0x11b   : > { %v10807_v23 = vld [vmem:[#allocation7 + $0xc68] sm:$0xff]  ;;  %v10809_v51 = vld [vmem:[#allocation7 + $0xc78] sm:$0xff]  ;;  %v10814_v41 = vsel %vm494_vm0, %v561_v22, %v563_v7  ;;  %758 = vst [vmem:[#allocation2 + $0x260] sm:$0x1] %v563_v7  ;;  %v8335_v38 = vpack.c.bf16 %v4746_v50, %v4744_v37  ;;  %v10821_v24 = vld [vmem:[#allocation7 + $0x3a0] sm:$0xff]  ;;  %v13030_v22 = vrot.slane %v10757_v30, 2  ;;  %v8613_v50 = vpack.c.bf16 %v10805_v47, %v10801_v40 }
 0x11c   : > { %v10817_v12 = vld [vmem:[#allocation2 + $0xa8] sm:$0xff]  ;;  %756 = vst [vmem:[#allocation2 + $0x250] sm:$0xff] %v10814_v41  ;;  %761 = vst [vmem:[#allocation2 + $0x278] sm:$0xfe] %v568_v55  ;;  %v4745_v3 = vld [vmem:[#allocation7 + $0x3b0] sm:$0xff]  ;;  %v2693_v62 = vsel %vm1585_vm2, %v13031_v27, %v2692_v5  ;;  %v2697_v2 = vrot.slane %v10791_v0, 2  ;;  %v8615_v32 = vpack.c.bf16 %v10809_v51, %v10807_v23 }
 0x11d   : > { %760 = vst [vmem:[#allocation2 + $0x270] sm:$0xfe] %v567_v34  ;;  %v309_v61 = vld [vmem:[%s10073_s9 + $0x198] sm:$0xff]  ;;  %v820_v59 = vld [vmem:[#allocation2 + $0x1b0] sm:$0xff]  ;;  %v2686_v11 = vsel %vm1585_vm2, %v2684_v20, %v13030_v22  ;;  %v10838_v20 = vld [vmem:[#allocation7 + $0xc60] sm:$0xff]  ;;  %8336 = vmatprep.subr.bf16.mxu1 %v8335_v38  ;;  %v8337_v33 = vpack.c.bf16 %v4745_v3, %v10821_v24  ;;  %8614 = vmatpush1.bf16.msra.mxu0 %v8613_v50 }
 0x11e   : > { %v10827_v37 = vld [vmem:[#allocation2 + $0x90] sm:$0xfc]  ;;  %v10829_v25 = vld [vmem:[#allocation2 + $0xb8] sm:$0x3]  ;;  %v571_v7 = vrot.slane %v309_v61, 7  ;;  %v10845_v9 = vld [vmem:[#allocation7 + $0xc88] sm:$0xff]  ;;  %5388 = vmatmul.mubr.f32.gmra.mrb[36].mxu1 %v820_v59  ;;  %6577 = vmatmul.mubr.f32.gmra.mrb[4].mxu0 %v2686_v11 }
 0x11f   : > { %v10840_v22 = vld [vmem:[#allocation7 + $0xc70] sm:$0xff]  ;;  %v10847_v5 = vld [vmem:[#allocation7 + $0xc98] sm:$0xff]  ;;  %v311_v40 = vld [vmem:[%s10073_s9 + $0x1a8] sm:$0xff]  ;;  %5393 = vmatprep.mubr.f32.mxu1 %v10628_v16  ;;  %6582 = vmatprep.mubr.f32.mxu0 %v2693_v62 }
 0x120   : > { %v308_v45 = vld [vmem:[%s10073_s9 + $0x190] sm:$0xff]  ;;  %v10851_v0 = vsel %vm494_vm0, %v568_v55, %v571_v7  ;;  %765 = vst [vmem:[#allocation2 + $0x298] sm:$0x1] %v571_v7  ;;  %v10854_v47 = vld [vmem:[#allocation2 + $0xa0] sm:$0xff]  ;;  %v574_v23 = vrot.slane %v311_v40, 7  ;;  %v4748_v61 = vld [vmem:[#allocation7 + $0x3c8] sm:$0xff]  ;;  %8616 = vmatprep.subr.bf16.mxu0 %v8615_v32  ;;  %8338 = vmatpush1.bf16.msra.mxu1 %v8337_v33 }
 0x121   : > { %v569_v56 = vrot.slane %v308_v45, 7  ;;  %763 = vst [vmem:[#allocation2 + $0x288] sm:$0xff] %v10851_v0  ;;  %v10859_v51 = vld [vmem:[%s10073_s9 + $0x1a0] sm:$0xff]  ;;  %v4750_v38 = vld [vmem:[#allocation7 + $0x3d8] sm:$0xff]  ;;  %v2694_v55 = vrot.slane %v10827_v37, 2  ;;  %v4749_v27 = vld [vmem:[#allocation7 + $0x3d0] sm:$0xff] }
 0x122   : > { %v10863_v24 = vld [vmem:[#allocation2 + $0xb0] sm:$0x3]  ;;  %v573_v3 = vrot.slane %v10859_v51, 7  ;;  %v8339_v59 = vpack.c.bf16 %v4750_v38, %v4748_v61  ;;  %v4747_v7 = vld [vmem:[#allocation7 + $0x3c0] sm:$0xff]  ;;  %v13032_v40 = vrot.slane %v10757_v30, 2  ;;  %v825_v14 = vld [vmem:[#allocation2 + $0x1e8] sm:$0xff]  ;;  %5394 = vmatmul.mubr.f32.gmra.mrb[38].mxu1 %v10646_v48 }
 0x123   : > { %v10866_v45 = vsel %vm494_vm0, %v567_v34, %v569_v56  ;;  %764 = vst [vmem:[#allocation2 + $0x290] sm:$0x1] %v569_v56  ;;  %v2702_v37 = vrot.slane %v10829_v25, 2  ;;  %v10873_v53 = vld [vmem:[#allocation2 + $0xc8] sm:$0xfc]  ;;  %v8617_v34 = vpack.c.bf16 %v10840_v22, %v10838_v20  ;;  %v313_v56 = vld [vmem:[%s10073_s9 + $0x1b8] sm:$0xff]  ;;  %v8619_v25 = vpack.c.bf16 %v10847_v5, %v10845_v9  ;;  %5399 = vmatprep.mubr.f32.mxu1 %v825_v14 }
 0x124   : > { %v2691_v11 = vsel %vm1585_vm2, %v13032_v40, %v2690_v4  ;;  %762 = vst [vmem:[#allocation2 + $0x280] sm:$0xff] %v10866_v45  ;;  %767 = vst [vmem:[#allocation2 + $0x2a8] sm:$0xfe] %v574_v23  ;;  %v13033_v51 = vrot.slane %v10817_v12, 2  ;;  %v824_v30 = vld [vmem:[#allocation2 + $0x1e0] sm:$0xff]  ;;  %v5029_v50 = vld [vmem:[#allocation7 + $0xc90] sm:$0xff]  ;;  %v8341_v20 = vpack.c.bf16 %v4749_v27, %v4747_v7  ;;  %8340 = vmatprep.subr.bf16.mxu1 %v8339_v59 }
 0x125   : > { %v10884_v4 = vld [vmem:[#allocation7 + $0xc80] sm:$0xff]  ;;  %766 = vst [vmem:[#allocation2 + $0x2a0] sm:$0xfe] %v573_v3  ;;  %v577_v22 = vrot.slane %v313_v56, 7  ;;  %v10887_v61 = vld [vmem:[#allocation2 + $0xd8] sm:$0xff]  ;;  %v5032_v38 = vld [vmem:[#allocation7 + $0xca8] sm:$0xff]  ;;  %6583 = vmatmul.mubr.f32.gmra.mrb[6].mxu0 %v2691_v11 }
 0x126   : > { %v2699_v62 = vsel %vm1585_vm2, %v2697_v2, %v13033_v51  ;;  %v5034_v40 = vld [vmem:[#allocation7 + $0xcb8] sm:$0xff]  ;;  %v312_v32 = vld [vmem:[%s10073_s9 + $0x1b0] sm:$0xff]  ;;  %v13034_v9 = vrot.slane %v10854_v47, 2  ;;  %v2700_v33 = vrot.slane %v10863_v24, 2  ;;  %v10895_v7 = vld [vmem:[#allocation2 + $0xc0] sm:$0xfc]  ;;  %8618 = vmatpush1.bf16.msra.mxu0 %v8617_v34  ;;  %v8621_v24 = vpack.c.bf16 %v5029_v50, %v10884_v4  ;;  %8342 = vmatpush1.bf16.msra.mxu1 %v8341_v20 }
 0x127   : > { %v10897_v27 = vld [vmem:[#allocation2 + $0xe8] sm:$0x3]  ;;  %v10899_v56 = vld [vmem:[#allocation7 + $0xca0] sm:$0xff]  ;;  %v10902_v51 = vsel %vm494_vm0, %v574_v23, %v577_v22  ;;  %771 = vst [vmem:[#allocation2 + $0x2c8] sm:$0x1] %v577_v22  ;;  %v575_v59 = vrot.slane %v312_v32, 7  ;;  %6588 = vmatprep.mubr.f32.mxu0 %v2699_v62  ;;  %8620 = vmatprep.subr.bf16.mxu0 %v8619_v25  ;;  %v8623_v22 = vpack.c.bf16 %v5034_v40, %v5032_v38 }
 0x128   : > { %v2696_v5 = vsel %vm1585_vm2, %v2694_v55, %v13034_v9  ;;  %v315_v11 = vld [vmem:[%s10073_s9 + $0x1c8] sm:$0xff]  ;;  %v13035_v14 = vrot.slane %v10817_v12, 2  ;;  %v2707_v9 = vrot.slane %v10873_v53, 2  ;;  %769 = vst [vmem:[#allocation2 + $0x2b8] sm:$0xff] %v10902_v51  ;;  %v314_v36 = vld [vmem:[%s10073_s9 + $0x1c0] sm:$0xff]  ;;  %v4754_v23 = vld [vmem:[#allocation7 + $0x3f8] sm:$0xff]  ;;  %5400 = vmatmul.mubr.f32.gmra.mrb[40].mxu1 %v824_v30 }
 0x129   : > { %v580_v2 = vrot.slane %v315_v11, 7  ;;  %v4752_v28 = vld [vmem:[#allocation7 + $0x3e8] sm:$0xff]  ;;  %v5033_v32 = vld [vmem:[#allocation7 + $0xcb0] sm:$0xff]  ;;  %v5038_v12 = vld [vmem:[#allocation7 + $0xcd8] sm:$0xff]  ;;  %770 = vst [vmem:[#allocation2 + $0x2c0] sm:$0x1] %v575_v59  ;;  %6589 = vmatmul.mubr.f32.gmra.mrb[8].mxu0 %v2696_v5  ;;  %5405 = vmatprep.mubr.f32.mxu1 %v10682_v60 }
 0x12a   : > { %v2703_v55 = vsel %vm1585_vm2, %v13035_v14, %v2702_v37  ;;  %v5036_v62 = vld [vmem:[#allocation7 + $0xcc8] sm:$0xff]  ;;  %v10913_v37 = vsel %vm494_vm0, %v573_v3, %v575_v59  ;;  %v579_v53 = vrot.slane %v314_v36, 7  ;;  %v8343_v34 = vpack.c.bf16 %v4754_v23, %v4752_v28  ;;  %v4751_v4 = vld [vmem:[#allocation7 + $0x3e0] sm:$0xff]  ;;  %v4753_v50 = vld [vmem:[#allocation7 + $0x3f0] sm:$0xff]  ;;  %8622 = vmatpush1.bf16.msra.mxu0 %v8621_v24 }
 0x12b   : > { %768 = vst [vmem:[#allocation2 + $0x2b0] sm:$0xff] %v10913_v37  ;;  %773 = vst [vmem:[#allocation2 + $0x2d8] sm:$0xfe] %v580_v2  ;;  %v317_v11 = vld [vmem:[%s10073_s9 + $0x1d8] sm:$0xff]  ;;  %v13036_v25 = vrot.slane %v10854_v47, 2  ;;  %v9558_v3 = vld [vmem:[#allocation2 + $0xd0] sm:$0xff]  ;;  %6594 = vmatprep.mubr.f32.mxu0 %v2703_v55  ;;  %v8625_v47 = vpack.c.bf16 %v5033_v32, %v10899_v56  ;;  %8624 = vmatprep.subr.bf16.mxu0 %v8623_v22  ;;  %v8345_v55 = vpack.c.bf16 %v4753_v50, %v4751_v4 }
 0x12c   : > { %v2705_v38 = vrot.slane %v9558_v3, 2  ;;  %772 = vst [vmem:[#allocation2 + $0x2d0] sm:$0xfe] %v579_v53  ;;  %v583_v36 = vrot.slane %v317_v11, 7  ;;  %v829_v28 = vld [vmem:[#allocation2 + $0x218] sm:$0xff]  ;;  %v13037_v30 = vrot.slane %v10887_v61, 2  ;;  %8344 = vmatprep.subr.bf16.mxu1 %v8343_v34  ;;  %5406 = vmatmul.mubr.f32.gmra.mrb[42].mxu1 %v10707_v19 }
 0x12d   : > { %v2701_v20 = vsel %vm1585_vm2, %v13036_v25, %v2700_v33  ;;  %v2704_v59 = vrot.slane %v10895_v7, 2  ;;  %v2712_v5 = vrot.slane %v10897_v27, 2  ;;  %v2504_v14 = vld [vmem:[#allocation2 + $0xe0] sm:$0x3]  ;;  %v316_v23 = vld [vmem:[%s10073_s9 + $0x1d0] sm:$0xff]  ;;  %v8627_v33 = vpack.c.bf16 %v5038_v12, %v5036_v62  ;;  %v5040_v27 = vld [vmem:[#allocation7 + $0xce8] sm:$0xff]  ;;  %5411 = vmatprep.mubr.f32.mxu1 %v829_v28  ;;  %8346 = vmatpush1.bf16.msra.mxu1 %v8345_v55 }
 0x12e   : > { %v2709_v40 = vsel %vm1585_vm2, %v2707_v9, %v13037_v30  ;;  %v5035_v25 = vld [vmem:[#allocation7 + $0xcc0] sm:$0xff]  ;;  %v5037_v3 = vld [vmem:[#allocation7 + $0xcd0] sm:$0xff]  ;;  %v10929_v11 = vsel %vm494_vm0, %v580_v2, %v583_v36  ;;  %777 = vst [vmem:[#allocation2 + $0x2f8] sm:$0x1] %v583_v36  ;;  %v581_v9 = vrot.slane %v316_v23, 7  ;;  %v4756_v30 = vld [vmem:[#allocation7 + $0x408] sm:$0xff]  ;;  %6595 = vmatmul.mubr.f32.gmra.mrb[10].mxu0 %v2701_v20 }
 0x12f   : > { %v2507_v7 = vld [vmem:[#allocation2 + $0xf8] sm:$0xfc]  ;;  %775 = vst [vmem:[#allocation2 + $0x2e8] sm:$0xff] %v10929_v11  ;;  %v828_v56 = vld [vmem:[#allocation2 + $0x210] sm:$0xff]  ;;  %6600 = vmatprep.mubr.f32.mxu0 %v2709_v40  ;;  %v2706_v2 = vsel %vm1585_vm2, %v2704_v59, %v2705_v38  ;;  %v2710_v62 = vrot.slane %v2504_v14, 2  ;;  %8626 = vmatpush1.bf16.msra.mxu0 %v8625_v47  ;;  %v8629_v12 = vpack.c.bf16 %v5037_v3, %v5035_v25  ;;  %v13038_v4 = vrot.slane %v10887_v61, 2 }
 0x130   : > { %v5042_v24 = vld [vmem:[#allocation7 + $0xcf8] sm:$0xff]  ;;  %v10934_v22 = vsel %vm494_vm0, %v579_v53, %v581_v9  ;;  %776 = vst [vmem:[#allocation2 + $0x2f0] sm:$0x1] %v581_v9  ;;  %v2717_v20 = vrot.slane %v2507_v7, 2  ;;  %v9559_v36 = vld [vmem:[#allocation2 + $0x108] sm:$0xff]  ;;  %8628 = vmatprep.subr.bf16.mxu0 %v8627_v33  ;;  %v5039_v40 = vld [vmem:[#allocation7 + $0xce0] sm:$0xff]  ;;  %5412 = vmatmul.mubr.f32.gmra.mrb[44].mxu1 %v828_v56 }
 0x131   : > { %v4758_v32 = vld [vmem:[#allocation7 + $0x418] sm:$0xff]  ;;  %774 = vst [vmem:[#allocation2 + $0x2e0] sm:$0xff] %v10934_v22  ;;  %v2713_v50 = vsel %vm1585_vm2, %v13038_v4, %v2712_v5  ;;  %v2718_v28 = vrot.slane %v9559_v36, 2  ;;  %v2506_v53 = vld [vmem:[#allocation2 + $0xf0] sm:$0xfc]  ;;  %v8631_v23 = vpack.c.bf16 %v5042_v24, %v5040_v27  ;;  %v5044_v14 = vld [vmem:[#allocation7 + $0xd08] sm:$0xff]  ;;  %5417 = vmatprep.mubr.f32.mxu1 %v10744_v42  ;;  %v2711_v61 = vsel %vm1585_vm2, %v2705_v38, %v2710_v62 }
 0x132   : > { %v8347_v34 = vpack.c.bf16 %v4758_v32, %v4756_v30  ;;  %v5041_v9 = vld [vmem:[#allocation7 + $0xcf0] sm:$0xff]  ;;  %v2511_v59 = vld [vmem:[#allocation2 + $0x118] sm:$0x3]  ;;  %6601 = vmatmul.mubr.f32.gmra.mrb[12].mxu0 %v2706_v2  ;;  %v833_v5 = vld [vmem:[#allocation2 + $0x248] sm:$0xff]  ;;  %v2714_v25 = vrot.slane %v2506_v53, 2 }
 0x133   : > { %v5046_v47 = vld [vmem:[#allocation7 + $0xd18] sm:$0xff]  ;;  %6606 = vmatprep.mubr.f32.mxu0 %v2713_v50  ;;  %v9560_v3 = vld [vmem:[#allocation2 + $0x100] sm:$0xff]  ;;  %8630 = vmatpush1.bf16.msra.mxu0 %v8629_v12  ;;  %v8633_v33 = vpack.c.bf16 %v5041_v9, %v5039_v40  ;;  %v2719_v55 = vsel %vm1585_vm2, %v2717_v20, %v2718_v28  ;;  %v2722_v7 = vrot.slane %v2511_v59, 2  ;;  %v2510_v27 = vld [vmem:[#allocation2 + $0x110] sm:$0x3] }
 0x134   : > { %8348 = vmatprep.subr.bf16.mxu1 %v8347_v34  ;;  %v2715_v30 = vrot.slane %v9560_v3, 2  ;;  %8632 = vmatprep.subr.bf16.mxu0 %v8631_v23  ;;  %v8635_v24 = vpack.c.bf16 %v5046_v47, %v5044_v14  ;;  %v5043_v56 = vld [vmem:[#allocation7 + $0xd00] sm:$0xff]  ;;  %v5045_v32 = vld [vmem:[#allocation7 + $0xd10] sm:$0xff]  ;;  %v2513_v2 = vld [vmem:[#allocation2 + $0x128] sm:$0xfc]  ;;  %v2720_v12 = vrot.slane %v2510_v27, 2 }
 0x135   : > { %5418 = vmatmul.mubr.f32.gmra.mrb[46].mxu1 %v10762_v46  ;;  %v832_v38 = vld [vmem:[#allocation2 + $0x240] sm:$0xff]  ;;  %v5048_v62 = vld [vmem:[#allocation7 + $0xd28] sm:$0xff]  ;;  %v8637_v4 = vpack.c.bf16 %v5045_v32, %v5043_v56  ;;  %v5050_v50 = vld [vmem:[#allocation7 + $0xd38] sm:$0xff]  ;;  %v2723_v20 = vsel %vm1585_vm2, %v2718_v28, %v2722_v7  ;;  %v2727_v36 = vrot.slane %v2513_v2, 2 }
 0x136   : > { %6607 = vmatmul.mubr.f32.gmra.mrb[14].mxu0 %v2711_v61  ;;  %5423 = vmatprep.mubr.f32.mxu1 %v833_v5  ;;  %v2716_v34 = vsel %vm1585_vm2, %v2714_v25, %v2715_v30  ;;  %v9561_v53 = vld [vmem:[#allocation2 + $0x138] sm:$0xff]  ;;  %v2512_v40 = vld [vmem:[#allocation2 + $0x120] sm:$0xfc]  ;;  %v8639_v9 = vpack.c.bf16 %v5050_v50, %v5048_v62  ;;  %v5049_v14 = vld [vmem:[#allocation7 + $0xd30] sm:$0xff]  ;;  %v2721_v61 = vsel %vm1585_vm2, %v2715_v30, %v2720_v12 }
 0x137   : > { %6612 = vmatprep.mubr.f32.mxu0 %v2719_v55  ;;  %8634 = vmatpush1.bf16.msra.mxu0 %v8633_v33  ;;  %v2728_v23 = vrot.slane %v9561_v53, 2  ;;  %v5047_v59 = vld [vmem:[#allocation7 + $0xd20] sm:$0xff]  ;;  %v2517_v47 = vld [vmem:[#allocation2 + $0x148] sm:$0x3]  ;;  %v837_v5 = vld [vmem:[#allocation2 + $0x278] sm:$0xff]  ;;  %v2724_v25 = vrot.slane %v2512_v40, 2 }
 0x138   : > { %8636 = vmatprep.subr.bf16.mxu0 %v8635_v24  ;;  %v9562_v3 = vld [vmem:[#allocation2 + $0x130] sm:$0xff]  ;;  %v8641_v33 = vpack.c.bf16 %v5049_v14, %v5047_v59  ;;  %v2732_v7 = vrot.slane %v2517_v47, 2  ;;  %v2516_v27 = vld [vmem:[#allocation2 + $0x140] sm:$0x3]  ;;  %v2519_v24 = vld [vmem:[#allocation2 + $0x158] sm:$0xfc] }
 0x139   : > { %5424 = vmatmul.mubr.f32.gmra.mrb[48].mxu1 %v832_v38  ;;  %v2725_v28 = vrot.slane %v9562_v3, 2  ;;  %v2729_v55 = vsel %vm1585_vm2, %v2727_v36, %v2728_v23  ;;  %v5052_v56 = vld [vmem:[#allocation7 + $0xd48] sm:$0xff]  ;;  %v5054_v32 = vld [vmem:[#allocation7 + $0xd58] sm:$0xff]  ;;  %v5051_v2 = vld [vmem:[#allocation7 + $0xd40] sm:$0xff]  ;;  %v2737_v50 = vrot.slane %v2519_v24, 2 }
 0x13a   : > { %6613 = vmatmul.mubr.f32.gmra.mrb[16].mxu0 %v2716_v34  ;;  %5429 = vmatprep.mubr.f32.mxu1 %v10794_v54  ;;  %v836_v54 = vld [vmem:[#allocation2 + $0x270] sm:$0xff]  ;;  %v8643_v30 = vpack.c.bf16 %v5054_v32, %v5052_v56  ;;  %v2730_v34 = vrot.slane %v2516_v27, 2  ;;  %v2523_v40 = vld [vmem:[#allocation2 + $0x178] sm:$0x3]  ;;  %v841_v59 = vld [vmem:[#allocation2 + $0x2a8] sm:$0xff] }
 0x13b   : > { %6618 = vmatprep.mubr.f32.mxu0 %v2723_v20  ;;  %8638 = vmatpush1.bf16.msra.mxu0 %v8637_v4  ;;  %v5053_v38 = vld [vmem:[#allocation7 + $0xd50] sm:$0xff]  ;;  %v2726_v62 = vsel %vm1585_vm2, %v2724_v25, %v2725_v28  ;;  %v2733_v4 = vsel %vm1585_vm2, %v2728_v23, %v2732_v7  ;;  %v9563_v20 = vld [vmem:[#allocation2 + $0x168] sm:$0xff]  ;;  %v9564_v47 = vld [vmem:[#allocation2 + $0x160] sm:$0xff]  ;;  %v2742_v25 = vrot.slane %v2523_v40, 2 }
 0x13c   : > { %8640 = vmatprep.subr.bf16.mxu0 %v8639_v9  ;;  %v8645_v12 = vpack.c.bf16 %v5053_v38, %v5051_v2  ;;  %v2738_v36 = vrot.slane %v9563_v20, 2  ;;  %v2518_v53 = vld [vmem:[#allocation2 + $0x150] sm:$0xfc]  ;;  %v2731_v9 = vsel %vm1585_vm2, %v2725_v28, %v2730_v34  ;;  %v2522_v3 = vld [vmem:[#allocation2 + $0x170] sm:$0x3]  ;;  %v5055_v27 = vld [vmem:[#allocation7 + $0xd60] sm:$0xff] }
 0x13d   : > { %5430 = vmatmul.mubr.f32.gmra.mrb[50].mxu1 %v10814_v41  ;;  %v2734_v14 = vrot.slane %v2518_v53, 2  ;;  %v840_v28 = vld [vmem:[#allocation2 + $0x2a0] sm:$0xff]  ;;  %v2740_v32 = vrot.slane %v2522_v3, 2  ;;  %v9565_v2 = vld [vmem:[#allocation2 + $0x198] sm:$0xff]  ;;  %v9566_v40 = vld [vmem:[#allocation2 + $0x190] sm:$0xff] }
 0x13e   : > { %6619 = vmatmul.mubr.f32.gmra.mrb[18].mxu0 %v2721_v61  ;;  %5435 = vmatprep.mubr.f32.mxu1 %v837_v5  ;;  %v2735_v61 = vrot.slane %v9564_v47, 2  ;;  %v5056_v5 = vld [vmem:[#allocation7 + $0xd68] sm:$0xff]  ;;  %v2739_v23 = vsel %vm1585_vm2, %v2737_v50, %v2738_v36  ;;  %v2748_v38 = vrot.slane %v9565_v2, 2  ;;  %v2528_v34 = vld [vmem:[#allocation2 + $0x1a0] sm:$0x3]  ;;  %v845_v20 = vld [vmem:[#allocation2 + $0x2d8] sm:$0xff] }
 0x13f   : > { %6624 = vmatprep.mubr.f32.mxu0 %v2729_v55  ;;  %8642 = vmatpush1.bf16.msra.mxu0 %v8641_v33  ;;  %v5058_v33 = vld [vmem:[#allocation7 + $0xd78] sm:$0xff]  ;;  %v2525_v55 = vld [vmem:[#allocation2 + $0x188] sm:$0xfc]  ;;  %v844_v3 = vld [vmem:[#allocation2 + $0x2d0] sm:$0xff] }
 0x140   : > { %8644 = vmatprep.subr.bf16.mxu0 %v8643_v30  ;;  %v8647_v7 = vpack.c.bf16 %v5058_v33, %v5056_v5  ;;  %v2736_v56 = vsel %vm1585_vm2, %v2734_v14, %v2735_v61  ;;  %v2747_v30 = vrot.slane %v2525_v55, 2  ;;  %v2741_v50 = vsel %vm1585_vm2, %v2735_v61, %v2740_v32  ;;  %v5061_v14 = vld [vmem:[#allocation7 + $0xd90] sm:$0xff]  ;;  %v9567_v33 = vld [vmem:[#allocation2 + $0x8] sm:$0xff]  ;;  %v4798_v17 = vld [vmem:[#allocation7 + $0x558] sm:$0xff] }
 0x141   : > { %5436 = vmatmul.mubr.f32.gmra.mrb[52].mxu1 %v836_v54  ;;  %v2743_v54 = vsel %vm1585_vm2, %v2738_v36, %v2742_v25  ;;  %v2745_v36 = vrot.slane %v9566_v40, 2  ;;  %v2750_v61 = vrot.slane %v2528_v34, 2  ;;  %v10963_v55 = vrot.slane %v9567_v33, 1  ;;  %v5064_v2 = vld [vmem:[#allocation7 + $0xda8] sm:$0xff]  ;;  %v5065_v40 = vld [vmem:[#allocation7 + $0xdb0] sm:$0xff]  ;;  %v5067_v33 = vld [vmem:[#allocation7 + $0xdc0] sm:$0xff] }
 0x142   : > { %6625 = vmatmul.mubr.f32.gmra.mrb[20].mxu0 %v2726_v62  ;;  %5441 = vmatprep.mubr.f32.mxu1 %v10851_v0  ;;  %v5057_v0 = vld [vmem:[#allocation7 + $0xd70] sm:$0xff]  ;;  %v2524_v62 = vld [vmem:[#allocation2 + $0x180] sm:$0xfc]  ;;  %v2749_v47 = vsel %vm1585_vm2, %v2747_v30, %v2748_v38  ;;  %v2535_v30 = vld [vmem:[#allocation2 + $0x1d8] sm:$0x3] }
 0x143   : > { %6630 = vmatprep.mubr.f32.mxu0 %v2733_v4  ;;  %8646 = vmatpush1.bf16.msra.mxu0 %v8645_v12  ;;  %v8649_v24 = vpack.c.bf16 %v5057_v0, %v5055_v27  ;;  %v5060_v12 = vld [vmem:[#allocation7 + $0xd88] sm:$0xff]  ;;  %v5062_v4 = vld [vmem:[#allocation7 + $0xd98] sm:$0xff]  ;;  %v2744_v53 = vrot.slane %v2524_v62, 2  ;;  %v2758_v0 = vrot.slane %v10628_v16, 2  ;;  %v2755_v62 = vrot.slane %v10646_v48, 2 }
 0x144   : > { %8648 = vmatprep.subr.bf16.mxu0 %v8647_v7  ;;  %v2751_v16 = vsel %vm1585_vm2, %v2745_v36, %v2750_v61  ;;  %v11000_v34 = vld [vmem:[#allocation2 + $0x50] sm:$0x1]  ;;  %v4806_v10 = vld [vmem:[#allocation7 + $0x598] sm:$0xff]  ;;  %v4808_v63 = vld [vmem:[#allocation7 + $0x5a8] sm:$0xff] }
 0x145   : > { %5442 = vmatmul.mubr.f32.gmra.mrb[54].mxu1 %v10866_v45  ;;  %v2529_v45 = vld [vmem:[#allocation2 + $0x1a8] sm:$0x3]  ;;  %v2746_v7 = vsel %vm1585_vm2, %v2744_v53, %v2745_v36  ;;  %v5063_v53 = vld [vmem:[#allocation7 + $0xda0] sm:$0xff] }
 0x146   : > { %6631 = vmatmul.mubr.f32.gmra.mrb[22].mxu0 %v2731_v9  ;;  %5447 = vmatprep.mubr.f32.mxu1 %v841_v59  ;;  %v8651_v9 = vpack.c.bf16 %v5062_v4, %v5060_v12  ;;  %v5059_v59 = vld [vmem:[#allocation7 + $0xd80] sm:$0xff]  ;;  %v2752_v5 = vrot.slane %v2529_v45, 2  ;;  %v5066_v12 = vld [vmem:[#allocation7 + $0xdb8] sm:$0xff]  ;;  %v10979_v36 = vld [vmem:[#allocation2 + $0x48] sm:$0xff] }
 0x147   : > { %6636 = vmatprep.mubr.f32.mxu0 %v2739_v23  ;;  %8650 = vmatpush1.bf16.msra.mxu0 %v8649_v24  ;;  %v913_v23 = vld [vmem:[#allocation2 + $0x8] sm:$0xfe]  ;;  %v8653_v25 = vpack.c.bf16 %v5061_v14, %v5059_v59  ;;  %v2530_v24 = vld [vmem:[#allocation2 + $0x1b0] sm:$0xfc]  ;;  %v10969_v45 = vld [vmem:[#allocation2 + $0x20] sm:$0x1] }
 0x148   : > { %8652 = vmatprep.subr.bf16.mxu0 %v8651_v9  ;;  %v1108_v27 = vrot.slane %v913_v23, 1  ;;  %v4755_v59 = vld [vmem:[#allocation7 + $0x400] sm:$0xff]  ;;  %v4757_v14 = vld [vmem:[#allocation7 + $0x410] sm:$0xff]  ;;  %v919_v23 = vld [vmem:[#allocation2 + $0x38] sm:$0xfe] }
 0x149   : > { %5448 = vmatmul.mubr.f32.gmra.mrb[56].mxu1 %v840_v28  ;;  %v912_v28 = vld [vmem:[#allocation2] sm:$0xfe] }
 0x14a   : > { %6637 = vmatmul.mubr.f32.gmra.mrb[24].mxu0 %v2736_v56  ;;  %5453 = vmatprep.mubr.f32.mxu1 %v10902_v51  ;;  %v2531_v51 = vld [vmem:[#allocation2 + $0x1b8] sm:$0xfc]  ;;  %v2753_v56 = vsel %vm1585_vm2, %v2748_v38, %v2752_v5  ;;  %v1105_v4 = vrot.slane %v912_v28, 1  ;;  %v10974_v38 = vld [vmem:[#allocation2 + $0x1d0] sm:$0x3]  ;;  %v1110_v9 = vsel %vm1104_vm1, %v1108_v27, %v10963_v55  ;;  %v2762_v5 = vrot.slane %v2535_v30, 2 }
 0x14b   : > { %6642 = vmatprep.mubr.f32.mxu0 %v2743_v54  ;;  %8654 = vmatpush1.bf16.msra.mxu0 %v8653_v25  ;;  %v2757_v32 = vrot.slane %v2531_v51, 2  ;;  %v917_v54 = vld [vmem:[#allocation2 + $0x28] sm:$0x1]  ;;  %v8657_v25 = vpack.c.bf16 %v5065_v40, %v5063_v53  ;;  %v2537_v51 = vld [vmem:[#allocation2 + $0x1e8] sm:$0xfc]  ;;  %v2760_v27 = vrot.slane %v10974_v38, 2  ;;  %v8349_v30 = vpack.c.bf16 %v4757_v14, %v4755_v59 }
 0x14c   : > { %v918_v28 = vld [vmem:[#allocation2 + $0x30] sm:$0xfe]  ;;  %v2767_v53 = vrot.slane %v2537_v51, 2  ;;  %v5068_v40 = vld [vmem:[#allocation7 + $0xdc8] sm:$0xff] }
 0x14d   : > { %5454 = vmatmul.mubr.f32.gmra.mrb[58].mxu1 %v10913_v37  ;;  %v4761_v14 = vld [vmem:[#allocation7 + $0x430] sm:$0xff] }
 0x14e   : > { %6643 = vmatmul.mubr.f32.gmra.mrb[26].mxu0 %v2741_v50  ;;  %5459 = vmatprep.mubr.f32.mxu1 %v845_v20  ;;  %v2754_v50 = vrot.slane %v2530_v24, 2  ;;  %v8655_v20 = vpack.c.bf16 %v5066_v12, %v5064_v2  ;;  %v4760_v24 = vld [vmem:[#allocation7 + $0x428] sm:$0xff]  ;;  %v1118_v2 = vrot.slane %v919_v23, 1  ;;  %v10993_v12 = vld [vmem:[#allocation7 + $0x420] sm:$0xff] }
 0x14f   : > { %6648 = vmatprep.mubr.f32.mxu0 %v2749_v47  ;;  %v1113_v47 = vrot.slane %v917_v54, 1 }
 0x150   : > { %8656 = vmatprep.subr.bf16.mxu0 %v8655_v20  ;;  %v2756_v54 = vsel %vm1585_vm2, %v2754_v50, %v2755_v62  ;;  %v1119_v20 = vrot.slane %v10979_v36, 1 }
 0x151   : > { %5460 = vmatmul.mubr.f32.gmra.mrb[60].mxu1 %v844_v3  ;;  %v10981_v3 = vld [vmem:[#allocation2 + $0x40] sm:$0xff]  ;;  %8658 = vmatpush1.bf16.msra.mxu0 %v8657_v25  ;;  %v1114_v38 = vsel %vm1104_vm1, %v10963_v55, %v1113_v47  ;;  %v1115_v25 = vrot.slane %v918_v28, 1 }
 0x152   : > { %6649 = vmatmul.mubr.f32.gmra.mrb[28].mxu0 %v2746_v7  ;;  %5465 = vmatprep.mubr.f32.mxu1 %v10929_v11  ;;  %v2759_v11 = vsel %vm1585_vm2, %v2757_v32, %v2758_v0  ;;  %v1111_v7 = vrot.slane %v10969_v45, 1  ;;  %v1107_v32 = vsel %vm1104_vm1, %v1105_v4, %v10963_v55  ;;  %v923_v45 = vld [vmem:[#allocation2 + $0x58] sm:$0x1]  ;;  %v2541_v4 = vld [vmem:[#allocation2 + $0x208] sm:$0x3]  ;;  %v1116_v50 = vrot.slane %v10981_v3, 1 }
 0x153   : > { %6654 = vmatprep.mubr.f32.mxu0 %v2753_v56  ;;  %v4762_v56 = vld [vmem:[#allocation7 + $0x438] sm:$0xff]  ;;  %v1123_v47 = vrot.slane %v923_v45, 1  ;;  %v2772_v28 = vrot.slane %v2541_v4, 2  ;;  %v13039_v45 = vrot.slane %v10682_v60, 2  ;;  %v318_v4 = vld [vmem:[%s10073_s9 + $0x1e0] sm:$0xff] }
 0x154   : > { %v8351_v59 = vpack.c.bf16 %v4762_v56, %v4760_v24  ;;  %v1112_v51 = vsel %vm1104_vm1, %v10963_v55, %v1111_v7  ;;  %v11004_v24 = vld [vmem:[#allocation2 + $0x200] sm:$0x3]  ;;  %v11006_v56 = vld [vmem:[#allocation2 + $0x68] sm:$0xfe]  ;;  %v11016_v55 = vld [vmem:[#allocation2 + $0x218] sm:$0xfc]  ;;  %v1117_v48 = vsel %vm1104_vm1, %v1115_v25, %v1116_v50 }
 0x155   : > { %5466 = vmatmul.mubr.f32.gmra.mrb[62].mxu1 %v10934_v22  ;;  %v2536_v22 = vld [vmem:[#allocation2 + $0x1e0] sm:$0xfc]  ;;  %v321_v7 = vld [vmem:[%s10073_s9 + $0x1f8] sm:$0xff]  ;;  %v1121_v25 = vrot.slane %v11000_v34, 1  ;;  %v11047_v60 = vld [vmem:[#allocation2 + $0x210] sm:$0xfc] }
 0x156   : > { %6655 = vmatmul.mubr.f32.gmra.mrb[30].mxu0 %v2751_v16  ;;  %5536 = vmatprep.mubr.f32.mxu1 %v1110_v9  ;;  %v2763_v16 = vsel %vm1585_vm2, %v2758_v0, %v2762_v5  ;;  %v5070_v9 = vld [vmem:[#allocation7 + $0xdd8] sm:$0xff]  ;;  %v2764_v61 = vrot.slane %v2536_v22, 2  ;;  %v4764_v0 = vld [vmem:[#allocation7 + $0x448] sm:$0xff] }
 0x157   : > { %6660 = vmatprep.mubr.f32.mxu0 %v2759_v11  ;;  %v8659_v23 = vpack.c.bf16 %v5070_v9, %v5068_v40  ;;  %v5069_v11 = vld [vmem:[#allocation7 + $0xdd0] sm:$0xff]  ;;  %v4766_v5 = vld [vmem:[#allocation7 + $0x458] sm:$0xff]  ;;  %v319_v40 = vld [vmem:[%s10073_s9 + $0x1e8] sm:$0xff]  ;;  %v13040_v9 = vrot.slane %v10707_v19, 2 }
 0x158   : > { %v8661_v36 = vpack.c.bf16 %v5069_v11, %v5067_v33  ;;  %v1120_v33 = vsel %vm1104_vm1, %v1118_v2, %v1119_v20  ;;  %v586_v22 = vrot.slane %v319_v40, 7  ;;  %v11027_v2 = vld [vmem:[#allocation7 + $0x440] sm:$0xff]  ;;  %v4770_v11 = vld [vmem:[#allocation7 + $0x478] sm:$0xff]  ;;  %v2770_v40 = vrot.slane %v11004_v24, 2 }
 0x159   : > { %5537 = vmatmul.mubr.f32.vlgmr.msra.gmra.mrb[0].mxu1 %v1107_v32  ;;  %v2761_v32 = vsel %vm1585_vm2, %v2755_v62, %v2760_v27  ;;  %v11025_v62 = vld [vmem:[#allocation2 + $0x60] sm:$0xfe]  ;;  %v8355_v27 = vpack.c.bf16 %v4766_v5, %v4764_v0  ;;  %8660 = vmatprep.subr.bf16.mxu0 %v8659_v23  ;;  %v320_v0 = vld [vmem:[%s10073_s9 + $0x1f0] sm:$0xff]  ;;  %v585_v5 = vrot.slane %v318_v4, 7  ;;  %v13041_v23 = vmov %v13039_v45 }
 0x15a   : > { %6661 = vmatmul.mubr.f32.gmra.mrb[32].mxu0 %v2756_v54  ;;  %8350 = vmatpush1.bf16.msra.mxu1 %v8349_v30  ;;  %v8353_v54 = vpack.c.bf16 %v4761_v14, %v10993_v12  ;;  %v11014_v30 = vld [vmem:[#allocation2 + $0x78] sm:$0xff]  ;;  %v4765_v12 = vld [vmem:[#allocation7 + $0x450] sm:$0xff]  ;;  %v1124_v14 = vsel %vm1104_vm1, %v1119_v20, %v1123_v47  ;;  %779 = vst [vmem:[#allocation2 + $0x308] sm:$0xfe] %v586_v22  ;;  %v587_v34 = vrot.slane %v320_v0, 7  ;;  %v5072_v20 = vld [vmem:[#allocation7 + $0xde8] sm:$0xff] }
 0x15b   : > { %5542 = vmatprep.mubr.f32.mxu1 %v1114_v38  ;;  %6666 = vmatprep.mubr.f32.mxu0 %v2763_v16  ;;  %v2769_v38 = vsel %vm1585_vm2, %v2767_v53, %v13039_v45  ;;  %v589_v16 = vrot.slane %v321_v7, 7  ;;  %v2766_v53 = vsel %vm1585_vm2, %v2764_v61, %v13040_v9  ;;  %v11040_v7 = vld [vmem:[#allocation2 + $0x70] sm:$0xff]  ;;  %v5074_v47 = vld [vmem:[#allocation7 + $0xdf8] sm:$0xff]  ;;  %778 = vst [vmem:[#allocation2 + $0x300] sm:$0xfe] %v585_v5  ;;  %v2777_v45 = vrot.slane %v11016_v55, 2 }
 0x15c   : > { %8352 = vmatprep.subr.bf16.mxu1 %v8351_v59  ;;  %v4768_v59 = vld [vmem:[#allocation7 + $0x468] sm:$0xff]  ;;  %8662 = vmatpush1.bf16.msra.mxu0 %v8661_v36  ;;  %v1128_v36 = vrot.slane %v11006_v56, 1  ;;  %v8663_v24 = vpack.c.bf16 %v5074_v47, %v5072_v20  ;;  %v4769_v4 = vld [vmem:[#allocation7 + $0x470] sm:$0xff]  ;;  %v11053_v56 = vsel %vm494_vm0, %v585_v5, %v587_v34  ;;  %782 = vst [vmem:[#allocation2 + $0x320] sm:$0x1] %v587_v34  ;;  %v4774_v20 = vld [vmem:[#allocation7 + $0x498] sm:$0xff] }
 0x15d   : > { %5543 = vmatmul.mubr.f32.gmra.mrb[2].mxu1 %v1112_v51  ;;  %v2773_v51 = vsel %vm1585_vm2, %v13041_v23, %v2772_v28  ;;  %v11043_v61 = vsel %vm494_vm0, %v586_v22, %v589_v16  ;;  %783 = vst [vmem:[#allocation2 + $0x328] sm:$0x1] %v589_v16  ;;  %v8357_v28 = vpack.c.bf16 %v4765_v12, %v11027_v2  ;;  %v5073_v22 = vld [vmem:[#allocation7 + $0xdf0] sm:$0xff]  ;;  %v929_v16 = vld [vmem:[#allocation2 + $0x88] sm:$0x1]  ;;  %v1125_v2 = vrot.slane %v11025_v62, 1 }
 0x15e   : > { %6667 = vmatmul.mubr.f32.gmra.mrb[34].mxu0 %v2761_v32  ;;  %5548 = vmatprep.mubr.f32.mxu1 %v1120_v33  ;;  %v1129_v32 = vrot.slane %v11014_v30, 1  ;;  %781 = vst [vmem:[#allocation2 + $0x318] sm:$0xff] %v11043_v61  ;;  %v5071_v33 = vld [vmem:[#allocation7 + $0xde0] sm:$0xff]  ;;  %v1126_v12 = vrot.slane %v11040_v7, 1  ;;  %v2547_v0 = vld [vmem:[#allocation2 + $0x238] sm:$0x3]  ;;  %v1122_v55 = vsel %vm1104_vm1, %v1116_v50, %v1121_v25 }
 0x15f   : > { %6672 = vmatprep.mubr.f32.mxu0 %v2769_v38  ;;  %8354 = vmatpush1.bf16.msra.mxu1 %v8353_v54  ;;  %v8359_v38 = vpack.c.bf16 %v4770_v11, %v4768_v59  ;;  %v4767_v54 = vld [vmem:[#allocation7 + $0x460] sm:$0xff]  ;;  %v8665_v9 = vpack.c.bf16 %v5073_v22, %v5071_v33  ;;  %v4772_v23 = vld [vmem:[#allocation7 + $0x488] sm:$0xff]  ;;  %780 = vst [vmem:[#allocation2 + $0x310] sm:$0xff] %v11053_v56  ;;  %v2775_v62 = vrot.slane %v10762_v46, 2  ;;  %v11065_v11 = vld [vmem:[#allocation2 + $0x230] sm:$0x3] }
 0x160   : > { %8356 = vmatprep.subr.bf16.mxu1 %v8355_v27  ;;  %8664 = vmatprep.subr.bf16.mxu0 %v8663_v24  ;;  %v13042_v27 = vrot.slane %v10707_v19, 2  ;;  %v928_v59 = vld [vmem:[#allocation2 + $0x80] sm:$0x1]  ;;  %v1130_v5 = vsel %vm1104_vm1, %v1128_v36, %v1129_v32  ;;  %v1133_v3 = vrot.slane %v929_v16, 1  ;;  %v11071_v50 = vld [vmem:[#allocation2 + $0xa8] sm:$0xff]  ;;  %v8361_v19 = vpack.c.bf16 %v4769_v4, %v4767_v54  ;;  %v4773_v33 = vld [vmem:[#allocation7 + $0x490] sm:$0xff] }
 0x161   : > { %5549 = vmatmul.mubr.f32.gmra.mrb[4].mxu1 %v1117_v48  ;;  %v5076_v25 = vld [vmem:[#allocation7 + $0xe08] sm:$0xff]  ;;  %v2782_v47 = vrot.slane %v2547_v0, 2  ;;  %v4771_v24 = vld [vmem:[#allocation7 + $0x480] sm:$0xff]  ;;  %8666 = vmatpush1.bf16.msra.mxu0 %v8665_v9  ;;  %v5078_v36 = vld [vmem:[#allocation7 + $0xe18] sm:$0xff]  ;;  %v1131_v4 = vrot.slane %v928_v59, 1  ;;  %v1139_v0 = vrot.slane %v11071_v50, 1 }
 0x162   : > { %6673 = vmatmul.mubr.f32.gmra.mrb[36].mxu0 %v2766_v53  ;;  %5554 = vmatprep.mubr.f32.mxu1 %v1124_v14  ;;  %v2771_v48 = vsel %vm1585_vm2, %v13042_v27, %v2770_v40  ;;  %v2774_v53 = vrot.slane %v11047_v60, 2  ;;  %v931_v14 = vld [vmem:[#allocation2 + $0x98] sm:$0xfe]  ;;  %v13043_v40 = vrot.slane %v10744_v42, 2  ;;  %v1127_v60 = vsel %vm1104_vm1, %v1125_v2, %v1126_v12  ;;  %v4776_v22 = vld [vmem:[#allocation7 + $0x4a8] sm:$0xff] }
 0x163   : > { %6678 = vmatprep.mubr.f32.mxu0 %v2773_v51  ;;  %8358 = vmatpush1.bf16.msra.mxu1 %v8357_v28  ;;  %v8363_v51 = vpack.c.bf16 %v4774_v20, %v4772_v23  ;;  %v2549_v28 = vld [vmem:[#allocation2 + $0x248] sm:$0xfc]  ;;  %v4778_v16 = vld [vmem:[#allocation7 + $0x4b8] sm:$0xff]  ;;  %v8667_v54 = vpack.c.bf16 %v5078_v36, %v5076_v25  ;;  %v11081_v23 = vld [vmem:[#allocation2 + $0xa0] sm:$0xff]  ;;  %v1134_v2 = vsel %vm1104_vm1, %v1129_v32, %v1133_v3  ;;  %v12936_v3 = vrot.slane %v10814_v41, 2 }
 0x164   : > { %v2779_v34 = vsel %vm1585_vm2, %v2777_v45, %v13043_v40  ;;  %8360 = vmatprep.subr.bf16.mxu1 %v8359_v38  ;;  %v2780_v45 = vrot.slane %v11065_v11, 2  ;;  %v1138_v38 = vrot.slane %v931_v14, 1  ;;  %v2776_v9 = vsel %vm1585_vm2, %v2774_v53, %v2775_v62  ;;  %v930_v20 = vld [vmem:[#allocation2 + $0x90] sm:$0xfe]  ;;  %v935_v27 = vld [vmem:[#allocation2 + $0xb8] sm:$0x1] }
 0x165   : > { %5555 = vmatmul.mubr.f32.gmra.mrb[6].mxu1 %v1122_v55  ;;  %v2548_v55 = vld [vmem:[#allocation2 + $0x240] sm:$0xfc]  ;;  %v13044_v59 = vmov %v13043_v40  ;;  %v9568_v14 = vld [vmem:[#allocation2 + $0x258] sm:$0xff]  ;;  %v8367_v40 = vpack.c.bf16 %v4778_v16, %v4776_v22  ;;  %v4777_v53 = vld [vmem:[#allocation7 + $0x4b0] sm:$0xff]  ;;  %8668 = vmatprep.subr.bf16.mxu0 %v8667_v54  ;;  %v1136_v32 = vrot.slane %v11081_v23, 1  ;;  %v1132_v42 = vsel %vm1104_vm1, %v1126_v12, %v1131_v4 }
 0x166   : > { %6679 = vmatmul.mubr.f32.gmra.mrb[38].mxu0 %v2771_v48  ;;  %5560 = vmatprep.mubr.f32.mxu1 %v1130_v5  ;;  %v8365_v48 = vpack.c.bf16 %v4773_v33, %v4771_v24  ;;  %v2783_v11 = vsel %vm1585_vm2, %v13044_v59, %v2782_v47  ;;  %v2787_v5 = vrot.slane %v2549_v28, 2  ;;  %v2788_v25 = vrot.slane %v9568_v14, 2  ;;  %v4780_v36 = vld [vmem:[#allocation7 + $0x4c8] sm:$0xff]  ;;  %v4782_v24 = vld [vmem:[#allocation7 + $0x4d8] sm:$0xff]  ;;  %v934_v22 = vld [vmem:[#allocation2 + $0xb0] sm:$0x1] }
 0x167   : > { %6684 = vmatprep.mubr.f32.mxu0 %v2779_v34  ;;  %8362 = vmatpush1.bf16.msra.mxu1 %v8361_v19  ;;  %v4775_v34 = vld [vmem:[#allocation7 + $0x4a0] sm:$0xff]  ;;  %v2553_v19 = vld [vmem:[#allocation2 + $0x268] sm:$0x3]  ;;  %v1135_v47 = vrot.slane %v930_v20, 1  ;;  %v1143_v33 = vrot.slane %v935_v27, 1  ;;  %v1140_v28 = vsel %vm1104_vm1, %v1138_v38, %v1139_v0  ;;  %v11102_v14 = vld [vmem:[#allocation2 + $0xd8] sm:$0xff]  ;;  %v8371_v12 = vpack.c.bf16 %v4782_v24, %v4780_v36 }
 0x168   : > { %8364 = vmatprep.subr.bf16.mxu1 %v8363_v51  ;;  %v2784_v51 = vrot.slane %v2548_v55, 2  ;;  %v2552_v16 = vld [vmem:[#allocation2 + $0x260] sm:$0x3]  ;;  %v937_v54 = vld [vmem:[#allocation2 + $0xc8] sm:$0xfe]  ;;  %v2792_v59 = vrot.slane %v2553_v19, 2 }
 0x169   : > { %5561 = vmatmul.mubr.f32.gmra.mrb[8].mxu1 %v1127_v60  ;;  %v2781_v60 = vsel %vm1585_vm2, %v2775_v62, %v2780_v45  ;;  %v4779_v4 = vld [vmem:[#allocation7 + $0x4c0] sm:$0xff]  ;;  %v4781_v20 = vld [vmem:[#allocation7 + $0x4d0] sm:$0xff]  ;;  %v2555_v46 = vld [vmem:[#allocation2 + $0x278] sm:$0xfc]  ;;  %v1137_v45 = vsel %vm1104_vm1, %v1135_v47, %v1136_v32  ;;  %v1144_v27 = vsel %vm1104_vm1, %v1139_v0, %v1143_v33 }
 0x16a   : > { %6685 = vmatmul.mubr.f32.gmra.mrb[40].mxu0 %v2776_v9  ;;  %5566 = vmatprep.mubr.f32.mxu1 %v1134_v2  ;;  %v8369_v9 = vpack.c.bf16 %v4777_v53, %v4775_v34  ;;  %v2789_v2 = vsel %vm1585_vm2, %v2787_v5, %v2788_v25  ;;  %v4784_v55 = vld [vmem:[#allocation7 + $0x4e8] sm:$0xff]  ;;  %v4786_v62 = vld [vmem:[#allocation7 + $0x4f8] sm:$0xff]  ;;  %v2786_v38 = vsel %vm1585_vm2, %v2784_v51, %v12936_v3  ;;  %v11111_v5 = vld [vmem:[#allocation2 + $0xd0] sm:$0xff]  ;;  %v1148_v34 = vrot.slane %v937_v54, 1 }
 0x16b   : > { %6690 = vmatprep.mubr.f32.mxu0 %v2783_v11  ;;  %8366 = vmatpush1.bf16.msra.mxu1 %v8365_v48  ;;  %v1141_v48 = vrot.slane %v934_v22, 1  ;;  %v936_v11 = vld [vmem:[#allocation2 + $0xc0] sm:$0xfe]  ;;  %v1149_v53 = vrot.slane %v11102_v14, 1  ;;  %v2554_v19 = vld [vmem:[#allocation2 + $0x270] sm:$0xfc]  ;;  %v8373_v36 = vpack.c.bf16 %v4781_v20, %v4779_v4  ;;  %v2793_v24 = vsel %vm1585_vm2, %v2788_v25, %v2792_v59 }
 0x16c   : > { %8368 = vmatprep.subr.bf16.mxu1 %v8367_v40  ;;  %v2790_v40 = vrot.slane %v2552_v16, 2  ;;  %v9569_v47 = vld [vmem:[#allocation2 + $0x288] sm:$0xff]  ;;  %v8375_v0 = vpack.c.bf16 %v4786_v62, %v4784_v55  ;;  %v4783_v33 = vld [vmem:[#allocation7 + $0x4e0] sm:$0xff]  ;;  %v1145_v22 = vrot.slane %v936_v11, 1  ;;  %v12937_v16 = vrot.slane %v11111_v5, 1  ;;  %v4790_v3 = vld [vmem:[#allocation7 + $0x518] sm:$0xff] }
 0x16d   : > { %5567 = vmatmul.mubr.f32.gmra.mrb[10].mxu1 %v1132_v42  ;;  %v2797_v42 = vrot.slane %v2555_v46, 2  ;;  %v941_v51 = vld [vmem:[#allocation2 + $0xe8] sm:$0x1]  ;;  %v2559_v54 = vld [vmem:[#allocation2 + $0x298] sm:$0x3]  ;;  %v1142_v25 = vsel %vm1104_vm1, %v1136_v32, %v1141_v48  ;;  %v9570_v59 = vld [vmem:[#allocation2 + $0x280] sm:$0xff]  ;;  %v1150_v55 = vsel %vm1104_vm1, %v1148_v34, %v1149_v53 }
 0x16e   : > { %6691 = vmatmul.mubr.f32.gmra.mrb[42].mxu0 %v2781_v60  ;;  %5572 = vmatprep.mubr.f32.mxu1 %v1140_v28  ;;  %v2798_v60 = vrot.slane %v9569_v47, 2  ;;  %v4785_v28 = vld [vmem:[#allocation7 + $0x4f0] sm:$0xff]  ;;  %v2795_v4 = vrot.slane %v9570_v59, 2  ;;  %v13045_v20 = vrot.slane %v10814_v41, 2  ;;  %v1153_v62 = vrot.slane %v941_v51, 1  ;;  %v4787_v47 = vld [vmem:[#allocation7 + $0x500] sm:$0xff] }
 0x16f   : > { %6696 = vmatprep.mubr.f32.mxu0 %v2789_v2  ;;  %8370 = vmatpush1.bf16.msra.mxu1 %v8369_v9  ;;  %v4788_v2 = vld [vmem:[#allocation7 + $0x508] sm:$0xff]  ;;  %v2794_v9 = vrot.slane %v2554_v19, 2  ;;  %v943_v11 = vld [vmem:[#allocation2 + $0xf8] sm:$0xfe]  ;;  %v2802_v48 = vrot.slane %v2559_v54, 2  ;;  %v1147_v41 = vsel %vm1104_vm1, %v1145_v22, %v12937_v16  ;;  %v4793_v16 = vld [vmem:[#allocation7 + $0x530] sm:$0xff] }
 0x170   : > { %8372 = vmatprep.subr.bf16.mxu1 %v8371_v12  ;;  %v940_v12 = vld [vmem:[#allocation2 + $0xe0] sm:$0x1]  ;;  %v2791_v46 = vsel %vm1585_vm2, %v13045_v20, %v2790_v40  ;;  %v2799_v32 = vsel %vm1585_vm2, %v2797_v42, %v2798_v60  ;;  %v8379_v19 = vpack.c.bf16 %v4790_v3, %v4788_v2  ;;  %v2561_v40 = vld [vmem:[#allocation2 + $0x2a8] sm:$0xfc]  ;;  %v4794_v51 = vld [vmem:[#allocation7 + $0x538] sm:$0xff] }
 0x171   : > { %5573 = vmatmul.mubr.f32.gmra.mrb[12].mxu1 %v1137_v45  ;;  %v2558_v45 = vld [vmem:[#allocation2 + $0x290] sm:$0x3]  ;;  %v4792_v34 = vld [vmem:[#allocation7 + $0x528] sm:$0xff]  ;;  %v1151_v59 = vrot.slane %v940_v12, 1  ;;  %v2796_v3 = vsel %vm1585_vm2, %v2794_v9, %v2795_v4  ;;  %v2560_v2 = vld [vmem:[#allocation2 + $0x2a0] sm:$0xfc]  ;;  %v2803_v20 = vsel %vm1585_vm2, %v2798_v60, %v2802_v48 }
 0x172   : > { %6697 = vmatmul.mubr.f32.gmra.mrb[44].mxu0 %v2786_v38  ;;  %5578 = vmatprep.mubr.f32.mxu1 %v1144_v27  ;;  %v11123_v38 = vld [vmem:[#allocation2 + $0x108] sm:$0xff]  ;;  %v8377_v27 = vpack.c.bf16 %v4785_v28, %v4783_v33  ;;  %v1158_v33 = vrot.slane %v943_v11, 1  ;;  %v11130_v28 = vld [vmem:[#allocation2 + $0x100] sm:$0xff]  ;;  %v942_v54 = vld [vmem:[#allocation2 + $0xf0] sm:$0xfe] }
 0x173   : > { %6702 = vmatprep.mubr.f32.mxu0 %v2793_v24  ;;  %8374 = vmatpush1.bf16.msra.mxu1 %v8373_v36  ;;  %v4789_v24 = vld [vmem:[#allocation7 + $0x510] sm:$0xff]  ;;  %v2800_v36 = vrot.slane %v2558_v45, 2  ;;  %v1159_v42 = vrot.slane %v11123_v38, 1  ;;  %v947_v22 = vld [vmem:[#allocation2 + $0x118] sm:$0x1]  ;;  %v8383_v45 = vpack.c.bf16 %v4794_v51, %v4792_v34  ;;  %v4791_v11 = vld [vmem:[#allocation7 + $0x520] sm:$0xff] }
 0x174   : > { %8376 = vmatprep.subr.bf16.mxu1 %v8375_v0  ;;  %v1154_v0 = vsel %vm1104_vm1, %v1149_v53, %v1153_v62  ;;  %v9571_v12 = vld [vmem:[#allocation2 + $0x2b8] sm:$0xff]  ;;  %v2565_v53 = vld [vmem:[#allocation2 + $0x2c8] sm:$0x3]  ;;  %v1155_v48 = vrot.slane %v942_v54, 1  ;;  %v2564_v34 = vld [vmem:[#allocation2 + $0x2c0] sm:$0x3] }
 0x175   : > { %5579 = vmatmul.mubr.f32.gmra.mrb[14].mxu1 %v1142_v25  ;;  %v8381_v25 = vpack.c.bf16 %v4789_v24, %v4787_v47  ;;  %v4796_v62 = vld [vmem:[#allocation7 + $0x548] sm:$0xff]  ;;  %v2804_v47 = vrot.slane %v2560_v2, 2  ;;  %v2801_v24 = vsel %vm1585_vm2, %v2795_v4, %v2800_v36  ;;  %v11143_v9 = vld [vmem:[#allocation2 + $0x138] sm:$0xff]  ;;  %v4795_v54 = vld [vmem:[#allocation7 + $0x540] sm:$0xff] }
 0x176   : > { %6703 = vmatmul.mubr.f32.gmra.mrb[46].mxu0 %v2791_v46  ;;  %5584 = vmatprep.mubr.f32.mxu1 %v1150_v55  ;;  %v2807_v46 = vrot.slane %v2561_v40, 2  ;;  %v2808_v55 = vrot.slane %v9571_v12, 2  ;;  %v946_v40 = vld [vmem:[#allocation2 + $0x110] sm:$0x1]  ;;  %v949_v51 = vld [vmem:[#allocation2 + $0x128] sm:$0xfe]  ;;  %v8385_v12 = vpack.c.bf16 %v4793_v16, %v4791_v11 }
 0x177   : > { %6708 = vmatprep.mubr.f32.mxu0 %v2799_v32  ;;  %8378 = vmatpush1.bf16.msra.mxu1 %v8377_v27  ;;  %v12939_v32 = vrot.slane %v11130_v28, 1  ;;  %v13046_v27 = vrot.slane %v11111_v5, 1  ;;  %v4797_v2 = vld [vmem:[#allocation7 + $0x550] sm:$0xff]  ;;  %v4802_v4 = vld [vmem:[#allocation7 + $0x578] sm:$0xff]  ;;  %v1161_v16 = vrot.slane %v946_v40, 1  ;;  %v1169_v11 = vrot.slane %v11143_v9, 1 }
 0x178   : > { %8380 = vmatprep.subr.bf16.mxu1 %v8379_v19  ;;  %v1163_v19 = vrot.slane %v947_v22, 1  ;;  %v2567_v22 = vld [vmem:[#allocation2 + $0x2d8] sm:$0xfc] }
 0x179   : > { %5585 = vmatmul.mubr.f32.gmra.mrb[16].mxu1 %v1147_v41  ;;  %v1152_v60 = vsel %vm1104_vm1, %v13046_v27, %v1151_v59  ;;  %v1160_v41 = vsel %vm1104_vm1, %v1158_v33, %v1159_v42  ;;  %v8387_v59 = vpack.c.bf16 %v4798_v17, %v4796_v62  ;;  %v1157_v36 = vsel %vm1104_vm1, %v1155_v48, %v12939_v32  ;;  %v11153_v62 = vld [vmem:[#allocation2 + $0x130] sm:$0xff]  ;;  %v4804_v32 = vld [vmem:[#allocation7 + $0x588] sm:$0xff] }
 0x17a   : > { %6709 = vmatmul.mubr.f32.gmra.mrb[48].mxu0 %v2796_v3  ;;  %5590 = vmatprep.mubr.f32.mxu1 %v1154_v0  ;;  %v2809_v3 = vsel %vm1585_vm2, %v2807_v46, %v2808_v55  ;;  %v2812_v0 = vrot.slane %v2565_v53, 2  ;;  %v2810_v33 = vrot.slane %v2564_v34, 2  ;;  %v13047_v46 = vrot.slane %v10913_v37, 2  ;;  %v948_v53 = vld [vmem:[#allocation2 + $0x120] sm:$0xfe] }
 0x17b   : > { %6714 = vmatprep.mubr.f32.mxu0 %v2803_v20  ;;  %8382 = vmatpush1.bf16.msra.mxu1 %v8381_v25  ;;  %v4800_v20 = vld [vmem:[#allocation7 + $0x568] sm:$0xff]  ;;  %v1168_v25 = vrot.slane %v949_v51, 1  ;;  %v2566_v27 = vld [vmem:[#allocation2 + $0x2d0] sm:$0xfc] }
 0x17c   : > { %8384 = vmatprep.subr.bf16.mxu1 %v8383_v45  ;;  %v2806_v17 = vsel %vm1585_vm2, %v2804_v47, %v13047_v46  ;;  %v1164_v45 = vsel %vm1104_vm1, %v1159_v42, %v1163_v19  ;;  %v2813_v48 = vsel %vm1585_vm2, %v2808_v55, %v2812_v0  ;;  %v953_v34 = vld [vmem:[#allocation2 + $0x148] sm:$0x1]  ;;  %v8391_v51 = vpack.c.bf16 %v4802_v4, %v4800_v20  ;;  %v4801_v47 = vld [vmem:[#allocation7 + $0x570] sm:$0xff]  ;;  %v11156_v42 = vld [vmem:[#allocation2 + $0x2e0] sm:$0xff] }
 0x17d   : > { %5591 = vmatmul.mubr.f32.gmra.mrb[18].mxu1 %v1152_v60  ;;  %v8389_v60 = vpack.c.bf16 %v4797_v2, %v4795_v54  ;;  %v2815_v19 = vrot.slane %v11156_v42, 2  ;;  %v2571_v46 = vld [vmem:[#allocation2 + $0x2f8] sm:$0x3]  ;;  %v13048_v55 = vrot.slane %v11130_v28, 1  ;;  %v13049_v0 = vrot.slane %v10913_v37, 2 }
 0x17e   : > { %6715 = vmatmul.mubr.f32.gmra.mrb[50].mxu0 %v2801_v24  ;;  %5596 = vmatprep.mubr.f32.mxu1 %v1160_v41  ;;  %v2817_v24 = vrot.slane %v2567_v22, 2  ;;  %v9572_v41 = vld [vmem:[#allocation2 + $0x2e8] sm:$0xff]  ;;  %v1165_v54 = vrot.slane %v948_v53, 1  ;;  %v1166_v2 = vrot.slane %v11153_v62, 1  ;;  %v952_v22 = vld [vmem:[#allocation2 + $0x140] sm:$0x1]  ;;  %v1170_v20 = vsel %vm1104_vm1, %v1168_v25, %v1169_v11 }
 0x17f   : > { %6720 = vmatprep.mubr.f32.mxu0 %v2809_v3  ;;  %8386 = vmatpush1.bf16.msra.mxu1 %v8385_v12  ;;  %v2818_v40 = vrot.slane %v9572_v41, 2  ;;  %v4799_v3 = vld [vmem:[#allocation7 + $0x560] sm:$0xff]  ;;  %v1162_v12 = vsel %vm1104_vm1, %v13048_v55, %v1161_v16  ;;  %v2814_v4 = vrot.slane %v2566_v27, 2  ;;  %v2570_v41 = vld [vmem:[#allocation2 + $0x2f0] sm:$0x3]  ;;  %v2822_v42 = vrot.slane %v2571_v46, 2 }
 0x180   : > { %8388 = vmatprep.subr.bf16.mxu1 %v8387_v59  ;;  %v2811_v59 = vsel %vm1585_vm2, %v13049_v0, %v2810_v33  ;;  %v955_v37 = vld [vmem:[#allocation2 + $0x158] sm:$0xfe]  ;;  %v8395_v33 = vpack.c.bf16 %v4806_v10, %v4804_v32  ;;  %v4803_v53 = vld [vmem:[#allocation7 + $0x580] sm:$0xff]  ;;  %v4805_v55 = vld [vmem:[#allocation7 + $0x590] sm:$0xff]  ;;  %v1171_v0 = vrot.slane %v952_v22, 1  ;;  %v1167_v27 = vsel %vm1104_vm1, %v1165_v54, %v1166_v2 }
 0x181   : > { %5597 = vmatmul.mubr.f32.gmra.mrb[20].mxu1 %v1157_v36  ;;  %v1173_v36 = vrot.slane %v953_v34, 1  ;;  %v2819_v16 = vsel %vm1585_vm2, %v2817_v24, %v2818_v40  ;;  %v4810_v25 = vld [vmem:[#allocation7 + $0x5b8] sm:$0xff]  ;;  %v2820_v34 = vrot.slane %v2570_v41, 2  ;;  %v2816_v24 = vsel %vm1585_vm2, %v2814_v4, %v2815_v19  ;;  %v954_v32 = vld [vmem:[#allocation2 + $0x150] sm:$0xfe]  ;;  %v4807_v41 = vld [vmem:[#allocation7 + $0x5a0] sm:$0xff] }
 0x182   : > { %6721 = vmatmul.mubr.f32.gmra.mrb[52].mxu0 %v2806_v17  ;;  %5602 = vmatprep.mubr.f32.mxu1 %v1164_v45  ;;  %v11167_v17 = vld [vmem:[#allocation2 + $0x168] sm:$0xff]  ;;  %v8393_v45 = vpack.c.bf16 %v4801_v47, %v4799_v3  ;;  %v1178_v10 = vrot.slane %v955_v37, 1  ;;  %v11174_v3 = vld [vmem:[#allocation2 + $0x160] sm:$0xff]  ;;  %v959_v47 = vld [vmem:[#allocation2 + $0x178] sm:$0x1]  ;;  %v8397_v46 = vpack.c.bf16 %v4805_v55, %v4803_v53  ;;  %v2828_v54 = vrot.slane %v11043_v61, 2 }
 0x183   : > { %6726 = vmatprep.mubr.f32.mxu0 %v2813_v48  ;;  %8390 = vmatpush1.bf16.msra.mxu1 %v8389_v60  ;;  %v2573_v48 = vld [vmem:[#allocation2 + $0x308] sm:$0xfc]  ;;  %v1179_v60 = vrot.slane %v11167_v17, 1  ;;  %v2572_v22 = vld [vmem:[#allocation2 + $0x300] sm:$0xfc]  ;;  %v4814_v37 = vld [vmem:[#allocation7 + $0x5d8] sm:$0xff] }
 0x184   : > { %8392 = vmatprep.subr.bf16.mxu1 %v8391_v51  ;;  %v1174_v51 = vsel %vm1104_vm1, %v1169_v11, %v1173_v36  ;;  %v1172_v11 = vsel %vm1104_vm1, %v1166_v2, %v1171_v0  ;;  %v2577_v4 = vld [vmem:[#allocation2 + $0x328] sm:$0x3]  ;;  %v1175_v53 = vrot.slane %v954_v32, 1  ;;  %v958_v61 = vld [vmem:[#allocation2 + $0x170] sm:$0x1]  ;;  %v2825_v55 = vrot.slane %v11053_v56, 2 }
 0x185   : > { %5603 = vmatmul.mubr.f32.gmra.mrb[22].mxu1 %v1162_v12  ;;  %v2823_v12 = vsel %vm1585_vm2, %v2818_v40, %v2822_v42  ;;  %v4812_v36 = vld [vmem:[#allocation7 + $0x5c8] sm:$0xff]  ;;  %v1176_v40 = vrot.slane %v11174_v3, 1  ;;  %v1183_v42 = vrot.slane %v959_v47, 1  ;;  %v11183_v2 = vld [vmem:[#allocation2 + $0x198] sm:$0xff] }
 0x186   : > { %6727 = vmatmul.mubr.f32.gmra.mrb[54].mxu0 %v2811_v59  ;;  %5608 = vmatprep.mubr.f32.mxu1 %v1170_v20  ;;  %v2827_v59 = vrot.slane %v2573_v48, 2  ;;  %v8399_v20 = vpack.c.bf16 %v4810_v25, %v4808_v63  ;;  %v1180_v63 = vsel %vm1104_vm1, %v1178_v10, %v1179_v60  ;;  %v961_v48 = vld [vmem:[#allocation2 + $0x188] sm:$0xfe]  ;;  %v4818_v47 = vld [vmem:[#allocation7 + $0x5f8] sm:$0xff] }
 0x187   : > { %6732 = vmatprep.mubr.f32.mxu0 %v2819_v16  ;;  %8394 = vmatpush1.bf16.msra.mxu1 %v8393_v45  ;;  %v4809_v16 = vld [vmem:[#allocation7 + $0x5b0] sm:$0xff]  ;;  %v2821_v45 = vsel %vm1585_vm2, %v2815_v19, %v2820_v34  ;;  %v2576_v19 = vld [vmem:[#allocation2 + $0x320] sm:$0x3]  ;;  %v8403_v34 = vpack.c.bf16 %v4814_v37, %v4812_v36  ;;  %v4816_v32 = vld [vmem:[#allocation7 + $0x5e8] sm:$0xff]  ;;  %v1177_v56 = vsel %vm1104_vm1, %v1175_v53, %v1176_v40 }
 0x188   : > { %8396 = vmatprep.subr.bf16.mxu1 %v8395_v33  ;;  %v2824_v33 = vrot.slane %v2572_v22, 2  ;;  %v8401_v0 = vpack.c.bf16 %v4809_v16, %v4807_v41  ;;  %v2829_v25 = vsel %vm1585_vm2, %v2827_v59, %v2828_v54  ;;  %v1184_v10 = vsel %vm1104_vm1, %v1179_v60, %v1183_v42  ;;  %v960_v41 = vld [vmem:[#allocation2 + $0x180] sm:$0xfe]  ;;  %v11190_v16 = vld [vmem:[#allocation2 + $0x190] sm:$0xff]  ;;  %v965_v36 = vld [vmem:[#allocation2 + $0x1a8] sm:$0x1] }
 0x189   : > { %5609 = vmatmul.mubr.f32.gmra.mrb[24].mxu1 %v1167_v27  ;;  %v2832_v27 = vrot.slane %v2577_v4, 2  ;;  %v2830_v22 = vrot.slane %v2576_v19, 2  ;;  %v8407_v37 = vpack.c.bf16 %v4818_v47, %v4816_v32  ;;  %v4817_v60 = vld [vmem:[#allocation7 + $0x5f0] sm:$0xff]  ;;  %v4820_v53 = vld [vmem:[#allocation7 + $0x608] sm:$0xff]  ;;  %v4822_v42 = vld [vmem:[#allocation7 + $0x618] sm:$0xff] }
 0x18a   : > { %6733 = vmatmul.mubr.f32.gmra.mrb[56].mxu0 %v2816_v24  ;;  %5614 = vmatprep.mubr.f32.mxu1 %v1174_v51  ;;  %v4811_v24 = vld [vmem:[#allocation7 + $0x5c0] sm:$0xff]  ;;  %v4813_v51 = vld [vmem:[#allocation7 + $0x5d0] sm:$0xff]  ;;  %v2826_v59 = vsel %vm1585_vm2, %v2824_v33, %v2825_v55  ;;  %v1186_v33 = vrot.slane %v11190_v16, 1  ;;  %v11197_v32 = vld [vmem:[#allocation2 + $0x1c8] sm:$0xff] }
 0x18b   : > { %6738 = vmatprep.mubr.f32.mxu0 %v2823_v12  ;;  %8398 = vmatpush1.bf16.msra.mxu1 %v8397_v46  ;;  %v1181_v12 = vrot.slane %v958_v61, 1  ;;  %v1188_v46 = vrot.slane %v961_v48, 1  ;;  %v2833_v4 = vsel %vm1585_vm2, %v2828_v54, %v2832_v27  ;;  %v2831_v48 = vsel %vm1585_vm2, %v2825_v55, %v2830_v22  ;;  %v5075_v27 = vld [vmem:[#allocation7 + $0xe00] sm:$0xff]  ;;  %v5080_v47 = vld [vmem:[#allocation7 + $0xe28] sm:$0xff] }
 0x18c   : > { %8400 = vmatprep.subr.bf16.mxu1 %v8399_v20  ;;  %v1189_v20 = vrot.slane %v11183_v2, 1  ;;  %v964_v19 = vld [vmem:[#allocation2 + $0x1a0] sm:$0x1] }
 0x18d   : > { %5615 = vmatmul.mubr.f32.gmra.mrb[26].mxu1 %v1172_v11  ;;  %v8405_v11 = vpack.c.bf16 %v4813_v51, %v4811_v24  ;;  %v1182_v61 = vsel %vm1104_vm1, %v1176_v40, %v1181_v12  ;;  %v5077_v24 = vld [vmem:[#allocation7 + $0xe10] sm:$0xff]  ;;  %v967_v51 = vld [vmem:[#allocation2 + $0x1b8] sm:$0xfe]  ;;  %v8411_v40 = vpack.c.bf16 %v4822_v42, %v4820_v53  ;;  %v2963_v12 = vld [vmem:[#allocation2 + $0x60] sm:$0xff] }
 0x18e   : > { %6739 = vmatmul.mubr.f32.gmra.mrb[58].mxu0 %v2821_v45  ;;  %5620 = vmatprep.mubr.f32.mxu1 %v1180_v63  ;;  %v4815_v45 = vld [vmem:[#allocation7 + $0x5e0] sm:$0xff]  ;;  %v1185_v63 = vrot.slane %v960_v41, 1  ;;  %v1190_v54 = vsel %vm1104_vm1, %v1188_v46, %v1189_v20  ;;  %v1198_v22 = vrot.slane %v967_v51, 1  ;;  %v1199_v41 = vrot.slane %v11197_v32, 1  ;;  %v5084_v53 = vld [vmem:[#allocation7 + $0xe48] sm:$0xff]  ;;  %v5086_v42 = vld [vmem:[#allocation7 + $0xe58] sm:$0xff] }
 0x18f   : > { %6744 = vmatprep.mubr.f32.mxu0 %v2829_v25  ;;  %8402 = vmatpush1.bf16.msra.mxu1 %v8401_v0  ;;  %v2964_v0 = vld [vmem:[#allocation2 + $0x68] sm:$0xff]  ;;  %v1193_v25 = vrot.slane %v965_v36, 1  ;;  %v5083_v51 = vld [vmem:[#allocation7 + $0xe40] sm:$0xff] }
 0x190   : > { %8404 = vmatprep.subr.bf16.mxu1 %v8403_v34  ;;  %v8409_v34 = vpack.c.bf16 %v4817_v60, %v4815_v45  ;;  %v1187_v55 = vsel %vm1104_vm1, %v1185_v63, %v1186_v33  ;;  %v5079_v45 = vld [vmem:[#allocation7 + $0xe20] sm:$0xff]  ;;  %v5081_v60 = vld [vmem:[#allocation7 + $0xe30] sm:$0xff] }
 0x191   : > { %5621 = vmatmul.mubr.f32.gmra.mrb[28].mxu1 %v1177_v56  ;;  %v5082_v56 = vld [vmem:[#allocation7 + $0xe38] sm:$0xff]  ;;  %v1194_v46 = vsel %vm1104_vm1, %v1189_v20, %v1193_v25  ;;  %v8673_v25 = vpack.c.bf16 %v5081_v60, %v5079_v45  ;;  %v5089_v45 = vld [vmem:[#allocation7 + $0xe70] sm:$0xff]  ;;  %v5092_v60 = vld [vmem:[#allocation7 + $0xe88] sm:$0xff] }
 0x192   : > { %6745 = vmatmul.mubr.f32.gmra.mrb[60].mxu0 %v2826_v59  ;;  %5626 = vmatprep.mubr.f32.mxu1 %v1184_v10  ;;  %v1191_v10 = vrot.slane %v964_v19, 1  ;;  %v8669_v59 = vpack.c.bf16 %v5077_v24, %v5075_v27  ;;  %v8671_v36 = vpack.c.bf16 %v5082_v56, %v5080_v47  ;;  %v970_v27 = vld [vmem:[#allocation2 + $0x1d0] sm:$0x1]  ;;  %v973_v19 = vld [vmem:[#allocation2 + $0x1e8] sm:$0xfe]  ;;  %v8675_v24 = vpack.c.bf16 %v5086_v42, %v5084_v53  ;;  %v5090_v47 = vld [vmem:[#allocation7 + $0xe78] sm:$0xff] }
 0x193   : > { %6750 = vmatprep.mubr.f32.mxu0 %v2833_v4  ;;  %8406 = vmatpush1.bf16.msra.mxu1 %v8405_v11  ;;  %v966_v11 = vld [vmem:[#allocation2 + $0x1b0] sm:$0xfe]  ;;  %v11202_v4 = vld [vmem:[#allocation2 + $0x1c0] sm:$0xff]  ;;  %v1201_v56 = vrot.slane %v970_v27, 1  ;;  %v5094_v53 = vld [vmem:[#allocation7 + $0xe98] sm:$0xff] }
 0x194   : > { %8408 = vmatprep.subr.bf16.mxu1 %v8407_v37  ;;  %v971_v37 = vld [vmem:[#allocation2 + $0x1d8] sm:$0x1]  ;;  %v1192_v20 = vsel %vm1104_vm1, %v1186_v33, %v1191_v10  ;;  %v1196_v63 = vrot.slane %v11202_v4, 1  ;;  %v5088_v33 = vld [vmem:[#allocation7 + $0xe68] sm:$0xff] }
 0x195   : > { %5627 = vmatmul.mubr.f32.gmra.mrb[30].mxu1 %v1182_v61  ;;  %v1195_v61 = vrot.slane %v966_v11, 1 }
 0x196   : > { %6751 = vmatmul.mubr.f32.gmra.mrb[62].mxu0 %v2831_v48  ;;  %5632 = vmatprep.mubr.f32.mxu1 %v1190_v54  ;;  %v1200_v48 = vsel %vm1104_vm1, %v1198_v22, %v1199_v41  ;;  %v2968_v54 = vld [vmem:[#allocation2 + $0x98] sm:$0xff]  ;;  %v11214_v22 = vld [vmem:[#allocation2 + $0x1f0] sm:$0xff] }
 0x197   : > { %6821 = vmatprep.mubr.f32.mxu0 %v2964_v0  ;;  %8410 = vmatpush1.bf16.msra.mxu1 %v8409_v34  ;;  %v1203_v0 = vrot.slane %v971_v37, 1  ;;  %v11208_v34 = vld [vmem:[#allocation2 + $0x1f8] sm:$0xff]  ;;  %v8679_v37 = vpack.c.bf16 %v5090_v47, %v5088_v33 }
 0x198   : > { %8412 = vmatprep.subr.bf16.mxu1 %v8411_v40  ;;  %v5085_v40 = vld [vmem:[#allocation7 + $0xe50] sm:$0xff]  ;;  %v5098_v33 = vld [vmem:[#allocation7 + $0xeb8] sm:$0xff] }
 0x199   : > { %5633 = vmatmul.mubr.f32.gmra.mrb[32].mxu1 %v1187_v55  ;;  %v2967_v55 = vld [vmem:[#allocation2 + $0x90] sm:$0xff]  ;;  %v1204_v10 = vsel %vm1104_vm1, %v1199_v41, %v1203_v0  ;;  %v8677_v11 = vpack.c.bf16 %v5085_v40, %v5083_v51  ;;  %v1202_v41 = vsel %vm1104_vm1, %v1196_v63, %v1201_v56  ;;  %v976_v0 = vld [vmem:[#allocation2 + $0x200] sm:$0x1] }
 0x19a   : > { %6822 = vmatmul.mubr.f32.vlgmr.msra.gmra.mrb[0].mxu0 %v2963_v12  ;;  %5638 = vmatprep.mubr.f32.mxu1 %v1194_v46  ;;  %v1208_v12 = vrot.slane %v973_v19, 1  ;;  %v1209_v46 = vrot.slane %v11208_v34, 1  ;;  %v11220_v19 = vld [vmem:[#allocation2 + $0x228] sm:$0xff]  ;;  %v5091_v51 = vld [vmem:[#allocation7 + $0xe80] sm:$0xff]  ;;  %v5093_v40 = vld [vmem:[#allocation7 + $0xe90] sm:$0xff]  ;;  %v1211_v47 = vrot.slane %v976_v0, 1 }
 0x19b   : > { %6827 = vmatprep.mubr.f32.mxu0 %v11014_v30  ;;  %8670 = vmatpush1.bf16.msra.mxu0 %v8669_v59  ;;  %v1197_v30 = vsel %vm1104_vm1, %v1195_v61, %v1196_v63  ;;  %v972_v59 = vld [vmem:[#allocation2 + $0x1e0] sm:$0xfe]  ;;  %v5096_v63 = vld [vmem:[#allocation7 + $0xea8] sm:$0xff] }
 0x19c   : > { %8672 = vmatprep.subr.bf16.mxu0 %v8671_v36  ;;  %v977_v36 = vld [vmem:[#allocation2 + $0x208] sm:$0x1]  ;;  %v1205_v42 = vrot.slane %v972_v59, 1  ;;  %v1210_v61 = vsel %vm1104_vm1, %v1208_v12, %v1209_v46  ;;  %v978_v12 = vld [vmem:[#allocation2 + $0x210] sm:$0xfe]  ;;  %v11226_v59 = vld [vmem:[#allocation2 + $0x220] sm:$0xff] }
 0x19d   : > { %5639 = vmatmul.mubr.f32.gmra.mrb[34].mxu1 %v1192_v20  ;;  %v1206_v20 = vrot.slane %v11214_v22, 1  ;;  %v985_v0 = vld [vmem:[#allocation2 + $0x248] sm:$0xfe] }
 0x19e   : > { %6828 = vmatmul.mubr.f32.gmra.mrb[2].mxu0 %v11040_v7  ;;  %5644 = vmatprep.mubr.f32.mxu1 %v1200_v48  ;;  %v5087_v7 = vld [vmem:[#allocation7 + $0xe60] sm:$0xff]  ;;  %v2972_v48 = vld [vmem:[#allocation2 + $0xc8] sm:$0xff] }
 0x19f   : > { %6833 = vmatprep.mubr.f32.mxu0 %v2968_v54  ;;  %8674 = vmatpush1.bf16.msra.mxu0 %v8673_v25  ;;  %v1213_v54 = vrot.slane %v977_v36, 1  ;;  %v979_v25 = vld [vmem:[#allocation2 + $0x218] sm:$0xfe]  ;;  %v8681_v27 = vpack.c.bf16 %v5089_v45, %v5087_v7  ;;  %v983_v36 = vld [vmem:[#allocation2 + $0x238] sm:$0x1]  ;;  %v5097_v7 = vld [vmem:[#allocation7 + $0xeb0] sm:$0xff] }
 0x1a0   : > { %8676 = vmatprep.subr.bf16.mxu0 %v8675_v24  ;;  %v8683_v24 = vpack.c.bf16 %v5094_v53, %v5092_v60  ;;  %v5100_v45 = vld [vmem:[#allocation7 + $0xec8] sm:$0xff]  ;;  %v5102_v60 = vld [vmem:[#allocation7 + $0xed8] sm:$0xff]  ;;  %v1215_v53 = vrot.slane %v978_v12, 1  ;;  %v11238_v12 = vld [vmem:[#allocation2 + $0x250] sm:$0xff] }
 0x1a1   : > { %5645 = vmatmul.mubr.f32.gmra.mrb[36].mxu1 %v1197_v30  ;;  %v2971_v30 = vld [vmem:[#allocation2 + $0xc0] sm:$0xff]  ;;  %v1214_v56 = vsel %vm1104_vm1, %v1209_v46, %v1213_v54  ;;  %v1212_v46 = vsel %vm1104_vm1, %v1206_v20, %v1211_v47  ;;  %v982_v54 = vld [vmem:[#allocation2 + $0x230] sm:$0x1] }
 0x1a2   : > { %6834 = vmatmul.mubr.f32.gmra.mrb[4].mxu0 %v2967_v55  ;;  %5650 = vmatprep.mubr.f32.mxu1 %v1204_v10  ;;  %v1218_v55 = vrot.slane %v979_v25, 1  ;;  %v1219_v10 = vrot.slane %v11220_v19, 1 }
 0x1a3   : > { %6839 = vmatprep.mubr.f32.mxu0 %v11071_v50  ;;  %8678 = vmatpush1.bf16.msra.mxu0 %v8677_v11  ;;  %v1207_v50 = vsel %vm1104_vm1, %v1205_v42, %v1206_v20  ;;  %v8685_v11 = vpack.c.bf16 %v5093_v40, %v5091_v51  ;;  %v5099_v51 = vld [vmem:[#allocation7 + $0xec0] sm:$0xff]  ;;  %v5101_v40 = vld [vmem:[#allocation7 + $0xed0] sm:$0xff]  ;;  %v5104_v20 = vld [vmem:[#allocation7 + $0xee8] sm:$0xff] }
 0x1a4   : > { %8680 = vmatprep.subr.bf16.mxu0 %v8679_v37  ;;  %v8687_v37 = vpack.c.bf16 %v5098_v33, %v5096_v63  ;;  %v1220_v42 = vsel %vm1104_vm1, %v1218_v55, %v1219_v10  ;;  %v5106_v63 = vld [vmem:[#allocation7 + $0xef8] sm:$0xff]  ;;  %v1221_v33 = vrot.slane %v982_v54, 1  ;;  %v984_v55 = vld [vmem:[#allocation2 + $0x240] sm:$0xfe] }
 0x1a5   : > { %5651 = vmatmul.mubr.f32.gmra.mrb[38].mxu1 %v1202_v41  ;;  %v1216_v41 = vrot.slane %v11226_v59, 1  ;;  %v991_v54 = vld [vmem:[#allocation2 + $0x278] sm:$0xfe] }
 0x1a6   : > { %6840 = vmatmul.mubr.f32.gmra.mrb[6].mxu0 %v11081_v23  ;;  %5656 = vmatprep.mubr.f32.mxu1 %v1210_v61  ;;  %v5095_v23 = vld [vmem:[#allocation7 + $0xea0] sm:$0xff]  ;;  %v2976_v61 = vld [vmem:[#allocation2 + $0xf8] sm:$0xff] }
 0x1a7   : > { %6845 = vmatprep.mubr.f32.mxu0 %v2972_v48  ;;  %8682 = vmatpush1.bf16.msra.mxu0 %v8681_v27  ;;  %v1223_v48 = vrot.slane %v983_v36, 1  ;;  %v8689_v25 = vpack.c.bf16 %v5097_v7, %v5095_v23  ;;  %v11232_v27 = vld [vmem:[#allocation2 + $0x258] sm:$0xff]  ;;  %v989_v36 = vld [vmem:[#allocation2 + $0x268] sm:$0x1]  ;;  %v5105_v23 = vld [vmem:[#allocation7 + $0xef0] sm:$0xff] }
 0x1a8   : > { %8684 = vmatprep.subr.bf16.mxu0 %v8683_v24  ;;  %v8691_v24 = vpack.c.bf16 %v5102_v60, %v5100_v45  ;;  %v5108_v7 = vld [vmem:[#allocation7 + $0xf08] sm:$0xff]  ;;  %v5110_v45 = vld [vmem:[#allocation7 + $0xf18] sm:$0xff]  ;;  %v1225_v60 = vrot.slane %v984_v55, 1  ;;  %v11250_v55 = vld [vmem:[#allocation2 + $0x280] sm:$0xff] }
 0x1a9   : > { %5657 = vmatmul.mubr.f32.gmra.mrb[40].mxu1 %v1207_v50  ;;  %v2975_v50 = vld [vmem:[#allocation2 + $0xf0] sm:$0xff]  ;;  %v1224_v47 = vsel %vm1104_vm1, %v1219_v10, %v1223_v48  ;;  %v1222_v10 = vsel %vm1104_vm1, %v1216_v41, %v1221_v33  ;;  %v988_v48 = vld [vmem:[#allocation2 + $0x260] sm:$0x1] }
 0x1aa   : > { %6846 = vmatmul.mubr.f32.gmra.mrb[8].mxu0 %v2971_v30  ;;  %5662 = vmatprep.mubr.f32.mxu1 %v1214_v56  ;;  %v1228_v30 = vrot.slane %v985_v0, 1  ;;  %v1229_v56 = vrot.slane %v11232_v27, 1 }
 0x1ab   : > { %6851 = vmatprep.mubr.f32.mxu0 %v11102_v14  ;;  %8686 = vmatpush1.bf16.msra.mxu0 %v8685_v11  ;;  %v1217_v14 = vsel %vm1104_vm1, %v1215_v53, %v1216_v41  ;;  %v8693_v11 = vpack.c.bf16 %v5101_v40, %v5099_v51  ;;  %v5107_v51 = vld [vmem:[#allocation7 + $0xf00] sm:$0xff]  ;;  %v5109_v40 = vld [vmem:[#allocation7 + $0xf10] sm:$0xff]  ;;  %v5112_v41 = vld [vmem:[#allocation7 + $0xf28] sm:$0xff] }
 0x1ac   : > { %8688 = vmatprep.subr.bf16.mxu0 %v8687_v37  ;;  %v8695_v37 = vpack.c.bf16 %v5106_v63, %v5104_v20  ;;  %v1230_v53 = vsel %vm1104_vm1, %v1228_v30, %v1229_v56  ;;  %v5114_v20 = vld [vmem:[#allocation7 + $0xf38] sm:$0xff]  ;;  %v1231_v63 = vrot.slane %v988_v48, 1  ;;  %v990_v30 = vld [vmem:[#allocation2 + $0x270] sm:$0xfe]  ;;  %v997_v48 = vld [vmem:[#allocation2 + $0x2a8] sm:$0xfe] }
 0x1ad   : > { %5663 = vmatmul.mubr.f32.gmra.mrb[42].mxu1 %v1212_v46  ;;  %v1226_v46 = vrot.slane %v11238_v12, 1 }
 0x1ae   : > { %6852 = vmatmul.mubr.f32.gmra.mrb[10].mxu0 %v11111_v5  ;;  %5668 = vmatprep.mubr.f32.mxu1 %v1220_v42  ;;  %v5103_v5 = vld [vmem:[#allocation7 + $0xee0] sm:$0xff]  ;;  %v2980_v42 = vld [vmem:[#allocation2 + $0x128] sm:$0xff] }
 0x1af   : > { %6857 = vmatprep.mubr.f32.mxu0 %v2976_v61  ;;  %8690 = vmatpush1.bf16.msra.mxu0 %v8689_v25  ;;  %v1233_v61 = vrot.slane %v989_v36, 1  ;;  %v8697_v0 = vpack.c.bf16 %v5105_v23, %v5103_v5  ;;  %v11244_v25 = vld [vmem:[#allocation2 + $0x288] sm:$0xff]  ;;  %v995_v36 = vld [vmem:[#allocation2 + $0x298] sm:$0x1]  ;;  %v5113_v5 = vld [vmem:[#allocation7 + $0xf30] sm:$0xff] }
 0x1b0   : > { %8692 = vmatprep.subr.bf16.mxu0 %v8691_v24  ;;  %v8699_v24 = vpack.c.bf16 %v5110_v45, %v5108_v7  ;;  %v5116_v23 = vld [vmem:[#allocation7 + $0xf48] sm:$0xff]  ;;  %v5118_v7 = vld [vmem:[#allocation7 + $0xf58] sm:$0xff]  ;;  %v1235_v45 = vrot.slane %v990_v30, 1  ;;  %v11262_v30 = vld [vmem:[#allocation2 + $0x2b0] sm:$0xff] }
 0x1b1   : > { %5669 = vmatmul.mubr.f32.gmra.mrb[44].mxu1 %v1217_v14  ;;  %v2979_v14 = vld [vmem:[#allocation2 + $0x120] sm:$0xff]  ;;  %v1234_v33 = vsel %vm1104_vm1, %v1229_v56, %v1233_v61  ;;  %v1232_v56 = vsel %vm1104_vm1, %v1226_v46, %v1231_v63  ;;  %v994_v61 = vld [vmem:[#allocation2 + $0x290] sm:$0x1] }
 0x1b2   : > { %6858 = vmatmul.mubr.f32.gmra.mrb[12].mxu0 %v2975_v50  ;;  %5674 = vmatprep.mubr.f32.mxu1 %v1224_v47  ;;  %v1238_v50 = vrot.slane %v991_v54, 1  ;;  %v1239_v47 = vrot.slane %v11244_v25, 1 }
 0x1b3   : > { %6863 = vmatprep.mubr.f32.mxu0 %v11123_v38  ;;  %8694 = vmatpush1.bf16.msra.mxu0 %v8693_v11  ;;  %v1227_v38 = vsel %vm1104_vm1, %v1225_v60, %v1226_v46  ;;  %v8701_v11 = vpack.c.bf16 %v5109_v40, %v5107_v51  ;;  %v5115_v51 = vld [vmem:[#allocation7 + $0xf40] sm:$0xff]  ;;  %v5117_v40 = vld [vmem:[#allocation7 + $0xf50] sm:$0xff]  ;;  %v5120_v46 = vld [vmem:[#allocation7 + $0xf68] sm:$0xff] }
 0x1b4   : > { %8696 = vmatprep.subr.bf16.mxu0 %v8695_v37  ;;  %v8703_v37 = vpack.c.bf16 %v5114_v20, %v5112_v41  ;;  %v1240_v60 = vsel %vm1104_vm1, %v1238_v50, %v1239_v47  ;;  %v5122_v41 = vld [vmem:[#allocation7 + $0xf78] sm:$0xff]  ;;  %v1241_v20 = vrot.slane %v994_v61, 1  ;;  %v996_v50 = vld [vmem:[#allocation2 + $0x2a0] sm:$0xfe] }
 0x1b5   : > { %5675 = vmatmul.mubr.f32.gmra.mrb[46].mxu1 %v1222_v10  ;;  %v1236_v10 = vrot.slane %v11250_v55, 1  ;;  %v1003_v61 = vld [vmem:[#allocation2 + $0x2d8] sm:$0xfe] }
 0x1b6   : > { %6864 = vmatmul.mubr.f32.gmra.mrb[14].mxu0 %v11130_v28  ;;  %5680 = vmatprep.mubr.f32.mxu1 %v1230_v53  ;;  %v5111_v28 = vld [vmem:[#allocation7 + $0xf20] sm:$0xff]  ;;  %v2984_v53 = vld [vmem:[#allocation2 + $0x158] sm:$0xff] }
 0x1b7   : > { %6869 = vmatprep.mubr.f32.mxu0 %v2980_v42  ;;  %8698 = vmatpush1.bf16.msra.mxu0 %v8697_v0  ;;  %v1243_v42 = vrot.slane %v995_v36, 1  ;;  %v8705_v54 = vpack.c.bf16 %v5113_v5, %v5111_v28  ;;  %v11256_v0 = vld [vmem:[#allocation2 + $0x2b8] sm:$0xff]  ;;  %v1001_v36 = vld [vmem:[#allocation2 + $0x2c8] sm:$0x1]  ;;  %v5121_v28 = vld [vmem:[#allocation7 + $0xf70] sm:$0xff] }
 0x1b8   : > { %8700 = vmatprep.subr.bf16.mxu0 %v8699_v24  ;;  %v8707_v24 = vpack.c.bf16 %v5118_v7, %v5116_v23  ;;  %v5124_v5 = vld [vmem:[#allocation7 + $0xf88] sm:$0xff]  ;;  %v5126_v23 = vld [vmem:[#allocation7 + $0xf98] sm:$0xff]  ;;  %v1245_v7 = vrot.slane %v996_v50, 1  ;;  %v11274_v50 = vld [vmem:[#allocation2 + $0x2e0] sm:$0xff] }
 0x1b9   : > { %5681 = vmatmul.mubr.f32.gmra.mrb[48].mxu1 %v1227_v38  ;;  %v2983_v38 = vld [vmem:[#allocation2 + $0x150] sm:$0xff]  ;;  %v1244_v63 = vsel %vm1104_vm1, %v1239_v47, %v1243_v42  ;;  %v1242_v47 = vsel %vm1104_vm1, %v1236_v10, %v1241_v20  ;;  %v1000_v42 = vld [vmem:[#allocation2 + $0x2c0] sm:$0x1] }
 0x1ba   : > { %6870 = vmatmul.mubr.f32.gmra.mrb[16].mxu0 %v2979_v14  ;;  %5686 = vmatprep.mubr.f32.mxu1 %v1234_v33  ;;  %v1248_v14 = vrot.slane %v997_v48, 1  ;;  %v1249_v33 = vrot.slane %v11256_v0, 1 }
 0x1bb   : > { %6875 = vmatprep.mubr.f32.mxu0 %v11143_v9  ;;  %8702 = vmatpush1.bf16.msra.mxu0 %v8701_v11  ;;  %v1237_v9 = vsel %vm1104_vm1, %v1235_v45, %v1236_v10  ;;  %v8709_v11 = vpack.c.bf16 %v5117_v40, %v5115_v51  ;;  %v5123_v51 = vld [vmem:[#allocation7 + $0xf80] sm:$0xff]  ;;  %v5125_v40 = vld [vmem:[#allocation7 + $0xf90] sm:$0xff]  ;;  %v5128_v10 = vld [vmem:[#allocation7 + $0xfa8] sm:$0xff] }
 0x1bc   : > { %8704 = vmatprep.subr.bf16.mxu0 %v8703_v37  ;;  %v8711_v37 = vpack.c.bf16 %v5122_v41, %v5120_v46  ;;  %v1250_v45 = vsel %vm1104_vm1, %v1248_v14, %v1249_v33  ;;  %v5130_v46 = vld [vmem:[#allocation7 + $0xfb8] sm:$0xff]  ;;  %v1251_v41 = vrot.slane %v1000_v42, 1  ;;  %v1002_v14 = vld [vmem:[#allocation2 + $0x2d0] sm:$0xfe] }
 0x1bd   : > { %5687 = vmatmul.mubr.f32.gmra.mrb[50].mxu1 %v1232_v56  ;;  %v1246_v56 = vrot.slane %v11262_v30, 1 }
 0x1be   : > { %6876 = vmatmul.mubr.f32.gmra.mrb[18].mxu0 %v11153_v62  ;;  %5692 = vmatprep.mubr.f32.mxu1 %v1240_v60  ;;  %v5119_v62 = vld [vmem:[#allocation7 + $0xf60] sm:$0xff]  ;;  %v2988_v60 = vld [vmem:[#allocation2 + $0x188] sm:$0xff] }
 0x1bf   : > { %6881 = vmatprep.mubr.f32.mxu0 %v2984_v53  ;;  %8706 = vmatpush1.bf16.msra.mxu0 %v8705_v54  ;;  %v1253_v53 = vrot.slane %v1001_v36, 1  ;;  %v8713_v48 = vpack.c.bf16 %v5121_v28, %v5119_v62  ;;  %v11268_v54 = vld [vmem:[#allocation2 + $0x2e8] sm:$0xff]  ;;  %v1007_v36 = vld [vmem:[#allocation2 + $0x2f8] sm:$0x1]  ;;  %v5129_v62 = vld [vmem:[#allocation7 + $0xfb0] sm:$0xff] }
 0x1c0   : > { %8708 = vmatprep.subr.bf16.mxu0 %v8707_v24  ;;  %v8715_v24 = vpack.c.bf16 %v5126_v23, %v5124_v5  ;;  %v5132_v28 = vld [vmem:[#allocation7 + $0xfc8] sm:$0xff]  ;;  %v5134_v5 = vld [vmem:[#allocation7 + $0xfd8] sm:$0xff]  ;;  %v1255_v23 = vrot.slane %v1002_v14, 1 }
 0x1c1   : > { %5693 = vmatmul.mubr.f32.gmra.mrb[52].mxu1 %v1237_v9  ;;  %v2987_v9 = vld [vmem:[#allocation2 + $0x180] sm:$0xff]  ;;  %v1254_v20 = vsel %vm1104_vm1, %v1249_v33, %v1253_v53  ;;  %v1252_v33 = vsel %vm1104_vm1, %v1246_v56, %v1251_v41  ;;  %v1006_v53 = vld [vmem:[#allocation2 + $0x2f0] sm:$0x1] }
 0x1c2   : > { %6882 = vmatmul.mubr.f32.gmra.mrb[20].mxu0 %v2983_v38  ;;  %5698 = vmatprep.mubr.f32.mxu1 %v1244_v63  ;;  %v1258_v38 = vrot.slane %v1003_v61, 1  ;;  %v1259_v63 = vrot.slane %v11268_v54, 1  ;;  %v1394_v61 = vld [vmem:[#allocation2 + $0x8] sm:$0xfc] }
 0x1c3   : > { %6887 = vmatprep.mubr.f32.mxu0 %v11167_v17  ;;  %8710 = vmatpush1.bf16.msra.mxu0 %v8709_v11  ;;  %v1247_v17 = vsel %vm1104_vm1, %v1245_v7, %v1246_v56  ;;  %v8717_v11 = vpack.c.bf16 %v5125_v40, %v5123_v51  ;;  %v5133_v51 = vld [vmem:[#allocation7 + $0xfd0] sm:$0xff]  ;;  %v5136_v40 = vld [vmem:[#allocation7 + $0xfe8] sm:$0xff]  ;;  %v5138_v56 = vld [vmem:[#allocation7 + $0xff8] sm:$0xff]  ;;  %v1589_v41 = vrot.slane %v1394_v61, 2 }
 0x1c4   : > { %8712 = vmatprep.subr.bf16.mxu0 %v8711_v37  ;;  %v8719_v37 = vpack.c.bf16 %v5130_v46, %v5128_v10  ;;  %v1260_v7 = vsel %vm1104_vm1, %v1258_v38, %v1259_v63  ;;  %v1261_v10 = vrot.slane %v1006_v53, 1  ;;  %v2991_v46 = vld [vmem:[#allocation2 + $0x1b0] sm:$0xff]  ;;  %v1393_v38 = vld [vmem:[#allocation2] sm:$0xfc]  ;;  %v1402_v61 = vld [vmem:[#allocation2 + $0x48] sm:$0xff] }
 0x1c5   : > { %5699 = vmatmul.mubr.f32.gmra.mrb[54].mxu1 %v1242_v47  ;;  %v1256_v47 = vrot.slane %v11274_v50, 1 }
 0x1c6   : > { %6888 = vmatmul.mubr.f32.gmra.mrb[22].mxu0 %v11174_v3  ;;  %5704 = vmatprep.mubr.f32.mxu1 %v1250_v45  ;;  %v5127_v3 = vld [vmem:[#allocation7 + $0xfa0] sm:$0xff]  ;;  %v2992_v45 = vld [vmem:[#allocation2 + $0x1b8] sm:$0xff] }
 0x1c7   : > { %6893 = vmatprep.mubr.f32.mxu0 %v2988_v60  ;;  %8714 = vmatpush1.bf16.msra.mxu0 %v8713_v48  ;;  %v1263_v60 = vrot.slane %v1007_v36, 1  ;;  %v8721_v42 = vpack.c.bf16 %v5129_v62, %v5127_v3  ;;  %v8723_v48 = vpack.c.bf16 %v5134_v5, %v5132_v28  ;;  %v5135_v36 = vld [vmem:[#allocation7 + $0xfe0] sm:$0xff]  ;;  %v5140_v3 = vld [vmem:[#allocation7 + $0x1008] sm:$0xff]  ;;  %v5142_v62 = vld [vmem:[#allocation7 + $0x1018] sm:$0xff]  ;;  %v1586_v28 = vrot.slane %v1393_v38, 2 }
 0x1c8   : > { %8716 = vmatprep.subr.bf16.mxu0 %v8715_v24  ;;  %v5131_v24 = vld [vmem:[#allocation7 + $0xfc0] sm:$0xff] }
 0x1c9   : > { %5705 = vmatmul.mubr.f32.gmra.mrb[56].mxu1 %v1247_v17  ;;  %v1264_v17 = vsel %vm1104_vm1, %v1259_v63, %v1263_v60  ;;  %v8725_v14 = vpack.c.bf16 %v5133_v51, %v5131_v24  ;;  %v1262_v63 = vsel %vm1104_vm1, %v1256_v47, %v1261_v10  ;;  %v2996_v60 = vld [vmem:[#allocation2 + $0x1e8] sm:$0xff]  ;;  %v4826_v51 = vld [vmem:[#allocation7 + $0x638] sm:$0xff]  ;;  %v1600_v10 = vrot.slane %v1402_v61, 2 }
 0x1ca   : > { %6894 = vmatmul.mubr.f32.gmra.mrb[24].mxu0 %v2987_v9  ;;  %5710 = vmatprep.mubr.f32.mxu1 %v1254_v20  ;;  %v11283_v9 = vld [vmem:[#allocation2 + $0x8] sm:$0xff]  ;;  %v4834_v61 = vld [vmem:[#allocation7 + $0x678] sm:$0xff] }
 0x1cb   : > { %6899 = vmatprep.mubr.f32.mxu0 %v11183_v2  ;;  %8718 = vmatpush1.bf16.msra.mxu0 %v8717_v11  ;;  %v1257_v2 = vsel %vm1104_vm1, %v1255_v23, %v1256_v47  ;;  %v1590_v20 = vrot.slane %v11283_v9, 2  ;;  %v8727_v11 = vpack.c.bf16 %v5138_v56, %v5136_v40  ;;  %v4821_v23 = vld [vmem:[#allocation7 + $0x610] sm:$0xff]  ;;  %v4824_v24 = vld [vmem:[#allocation7 + $0x628] sm:$0xff]  ;;  %v2995_v56 = vld [vmem:[#allocation2 + $0x1e0] sm:$0xff] }
 0x1cc   : > { %8720 = vmatprep.subr.bf16.mxu0 %v8719_v37  ;;  %v1398_v37 = vld [vmem:[#allocation2 + $0x28] sm:$0x3]  ;;  %v8415_v38 = vpack.c.bf16 %v4826_v51, %v4824_v24  ;;  %v2999_v24 = vld [vmem:[#allocation2 + $0x210] sm:$0xff] }
 0x1cd   : > { %5711 = vmatmul.mubr.f32.gmra.mrb[58].mxu1 %v1252_v33  ;;  %v1591_v5 = vsel %vm1585_vm2, %v1589_v41, %v1590_v20  ;;  %v4819_v33 = vld [vmem:[#allocation7 + $0x600] sm:$0xff]  ;;  %v1594_v53 = vrot.slane %v1398_v37, 2 }
 0x1ce   : > { %6900 = vmatmul.mubr.f32.gmra.mrb[26].mxu0 %v11190_v16  ;;  %5716 = vmatprep.mubr.f32.mxu1 %v1260_v7  ;;  %v5137_v16 = vld [vmem:[#allocation7 + $0xff0] sm:$0xff]  ;;  %v1397_v7 = vld [vmem:[#allocation2 + $0x20] sm:$0x3]  ;;  %v8413_v47 = vpack.c.bf16 %v4821_v23, %v4819_v33 }
 0x1cf   : > { %6905 = vmatprep.mubr.f32.mxu0 %v2992_v45  ;;  %8722 = vmatpush1.bf16.msra.mxu0 %v8721_v42  ;;  %v8729_v45 = vpack.c.bf16 %v5137_v16, %v5135_v36  ;;  %v1400_v42 = vld [vmem:[#allocation2 + $0x38] sm:$0xfc]  ;;  %v1592_v40 = vrot.slane %v1397_v7, 2  ;;  %v1595_v41 = vsel %vm1585_vm2, %v1590_v20, %v1594_v53  ;;  %v1404_v36 = vld [vmem:[#allocation2 + $0x58] sm:$0x3]  ;;  %v4827_v53 = vld [vmem:[#allocation7 + $0x640] sm:$0xff] }
 0x1d0   : > { %8724 = vmatprep.subr.bf16.mxu0 %v8723_v48  ;;  %v8731_v48 = vpack.c.bf16 %v5142_v62, %v5140_v3  ;;  %v4830_v16 = vld [vmem:[#allocation7 + $0x658] sm:$0xff]  ;;  %v1604_v33 = vrot.slane %v1404_v36, 2  ;;  %v1403_v23 = vld [vmem:[#allocation2 + $0x50] sm:$0x3]  ;;  %v1406_v7 = vld [vmem:[#allocation2 + $0x68] sm:$0xfc] }
 0x1d1   : > { %5717 = vmatmul.mubr.f32.gmra.mrb[60].mxu1 %v1257_v2  ;;  %v1599_v2 = vrot.slane %v1400_v42, 2  ;;  %v1593_v37 = vsel %vm1585_vm2, %v1590_v20, %v1592_v40  ;;  %v4829_v42 = vld [vmem:[#allocation7 + $0x650] sm:$0xff]  ;;  %v1405_v40 = vld [vmem:[#allocation2 + $0x60] sm:$0xfc] }
 0x1d2   : > { %6906 = vmatmul.mubr.f32.gmra.mrb[28].mxu0 %v2991_v46  ;;  %5722 = vmatprep.mubr.f32.mxu1 %v1264_v17  ;;  %v1399_v46 = vld [vmem:[#allocation2 + $0x30] sm:$0xfc]  ;;  %v1401_v17 = vld [vmem:[#allocation2 + $0x40] sm:$0xff]  ;;  %v1605_v51 = vsel %vm1585_vm2, %v1600_v10, %v1604_v33 }
 0x1d3   : > { %6911 = vmatprep.mubr.f32.mxu0 %v11197_v32  ;;  %8726 = vmatpush1.bf16.msra.mxu0 %v8725_v14  ;;  %v1588_v32 = vsel %vm1585_vm2, %v1586_v28, %v1590_v20  ;;  %v4823_v14 = vld [vmem:[#allocation7 + $0x620] sm:$0xff]  ;;  %v1596_v3 = vrot.slane %v1399_v46, 2  ;;  %v1597_v62 = vrot.slane %v1401_v17, 2  ;;  %v3000_v28 = vld [vmem:[#allocation2 + $0x218] sm:$0xff]  ;;  %v4832_v20 = vld [vmem:[#allocation7 + $0x668] sm:$0xff] }
 0x1d4   : > { %8728 = vmatprep.subr.bf16.mxu0 %v8727_v11  ;;  %v4825_v11 = vld [vmem:[#allocation7 + $0x630] sm:$0xff]  ;;  %v1410_v46 = vld [vmem:[#allocation2 + $0x88] sm:$0x3]  ;;  %v8423_v17 = vpack.c.bf16 %v4834_v61, %v4832_v20 }
 0x1d5   : > { %5723 = vmatmul.mubr.f32.gmra.mrb[62].mxu1 %v1262_v63  ;;  %v1601_v63 = vsel %vm1585_vm2, %v1599_v2, %v1600_v10  ;;  %v8421_v2 = vpack.c.bf16 %v4829_v42, %v4827_v53  ;;  %v1606_v10 = vrot.slane %v1405_v40, 2  ;;  %v3003_v42 = vld [vmem:[#allocation2 + $0x240] sm:$0xff] }
 0x1d6   : > { %6912 = vmatmul.mubr.f32.gmra.mrb[30].mxu0 %v11202_v4  ;;  %5793 = vmatprep.mubr.f32.mxu1 %v1591_v5  ;;  %v4828_v4 = vld [vmem:[#allocation7 + $0x648] sm:$0xff]  ;;  %v8417_v5 = vpack.c.bf16 %v4825_v11, %v4823_v14  ;;  %v4838_v14 = vld [vmem:[#allocation7 + $0x698] sm:$0xff] }
 0x1d7   : > { %6917 = vmatprep.mubr.f32.mxu0 %v2996_v60  ;;  %8730 = vmatpush1.bf16.msra.mxu0 %v8729_v45  ;;  %v11295_v45 = vld [vmem:[#allocation2 + $0x78] sm:$0xff]  ;;  %v8419_v60 = vpack.c.bf16 %v4830_v16, %v4828_v4  ;;  %v3004_v16 = vld [vmem:[#allocation2 + $0x248] sm:$0xff] }
 0x1d8   : > { %8732 = vmatprep.subr.bf16.mxu0 %v8731_v48  ;;  %v1602_v48 = vrot.slane %v1403_v23, 2  ;;  %v4835_v23 = vld [vmem:[#allocation7 + $0x680] sm:$0xff] }
 0x1d9   : > { %5794 = vmatmul.mubr.f32.vlgmr.msra.gmra.mrb[0].mxu1 %v1588_v32  ;;  %v1609_v32 = vrot.slane %v1406_v7, 2  ;;  %v4837_v7 = vld [vmem:[#allocation7 + $0x690] sm:$0xff] }
 0x1da   : > { %6918 = vmatmul.mubr.f32.gmra.mrb[32].mxu0 %v2995_v56  ;;  %8414 = vmatpush1.bf16.msra.mxu1 %v8413_v47  ;;  %v1610_v47 = vrot.slane %v11295_v45, 2  ;;  %v11301_v56 = vld [vmem:[#allocation2 + $0x70] sm:$0xff]  ;;  %v1603_v11 = vsel %vm1585_vm2, %v1597_v62, %v1602_v48 }
 0x1db   : > { %5799 = vmatprep.mubr.f32.mxu1 %v1595_v41  ;;  %6923 = vmatprep.mubr.f32.mxu0 %v11208_v34  ;;  %v1598_v34 = vsel %vm1585_vm2, %v1596_v3, %v1597_v62  ;;  %v4833_v41 = vld [vmem:[#allocation7 + $0x670] sm:$0xff]  ;;  %v1607_v36 = vrot.slane %v11301_v56, 2  ;;  %v1409_v3 = vld [vmem:[#allocation2 + $0x80] sm:$0x3]  ;;  %v4840_v62 = vld [vmem:[#allocation7 + $0x6a8] sm:$0xff] }
 0x1dc   : > { %8416 = vmatprep.subr.bf16.mxu1 %v8415_v38  ;;  %v4836_v38 = vld [vmem:[#allocation7 + $0x688] sm:$0xff]  ;;  %v1611_v4 = vsel %vm1585_vm2, %v1609_v32, %v1610_v47  ;;  %v1612_v53 = vrot.slane %v1409_v3, 2  ;;  %v1411_v48 = vld [vmem:[#allocation2 + $0x90] sm:$0xfc]  ;;  %v1416_v32 = vld [vmem:[#allocation2 + $0xb8] sm:$0x3] }
 0x1dd   : > { %5800 = vmatmul.mubr.f32.gmra.mrb[2].mxu1 %v1593_v37  ;;  %v1614_v37 = vrot.slane %v1410_v46, 2  ;;  %v8427_v33 = vpack.c.bf16 %v4838_v14, %v4836_v38  ;;  %v4844_v46 = vld [vmem:[#allocation7 + $0x6c8] sm:$0xff]  ;;  %v3008_v14 = vld [vmem:[#allocation2 + $0x278] sm:$0xff] }
 0x1de   : > { %6924 = vmatmul.mubr.f32.gmra.mrb[34].mxu0 %v11214_v22  ;;  %5805 = vmatprep.mubr.f32.mxu1 %v1601_v63  ;;  %v4831_v22 = vld [vmem:[#allocation7 + $0x660] sm:$0xff]  ;;  %v1412_v63 = vld [vmem:[#allocation2 + $0x98] sm:$0xfc] }
 0x1df   : > { %6929 = vmatprep.mubr.f32.mxu0 %v3000_v28  ;;  %8418 = vmatpush1.bf16.msra.mxu1 %v8417_v5  ;;  %v8425_v28 = vpack.c.bf16 %v4833_v41, %v4831_v22  ;;  %v11307_v5 = vld [vmem:[#allocation2 + $0xa8] sm:$0xff]  ;;  %v1615_v20 = vsel %vm1585_vm2, %v1610_v47, %v1614_v37  ;;  %v1619_v61 = vrot.slane %v1412_v63, 2  ;;  %v1613_v47 = vsel %vm1585_vm2, %v1607_v36, %v1612_v53  ;;  %v11319_v37 = vld [vmem:[#allocation2 + $0xd8] sm:$0xff]  ;;  %v4843_v63 = vld [vmem:[#allocation7 + $0x6c0] sm:$0xff] }
 0x1e0   : > { %8420 = vmatprep.subr.bf16.mxu1 %v8419_v60  ;;  %v4842_v60 = vld [vmem:[#allocation7 + $0x6b8] sm:$0xff]  ;;  %v1616_v22 = vrot.slane %v1411_v48, 2  ;;  %v1417_v53 = vld [vmem:[#allocation2 + $0xc0] sm:$0xfc] }
 0x1e1   : > { %5806 = vmatmul.mubr.f32.gmra.mrb[4].mxu1 %v1598_v34  ;;  %v1620_v34 = vrot.slane %v11307_v5, 2  ;;  %v8431_v40 = vpack.c.bf16 %v4842_v60, %v4840_v62 }
 0x1e2   : > { %6930 = vmatmul.mubr.f32.gmra.mrb[36].mxu0 %v2999_v24  ;;  %5811 = vmatprep.mubr.f32.mxu1 %v1605_v51  ;;  %v11313_v24 = vld [vmem:[#allocation2 + $0xa0] sm:$0xff]  ;;  %v8429_v51 = vpack.c.bf16 %v4837_v7, %v4835_v23  ;;  %v3007_v7 = vld [vmem:[#allocation2 + $0x270] sm:$0xff] }
 0x1e3   : > { %6935 = vmatprep.mubr.f32.mxu0 %v11220_v19  ;;  %8422 = vmatpush1.bf16.msra.mxu1 %v8421_v2  ;;  %v1608_v19 = vsel %vm1585_vm2, %v1606_v10, %v1607_v36  ;;  %v4841_v2 = vld [vmem:[#allocation7 + $0x6b0] sm:$0xff]  ;;  %v1617_v41 = vrot.slane %v11313_v24, 2  ;;  %v1621_v38 = vsel %vm1585_vm2, %v1619_v61, %v1620_v34  ;;  %v4848_v36 = vld [vmem:[#allocation7 + $0x6e8] sm:$0xff] }
 0x1e4   : > { %8424 = vmatprep.subr.bf16.mxu1 %v8423_v17  ;;  %v4846_v17 = vld [vmem:[#allocation7 + $0x6d8] sm:$0xff]  ;;  %v1415_v10 = vld [vmem:[#allocation2 + $0xb0] sm:$0x3]  ;;  %v1422_v61 = vld [vmem:[#allocation2 + $0xe8] sm:$0x3] }
 0x1e5   : > { %5812 = vmatmul.mubr.f32.gmra.mrb[6].mxu1 %v1603_v11  ;;  %v1624_v11 = vrot.slane %v1416_v32, 2  ;;  %v8435_v3 = vpack.c.bf16 %v4846_v17, %v4844_v46  ;;  %v1622_v23 = vrot.slane %v1415_v10, 2  ;;  %v4852_v32 = vld [vmem:[#allocation7 + $0x708] sm:$0xff] }
 0x1e6   : > { %6936 = vmatmul.mubr.f32.gmra.mrb[38].mxu0 %v11226_v59  ;;  %5817 = vmatprep.mubr.f32.mxu1 %v1611_v4  ;;  %v4839_v59 = vld [vmem:[#allocation7 + $0x6a0] sm:$0xff]  ;;  %v1418_v4 = vld [vmem:[#allocation2 + $0xc8] sm:$0xfc] }
 0x1e7   : > { %6941 = vmatprep.mubr.f32.mxu0 %v3004_v16  ;;  %8426 = vmatpush1.bf16.msra.mxu1 %v8425_v28  ;;  %v8433_v16 = vpack.c.bf16 %v4841_v2, %v4839_v59  ;;  %v4845_v28 = vld [vmem:[#allocation7 + $0x6d0] sm:$0xff]  ;;  %v1625_v62 = vsel %vm1585_vm2, %v1620_v34, %v1624_v11  ;;  %v1629_v60 = vrot.slane %v1418_v4, 2  ;;  %v1623_v34 = vsel %vm1585_vm2, %v1617_v41, %v1622_v23  ;;  %v3012_v17 = vld [vmem:[#allocation2 + $0x2a8] sm:$0xff]  ;;  %v4851_v4 = vld [vmem:[#allocation7 + $0x700] sm:$0xff] }
 0x1e8   : > { %8428 = vmatprep.subr.bf16.mxu1 %v8427_v33  ;;  %v4850_v33 = vld [vmem:[#allocation7 + $0x6f8] sm:$0xff]  ;;  %v1626_v59 = vrot.slane %v1417_v53, 2  ;;  %v11331_v11 = vld [vmem:[#allocation2 + $0x108] sm:$0xff]  ;;  %v1423_v23 = vld [vmem:[#allocation2 + $0xf0] sm:$0xfc] }
 0x1e9   : > { %5818 = vmatmul.mubr.f32.gmra.mrb[8].mxu1 %v1608_v19  ;;  %v1630_v19 = vrot.slane %v11319_v37, 2  ;;  %v8439_v48 = vpack.c.bf16 %v4850_v33, %v4848_v36 }
 0x1ea   : > { %6942 = vmatmul.mubr.f32.gmra.mrb[40].mxu0 %v3003_v42  ;;  %5823 = vmatprep.mubr.f32.mxu1 %v1615_v20  ;;  %v11325_v42 = vld [vmem:[#allocation2 + $0xd0] sm:$0xff]  ;;  %v8437_v20 = vpack.c.bf16 %v4845_v28, %v4843_v63  ;;  %v3011_v28 = vld [vmem:[#allocation2 + $0x2a0] sm:$0xff] }
 0x1eb   : > { %6947 = vmatprep.mubr.f32.mxu0 %v11232_v27  ;;  %8430 = vmatpush1.bf16.msra.mxu1 %v8429_v51  ;;  %v1618_v27 = vsel %vm1585_vm2, %v1616_v22, %v1617_v41  ;;  %v4849_v51 = vld [vmem:[#allocation7 + $0x6f0] sm:$0xff]  ;;  %v1627_v2 = vrot.slane %v11325_v42, 2  ;;  %v1631_v46 = vsel %vm1585_vm2, %v1629_v60, %v1630_v19  ;;  %v1421_v22 = vld [vmem:[#allocation2 + $0xe0] sm:$0x3]  ;;  %v4856_v41 = vld [vmem:[#allocation7 + $0x728] sm:$0xff] }
 0x1ec   : > { %8432 = vmatprep.subr.bf16.mxu1 %v8431_v40  ;;  %v4854_v40 = vld [vmem:[#allocation7 + $0x718] sm:$0xff]  ;;  %v1632_v63 = vrot.slane %v1421_v22, 2 }
 0x1ed   : > { %5824 = vmatmul.mubr.f32.gmra.mrb[10].mxu1 %v1613_v47  ;;  %v1634_v47 = vrot.slane %v1422_v61, 2  ;;  %v8443_v10 = vpack.c.bf16 %v4854_v40, %v4852_v32  ;;  %v1428_v60 = vld [vmem:[#allocation2 + $0x118] sm:$0x3]  ;;  %v4860_v61 = vld [vmem:[#allocation7 + $0x748] sm:$0xff] }
 0x1ee   : > { %6948 = vmatmul.mubr.f32.gmra.mrb[42].mxu0 %v11238_v12  ;;  %5829 = vmatprep.mubr.f32.mxu1 %v1621_v38  ;;  %v4847_v12 = vld [vmem:[#allocation7 + $0x6e0] sm:$0xff]  ;;  %v1424_v38 = vld [vmem:[#allocation2 + $0xf8] sm:$0xfc] }
 0x1ef   : > { %6953 = vmatprep.mubr.f32.mxu0 %v3008_v14  ;;  %8434 = vmatpush1.bf16.msra.mxu1 %v8433_v16  ;;  %v8441_v14 = vpack.c.bf16 %v4849_v51, %v4847_v12  ;;  %v4853_v16 = vld [vmem:[#allocation7 + $0x710] sm:$0xff]  ;;  %v1635_v36 = vsel %vm1585_vm2, %v1630_v19, %v1634_v47  ;;  %v1639_v33 = vrot.slane %v1424_v38, 2  ;;  %v1633_v19 = vsel %vm1585_vm2, %v1627_v2, %v1632_v63  ;;  %v3016_v40 = vld [vmem:[#allocation2 + $0x2d8] sm:$0xff]  ;;  %v4859_v38 = vld [vmem:[#allocation7 + $0x740] sm:$0xff] }
 0x1f0   : > { %8436 = vmatprep.subr.bf16.mxu1 %v8435_v3  ;;  %v4858_v3 = vld [vmem:[#allocation7 + $0x738] sm:$0xff]  ;;  %v1636_v12 = vrot.slane %v1423_v23, 2  ;;  %v1429_v63 = vld [vmem:[#allocation2 + $0x120] sm:$0xfc] }
 0x1f1   : > { %5830 = vmatmul.mubr.f32.gmra.mrb[12].mxu1 %v1618_v27  ;;  %v1640_v27 = vrot.slane %v11331_v11, 2  ;;  %v8447_v53 = vpack.c.bf16 %v4858_v3, %v4856_v41  ;;  %v11343_v47 = vld [vmem:[#allocation2 + $0x138] sm:$0xff] }
 0x1f2   : > { %6954 = vmatmul.mubr.f32.gmra.mrb[44].mxu0 %v3007_v7  ;;  %5835 = vmatprep.mubr.f32.mxu1 %v1625_v62  ;;  %v11337_v7 = vld [vmem:[#allocation2 + $0x100] sm:$0xff]  ;;  %v8445_v62 = vpack.c.bf16 %v4853_v16, %v4851_v4  ;;  %v3015_v16 = vld [vmem:[#allocation2 + $0x2d0] sm:$0xff] }
 0x1f3   : > { %6959 = vmatprep.mubr.f32.mxu0 %v11244_v25  ;;  %8438 = vmatpush1.bf16.msra.mxu1 %v8437_v20  ;;  %v1628_v25 = vsel %vm1585_vm2, %v1626_v59, %v1627_v2  ;;  %v4857_v20 = vld [vmem:[#allocation7 + $0x730] sm:$0xff]  ;;  %v1637_v51 = vrot.slane %v11337_v7, 2  ;;  %v1641_v32 = vsel %vm1585_vm2, %v1639_v33, %v1640_v27  ;;  %v4864_v2 = vld [vmem:[#allocation7 + $0x768] sm:$0xff] }
 0x1f4   : > { %8440 = vmatprep.subr.bf16.mxu1 %v8439_v48  ;;  %v4862_v48 = vld [vmem:[#allocation7 + $0x758] sm:$0xff]  ;;  %v1427_v59 = vld [vmem:[#allocation2 + $0x110] sm:$0x3]  ;;  %v1434_v33 = vld [vmem:[#allocation2 + $0x148] sm:$0x3] }
 0x1f5   : > { %5836 = vmatmul.mubr.f32.gmra.mrb[14].mxu1 %v1623_v34  ;;  %v1644_v34 = vrot.slane %v1428_v60, 2  ;;  %v8451_v22 = vpack.c.bf16 %v4862_v48, %v4860_v61  ;;  %v1642_v4 = vrot.slane %v1427_v59, 2  ;;  %v4868_v60 = vld [vmem:[#allocation7 + $0x788] sm:$0xff] }
 0x1f6   : > { %6960 = vmatmul.mubr.f32.gmra.mrb[46].mxu0 %v11250_v55  ;;  %5841 = vmatprep.mubr.f32.mxu1 %v1631_v46  ;;  %v4855_v55 = vld [vmem:[#allocation7 + $0x720] sm:$0xff]  ;;  %v1430_v46 = vld [vmem:[#allocation2 + $0x128] sm:$0xfc] }
 0x1f7   : > { %6965 = vmatprep.mubr.f32.mxu0 %v3012_v17  ;;  %8442 = vmatpush1.bf16.msra.mxu1 %v8441_v14  ;;  %v8449_v17 = vpack.c.bf16 %v4857_v20, %v4855_v55  ;;  %v4861_v14 = vld [vmem:[#allocation7 + $0x750] sm:$0xff]  ;;  %v1645_v41 = vsel %vm1585_vm2, %v1640_v27, %v1644_v34  ;;  %v1649_v3 = vrot.slane %v1430_v46, 2  ;;  %v1643_v27 = vsel %vm1585_vm2, %v1637_v51, %v1642_v4  ;;  %v3020_v48 = vld [vmem:[#allocation2 + $0x308] sm:$0xff]  ;;  %v4867_v46 = vld [vmem:[#allocation7 + $0x780] sm:$0xff] }
 0x1f8   : > { %8444 = vmatprep.subr.bf16.mxu1 %v8443_v10  ;;  %v4866_v10 = vld [vmem:[#allocation7 + $0x778] sm:$0xff]  ;;  %v1646_v55 = vrot.slane %v1429_v63, 2  ;;  %v11355_v34 = vld [vmem:[#allocation2 + $0x168] sm:$0xff] }
 0x1f9   : > { %5842 = vmatmul.mubr.f32.gmra.mrb[16].mxu1 %v1628_v25  ;;  %v1650_v25 = vrot.slane %v11343_v47, 2  ;;  %v8455_v23 = vpack.c.bf16 %v4866_v10, %v4864_v2  ;;  %v3022_v10 = vld [vmem:[#allocation2 + $0x318] sm:$0xff]  ;;  %v1660_v4 = vrot.slane %v11355_v34, 2 }
 0x1fa   : > { %6966 = vmatmul.mubr.f32.gmra.mrb[48].mxu0 %v3011_v28  ;;  %5847 = vmatprep.mubr.f32.mxu1 %v1635_v36  ;;  %v11349_v28 = vld [vmem:[#allocation2 + $0x130] sm:$0xff]  ;;  %v8453_v36 = vpack.c.bf16 %v4861_v14, %v4859_v38  ;;  %v3019_v38 = vld [vmem:[#allocation2 + $0x300] sm:$0xff]  ;;  %v1440_v63 = vld [vmem:[#allocation2 + $0x178] sm:$0x3] }
 0x1fb   : > { %6971 = vmatprep.mubr.f32.mxu0 %v11256_v0  ;;  %8446 = vmatpush1.bf16.msra.mxu1 %v8445_v62  ;;  %v1638_v0 = vsel %vm1585_vm2, %v1636_v12, %v1637_v51  ;;  %v4865_v62 = vld [vmem:[#allocation7 + $0x770] sm:$0xff]  ;;  %v1647_v20 = vrot.slane %v11349_v28, 2  ;;  %v1651_v61 = vsel %vm1585_vm2, %v1649_v3, %v1650_v25  ;;  %v1433_v12 = vld [vmem:[#allocation2 + $0x140] sm:$0x3]  ;;  %v4872_v51 = vld [vmem:[#allocation7 + $0x7a8] sm:$0xff] }
 0x1fc   : > { %8448 = vmatprep.subr.bf16.mxu1 %v8447_v53  ;;  %v4870_v53 = vld [vmem:[#allocation7 + $0x798] sm:$0xff]  ;;  %v1652_v14 = vrot.slane %v1433_v12, 2 }
 0x1fd   : > { %5848 = vmatmul.mubr.f32.gmra.mrb[18].mxu1 %v1633_v19  ;;  %v1654_v19 = vrot.slane %v1434_v33, 2  ;;  %v8459_v59 = vpack.c.bf16 %v4870_v53, %v4868_v60  ;;  %v4873_v33 = vld [vmem:[#allocation7 + $0x7b0] sm:$0xff]  ;;  %v11366_v12 = vld [vmem:[#allocation2 + $0x198] sm:$0xff] }
 0x1fe   : > { %6972 = vmatmul.mubr.f32.gmra.mrb[50].mxu0 %v11262_v30  ;;  %5853 = vmatprep.mubr.f32.mxu1 %v1641_v32  ;;  %v4863_v30 = vld [vmem:[#allocation7 + $0x760] sm:$0xff]  ;;  %v1436_v32 = vld [vmem:[#allocation2 + $0x158] sm:$0xfc]  ;;  %v3021_v53 = vld [vmem:[#allocation2 + $0x310] sm:$0xff] }
 0x1ff   : > { %6977 = vmatprep.mubr.f32.mxu0 %v3016_v40  ;;  %8450 = vmatpush1.bf16.msra.mxu1 %v8449_v17  ;;  %v8457_v40 = vpack.c.bf16 %v4865_v62, %v4863_v30  ;;  %v4869_v17 = vld [vmem:[#allocation7 + $0x790] sm:$0xff]  ;;  %v1655_v2 = vsel %vm1585_vm2, %v1650_v25, %v1654_v19  ;;  %v4878_v30 = vld [vmem:[#allocation7 + $0x7d8] sm:$0xff]  ;;  %v1653_v25 = vsel %vm1585_vm2, %v1647_v20, %v1652_v14  ;;  %v1670_v14 = vrot.slane %v11366_v12, 2 }
 0x200   : > { %8452 = vmatprep.subr.bf16.mxu1 %v8451_v22  ;;  %v4874_v22 = vld [vmem:[#allocation7 + $0x7b8] sm:$0xff]  ;;  %v8461_v3 = vpack.c.bf16 %v4869_v17, %v4867_v46  ;;  %v4880_v46 = vld [vmem:[#allocation7 + $0x7e8] sm:$0xff] }
 0x201   : > { %5854 = vmatmul.mubr.f32.gmra.mrb[20].mxu1 %v1638_v0  ;;  %v1659_v0 = vrot.slane %v1436_v32, 2  ;;  %v4882_v17 = vld [vmem:[#allocation7 + $0x7f8] sm:$0xff] }
 0x202   : > { %6978 = vmatmul.mubr.f32.gmra.mrb[52].mxu0 %v3015_v16  ;;  %5859 = vmatprep.mubr.f32.mxu1 %v1645_v41  ;;  %v1435_v16 = vld [vmem:[#allocation2 + $0x150] sm:$0xfc]  ;;  %v11361_v41 = vld [vmem:[#allocation2 + $0x160] sm:$0xff] }
 0x203   : > { %6983 = vmatprep.mubr.f32.mxu0 %v11268_v54  ;;  %8454 = vmatpush1.bf16.msra.mxu1 %v8453_v36  ;;  %v1648_v54 = vsel %vm1585_vm2, %v1646_v55, %v1647_v20  ;;  %v4871_v36 = vld [vmem:[#allocation7 + $0x7a0] sm:$0xff]  ;;  %v1656_v62 = vrot.slane %v1435_v16, 2  ;;  %v1657_v60 = vrot.slane %v11361_v41, 2  ;;  %v1664_v55 = vrot.slane %v1440_v63, 2  ;;  %v3092_v20 = vld [vmem:[#allocation2 + $0x68] sm:$0xfe] }
 0x204   : > { %8456 = vmatprep.subr.bf16.mxu1 %v8455_v23  ;;  %v4876_v23 = vld [vmem:[#allocation7 + $0x7c8] sm:$0xff]  ;;  %v8465_v19 = vpack.c.bf16 %v4873_v33, %v4871_v36  ;;  %v3287_v63 = vrot.slane %v11295_v45, 1  ;;  %v8471_v36 = vpack.c.bf16 %v4882_v17, %v4880_v46  ;;  %v4879_v33 = vld [vmem:[#allocation7 + $0x7e0] sm:$0xff]  ;;  %v1448_v46 = vld [vmem:[#allocation2 + $0x1b8] sm:$0xfc] }
 0x205   : > { %5860 = vmatmul.mubr.f32.gmra.mrb[22].mxu1 %v1643_v27  ;;  %v1661_v27 = vsel %vm1585_vm2, %v1659_v0, %v1660_v4  ;;  %v8467_v32 = vpack.c.bf16 %v4878_v30, %v4876_v23  ;;  %v3091_v0 = vld [vmem:[#allocation2 + $0x60] sm:$0xfe]  ;;  %v4881_v23 = vld [vmem:[#allocation7 + $0x7f0] sm:$0xff]  ;;  %v3284_v30 = vrot.slane %v11301_v56, 1  ;;  %v3098_v17 = vld [vmem:[#allocation2 + $0x98] sm:$0xfe] }
 0x206   : > { %6984 = vmatmul.mubr.f32.gmra.mrb[54].mxu0 %v11274_v50  ;;  %5865 = vmatprep.mubr.f32.mxu1 %v1651_v61  ;;  %v8463_v50 = vpack.c.bf16 %v4874_v22, %v4872_v51  ;;  %v1439_v61 = vld [vmem:[#allocation2 + $0x170] sm:$0x3]  ;;  %v1658_v51 = vsel %vm1585_vm2, %v1656_v62, %v1657_v60 }
 0x207   : > { %6989 = vmatprep.mubr.f32.mxu0 %v3020_v48  ;;  %8458 = vmatpush1.bf16.msra.mxu1 %v8457_v40  ;;  %v1442_v48 = vld [vmem:[#allocation2 + $0x188] sm:$0xfc]  ;;  %v4875_v40 = vld [vmem:[#allocation7 + $0x7c0] sm:$0xff]  ;;  %v1662_v22 = vrot.slane %v1439_v61, 2 }
 0x208   : > { %8460 = vmatprep.subr.bf16.mxu1 %v8459_v59  ;;  %v4877_v59 = vld [vmem:[#allocation7 + $0x7d0] sm:$0xff]  ;;  %v5139_v61 = vld [vmem:[#allocation7 + $0x1000] sm:$0xff] }
 0x209   : > { %5866 = vmatmul.mubr.f32.gmra.mrb[24].mxu1 %v1648_v54  ;;  %v1669_v54 = vrot.slane %v1442_v48, 2  ;;  %v8469_v16 = vpack.c.bf16 %v4877_v59, %v4875_v40  ;;  %v5141_v48 = vld [vmem:[#allocation7 + $0x1010] sm:$0xff] }
 0x20a   : > { %6990 = vmatmul.mubr.f32.gmra.mrb[56].mxu0 %v3019_v38  ;;  %5871 = vmatprep.mubr.f32.mxu1 %v1655_v2  ;;  %v1665_v38 = vsel %vm1585_vm2, %v1660_v4, %v1664_v55  ;;  %v1441_v2 = vld [vmem:[#allocation2 + $0x180] sm:$0xfc]  ;;  %v3096_v4 = vld [vmem:[#allocation2 + $0x88] sm:$0x1] }
 0x20b   : > { %6995 = vmatprep.mubr.f32.mxu0 %v3022_v10  ;;  %8462 = vmatpush1.bf16.msra.mxu1 %v8461_v3  ;;  %v11372_v10 = vld [vmem:[#allocation2 + $0x190] sm:$0xff]  ;;  %v3286_v3 = vrot.slane %v3092_v20, 1  ;;  %v1666_v62 = vrot.slane %v1441_v2, 2  ;;  %v1671_v45 = vsel %vm1585_vm2, %v1669_v54, %v1670_v14  ;;  %v3291_v59 = vrot.slane %v3096_v4, 1  ;;  %v3095_v20 = vld [vmem:[#allocation2 + $0x80] sm:$0x1] }
 0x20c   : > { %8464 = vmatprep.subr.bf16.mxu1 %v8463_v50  ;;  %v1446_v50 = vld [vmem:[#allocation2 + $0x1a8] sm:$0x3]  ;;  %v8733_v2 = vpack.c.bf16 %v5141_v48, %v5139_v61  ;;  %v5143_v61 = vld [vmem:[#allocation7 + $0x1020] sm:$0xff]  ;;  %v5145_v48 = vld [vmem:[#allocation7 + $0x1030] sm:$0xff] }
 0x20d   : > { %5872 = vmatmul.mubr.f32.gmra.mrb[26].mxu1 %v1653_v25  ;;  %v1663_v25 = vsel %vm1585_vm2, %v1657_v60, %v1662_v22  ;;  %v1674_v55 = vrot.slane %v1446_v50, 2  ;;  %v3288_v40 = vsel %vm1104_vm1, %v3286_v3, %v3287_v63  ;;  %v11382_v60 = vld [vmem:[#allocation2 + $0x1c8] sm:$0xff]  ;;  %v5146_v22 = vld [vmem:[#allocation7 + $0x1038] sm:$0xff]  ;;  %v11389_v3 = vld [vmem:[#allocation2 + $0x1c0] sm:$0xff]  ;;  %v3292_v4 = vsel %vm1104_vm1, %v3287_v63, %v3291_v59 }
 0x20e   : > { %6996 = vmatmul.mubr.f32.gmra.mrb[58].mxu0 %v3021_v53  ;;  %5877 = vmatprep.mubr.f32.mxu1 %v1661_v27  ;;  %v1667_v53 = vrot.slane %v11372_v10, 2  ;;  %v3283_v27 = vrot.slane %v3091_v0, 1  ;;  %v1451_v59 = vld [vmem:[#allocation2 + $0x1d0] sm:$0x3] }
 0x20f   : > { %7001 = vmatprep.mubr.f32.mxu0 %v11283_v9  ;;  %8466 = vmatpush1.bf16.msra.mxu1 %v8465_v19  ;;  %v1445_v19 = vld [vmem:[#allocation2 + $0x1a0] sm:$0x3]  ;;  %v1675_v50 = vsel %vm1585_vm2, %v1670_v14, %v1674_v55  ;;  %v1677_v14 = vrot.slane %v11389_v3, 2  ;;  %v3102_v55 = vld [vmem:[#allocation2 + $0xb8] sm:$0x1] }
 0x210   : > { %8468 = vmatprep.subr.bf16.mxu1 %v8467_v32  ;;  %v8473_v32 = vpack.c.bf16 %v4881_v23, %v4879_v33  ;;  %v1668_v54 = vsel %vm1585_vm2, %v1666_v62, %v1667_v53  ;;  %v1672_v0 = vrot.slane %v1445_v19, 2  ;;  %v1679_v33 = vrot.slane %v1448_v46, 2 }
 0x211   : > { %5878 = vmatmul.mubr.f32.gmra.mrb[28].mxu1 %v1658_v51  ;;  %v5144_v51 = vld [vmem:[#allocation7 + $0x1028] sm:$0xff]  ;;  %v1680_v23 = vrot.slane %v11382_v60, 2  ;;  %v3297_v62 = vrot.slane %v11307_v5, 1  ;;  %v3294_v5 = vrot.slane %v11313_v24, 1 }
 0x212   : > { %7002 = vmatmul.mubr.f32.gmra.mrb[60].mxu0 %v11283_v9  ;;  %5883 = vmatprep.mubr.f32.mxu1 %v1665_v38  ;;  %v3285_v38 = vsel %vm1104_vm1, %v3283_v27, %v3284_v30  ;;  %v8735_v27 = vpack.c.bf16 %v5146_v22, %v5144_v51  ;;  %v1673_v63 = vsel %vm1585_vm2, %v1667_v53, %v1672_v0  ;;  %v3101_v22 = vld [vmem:[#allocation2 + $0xb0] sm:$0x1]  ;;  %v3301_v0 = vrot.slane %v3102_v55, 1  ;;  %v1458_v55 = vld [vmem:[#allocation2 + $0x208] sm:$0x3] }
 0x213   : > { %7007 = vmatprep.mubr.f32.mxu0 %v11283_v9  ;;  %8470 = vmatpush1.bf16.msra.mxu1 %v8469_v16  ;;  %v1447_v16 = vld [vmem:[#allocation2 + $0x1b0] sm:$0xfc]  ;;  %v1681_v46 = vsel %vm1585_vm2, %v1679_v33, %v1680_v23  ;;  %v8737_v51 = vpack.c.bf16 %v5145_v48, %v5143_v61  ;;  %v1682_v33 = vrot.slane %v1451_v59, 2  ;;  %v1453_v48 = vld [vmem:[#allocation2 + $0x1e0] sm:$0xfc]  ;;  %v3307_v59 = vrot.slane %v11319_v37, 1 }
 0x214   : > { %8472 = vmatprep.subr.bf16.mxu1 %v8471_v36  ;;  %v3289_v36 = vrot.slane %v3095_v20, 1  ;;  %v1676_v19 = vrot.slane %v1447_v16, 2  ;;  %v5150_v20 = vld [vmem:[#allocation7 + $0x1058] sm:$0xff]  ;;  %v5147_v16 = vld [vmem:[#allocation7 + $0x1040] sm:$0xff]  ;;  %v11408_v61 = vld [vmem:[#allocation2 + $0x1f0] sm:$0xff] }
 0x215   : > { %5884 = vmatmul.mubr.f32.gmra.mrb[30].mxu1 %v1663_v25  ;;  %v3296_v25 = vrot.slane %v3098_v17, 1 }
 0x216   : > { %7008 = vmatmul.mubr.f32.gmra.mrb[62].mxu0 %v11283_v9  ;;  %5889 = vmatprep.mubr.f32.mxu1 %v1671_v45  ;;  %v3097_v9 = vld [vmem:[#allocation2 + $0x90] sm:$0xfe]  ;;  %v1452_v45 = vld [vmem:[#allocation2 + $0x1d8] sm:$0x3]  ;;  %v1678_v56 = vsel %vm1585_vm2, %v1676_v19, %v1677_v14  ;;  %v3103_v19 = vld [vmem:[#allocation2 + $0xc0] sm:$0xfe] }
 0x217   : > { %7078 = vmatprep.mubr.f32.mxu0 %v3288_v40  ;;  %8474 = vmatpush1.bf16.msra.mxu1 %v8473_v32  ;;  %v5148_v40 = vld [vmem:[#allocation7 + $0x1048] sm:$0xff]  ;;  %v3293_v32 = vrot.slane %v3097_v9, 1  ;;  %v1684_v17 = vrot.slane %v1452_v45, 2  ;;  %v3298_v53 = vsel %vm1104_vm1, %v3296_v25, %v3297_v62  ;;  %v3299_v9 = vrot.slane %v3101_v22, 1  ;;  %v5153_v22 = vld [vmem:[#allocation7 + $0x1070] sm:$0xff] }
 0x218   : > { %8859 = vmatprep.subr.bf16.mxu1 %v10160_v8  ;;  %v3290_v8 = vsel %vm1104_vm1, %v3284_v30, %v3289_v36  ;;  %v8739_v24 = vpack.c.bf16 %v5150_v20, %v5148_v40  ;;  %v5152_v30 = vld [vmem:[#allocation7 + $0x1068] sm:$0xff]  ;;  %v5154_v36 = vld [vmem:[#allocation7 + $0x1078] sm:$0xff]  ;;  %v3302_v20 = vsel %vm1104_vm1, %v3297_v62, %v3301_v0  ;;  %v1686_v62 = vrot.slane %v1453_v48, 2 }
 0x219   : > { %5890 = vmatmul.mubr.f32.gmra.mrb[32].mxu1 %v1668_v54  ;;  %v1454_v54 = vld [vmem:[#allocation2 + $0x1e8] sm:$0xfc]  ;;  %v3295_v25 = vsel %vm1104_vm1, %v3293_v32, %v3294_v5  ;;  %v3303_v0 = vrot.slane %v3103_v19, 1  ;;  %v3300_v37 = vsel %vm1104_vm1, %v3294_v5, %v3299_v9  ;;  %v3110_v48 = vld [vmem:[#allocation2 + $0xf8] sm:$0xfe] }
 0x21a   : > { %7079 = vmatmul.mubr.f32.vlgmr.msra.gmra.mrb[0].mxu0 %v3285_v38  ;;  %5895 = vmatprep.mubr.f32.mxu1 %v1675_v50  ;;  %v11403_v38 = vld [vmem:[#allocation2 + $0x1f8] sm:$0xff]  ;;  %v5149_v50 = vld [vmem:[#allocation7 + $0x1050] sm:$0xff]  ;;  %v5160_v19 = vld [vmem:[#allocation7 + $0x10a8] sm:$0xff] }
 0x21b   : > { %7084 = vmatprep.mubr.f32.mxu0 %v3292_v4  ;;  %8734 = vmatpush1.bf16.msra.mxu0 %v8733_v2  ;;  %v3104_v2 = vld [vmem:[#allocation2 + $0xc8] sm:$0xfe]  ;;  %v1689_v4 = vrot.slane %v1454_v54, 2  ;;  %v1690_v45 = vrot.slane %v11403_v38, 2  ;;  %v8741_v40 = vpack.c.bf16 %v5149_v50, %v5147_v16  ;;  %v1687_v54 = vrot.slane %v11408_v61, 2  ;;  %v5162_v5 = vld [vmem:[#allocation7 + $0x10b8] sm:$0xff] }
 0x21c   : > { %8736 = vmatprep.subr.bf16.mxu0 %v8735_v27  ;;  %v1685_v27 = vsel %vm1585_vm2, %v1680_v23, %v1684_v17  ;;  %v3108_v23 = vld [vmem:[#allocation2 + $0xe8] sm:$0x1]  ;;  %v1694_v16 = vrot.slane %v1458_v55, 2  ;;  %v1457_v50 = vld [vmem:[#allocation2 + $0x200] sm:$0x3] }
 0x21d   : > { %5896 = vmatmul.mubr.f32.gmra.mrb[34].mxu1 %v1673_v63  ;;  %v3306_v63 = vrot.slane %v3104_v2, 1  ;;  %v5156_v17 = vld [vmem:[#allocation7 + $0x1088] sm:$0xff]  ;;  %v1460_v2 = vld [vmem:[#allocation2 + $0x218] sm:$0xfc]  ;;  %v3311_v32 = vrot.slane %v3108_v23, 1  ;;  %v1688_v9 = vsel %vm1585_vm2, %v1686_v62, %v1687_v54  ;;  %v3316_v62 = vrot.slane %v3110_v48, 1 }
 0x21e   : > { %7085 = vmatmul.mubr.f32.gmra.mrb[2].mxu0 %v3290_v8  ;;  %5901 = vmatprep.mubr.f32.mxu1 %v1681_v46  ;;  %v8743_v8 = vpack.c.bf16 %v5154_v36, %v5152_v30  ;;  %v5151_v46 = vld [vmem:[#allocation7 + $0x1060] sm:$0xff] }
 0x21f   : > { %7090 = vmatprep.mubr.f32.mxu0 %v3298_v53  ;;  %8738 = vmatpush1.bf16.msra.mxu0 %v8737_v51  ;;  %v5158_v51 = vld [vmem:[#allocation7 + $0x1098] sm:$0xff]  ;;  %v1683_v53 = vsel %vm1585_vm2, %v1677_v14, %v1682_v33  ;;  %v8745_v30 = vpack.c.bf16 %v5153_v22, %v5151_v46  ;;  %v3308_v36 = vsel %vm1104_vm1, %v3306_v63, %v3307_v59  ;;  %v5155_v33 = vld [vmem:[#allocation7 + $0x1080] sm:$0xff]  ;;  %v1459_v63 = vld [vmem:[#allocation2 + $0x210] sm:$0xfc]  ;;  %v1699_v22 = vrot.slane %v1460_v2, 2 }
 0x220   : > { %8740 = vmatprep.subr.bf16.mxu0 %v8739_v24  ;;  %v1691_v24 = vsel %vm1585_vm2, %v1689_v4, %v1690_v45  ;;  %v8747_v14 = vpack.c.bf16 %v5158_v51, %v5156_v17  ;;  %v13050_v4 = vrot.slane %v11325_v42, 1  ;;  %v3109_v17 = vld [vmem:[#allocation2 + $0xf0] sm:$0xfe]  ;;  %v3114_v2 = vld [vmem:[#allocation2 + $0x118] sm:$0x1] }
 0x221   : > { %5902 = vmatmul.mubr.f32.gmra.mrb[36].mxu1 %v1678_v56  ;;  %v3107_v56 = vld [vmem:[#allocation2 + $0xe0] sm:$0x1] }
 0x222   : > { %7091 = vmatmul.mubr.f32.gmra.mrb[4].mxu0 %v3295_v25  ;;  %5907 = vmatprep.mubr.f32.mxu1 %v1685_v27  ;;  %v11420_v25 = vld [vmem:[#allocation2 + $0x228] sm:$0xff]  ;;  %v5157_v27 = vld [vmem:[#allocation7 + $0x1090] sm:$0xff]  ;;  %v3305_v55 = vsel %vm1104_vm1, %v3303_v0, %v13050_v4  ;;  %v3309_v46 = vrot.slane %v3107_v56, 1  ;;  %v1464_v0 = vld [vmem:[#allocation2 + $0x238] sm:$0x3] }
 0x223   : > { %7096 = vmatprep.mubr.f32.mxu0 %v3302_v20  ;;  %8742 = vmatpush1.bf16.msra.mxu0 %v8741_v40  ;;  %v1695_v40 = vsel %vm1585_vm2, %v1690_v45, %v1694_v16  ;;  %v1692_v20 = vrot.slane %v1457_v50, 2  ;;  %v1700_v23 = vrot.slane %v11420_v25, 2  ;;  %v8749_v51 = vpack.c.bf16 %v5157_v27, %v5155_v33  ;;  %v5159_v16 = vld [vmem:[#allocation7 + $0x10a0] sm:$0xff]  ;;  %v5166_v4 = vld [vmem:[#allocation7 + $0x10d8] sm:$0xff] }
 0x224   : > { %8744 = vmatprep.subr.bf16.mxu0 %v8743_v8  ;;  %v11427_v8 = vld [vmem:[#allocation2 + $0x220] sm:$0xff]  ;;  %v8751_v45 = vpack.c.bf16 %v5162_v5, %v5160_v19  ;;  %v1696_v50 = vrot.slane %v1459_v63, 2  ;;  %v1704_v48 = vrot.slane %v1464_v0, 2  ;;  %v3113_v19 = vld [vmem:[#allocation2 + $0x110] sm:$0x1] }
 0x225   : > { %5908 = vmatmul.mubr.f32.gmra.mrb[38].mxu1 %v1683_v53  ;;  %v3312_v53 = vsel %vm1104_vm1, %v3307_v59, %v3311_v32  ;;  %v1697_v56 = vrot.slane %v11427_v8, 2  ;;  %v3313_v59 = vrot.slane %v3109_v17, 1  ;;  %v3314_v32 = vrot.slane %v11337_v7, 1  ;;  %v1466_v5 = vld [vmem:[#allocation2 + $0x248] sm:$0xfc]  ;;  %v5165_v63 = vld [vmem:[#allocation7 + $0x10d0] sm:$0xff] }
 0x226   : > { %7097 = vmatmul.mubr.f32.gmra.mrb[6].mxu0 %v3300_v37  ;;  %5913 = vmatprep.mubr.f32.mxu1 %v1691_v24  ;;  %v3317_v37 = vrot.slane %v11331_v11, 1  ;;  %v5161_v24 = vld [vmem:[#allocation7 + $0x10b0] sm:$0xff]  ;;  %v1701_v27 = vsel %vm1585_vm2, %v1699_v22, %v1700_v23  ;;  %v5168_v17 = vld [vmem:[#allocation7 + $0x10e8] sm:$0xff]  ;;  %v5170_v22 = vld [vmem:[#allocation7 + $0x10f8] sm:$0xff]  ;;  %v3319_v0 = vrot.slane %v3113_v19, 1 }
 0x227   : > { %7102 = vmatprep.mubr.f32.mxu0 %v3308_v36  ;;  %8746 = vmatpush1.bf16.msra.mxu0 %v8745_v30  ;;  %v5164_v36 = vld [vmem:[#allocation7 + $0x10c8] sm:$0xff]  ;;  %v1693_v30 = vsel %vm1585_vm2, %v1687_v54, %v1692_v20  ;;  %v1463_v11 = vld [vmem:[#allocation2 + $0x230] sm:$0x3]  ;;  %v5163_v20 = vld [vmem:[#allocation7 + $0x10c0] sm:$0xff] }
 0x228   : > { %8748 = vmatprep.subr.bf16.mxu0 %v8747_v14  ;;  %v13051_v14 = vrot.slane %v11325_v42, 1  ;;  %v3318_v54 = vsel %vm1104_vm1, %v3316_v62, %v3317_v37  ;;  %v8755_v7 = vpack.c.bf16 %v5166_v4, %v5164_v36  ;;  %v1698_v42 = vsel %vm1585_vm2, %v1696_v50, %v1697_v56  ;;  %v1470_v50 = vld [vmem:[#allocation2 + $0x268] sm:$0x3]  ;;  %v5169_v19 = vld [vmem:[#allocation7 + $0x10f0] sm:$0xff] }
 0x229   : > { %5914 = vmatmul.mubr.f32.gmra.mrb[40].mxu1 %v1688_v9  ;;  %v11439_v9 = vld [vmem:[#allocation2 + $0x258] sm:$0xff]  ;;  %v3315_v62 = vsel %vm1104_vm1, %v3313_v59, %v3314_v32  ;;  %v8757_v36 = vpack.c.bf16 %v5165_v63, %v5163_v20  ;;  %v1714_v20 = vrot.slane %v1470_v50, 2  ;;  %v1469_v63 = vld [vmem:[#allocation2 + $0x260] sm:$0x3] }
 0x22a   : > { %7103 = vmatmul.mubr.f32.gmra.mrb[8].mxu0 %v3305_v55  ;;  %5919 = vmatprep.mubr.f32.mxu1 %v1695_v40  ;;  %v3310_v33 = vsel %vm1104_vm1, %v13051_v14, %v3309_v46  ;;  %v8753_v55 = vpack.c.bf16 %v5161_v24, %v5159_v16  ;;  %v3321_v40 = vrot.slane %v3114_v2, 1  ;;  %v3116_v46 = vld [vmem:[#allocation2 + $0x128] sm:$0xfe]  ;;  %v1709_v14 = vrot.slane %v1466_v5, 2  ;;  %v11444_v16 = vld [vmem:[#allocation2 + $0x250] sm:$0xff] }
 0x22b   : > { %7108 = vmatprep.mubr.f32.mxu0 %v3312_v53  ;;  %8750 = vmatpush1.bf16.msra.mxu0 %v8749_v51  ;;  %v1702_v53 = vrot.slane %v1463_v11, 2  ;;  %v1710_v51 = vrot.slane %v11439_v9, 2  ;;  %v1465_v24 = vld [vmem:[#allocation2 + $0x240] sm:$0xfc]  ;;  %v3327_v11 = vrot.slane %v11343_v47, 1  ;;  %v1707_v5 = vrot.slane %v11444_v16, 2 }
 0x22c   : > { %8752 = vmatprep.subr.bf16.mxu0 %v8751_v45  ;;  %v1705_v45 = vsel %vm1585_vm2, %v1700_v23, %v1704_v48  ;;  %v3115_v2 = vld [vmem:[#allocation2 + $0x120] sm:$0xfe]  ;;  %v3322_v4 = vsel %vm1104_vm1, %v3317_v37, %v3321_v40  ;;  %v3120_v23 = vld [vmem:[#allocation2 + $0x148] sm:$0x1]  ;;  %v1706_v37 = vrot.slane %v1465_v24, 2  ;;  %v3320_v47 = vsel %vm1104_vm1, %v3314_v32, %v3319_v0  ;;  %v5178_v32 = vld [vmem:[#allocation7 + $0x1138] sm:$0xff] }
 0x22d   : > { %5920 = vmatmul.mubr.f32.gmra.mrb[42].mxu1 %v1693_v30  ;;  %v3326_v30 = vrot.slane %v3116_v46, 1  ;;  %v5172_v48 = vld [vmem:[#allocation7 + $0x1108] sm:$0xff]  ;;  %v3323_v40 = vrot.slane %v3115_v2, 1  ;;  %v1472_v46 = vld [vmem:[#allocation2 + $0x278] sm:$0xfc]  ;;  %v3331_v59 = vrot.slane %v3120_v23, 1 }
 0x22e   : > { %7109 = vmatmul.mubr.f32.gmra.mrb[10].mxu0 %v3310_v33  ;;  %5925 = vmatprep.mubr.f32.mxu1 %v1701_v27  ;;  %v8759_v33 = vpack.c.bf16 %v5170_v22, %v5168_v17  ;;  %v5167_v27 = vld [vmem:[#allocation7 + $0x10e0] sm:$0xff]  ;;  %v3122_v24 = vld [vmem:[#allocation2 + $0x158] sm:$0xfe]  ;;  %v5176_v2 = vld [vmem:[#allocation7 + $0x1128] sm:$0xff]  ;;  %v1708_v0 = vsel %vm1585_vm2, %v1706_v37, %v1707_v5 }
 0x22f   : > { %7114 = vmatprep.mubr.f32.mxu0 %v3318_v54  ;;  %8754 = vmatpush1.bf16.msra.mxu0 %v8753_v55  ;;  %v5174_v54 = vld [vmem:[#allocation7 + $0x1118] sm:$0xff]  ;;  %v1703_v55 = vsel %vm1585_vm2, %v1697_v56, %v1702_v53  ;;  %v8761_v17 = vpack.c.bf16 %v5169_v19, %v5167_v27  ;;  %v3328_v22 = vsel %vm1104_vm1, %v3326_v30, %v3327_v11  ;;  %v5171_v53 = vld [vmem:[#allocation7 + $0x1100] sm:$0xff]  ;;  %v1471_v30 = vld [vmem:[#allocation2 + $0x270] sm:$0xfc]  ;;  %v1719_v19 = vrot.slane %v1472_v46, 2 }
 0x230   : > { %8756 = vmatprep.subr.bf16.mxu0 %v8755_v7  ;;  %v1711_v7 = vsel %vm1585_vm2, %v1709_v14, %v1710_v51  ;;  %v8763_v56 = vpack.c.bf16 %v5174_v54, %v5172_v48  ;;  %v13052_v14 = vrot.slane %v11349_v28, 1  ;;  %v3121_v48 = vld [vmem:[#allocation2 + $0x150] sm:$0xfe]  ;;  %v3336_v37 = vrot.slane %v3122_v24, 1  ;;  %v3126_v46 = vld [vmem:[#allocation2 + $0x178] sm:$0x1] }
 0x231   : > { %5926 = vmatmul.mubr.f32.gmra.mrb[44].mxu1 %v1698_v42  ;;  %v3119_v42 = vld [vmem:[#allocation2 + $0x140] sm:$0x1] }
 0x232   : > { %7115 = vmatmul.mubr.f32.gmra.mrb[12].mxu0 %v3315_v62  ;;  %5931 = vmatprep.mubr.f32.mxu1 %v1705_v45  ;;  %v11456_v62 = vld [vmem:[#allocation2 + $0x288] sm:$0xff]  ;;  %v5173_v45 = vld [vmem:[#allocation7 + $0x1110] sm:$0xff]  ;;  %v3325_v50 = vsel %vm1104_vm1, %v3323_v40, %v13052_v14  ;;  %v3329_v27 = vrot.slane %v3119_v42, 1  ;;  %v1476_v40 = vld [vmem:[#allocation2 + $0x298] sm:$0x3] }
 0x233   : > { %7120 = vmatprep.mubr.f32.mxu0 %v3322_v4  ;;  %8758 = vmatpush1.bf16.msra.mxu0 %v8757_v36  ;;  %v1715_v36 = vsel %vm1585_vm2, %v1710_v51, %v1714_v20  ;;  %v1712_v4 = vrot.slane %v1469_v63, 2  ;;  %v1720_v23 = vrot.slane %v11456_v62, 2  ;;  %v8765_v54 = vpack.c.bf16 %v5173_v45, %v5171_v53  ;;  %v5175_v20 = vld [vmem:[#allocation7 + $0x1120] sm:$0xff]  ;;  %v5182_v14 = vld [vmem:[#allocation7 + $0x1158] sm:$0xff] }
 0x234   : > { %8760 = vmatprep.subr.bf16.mxu0 %v8759_v33  ;;  %v11463_v33 = vld [vmem:[#allocation2 + $0x280] sm:$0xff]  ;;  %v8767_v51 = vpack.c.bf16 %v5178_v32, %v5176_v2  ;;  %v1716_v63 = vrot.slane %v1471_v30, 2  ;;  %v1724_v24 = vrot.slane %v1476_v40, 2  ;;  %v3125_v2 = vld [vmem:[#allocation2 + $0x170] sm:$0x1] }
 0x235   : > { %5932 = vmatmul.mubr.f32.gmra.mrb[46].mxu1 %v1703_v55  ;;  %v3332_v55 = vsel %vm1104_vm1, %v3327_v11, %v3331_v59  ;;  %v1717_v42 = vrot.slane %v11463_v33, 2  ;;  %v3333_v11 = vrot.slane %v3121_v48, 1  ;;  %v3334_v59 = vrot.slane %v11361_v41, 1  ;;  %v1478_v32 = vld [vmem:[#allocation2 + $0x2a8] sm:$0xfc]  ;;  %v5181_v30 = vld [vmem:[#allocation7 + $0x1150] sm:$0xff] }
 0x236   : > { %7121 = vmatmul.mubr.f32.gmra.mrb[14].mxu0 %v3320_v47  ;;  %5937 = vmatprep.mubr.f32.mxu1 %v1711_v7  ;;  %v3337_v47 = vrot.slane %v11355_v34, 1  ;;  %v5177_v7 = vld [vmem:[#allocation7 + $0x1130] sm:$0xff]  ;;  %v1721_v45 = vsel %vm1585_vm2, %v1719_v19, %v1720_v23  ;;  %v5184_v48 = vld [vmem:[#allocation7 + $0x1168] sm:$0xff]  ;;  %v5186_v19 = vld [vmem:[#allocation7 + $0x1178] sm:$0xff]  ;;  %v3339_v40 = vrot.slane %v3125_v2, 1 }
 0x237   : > { %7126 = vmatprep.mubr.f32.mxu0 %v3328_v22  ;;  %8762 = vmatpush1.bf16.msra.mxu0 %v8761_v17  ;;  %v5180_v22 = vld [vmem:[#allocation7 + $0x1148] sm:$0xff]  ;;  %v1713_v17 = vsel %vm1585_vm2, %v1707_v5, %v1712_v4  ;;  %v1475_v34 = vld [vmem:[#allocation2 + $0x290] sm:$0x3]  ;;  %v5179_v4 = vld [vmem:[#allocation7 + $0x1140] sm:$0xff] }
 0x238   : > { %8764 = vmatprep.subr.bf16.mxu0 %v8763_v56  ;;  %v13053_v56 = vrot.slane %v11349_v28, 1  ;;  %v3338_v5 = vsel %vm1104_vm1, %v3336_v37, %v3337_v47  ;;  %v8771_v41 = vpack.c.bf16 %v5182_v14, %v5180_v22  ;;  %v1718_v28 = vsel %vm1585_vm2, %v1716_v63, %v1717_v42  ;;  %v1482_v63 = vld [vmem:[#allocation2 + $0x2c8] sm:$0x3]  ;;  %v5185_v2 = vld [vmem:[#allocation7 + $0x1170] sm:$0xff] }
 0x239   : > { %5938 = vmatmul.mubr.f32.gmra.mrb[48].mxu1 %v1708_v0  ;;  %v11475_v0 = vld [vmem:[#allocation2 + $0x2b8] sm:$0xff]  ;;  %v3335_v37 = vsel %vm1104_vm1, %v3333_v11, %v3334_v59  ;;  %v8773_v22 = vpack.c.bf16 %v5181_v30, %v5179_v4  ;;  %v3344_v11 = vrot.slane %v11372_v10, 1  ;;  %v1734_v4 = vrot.slane %v1482_v63, 2  ;;  %v1481_v30 = vld [vmem:[#allocation2 + $0x2c0] sm:$0x3] }
 0x23a   : > { %7127 = vmatmul.mubr.f32.gmra.mrb[16].mxu0 %v3325_v50  ;;  %5943 = vmatprep.mubr.f32.mxu1 %v1715_v36  ;;  %v3330_v53 = vsel %vm1104_vm1, %v13053_v56, %v3329_v27  ;;  %v8769_v50 = vpack.c.bf16 %v5177_v7, %v5175_v20  ;;  %v3341_v36 = vrot.slane %v3126_v46, 1  ;;  %v3128_v27 = vld [vmem:[#allocation2 + $0x188] sm:$0xfe]  ;;  %v1729_v56 = vrot.slane %v1478_v32, 2  ;;  %v11480_v20 = vld [vmem:[#allocation2 + $0x2b0] sm:$0xff] }
 0x23b   : > { %7132 = vmatprep.mubr.f32.mxu0 %v3332_v55  ;;  %8766 = vmatpush1.bf16.msra.mxu0 %v8765_v54  ;;  %v1722_v55 = vrot.slane %v1475_v34, 2  ;;  %v1730_v54 = vrot.slane %v11475_v0, 2  ;;  %v1477_v7 = vld [vmem:[#allocation2 + $0x2a0] sm:$0xfc]  ;;  %v3347_v34 = vrot.slane %v11366_v12, 1  ;;  %v1727_v32 = vrot.slane %v11480_v20, 2 }
 0x23c   : > { %8768 = vmatprep.subr.bf16.mxu0 %v8767_v51  ;;  %v1725_v51 = vsel %vm1585_vm2, %v1720_v23, %v1724_v24  ;;  %v3127_v46 = vld [vmem:[#allocation2 + $0x180] sm:$0xfe]  ;;  %v3342_v14 = vsel %vm1104_vm1, %v3337_v47, %v3341_v36  ;;  %v3132_v23 = vld [vmem:[#allocation2 + $0x1a8] sm:$0x1]  ;;  %v1726_v47 = vrot.slane %v1477_v7, 2  ;;  %v3340_v12 = vsel %vm1104_vm1, %v3334_v59, %v3339_v40  ;;  %v5194_v59 = vld [vmem:[#allocation7 + $0x11b8] sm:$0xff] }
 0x23d   : > { %5944 = vmatmul.mubr.f32.gmra.mrb[50].mxu1 %v1713_v17  ;;  %v3346_v17 = vrot.slane %v3128_v27, 1  ;;  %v5188_v24 = vld [vmem:[#allocation7 + $0x1188] sm:$0xff]  ;;  %v3343_v36 = vrot.slane %v3127_v46, 1  ;;  %v1484_v27 = vld [vmem:[#allocation2 + $0x2d8] sm:$0xfc] }
 0x23e   : > { %7133 = vmatmul.mubr.f32.gmra.mrb[18].mxu0 %v3330_v53  ;;  %5949 = vmatprep.mubr.f32.mxu1 %v1721_v45  ;;  %v8775_v53 = vpack.c.bf16 %v5186_v19, %v5184_v48  ;;  %v5183_v45 = vld [vmem:[#allocation7 + $0x1160] sm:$0xff]  ;;  %v3351_v19 = vrot.slane %v3132_v23, 1  ;;  %v3134_v7 = vld [vmem:[#allocation2 + $0x1b8] sm:$0xfe]  ;;  %v5192_v46 = vld [vmem:[#allocation7 + $0x11a8] sm:$0xff]  ;;  %v1728_v40 = vsel %vm1585_vm2, %v1726_v47, %v1727_v32  ;;  %v3357_v47 = vrot.slane %v11382_v60, 1 }
 0x23f   : > { %7138 = vmatprep.mubr.f32.mxu0 %v3338_v5  ;;  %8770 = vmatpush1.bf16.msra.mxu0 %v8769_v50  ;;  %v5190_v5 = vld [vmem:[#allocation7 + $0x1198] sm:$0xff]  ;;  %v1723_v50 = vsel %vm1585_vm2, %v1717_v42, %v1722_v55  ;;  %v8777_v10 = vpack.c.bf16 %v5185_v2, %v5183_v45  ;;  %v3348_v48 = vsel %vm1104_vm1, %v3346_v17, %v3347_v34  ;;  %v5187_v55 = vld [vmem:[#allocation7 + $0x1180] sm:$0xff]  ;;  %v1483_v45 = vld [vmem:[#allocation2 + $0x2d0] sm:$0xfc] }
 0x240   : > { %8772 = vmatprep.subr.bf16.mxu0 %v8771_v41  ;;  %v1731_v41 = vsel %vm1585_vm2, %v1729_v56, %v1730_v54  ;;  %v8779_v42 = vpack.c.bf16 %v5190_v5, %v5188_v24  ;;  %v1732_v56 = vrot.slane %v1481_v30, 2  ;;  %v1735_v17 = vsel %vm1585_vm2, %v1730_v54, %v1734_v4  ;;  %v11498_v2 = vld [vmem:[#allocation2 + $0x2e0] sm:$0xff]  ;;  %v3133_v23 = vld [vmem:[#allocation2 + $0x1b0] sm:$0xfe]  ;;  %v3138_v4 = vld [vmem:[#allocation2 + $0x1d8] sm:$0x1] }
 0x241   : > { %5950 = vmatmul.mubr.f32.gmra.mrb[52].mxu1 %v1718_v28  ;;  %v3131_v28 = vld [vmem:[#allocation2 + $0x1a0] sm:$0x1]  ;;  %v3352_v5 = vsel %vm1104_vm1, %v3347_v34, %v3351_v19  ;;  %v3354_v54 = vrot.slane %v11389_v3, 1  ;;  %v1737_v60 = vrot.slane %v11498_v2, 2 }
 0x242   : > { %7139 = vmatmul.mubr.f32.gmra.mrb[20].mxu0 %v3335_v37  ;;  %5955 = vmatprep.mubr.f32.mxu1 %v1725_v51  ;;  %v11492_v37 = vld [vmem:[#allocation2 + $0x2e8] sm:$0xff]  ;;  %v5189_v51 = vld [vmem:[#allocation7 + $0x1190] sm:$0xff]  ;;  %v3349_v63 = vrot.slane %v3131_v28, 1  ;;  %v5191_v30 = vld [vmem:[#allocation7 + $0x11a0] sm:$0xff] }
 0x243   : > { %7144 = vmatprep.mubr.f32.mxu0 %v3342_v14  ;;  %8774 = vmatpush1.bf16.msra.mxu0 %v8773_v22  ;;  %v1739_v22 = vrot.slane %v1484_v27, 2  ;;  %v3345_v14 = vsel %vm1104_vm1, %v3343_v36, %v3344_v11  ;;  %v8781_v24 = vpack.c.bf16 %v5189_v51, %v5187_v55  ;;  %v5193_v36 = vld [vmem:[#allocation7 + $0x11b0] sm:$0xff]  ;;  %v5196_v28 = vld [vmem:[#allocation7 + $0x11c8] sm:$0xff]  ;;  %v5198_v27 = vld [vmem:[#allocation7 + $0x11d8] sm:$0xff] }
 0x244   : > { %8776 = vmatprep.subr.bf16.mxu0 %v8775_v53  ;;  %v1740_v53 = vrot.slane %v11492_v37, 2  ;;  %v3350_v34 = vsel %vm1104_vm1, %v3344_v11, %v3349_v63  ;;  %v1487_v51 = vld [vmem:[#allocation2 + $0x2f0] sm:$0x3]  ;;  %v8785_v3 = vpack.c.bf16 %v5193_v36, %v5191_v30  ;;  %v3140_v11 = vld [vmem:[#allocation2 + $0x1e8] sm:$0xfe] }
 0x245   : > { %5956 = vmatmul.mubr.f32.gmra.mrb[54].mxu1 %v1723_v50  ;;  %v3356_v50 = vrot.slane %v3134_v7, 1  ;;  %v5200_v63 = vld [vmem:[#allocation7 + $0x11e8] sm:$0xff]  ;;  %v3139_v30 = vld [vmem:[#allocation2 + $0x1e0] sm:$0xfe] }
 0x246   : > { %7145 = vmatmul.mubr.f32.gmra.mrb[22].mxu0 %v3340_v12  ;;  %5961 = vmatprep.mubr.f32.mxu1 %v1731_v41  ;;  %v1488_v12 = vld [vmem:[#allocation2 + $0x2f8] sm:$0x3]  ;;  %v8783_v41 = vpack.c.bf16 %v5194_v59, %v5192_v46  ;;  %v1741_v19 = vsel %vm1585_vm2, %v1739_v22, %v1740_v53  ;;  %v3361_v46 = vrot.slane %v3138_v4, 1  ;;  %v3137_v59 = vld [vmem:[#allocation2 + $0x1d0] sm:$0x1]  ;;  %v5199_v4 = vld [vmem:[#allocation7 + $0x11e0] sm:$0xff] }
 0x247   : > { %7150 = vmatprep.mubr.f32.mxu0 %v3348_v48  ;;  %8778 = vmatpush1.bf16.msra.mxu0 %v8777_v10  ;;  %v1733_v10 = vsel %vm1585_vm2, %v1727_v32, %v1732_v56  ;;  %v1736_v48 = vrot.slane %v1483_v45, 2  ;;  %v1744_v55 = vrot.slane %v1488_v12, 2  ;;  %v3358_v7 = vsel %vm1104_vm1, %v3356_v50, %v3357_v47  ;;  %v5195_v32 = vld [vmem:[#allocation7 + $0x11c0] sm:$0xff]  ;;  %v5197_v56 = vld [vmem:[#allocation7 + $0x11d0] sm:$0xff] }
 0x248   : > { %8780 = vmatprep.subr.bf16.mxu0 %v8779_v42  ;;  %v3353_v42 = vrot.slane %v3133_v23, 1  ;;  %v3362_v50 = vsel %vm1104_vm1, %v3357_v47, %v3361_v46  ;;  %v3366_v12 = vrot.slane %v3140_v11, 1  ;;  %v3364_v47 = vrot.slane %v11408_v61, 1 }
 0x249   : > { %5962 = vmatmul.mubr.f32.gmra.mrb[56].mxu1 %v1728_v40  ;;  %v8787_v40 = vpack.c.bf16 %v5198_v27, %v5196_v28  ;;  %v1738_v22 = vsel %vm1585_vm2, %v1736_v48, %v1737_v60  ;;  %v1745_v23 = vsel %vm1585_vm2, %v1740_v53, %v1744_v55  ;;  %v5201_v28 = vld [vmem:[#allocation7 + $0x11f0] sm:$0xff]  ;;  %v3144_v27 = vld [vmem:[#allocation2 + $0x208] sm:$0x1]  ;;  %v3363_v48 = vrot.slane %v3139_v30, 1  ;;  %v3143_v55 = vld [vmem:[#allocation2 + $0x200] sm:$0x1] }
 0x24a   : > { %7151 = vmatmul.mubr.f32.gmra.mrb[24].mxu0 %v3345_v14  ;;  %5967 = vmatprep.mubr.f32.mxu1 %v1735_v17  ;;  %v5202_v14 = vld [vmem:[#allocation7 + $0x11f8] sm:$0xff]  ;;  %v1742_v17 = vrot.slane %v1487_v51, 2  ;;  %v3355_v45 = vsel %vm1104_vm1, %v3353_v42, %v3354_v54  ;;  %v3371_v42 = vrot.slane %v3144_v27, 1  ;;  %v3156_v30 = vld [vmem:[#allocation2 + $0x268] sm:$0x1]  ;;  %v3384_v27 = vrot.slane %v11444_v16, 1 }
 0x24b   : > { %7156 = vmatprep.mubr.f32.mxu0 %v3352_v5  ;;  %8782 = vmatpush1.bf16.msra.mxu0 %v8781_v24  ;;  %v3359_v24 = vrot.slane %v3137_v59, 1  ;;  %v8789_v5 = vpack.c.bf16 %v5197_v56, %v5195_v32  ;;  %v8791_v36 = vpack.c.bf16 %v5202_v14, %v5200_v63  ;;  %v3146_v51 = vld [vmem:[#allocation2 + $0x218] sm:$0xfe]  ;;  %v3377_v59 = vrot.slane %v11420_v25, 1  ;;  %v3150_v32 = vld [vmem:[#allocation2 + $0x238] sm:$0x1] }
 0x24c   : > { %8784 = vmatprep.subr.bf16.mxu0 %v8783_v41  ;;  %v3367_v41 = vrot.slane %v11403_v38, 1  ;;  %v8793_v38 = vpack.c.bf16 %v5201_v28, %v5199_v4  ;;  %v3376_v46 = vrot.slane %v3146_v51, 1  ;;  %v1876_v56 = vld [vmem:[#allocation2 + $0x40] sm:$0xff]  ;;  %v1879_v63 = vld [vmem:[#allocation2 + $0x68] sm:$0xff]  ;;  %v3381_v25 = vrot.slane %v3150_v32, 1  ;;  %v1883_v4 = vld [vmem:[#allocation2 + $0x98] sm:$0xff] }
 0x24d   : > { %5968 = vmatmul.mubr.f32.gmra.mrb[58].mxu1 %v1733_v10  ;;  %v1743_v10 = vsel %vm1585_vm2, %v1737_v60, %v1742_v17  ;;  %v3360_v53 = vsel %vm1104_vm1, %v3354_v54, %v3359_v24  ;;  %v3365_v60 = vsel %vm1104_vm1, %v3363_v48, %v3364_v47  ;;  %v3369_v54 = vrot.slane %v3143_v55, 1  ;;  %v11549_v55 = vld [vmem:[#allocation2 + $0xa0] sm:$0xff] }
 0x24e   : > { %7157 = vmatmul.mubr.f32.gmra.mrb[26].mxu0 %v3350_v34  ;;  %5973 = vmatprep.mubr.f32.mxu1 %v1741_v19  ;;  %v1875_v34 = vld [vmem:[#allocation2 + $0x38] sm:$0xff]  ;;  %v3368_v19 = vsel %vm1104_vm1, %v3366_v12, %v3367_v41  ;;  %v3372_v61 = vsel %vm1104_vm1, %v3367_v41, %v3371_v42  ;;  %v3378_v17 = vsel %vm1104_vm1, %v3376_v46, %v3377_v59  ;;  %v3151_v41 = vld [vmem:[#allocation2 + $0x240] sm:$0xfe]  ;;  %v3407_v32 = vrot.slane %v11475_v0, 1 }
 0x24f   : > { %7162 = vmatprep.mubr.f32.mxu0 %v3358_v7  ;;  %8786 = vmatpush1.bf16.msra.mxu0 %v8785_v3  ;;  %v1874_v3 = vld [vmem:[#allocation2 + $0x30] sm:$0xff]  ;;  %v1877_v7 = vld [vmem:[#allocation2 + $0x48] sm:$0xff]  ;;  %v3370_v11 = vsel %vm1104_vm1, %v3364_v47, %v3369_v54  ;;  %v3383_v28 = vrot.slane %v3151_v41, 1  ;;  %v3162_v42 = vld [vmem:[#allocation2 + $0x298] sm:$0x1] }
 0x250   : > { %8788 = vmatprep.subr.bf16.mxu0 %v8787_v40  ;;  %v3145_v40 = vld [vmem:[#allocation2 + $0x210] sm:$0xfe]  ;;  %v11542_v47 = vld [vmem:[#allocation2 + $0xa8] sm:$0xff]  ;;  %v3401_v54 = vrot.slane %v3162_v42, 1 }
 0x251   : > { %5974 = vmatmul.mubr.f32.gmra.mrb[60].mxu1 %v1738_v22  ;;  %v3373_v14 = vrot.slane %v3145_v40, 1  ;;  %v3374_v22 = vrot.slane %v11427_v8, 1  ;;  %v3382_v8 = vsel %vm1104_vm1, %v3377_v59, %v3381_v25  ;;  %v3385_v48 = vsel %vm1104_vm1, %v3383_v28, %v3384_v27  ;;  %v11558_v59 = vld [vmem:[#allocation2 + $0xd8] sm:$0xff]  ;;  %v1895_v41 = vld [vmem:[#allocation2 + $0x128] sm:$0xff] }
 0x252   : > { %7163 = vmatmul.mubr.f32.gmra.mrb[28].mxu0 %v3355_v45  ;;  %5979 = vmatprep.mubr.f32.mxu1 %v1745_v23  ;;  %v3149_v45 = vld [vmem:[#allocation2 + $0x230] sm:$0x1]  ;;  %v3152_v23 = vld [vmem:[#allocation2 + $0x248] sm:$0xfe]  ;;  %v3170_v25 = vld [vmem:[#allocation2 + $0x2d8] sm:$0xfe] }
 0x253   : > { %7168 = vmatprep.mubr.f32.mxu0 %v3362_v50  ;;  %8790 = vmatpush1.bf16.msra.mxu0 %v8789_v5  ;;  %v3375_v24 = vsel %vm1104_vm1, %v3373_v14, %v3374_v22  ;;  %v11527_v5 = vld [vmem:[#allocation2 + $0x78] sm:$0xff]  ;;  %v3379_v50 = vrot.slane %v3149_v45, 1  ;;  %v3386_v12 = vrot.slane %v3152_v23, 1  ;;  %v1890_v45 = vld [vmem:[#allocation2 + $0xf0] sm:$0xff]  ;;  %v3176_v28 = vld [vmem:[#allocation2 + $0x308] sm:$0xfe] }
 0x254   : > { %8792 = vmatprep.subr.bf16.mxu0 %v8791_v36  ;;  %v11533_v36 = vld [vmem:[#allocation2 + $0x70] sm:$0xff]  ;;  %v1891_v14 = vld [vmem:[#allocation2 + $0xf8] sm:$0xff] }
 0x255   : > { %5980 = vmatmul.mubr.f32.gmra.mrb[62].mxu1 %v1743_v10  ;;  %v3155_v10 = vld [vmem:[#allocation2 + $0x260] sm:$0x1] }
 0x256   : > { %7169 = vmatmul.mubr.f32.gmra.mrb[30].mxu0 %v3360_v53  ;;  %6050 = vmatprep.mubr.f32.mxu1 %v1875_v34  ;;  %v3158_v53 = vld [vmem:[#allocation2 + $0x278] sm:$0xfe]  ;;  %v1882_v34 = vld [vmem:[#allocation2 + $0x90] sm:$0xff]  ;;  %v3389_v16 = vrot.slane %v3155_v10, 1 }
 0x257   : > { %7174 = vmatprep.mubr.f32.mxu0 %v3368_v19  ;;  %8794 = vmatpush1.bf16.msra.mxu0 %v8793_v38  ;;  %v3396_v38 = vrot.slane %v3158_v53, 1  ;;  %v3397_v19 = vrot.slane %v11456_v62, 1  ;;  %v13055_v10 = vld [vmem:[#allocation18_spill] sm:$0xff] }
 0x258   : > { %v3390_v51 = vsel %vm1104_vm1, %v3384_v27, %v3389_v16  ;;  %v11589_v27 = vld [vmem:[#allocation2 + $0x318] sm:$0xff]  ;;  %v3175_v16 = vld [vmem:[#allocation2 + $0x300] sm:$0xfe] }
 0x259   : > { %6051 = vmatmul.mubr.f32.vlgmr.msra.gmra.mrb[0].mxu1 %v1874_v3  ;;  %v1887_v3 = vld [vmem:[#allocation2 + $0xc8] sm:$0xff]  ;;  %v3398_v62 = vsel %vm1104_vm1, %v3396_v38, %v3397_v19  ;;  %v13056_v38 = vld [vmem:[#allocation19_spill] sm:$0xff] }
 0x25a   : > { %7175 = vmatmul.mubr.f32.gmra.mrb[32].mxu0 %v3365_v60  ;;  %8875 = vmatpush1.bf16.msra.mxu1 %v10162_v13  ;;  %v1878_v13 = vld [vmem:[#allocation2 + $0x60] sm:$0xff]  ;;  %v3394_v60 = vrot.slane %v11463_v33, 1 }
 0x25b   : > { %6056 = vmatprep.mubr.f32.mxu1 %v1877_v7  ;;  %7180 = vmatprep.mubr.f32.mxu0 %v3372_v61  ;;  %v3164_v7 = vld [vmem:[#allocation2 + $0x2a8] sm:$0xfe]  ;;  %v1886_v61 = vld [vmem:[#allocation2 + $0xc0] sm:$0xff] }
 0x25c   : > { %8860 = vmatprep.subr.bf16.mxu1 %v10165_v18  ;;  %v3387_v18 = vrot.slane %v11439_v9, 1  ;;  %v3406_v40 = vrot.slane %v3164_v7, 1  ;;  %v13058_v7 = vld [vmem:[#allocation21_spill] sm:$0xff] }
 0x25d   : > { %6057 = vmatmul.mubr.f32.gmra.mrb[2].mxu1 %v1876_v56  ;;  %v3168_v56 = vld [vmem:[#allocation2 + $0x2c8] sm:$0x1] }
 0x25e   : > { %7181 = vmatmul.mubr.f32.gmra.mrb[34].mxu0 %v3370_v11  ;;  %6062 = vmatprep.mubr.f32.mxu1 %v1879_v63  ;;  %v3388_v9 = vsel %vm1104_vm1, %v3386_v12, %v3387_v18  ;;  %v11565_v11 = vld [vmem:[#allocation2 + $0xd0] sm:$0xff]  ;;  %v3408_v0 = vsel %vm1104_vm1, %v3406_v40, %v3407_v32  ;;  %v11581_v12 = vld [vmem:[#allocation2 + $0x100] sm:$0xff] }
 0x25f   : > { %7186 = vmatprep.mubr.f32.mxu0 %v3378_v17  ;;  %8876 = vmatpush1.bf16.msra.mxu1 %v10169_v26  ;;  %v3380_v26 = vsel %vm1104_vm1, %v3374_v22, %v3379_v50  ;;  %v3404_v22 = vrot.slane %v11480_v20, 1  ;;  %v3411_v17 = vrot.slane %v3168_v56, 1  ;;  %v3417_v50 = vrot.slane %v11492_v37, 1 }
 0x260   : > { %8861 = vmatprep.subr.bf16.mxu1 %v10171_v31  ;;  %v3391_v31 = vrot.slane %v3156_v30, 1  ;;  %v3414_v30 = vrot.slane %v11498_v2, 1  ;;  %v11592_v2 = vld [vmem:[#allocation2 + $0x138] sm:$0xff] }
 0x261   : > { %6063 = vmatmul.mubr.f32.gmra.mrb[4].mxu1 %v1878_v13  ;;  %v11574_v13 = vld [vmem:[#allocation2 + $0x108] sm:$0xff] }
 0x262   : > { %7187 = vmatmul.mubr.f32.gmra.mrb[36].mxu0 %v3375_v24  ;;  %6068 = vmatprep.mubr.f32.mxu1 %v11527_v5  ;;  %v3416_v24 = vrot.slane %v3170_v25, 1  ;;  %v1903_v25 = vld [vmem:[#allocation2 + $0x188] sm:$0xff] }
 0x263   : > { %7192 = vmatprep.mubr.f32.mxu0 %v3382_v8  ;;  %8877 = vmatpush1.bf16.msra.mxu1 %v10174_v39  ;;  %v3392_v39 = vsel %vm1104_vm1, %v3387_v18, %v3391_v31  ;;  %v3174_v8 = vld [vmem:[#allocation2 + $0x2f8] sm:$0x1] }
 0x264   : > { %8862 = vmatprep.subr.bf16.mxu1 %v10177_v44  ;;  %v3157_v44 = vld [vmem:[#allocation2 + $0x270] sm:$0xfe]  ;;  %v3418_v37 = vsel %vm1104_vm1, %v3416_v24, %v3417_v50  ;;  %v3185_v24 = vld [vmem:[#allocation2 + $0x350] sm:$0x1] }
 0x265   : > { %6069 = vmatmul.mubr.f32.gmra.mrb[6].mxu1 %v11533_v36 }
 0x266   : > { %7193 = vmatmul.mubr.f32.gmra.mrb[38].mxu0 %v3380_v26  ;;  %6074 = vmatprep.mubr.f32.mxu1 %v1883_v4  ;;  %v3421_v26 = vrot.slane %v3174_v8, 1  ;;  %v13054_v4 = vld [vmem:[#allocation17_spill] sm:$0xff]  ;;  %v1902_v8 = vld [vmem:[#allocation2 + $0x180] sm:$0xff] }
 0x267   : > { %7198 = vmatprep.mubr.f32.mxu0 %v3388_v9  ;;  %8878 = vmatpush1.bf16.msra.mxu1 %v10180_v52  ;;  %v3393_v52 = vrot.slane %v3157_v44, 1  ;;  %v1894_v9 = vld [vmem:[#allocation2 + $0x120] sm:$0xff]  ;;  %v11601_v44 = vld [vmem:[#allocation2 + $0x130] sm:$0xff] }
 0x268   : > { %8863 = vmatprep.subr.bf16.mxu1 %v10183_v57  ;;  %v3161_v57 = vld [vmem:[#allocation2 + $0x290] sm:$0x1]  ;;  %v3422_v53 = vsel %vm1104_vm1, %v3417_v50, %v3421_v26  ;;  %v13062_v50 = vld [vmem:[#allocation25_spill] sm:$0xff] }
 0x269   : > { %6075 = vmatmul.mubr.f32.gmra.mrb[8].mxu1 %v1882_v34  ;;  %v3395_v46 = vsel %vm1104_vm1, %v3393_v52, %v3394_v60  ;;  %v3399_v33 = vrot.slane %v3161_v57, 1  ;;  %v3426_v34 = vrot.slane %v3176_v28, 1  ;;  %v3179_v57 = vld [vmem:[#allocation2 + $0x320] sm:$0x1]  ;;  %v13064_v28 = vld [vmem:[#allocation27_spill] sm:$0xff] }
 0x26a   : > { %7199 = vmatmul.mubr.f32.gmra.mrb[40].mxu0 %v3385_v48  ;;  %6080 = vmatprep.mubr.f32.mxu1 %v11542_v47  ;;  %v3427_v48 = vrot.slane %v11589_v27, 1  ;;  %v3429_v40 = vrot.slane %v3179_v57, 1  ;;  %v3777_v57 = vrot.slane %v11542_v47, 2  ;;  %v3584_v47 = vld [vmem:[#allocation2 + $0xc8] sm:$0xfc] }
 0x26b   : > { %7204 = vmatprep.mubr.f32.mxu0 %v3392_v39  ;;  %8879 = vmatpush1.bf16.msra.mxu1 %v10186_v1  ;;  %v3402_v1 = vsel %vm1104_vm1, %v3397_v19, %v3401_v54  ;;  %v3400_v63 = vsel %vm1104_vm1, %v3394_v60, %v3399_v33  ;;  %v11597_v39 = vld [vmem:[#allocation2 + $0x310] sm:$0xff]  ;;  %v3180_v19 = vld [vmem:[#allocation2 + $0x328] sm:$0x1]  ;;  %v13057_v60 = vld [vmem:[#allocation20_spill] sm:$0xff] }
 0x26c   : > { %8864 = vmatprep.subr.bf16.mxu1 %v10189_v6  ;;  %v3163_v6 = vld [vmem:[#allocation2 + $0x2a0] sm:$0xfe]  ;;  %v3424_v52 = vrot.slane %v11597_v39, 1  ;;  %v3431_v54 = vrot.slane %v3180_v19, 1  ;;  %v13066_v19 = vld [vmem:[#allocation29_spill] sm:$0xff] }
 0x26d   : > { %6081 = vmatmul.mubr.f32.gmra.mrb[10].mxu1 %v11549_v55 }
 0x26e   : > { %7205 = vmatmul.mubr.f32.gmra.mrb[42].mxu0 %v3390_v51  ;;  %6086 = vmatprep.mubr.f32.mxu1 %v1887_v3  ;;  %v1899_v51 = vld [vmem:[#allocation2 + $0x158] sm:$0xff]  ;;  %v3423_v3 = vrot.slane %v3175_v16, 1 }
 0x26f   : > { %7210 = vmatprep.mubr.f32.mxu0 %v3398_v62  ;;  %8880 = vmatpush1.bf16.msra.mxu1 %v10192_v15  ;;  %v3403_v15 = vrot.slane %v3163_v6, 1  ;;  %v3428_v62 = vsel %vm1104_vm1, %v3426_v34, %v3427_v48  ;;  %v3432_v6 = vsel %vm1104_vm1, %v3427_v48, %v3431_v54  ;;  %v3764_v34 = vrot.slane %v11533_v36, 2  ;;  %v13065_v48 = vld [vmem:[#allocation28_spill] sm:$0xff] }
 0x270   : > { %8865 = vmatprep.subr.bf16.mxu1 %v10195_v21  ;;  %v3167_v21 = vld [vmem:[#allocation2 + $0x2c0] sm:$0x1]  ;;  %v3425_v33 = vsel %vm1104_vm1, %v3423_v3, %v3424_v52 }
 0x271   : > { %6087 = vmatmul.mubr.f32.gmra.mrb[12].mxu1 %v1886_v61  ;;  %v3405_v23 = vsel %vm1104_vm1, %v3403_v15, %v3404_v22  ;;  %v3409_v20 = vrot.slane %v3167_v21, 1  ;;  %v3182_v61 = vld [vmem:[#allocation2 + $0x338] sm:$0xfe]  ;;  %v3181_v15 = vld [vmem:[#allocation2 + $0x330] sm:$0xfe]  ;;  %v3430_v21 = vsel %vm1104_vm1, %v3424_v52, %v3429_v40  ;;  %v11643_v52 = vld [vmem:[#allocation2 + $0x1c8] sm:$0xff] }
 0x272   : > { %7211 = vmatmul.mubr.f32.gmra.mrb[44].mxu0 %v3395_v46  ;;  %6092 = vmatprep.mubr.f32.mxu1 %v11558_v59  ;;  %v1898_v46 = vld [vmem:[#allocation2 + $0x150] sm:$0xff]  ;;  %v3436_v56 = vrot.slane %v3182_v61, 1  ;;  %v3582_v61 = vld [vmem:[#allocation2 + $0xb8] sm:$0x3]  ;;  %v1911_v40 = vld [vmem:[#allocation2 + $0x1e8] sm:$0xff] }
 0x273   : > { %7216 = vmatprep.mubr.f32.mxu0 %v3402_v1  ;;  %8881 = vmatpush1.bf16.msra.mxu1 %v10198_v29  ;;  %v3412_v29 = vsel %vm1104_vm1, %v3407_v32, %v3411_v17  ;;  %v3410_v18 = vsel %vm1104_vm1, %v3404_v22, %v3409_v20  ;;  %v11610_v1 = vld [vmem:[#allocation2 + $0x168] sm:$0xff]  ;;  %v13059_v32 = vld [vmem:[#allocation22_spill] sm:$0xff]  ;;  %v13060_v22 = vld [vmem:[#allocation23_spill] sm:$0xff] }
 0x274   : > { %8866 = vmatprep.subr.bf16.mxu1 %v10201_v35  ;;  %v3169_v35 = vld [vmem:[#allocation2 + $0x2d0] sm:$0xfe]  ;;  %v11619_v17 = vld [vmem:[#allocation2 + $0x160] sm:$0xff] }
 0x275   : > { %6093 = vmatmul.mubr.f32.gmra.mrb[14].mxu1 %v11565_v11 }
 0x276   : > { %7217 = vmatmul.mubr.f32.gmra.mrb[46].mxu0 %v3400_v63  ;;  %6098 = vmatprep.mubr.f32.mxu1 %v1891_v14  ;;  %v11614_v63 = vld [vmem:[#allocation2 + $0x8] sm:$0xff] }
 0x277   : > { %7222 = vmatprep.mubr.f32.mxu0 %v3408_v0  ;;  %8882 = vmatpush1.bf16.msra.mxu1 %v10204_v43  ;;  %v3413_v43 = vrot.slane %v3169_v35, 1  ;;  %v3437_v14 = vrot.slane %v11614_v63, 1  ;;  %v3186_v0 = vld [vmem:[#allocation2 + $0x358] sm:$0x1]  ;;  %v3572_v35 = vld [vmem:[#allocation2 + $0x68] sm:$0xfc] }
 0x278   : > { %8867 = vmatprep.subr.bf16.mxu1 %v10207_v49  ;;  %v3173_v49 = vld [vmem:[#allocation2 + $0x2f0] sm:$0x1]  ;;  %v3766_v26 = vrot.slane %v3572_v35, 2  ;;  %v1915_v35 = vld [vmem:[#allocation2 + $0x218] sm:$0xff] }
 0x279   : > { %6099 = vmatmul.mubr.f32.gmra.mrb[16].mxu1 %v1890_v45  ;;  %v3415_v31 = vsel %vm1104_vm1, %v3413_v43, %v3414_v30  ;;  %v3433_v45 = vrot.slane %v3181_v15, 1  ;;  %v3438_v20 = vsel %vm1104_vm1, %v3436_v56, %v3437_v14  ;;  %v3439_v43 = vrot.slane %v3185_v24, 1  ;;  %v3581_v15 = vld [vmem:[#allocation2 + $0xb0] sm:$0x3] }
 0x27a   : > { %7223 = vmatmul.mubr.f32.gmra.mrb[48].mxu0 %v3405_v23  ;;  %6104 = vmatprep.mubr.f32.mxu1 %v11574_v13  ;;  %v13061_v23 = vld [vmem:[#allocation24_spill] sm:$0xff]  ;;  %v11661_v24 = vld [vmem:[#allocation2 + $0x1f0] sm:$0xff] }
 0x27b   : > { %7228 = vmatprep.mubr.f32.mxu0 %v3412_v29  ;;  %8883 = vmatpush1.bf16.msra.mxu1 %v10210_v58  ;;  %v3419_v58 = vrot.slane %v3173_v49, 1  ;;  %v3441_v29 = vrot.slane %v3186_v0, 1  ;;  %v3767_v49 = vrot.slane %v11527_v5, 2 }
 0x27c   : > { %8868 = vmatprep.subr.bf16.mxu1 %v13054_v4  ;;  %v3571_v4 = vld [vmem:[#allocation2 + $0x60] sm:$0xfc] }
 0x27d   : > { %6105 = vmatmul.mubr.f32.gmra.mrb[18].mxu1 %v11581_v12  ;;  %v3420_v42 = vsel %vm1104_vm1, %v3414_v30, %v3419_v58  ;;  %v13063_v30 = vld [vmem:[#allocation26_spill] sm:$0xff]  ;;  %v3440_v58 = vsel %vm1104_vm1, %v3437_v14, %v3439_v43  ;;  %v3768_v5 = vsel %vm1585_vm2, %v3766_v26, %v3767_v49 }
 0x27e   : > { %7229 = vmatmul.mubr.f32.gmra.mrb[50].mxu0 %v3410_v18  ;;  %6110 = vmatprep.mubr.f32.mxu1 %v1895_v41  ;;  %v3435_v18 = vsel %vm1104_vm1, %v3433_v45, %v3437_v14  ;;  %v11627_v41 = vld [vmem:[#allocation2 + $0x198] sm:$0xff]  ;;  %v1914_v26 = vld [vmem:[#allocation2 + $0x210] sm:$0xff] }
 0x27f   : > { %7234 = vmatprep.mubr.f32.mxu0 %v3418_v37  ;;  %8884 = vmatpush1.bf16.msra.mxu1 %v13055_v10  ;;  %v3442_v37 = vsel %vm1104_vm1, %v3437_v14, %v3441_v29  ;;  %v1907_v10 = vld [vmem:[#allocation2 + $0x1b8] sm:$0xff]  ;;  %v3781_v14 = vrot.slane %v3582_v61, 2  ;;  %v3588_v29 = vld [vmem:[#allocation2 + $0xe8] sm:$0x3] }
 0x280   : > { %8869 = vmatprep.subr.bf16.mxu1 %v13056_v38  ;;  %v3575_v38 = vld [vmem:[#allocation2 + $0x80] sm:$0x3]  ;;  %v3600_v61 = vld [vmem:[#allocation2 + $0x148] sm:$0x3] }
 0x281   : > { %6111 = vmatmul.mubr.f32.gmra.mrb[20].mxu1 %v1894_v9  ;;  %v3576_v9 = vld [vmem:[#allocation2 + $0x88] sm:$0x3]  ;;  %v3769_v36 = vrot.slane %v3575_v38, 2  ;;  %v3782_v45 = vsel %vm1585_vm2, %v3777_v57, %v3781_v14  ;;  %v3794_v38 = vrot.slane %v11581_v12, 2  ;;  %v3807_v12 = vrot.slane %v11592_v2, 2 }
 0x282   : > { %7235 = vmatmul.mubr.f32.gmra.mrb[52].mxu0 %v3415_v31  ;;  %6116 = vmatprep.mubr.f32.mxu1 %v11592_v2  ;;  %v11634_v31 = vld [vmem:[#allocation2 + $0x190] sm:$0xff]  ;;  %v3771_v16 = vrot.slane %v3576_v9, 2  ;;  %v3602_v2 = vld [vmem:[#allocation2 + $0x158] sm:$0xfc] }
 0x283   : > { %7240 = vmatprep.mubr.f32.mxu0 %v3422_v53  ;;  %8885 = vmatpush1.bf16.msra.mxu1 %v13057_v60  ;;  %v3763_v53 = vrot.slane %v3571_v4, 2  ;;  %v13067_v60 = vld [vmem:[#allocation30_spill] sm:$0xff]  ;;  %v11668_v4 = vld [vmem:[#allocation2 + $0x228] sm:$0xff] }
 0x284   : > { %8870 = vmatprep.subr.bf16.mxu1 %v13058_v7  ;;  %v3577_v7 = vld [vmem:[#allocation2 + $0x90] sm:$0xfc] }
 0x285   : > { %6117 = vmatmul.mubr.f32.gmra.mrb[22].mxu1 %v11601_v44  ;;  %v3765_v3 = vsel %vm1585_vm2, %v3763_v53, %v3764_v34  ;;  %v3594_v53 = vld [vmem:[#allocation2 + $0x118] sm:$0x3] }
 0x286   : > { %7241 = vmatmul.mubr.f32.gmra.mrb[54].mxu0 %v3420_v42  ;;  %6122 = vmatprep.mubr.f32.mxu1 %v1899_v51  ;;  %v3578_v42 = vld [vmem:[#allocation2 + $0x98] sm:$0xfc]  ;;  %v1906_v51 = vld [vmem:[#allocation2 + $0x1b0] sm:$0xff] }
 0x287   : > { %7246 = vmatprep.mubr.f32.mxu0 %v3428_v62  ;;  %8886 = vmatpush1.bf16.msra.mxu1 %v13059_v32  ;;  %v3772_v62 = vsel %vm1585_vm2, %v3767_v49, %v3771_v16  ;;  %v3776_v54 = vrot.slane %v3578_v42, 2  ;;  %v3773_v32 = vrot.slane %v3577_v7, 2  ;;  %v3801_v42 = vrot.slane %v3594_v53, 2  ;;  %v3595_v7 = vld [vmem:[#allocation2 + $0x120] sm:$0xfc] }
 0x288   : > { %8871 = vmatprep.subr.bf16.mxu1 %v13060_v22  ;;  %v1910_v22 = vld [vmem:[#allocation2 + $0x1e0] sm:$0xff]  ;;  %v3612_v53 = vld [vmem:[#allocation2 + $0x1a8] sm:$0x3] }
 0x289   : > { %6123 = vmatmul.mubr.f32.gmra.mrb[24].mxu1 %v1898_v46  ;;  %v11649_v46 = vld [vmem:[#allocation2 + $0x1c0] sm:$0xff]  ;;  %v3778_v56 = vsel %vm1585_vm2, %v3776_v54, %v3777_v57 }
 0x28a   : > { %7247 = vmatmul.mubr.f32.gmra.mrb[56].mxu0 %v3425_v33  ;;  %6128 = vmatprep.mubr.f32.mxu1 %v11610_v1  ;;  %v3770_v33 = vsel %vm1585_vm2, %v3764_v34, %v3769_v36  ;;  %v11673_v34 = vld [vmem:[#allocation2 + $0x220] sm:$0xff] }
 0x28b   : > { %7252 = vmatprep.mubr.f32.mxu0 %v3432_v6  ;;  %8887 = vmatpush1.bf16.msra.mxu1 %v13061_v23  ;;  %v3774_v6 = vrot.slane %v11549_v55, 2  ;;  %v3786_v23 = vrot.slane %v3584_v47, 2  ;;  %v3787_v55 = vrot.slane %v11558_v59, 2  ;;  %v3590_v59 = vld [vmem:[#allocation2 + $0xf8] sm:$0xfc] }
 0x28c   : > { %8872 = vmatprep.subr.bf16.mxu1 %v13062_v50  ;;  %v3599_v47 = vld [vmem:[#allocation2 + $0x140] sm:$0x3] }
 0x28d   : > { %6129 = vmatmul.mubr.f32.gmra.mrb[26].mxu1 %v11619_v17  ;;  %v3775_v0 = vsel %vm1585_vm2, %v3773_v32, %v3774_v6  ;;  %v3788_v43 = vsel %vm1585_vm2, %v3786_v23, %v3787_v55  ;;  %v1923_v32 = vld [vmem:[#allocation2 + $0x278] sm:$0xff] }
 0x28e   : > { %7253 = vmatmul.mubr.f32.gmra.mrb[58].mxu0 %v3430_v21  ;;  %6134 = vmatprep.mubr.f32.mxu1 %v1903_v25  ;;  %v11656_v21 = vld [vmem:[#allocation2 + $0x1f8] sm:$0xff]  ;;  %v3779_v25 = vrot.slane %v3581_v15, 2  ;;  %v3811_v15 = vrot.slane %v3600_v61, 2 }
 0x28f   : > { %7258 = vmatprep.mubr.f32.mxu0 %v3438_v20  ;;  %8888 = vmatpush1.bf16.msra.mxu1 %v13063_v30  ;;  %v3583_v20 = vld [vmem:[#allocation2 + $0xc0] sm:$0xfc]  ;;  %v3791_v30 = vrot.slane %v3588_v29, 2  ;;  %v3606_v29 = vld [vmem:[#allocation2 + $0x178] sm:$0x3] }
 0x290   : > { %8873 = vmatprep.subr.bf16.mxu1 %v13064_v28  ;;  %v3780_v50 = vsel %vm1585_vm2, %v3774_v6, %v3779_v25  ;;  %v3803_v6 = vrot.slane %v3595_v7, 2  ;;  %v11692_v25 = vld [vmem:[#allocation2 + $0x288] sm:$0xff]  ;;  %v3812_v23 = vsel %vm1585_vm2, %v3807_v12, %v3811_v15  ;;  %v3613_v7 = vld [vmem:[#allocation2 + $0x1b0] sm:$0xfc]  ;;  %v3618_v61 = vld [vmem:[#allocation2 + $0x1d8] sm:$0x3] }
 0x291   : > { %6135 = vmatmul.mubr.f32.gmra.mrb[28].mxu1 %v1902_v8  ;;  %v3783_v8 = vrot.slane %v3583_v20, 2  ;;  %v3792_v9 = vsel %vm1585_vm2, %v3787_v55, %v3791_v30  ;;  %v3816_v55 = vrot.slane %v3602_v2, 2  ;;  %v3601_v20 = vld [vmem:[#allocation2 + $0x150] sm:$0xfc]  ;;  %v3617_v15 = vld [vmem:[#allocation2 + $0x1d0] sm:$0x3] }
 0x292   : > { %7259 = vmatmul.mubr.f32.gmra.mrb[60].mxu0 %v3435_v18  ;;  %6140 = vmatprep.mubr.f32.mxu1 %v11627_v41  ;;  %v3784_v18 = vrot.slane %v11565_v11, 2  ;;  %v3797_v11 = vrot.slane %v11574_v13, 2  ;;  %v3596_v13 = vld [vmem:[#allocation2 + $0x128] sm:$0xfc]  ;;  %v3841_v2 = vrot.slane %v3618_v61, 2  ;;  %v2285_v61 = vrot.slane %v11661_v24, 1 }
 0x293   : > { %7264 = vmatprep.mubr.f32.mxu0 %v3442_v37  ;;  %8889 = vmatpush1.bf16.msra.mxu1 %v13065_v48  ;;  %v3587_v37 = vld [vmem:[#allocation2 + $0xe0] sm:$0x3]  ;;  %v3806_v57 = vrot.slane %v3596_v13, 2 }
 0x294   : > { %8874 = vmatprep.subr.bf16.mxu1 %v13066_v19  ;;  %v3785_v49 = vsel %vm1585_vm2, %v3783_v8, %v3784_v18  ;;  %v3789_v28 = vrot.slane %v3587_v37, 2  ;;  %v3802_v54 = vsel %vm1585_vm2, %v3797_v11, %v3801_v42  ;;  %v1927_v8 = vld [vmem:[#allocation2 + $0x2a8] sm:$0xff]  ;;  %v3821_v37 = vrot.slane %v3606_v29, 2  ;;  %v3611_v13 = vld [vmem:[#allocation2 + $0x1a0] sm:$0x3] }
 0x295   : > { %6141 = vmatmul.mubr.f32.gmra.mrb[30].mxu1 %v11634_v31  ;;  %v3808_v14 = vsel %vm1585_vm2, %v3806_v57, %v3807_v12  ;;  %v2050_v29 = vld [vmem:[#allocation2 + $0x1b0] sm:$0xfe] }
 0x296   : > { %7265 = vmatmul.mubr.f32.gmra.mrb[62].mxu0 %v3440_v58  ;;  %6146 = vmatprep.mubr.f32.mxu1 %v1907_v10  ;;  %v3796_v58 = vrot.slane %v3590_v59, 2  ;;  %v3589_v10 = vld [vmem:[#allocation2 + $0xf0] sm:$0xfc]  ;;  %v3790_v48 = vsel %vm1585_vm2, %v3784_v18, %v3789_v28  ;;  %v3813_v18 = vrot.slane %v3601_v20, 2  ;;  %v3605_v59 = vld [vmem:[#allocation2 + $0x170] sm:$0x3] }
 0x297   : > { %7335 = vmatprep.mubr.f32.mxu0 %v3768_v5  ;;  %8890 = vmatpush1.bf16.msra.mxu1 %v13067_v60  ;;  %v1919_v5 = vld [vmem:[#allocation2 + $0x248] sm:$0xff]  ;;  %v3793_v16 = vrot.slane %v3589_v10, 2  ;;  %v11680_v60 = vld [vmem:[#allocation2 + $0x258] sm:$0xff]  ;;  %v3607_v10 = vld [vmem:[#allocation2 + $0x180] sm:$0xfc]  ;;  %v2278_v20 = vrot.slane %v11643_v52, 1 }
 0x298   : > { %v3798_v19 = vsel %vm1585_vm2, %v3796_v58, %v3797_v11  ;;  %v11704_v28 = vld [vmem:[#allocation2 + $0x2b8] sm:$0xff] }
 0x299   : > { %6147 = vmatmul.mubr.f32.gmra.mrb[32].mxu1 %v1906_v51  ;;  %v3593_v51 = vld [vmem:[#allocation2 + $0x110] sm:$0x3]  ;;  %v3795_v36 = vsel %vm1585_vm2, %v3793_v16, %v3794_v38  ;;  %v1931_v16 = vld [vmem:[#allocation2 + $0x2d8] sm:$0xff] }
 0x29a   : > { %7336 = vmatmul.mubr.f32.vlgmr.msra.gmra.mrb[0].mxu0 %v3765_v3  ;;  %6152 = vmatprep.mubr.f32.mxu1 %v11643_v52  ;;  %v1918_v3 = vld [vmem:[#allocation2 + $0x240] sm:$0xff] }
 0x29b   : > { %7341 = vmatprep.mubr.f32.mxu0 %v3772_v62  ;;  %v3799_v62 = vrot.slane %v3593_v51, 2  ;;  %v3831_v51 = vrot.slane %v3612_v53, 2 }
 0x29d   : > { %6153 = vmatmul.mubr.f32.gmra.mrb[34].mxu1 %v11649_v46 }
 0x29e   : > { %7342 = vmatmul.mubr.f32.gmra.mrb[2].mxu0 %v3770_v33  ;;  %6158 = vmatprep.mubr.f32.mxu1 %v1911_v40  ;;  %v11685_v33 = vld [vmem:[#allocation2 + $0x250] sm:$0xff]  ;;  %v3800_v40 = vsel %vm1585_vm2, %v3794_v38, %v3799_v62  ;;  %v3823_v38 = vrot.slane %v3607_v10, 2  ;;  %v11716_v62 = vld [vmem:[#allocation2 + $0x2e8] sm:$0xff] }
 0x29f   : > { %7347 = vmatprep.mubr.f32.mxu0 %v3778_v56  ;;  %v3804_v56 = vrot.slane %v11601_v44, 2  ;;  %v3817_v44 = vrot.slane %v11610_v1, 2  ;;  %v3608_v1 = vld [vmem:[#allocation2 + $0x188] sm:$0xfc] }
 0x2a0   : > { %v3826_v11 = vrot.slane %v3608_v1, 2  ;;  %v2274_v1 = vrot.slane %v2050_v29, 1 }
 0x2a1   : > { %6159 = vmatmul.mubr.f32.gmra.mrb[36].mxu1 %v1910_v22  ;;  %v1922_v22 = vld [vmem:[#allocation2 + $0x270] sm:$0xff]  ;;  %v3818_v30 = vsel %vm1585_vm2, %v3816_v55, %v3817_v44  ;;  %v3822_v58 = vsel %vm1585_vm2, %v3817_v44, %v3821_v37  ;;  %v3624_v37 = vld [vmem:[#allocation2 + $0x208] sm:$0x3] }
 0x2a2   : > { %7348 = vmatmul.mubr.f32.gmra.mrb[4].mxu0 %v3775_v0  ;;  %6164 = vmatprep.mubr.f32.mxu1 %v11656_v21  ;;  %v3805_v0 = vsel %vm1585_vm2, %v3803_v6, %v3804_v56  ;;  %v1935_v6 = vld [vmem:[#allocation2 + $0x308] sm:$0xff]  ;;  %v3851_v53 = vrot.slane %v3624_v37, 2  ;;  %v3631_v37 = vld [vmem:[#allocation2 + $0x240] sm:$0xfc] }
 0x2a3   : > { %7353 = vmatprep.mubr.f32.mxu0 %v3782_v45  ;;  %v3809_v45 = vrot.slane %v3599_v47, 2 }
 0x2a5   : > { %6165 = vmatmul.mubr.f32.gmra.mrb[38].mxu1 %v11661_v24 }
 0x2a6   : > { %7354 = vmatmul.mubr.f32.gmra.mrb[6].mxu0 %v3780_v50  ;;  %6170 = vmatprep.mubr.f32.mxu1 %v1915_v35  ;;  %v11697_v50 = vld [vmem:[#allocation2 + $0x280] sm:$0xff]  ;;  %v3810_v35 = vsel %vm1585_vm2, %v3804_v56, %v3809_v45  ;;  %v3833_v56 = vrot.slane %v3613_v7, 2 }
 0x2a7   : > { %7359 = vmatprep.mubr.f32.mxu0 %v3788_v43  ;;  %v3814_v43 = vrot.slane %v11619_v17, 2  ;;  %v3827_v17 = vrot.slane %v11627_v41, 2  ;;  %v3614_v41 = vld [vmem:[#allocation2 + $0x1b8] sm:$0xfc]  ;;  %v1934_v45 = vld [vmem:[#allocation2 + $0x300] sm:$0xff] }
 0x2a8   : > { %v3836_v12 = vrot.slane %v3614_v41, 2  ;;  %v2056_v41 = vld [vmem:[#allocation2 + $0x1e0] sm:$0xfe] }
 0x2a9   : > { %6171 = vmatmul.mubr.f32.gmra.mrb[40].mxu1 %v1914_v26  ;;  %v1926_v26 = vld [vmem:[#allocation2 + $0x2a0] sm:$0xff]  ;;  %v3828_v42 = vsel %vm1585_vm2, %v3826_v11, %v3827_v17  ;;  %v3832_v57 = vsel %vm1585_vm2, %v3827_v17, %v3831_v51  ;;  %v2284_v7 = vrot.slane %v2056_v41, 1  ;;  %v2308_v41 = vrot.slane %v11680_v60, 1 }
 0x2aa   : > { %7360 = vmatmul.mubr.f32.gmra.mrb[8].mxu0 %v3785_v49  ;;  %6176 = vmatprep.mubr.f32.mxu1 %v11668_v4  ;;  %v3815_v49 = vsel %vm1585_vm2, %v3813_v18, %v3814_v43  ;;  %v3847_v18 = vrot.slane %v11656_v21, 2  ;;  %v3623_v17 = vld [vmem:[#allocation2 + $0x200] sm:$0x3] }
 0x2ab   : > { %7365 = vmatprep.mubr.f32.mxu0 %v3792_v9  ;;  %v3819_v9 = vrot.slane %v3605_v59, 2 }
 0x2ad   : > { %6177 = vmatmul.mubr.f32.gmra.mrb[42].mxu1 %v11673_v34 }
 0x2ae   : > { %7366 = vmatmul.mubr.f32.gmra.mrb[10].mxu0 %v3790_v48  ;;  %6182 = vmatprep.mubr.f32.mxu1 %v1919_v5  ;;  %v11709_v48 = vld [vmem:[#allocation2 + $0x2b0] sm:$0xff]  ;;  %v3820_v5 = vsel %vm1585_vm2, %v3814_v43, %v3819_v9  ;;  %v3619_v43 = vld [vmem:[#allocation2 + $0x1e0] sm:$0xfc] }
 0x2af   : > { %7371 = vmatprep.mubr.f32.mxu0 %v3798_v19  ;;  %v3824_v19 = vrot.slane %v11634_v31, 2  ;;  %v3837_v31 = vrot.slane %v11643_v52, 2  ;;  %v3843_v9 = vrot.slane %v3619_v43, 2 }
 0x2b1   : > { %6183 = vmatmul.mubr.f32.gmra.mrb[44].mxu1 %v1918_v3  ;;  %v1930_v3 = vld [vmem:[#allocation2 + $0x2d0] sm:$0xff]  ;;  %v3838_v47 = vsel %vm1585_vm2, %v3836_v12, %v3837_v31 }
 0x2b2   : > { %7372 = vmatmul.mubr.f32.gmra.mrb[12].mxu0 %v3795_v36  ;;  %6188 = vmatprep.mubr.f32.mxu1 %v11680_v60  ;;  %v3825_v36 = vsel %vm1585_vm2, %v3823_v38, %v3824_v19  ;;  %v3849_v38 = vrot.slane %v3623_v17, 2 }
 0x2b3   : > { %7377 = vmatprep.mubr.f32.mxu0 %v3802_v54  ;;  %v3829_v54 = vrot.slane %v3611_v13, 2  ;;  %v2288_v13 = vrot.slane %v11656_v21, 1  ;;  %v3854_v21 = vrot.slane %v11673_v34, 2 }
 0x2b5   : > { %6189 = vmatmul.mubr.f32.gmra.mrb[46].mxu1 %v11685_v33 }
 0x2b6   : > { %7378 = vmatmul.mubr.f32.gmra.mrb[14].mxu0 %v3800_v40  ;;  %6194 = vmatprep.mubr.f32.mxu1 %v1923_v32  ;;  %v11721_v40 = vld [vmem:[#allocation2 + $0x2e0] sm:$0xff]  ;;  %v3830_v32 = vsel %vm1585_vm2, %v3824_v19, %v3829_v54  ;;  %v3857_v54 = vrot.slane %v11668_v4, 2 }
 0x2b7   : > { %7383 = vmatprep.mubr.f32.mxu0 %v3808_v14  ;;  %v3834_v14 = vrot.slane %v11649_v46, 2 }
 0x2b9   : > { %6195 = vmatmul.mubr.f32.gmra.mrb[48].mxu1 %v1922_v22  ;;  %v2051_v22 = vld [vmem:[#allocation2 + $0x1b8] sm:$0xfe]  ;;  %v3835_v55 = vsel %vm1585_vm2, %v3833_v56, %v3834_v14 }
 0x2ba   : > { %7384 = vmatmul.mubr.f32.gmra.mrb[16].mxu0 %v3805_v0  ;;  %6200 = vmatprep.mubr.f32.mxu1 %v11692_v25  ;;  %v3620_v0 = vld [vmem:[#allocation2 + $0x1e8] sm:$0xfc]  ;;  %v2277_v44 = vrot.slane %v2051_v22, 1  ;;  %v3629_v22 = vld [vmem:[#allocation2 + $0x230] sm:$0x3] }
 0x2bb   : > { %7389 = vmatprep.mubr.f32.mxu0 %v3812_v23  ;;  %v3839_v23 = vrot.slane %v3617_v15, 2  ;;  %v2060_v15 = vld [vmem:[#allocation2 + $0x200] sm:$0x1] }
 0x2bc   : > { %v2279_v52 = vsel %vm1104_vm1, %v2277_v44, %v2278_v20 }
 0x2bd   : > { %6201 = vmatmul.mubr.f32.gmra.mrb[50].mxu1 %v11697_v50  ;;  %v3840_v59 = vsel %vm1585_vm2, %v3834_v14, %v3839_v23 }
 0x2be   : > { %7390 = vmatmul.mubr.f32.gmra.mrb[18].mxu0 %v3810_v35  ;;  %6206 = vmatprep.mubr.f32.mxu1 %v1927_v8  ;;  %v3842_v35 = vsel %vm1585_vm2, %v3837_v31, %v3841_v2  ;;  %v3846_v8 = vrot.slane %v3620_v0, 2  ;;  %v3630_v31 = vld [vmem:[#allocation2 + $0x238] sm:$0x3] }
 0x2bf   : > { %7395 = vmatprep.mubr.f32.mxu0 %v3818_v30  ;;  %v2055_v30 = vld [vmem:[#allocation2 + $0x1d8] sm:$0x1]  ;;  %v3861_v2 = vrot.slane %v3630_v31, 2  ;;  %v2063_v0 = vld [vmem:[#allocation2 + $0x218] sm:$0xfe] }
 0x2c0   : > { %v2282_v11 = vrot.slane %v2055_v30, 1  ;;  %v3848_v10 = vsel %vm1585_vm2, %v3846_v8, %v3847_v18  ;;  %v2297_v29 = vrot.slane %v2063_v0, 1  ;;  %v2062_v8 = vld [vmem:[#allocation2 + $0x210] sm:$0xfe]  ;;  %v3867_v30 = vrot.slane %v11680_v60, 2 }
 0x2c1   : > { %6207 = vmatmul.mubr.f32.gmra.mrb[52].mxu1 %v1926_v26  ;;  %v2275_v26 = vrot.slane %v11649_v46, 1  ;;  %v3642_v31 = vld [vmem:[#allocation2 + $0x298] sm:$0x3]  ;;  %v2072_v60 = vld [vmem:[#allocation2 + $0x260] sm:$0x1] }
 0x2c2   : > { %7396 = vmatmul.mubr.f32.gmra.mrb[20].mxu0 %v3815_v49  ;;  %6212 = vmatprep.mubr.f32.mxu1 %v11704_v28  ;;  %v2054_v49 = vld [vmem:[#allocation2 + $0x1d0] sm:$0x1]  ;;  %v2075_v0 = vld [vmem:[#allocation2 + $0x278] sm:$0xfe] }
 0x2c3   : > { %7401 = vmatprep.mubr.f32.mxu0 %v3822_v58  ;;  %v3844_v58 = vrot.slane %v11661_v24, 2  ;;  %v2276_v46 = vsel %vm1104_vm1, %v2274_v1, %v2275_v26  ;;  %v2286_v24 = vsel %vm1104_vm1, %v2284_v7, %v2285_v61  ;;  %v3636_v1 = vld [vmem:[#allocation2 + $0x268] sm:$0x3] }
 0x2c5   : > { %6213 = vmatmul.mubr.f32.gmra.mrb[54].mxu1 %v11709_v48  ;;  %v3845_v19 = vsel %vm1585_vm2, %v3843_v9, %v3844_v58  ;;  %v3864_v9 = vrot.slane %v11685_v33, 2 }
 0x2c6   : > { %7402 = vmatmul.mubr.f32.gmra.mrb[22].mxu0 %v3820_v5  ;;  %6218 = vmatprep.mubr.f32.mxu1 %v1931_v16  ;;  %v2057_v5 = vld [vmem:[#allocation2 + $0x1e8] sm:$0xfe]  ;;  %v3626_v16 = vld [vmem:[#allocation2 + $0x218] sm:$0xfc] }
 0x2c7   : > { %7407 = vmatprep.mubr.f32.mxu0 %v3828_v42  ;;  %v2283_v42 = vsel %vm1104_vm1, %v2278_v20, %v2282_v11  ;;  %v2287_v51 = vrot.slane %v2057_v5, 1  ;;  %v3859_v20 = vrot.slane %v3629_v22, 2  ;;  %v3863_v11 = vrot.slane %v3631_v37, 2  ;;  %v2079_v37 = vld [vmem:[#allocation2 + $0x298] sm:$0x1] }
 0x2c8   : > { %v3881_v22 = vrot.slane %v3642_v31, 2  ;;  %v2325_v31 = vrot.slane %v11709_v48, 1 }
 0x2c9   : > { %6219 = vmatmul.mubr.f32.gmra.mrb[56].mxu1 %v1930_v3  ;;  %v3625_v3 = vld [vmem:[#allocation2 + $0x210] sm:$0xfc]  ;;  %v2289_v56 = vsel %vm1104_vm1, %v2287_v51, %v2288_v13 }
 0x2ca   : > { %7408 = vmatmul.mubr.f32.gmra.mrb[24].mxu0 %v3825_v36  ;;  %6224 = vmatprep.mubr.f32.mxu1 %v11716_v62  ;;  %v3852_v36 = vsel %vm1585_vm2, %v3847_v18, %v3851_v53  ;;  %v3862_v18 = vsel %vm1585_vm2, %v3857_v54, %v3861_v2  ;;  %v3635_v53 = vld [vmem:[#allocation2 + $0x260] sm:$0x3] }
 0x2cb   : > { %7413 = vmatprep.mubr.f32.mxu0 %v3832_v57  ;;  %v2061_v57 = vld [vmem:[#allocation2 + $0x208] sm:$0x1] }
 0x2cc   : > { %v2292_v14 = vrot.slane %v2061_v57, 1  ;;  %v3637_v57 = vld [vmem:[#allocation2 + $0x270] sm:$0xfc] }
 0x2cd   : > { %6225 = vmatmul.mubr.f32.gmra.mrb[58].mxu1 %v11721_v40 }
 0x2ce   : > { %7414 = vmatmul.mubr.f32.gmra.mrb[26].mxu0 %v3830_v32  ;;  %6230 = vmatprep.mubr.f32.mxu1 %v1935_v6  ;;  %v3853_v32 = vrot.slane %v3625_v3, 2  ;;  %v3850_v6 = vsel %vm1585_vm2, %v3844_v58, %v3849_v38  ;;  %v2293_v44 = vsel %vm1104_vm1, %v2288_v13, %v2292_v14  ;;  %v2068_v3 = vld [vmem:[#allocation2 + $0x240] sm:$0xfe]  ;;  %v3874_v14 = vrot.slane %v11697_v50, 2 }
 0x2cf   : > { %7419 = vmatprep.mubr.f32.mxu0 %v3838_v47 }
 0x2d0   : > { %v3855_v23 = vsel %vm1585_vm2, %v3853_v32, %v3854_v21  ;;  %v2304_v32 = vrot.slane %v2068_v3, 1  ;;  %v3897_v3 = vrot.slane %v11716_v62, 2 }
 0x2d1   : > { %6231 = vmatmul.mubr.f32.gmra.mrb[60].mxu1 %v1934_v45  ;;  %v3632_v45 = vld [vmem:[#allocation2 + $0x248] sm:$0xfc] }
 0x2d2   : > { %7420 = vmatmul.mubr.f32.gmra.mrb[28].mxu0 %v3835_v55  ;;  %6236 = vmatprep.mubr.f32.mxu1 %v11589_v27  ;;  %v2280_v27 = vrot.slane %v2054_v49, 1  ;;  %v2290_v55 = vrot.slane %v2060_v15, 1  ;;  %v3866_v43 = vrot.slane %v3632_v45, 2  ;;  %v2294_v49 = vrot.slane %v2062_v8, 1  ;;  %v3643_v8 = vld [vmem:[#allocation2 + $0x2a0] sm:$0xfc] }
 0x2d3   : > { %7425 = vmatprep.mubr.f32.mxu0 %v3842_v35  ;;  %v2298_v35 = vrot.slane %v11668_v4, 1  ;;  %v3860_v4 = vsel %vm1585_vm2, %v3854_v21, %v3859_v20  ;;  %v2305_v21 = vrot.slane %v11685_v33, 1  ;;  %v2310_v45 = vrot.slane %v2072_v60, 1 }
 0x2d4   : > { %v2281_v12 = vsel %vm1104_vm1, %v2275_v26, %v2280_v27  ;;  %v2291_v26 = vsel %vm1104_vm1, %v2285_v61, %v2290_v55  ;;  %v3868_v5 = vsel %vm1585_vm2, %v3866_v43, %v3867_v30  ;;  %v3871_v27 = vrot.slane %v3636_v1, 2  ;;  %v3648_v1 = vld [vmem:[#allocation2 + $0x2c8] sm:$0x3] }
 0x2d5   : > { %6237 = vmatmul.mubr.f32.gmra.mrb[62].mxu1 %v11597_v39  ;;  %v3856_v39 = vrot.slane %v3626_v16, 2  ;;  %v2299_v58 = vsel %vm1104_vm1, %v2297_v29, %v2298_v35  ;;  %v2069_v16 = vld [vmem:[#allocation2 + $0x248] sm:$0xfe]  ;;  %v2306_v33 = vsel %vm1104_vm1, %v2304_v32, %v2305_v21  ;;  %v2317_v20 = vrot.slane %v2075_v0, 1 }
 0x2d6   : > { %7426 = vmatmul.mubr.f32.gmra.mrb[30].mxu0 %v3840_v59  ;;  %6403 = vmatprep.mubr.f32.mxu1 %v2279_v52  ;;  %v2067_v59 = vld [vmem:[#allocation2 + $0x238] sm:$0x1]  ;;  %v2295_v52 = vrot.slane %v11673_v34, 1  ;;  %v2307_v13 = vrot.slane %v2069_v16, 1  ;;  %v2318_v29 = vrot.slane %v11692_v25, 1 }
 0x2d7   : > { %7431 = vmatprep.mubr.f32.mxu0 %v3848_v10  ;;  %v3858_v47 = vsel %vm1585_vm2, %v3856_v39, %v3857_v54  ;;  %v2302_v17 = vrot.slane %v2067_v59, 1  ;;  %v2066_v10 = vld [vmem:[#allocation2 + $0x230] sm:$0x1]  ;;  %v3877_v54 = vrot.slane %v11692_v25, 2  ;;  %v2311_v59 = vsel %vm1104_vm1, %v2305_v21, %v2310_v45 }
 0x2d8   : > { %v2296_v34 = vsel %vm1104_vm1, %v2294_v49, %v2295_v52  ;;  %v2300_v38 = vrot.slane %v2066_v10, 1  ;;  %v2315_v49 = vrot.slane %v11697_v50, 1  ;;  %v3884_v25 = vrot.slane %v11709_v48, 2 }
 0x2d9   : > { %6404 = vmatmul.mubr.f32.vlgmr.msra.gmra.mrb[32].mxu1 %v2276_v46  ;;  %v3638_v46 = vld [vmem:[#allocation2 + $0x278] sm:$0xfc]  ;;  %v2303_v51 = vsel %vm1104_vm1, %v2298_v35, %v2302_v17  ;;  %v2074_v35 = vld [vmem:[#allocation2 + $0x270] sm:$0xfe]  ;;  %v3891_v10 = vrot.slane %v3648_v1, 2 }
 0x2da   : > { %7432 = vmatmul.mubr.f32.gmra.mrb[32].mxu0 %v3845_v19  ;;  %6409 = vmatprep.mubr.f32.mxu1 %v2283_v42  ;;  %v3869_v19 = vrot.slane %v3635_v53, 2  ;;  %v3865_v42 = vsel %vm1585_vm2, %v3863_v11, %v3864_v9  ;;  %v3876_v39 = vrot.slane %v3638_v46, 2  ;;  %v2301_v7 = vsel %vm1104_vm1, %v2295_v52, %v2300_v38  ;;  %v2078_v11 = vld [vmem:[#allocation2 + $0x290] sm:$0x1]  ;;  %v3647_v53 = vld [vmem:[#allocation2 + $0x2c0] sm:$0x3] }
 0x2db   : > { %7437 = vmatprep.mubr.f32.mxu0 %v3852_v36  ;;  %v3872_v36 = vsel %vm1585_vm2, %v3867_v30, %v3871_v27  ;;  %v3887_v30 = vrot.slane %v11704_v28, 2  ;;  %v3883_v52 = vrot.slane %v3643_v8, 2  ;;  %v3650_v27 = vld [vmem:[#allocation2 + $0x2d8] sm:$0xfc]  ;;  %v2320_v46 = vrot.slane %v2078_v11, 1 }
 0x2dc   : > { %v3870_v61 = vsel %vm1585_vm2, %v3864_v9, %v3869_v19  ;;  %v3878_v2 = vsel %vm1585_vm2, %v3876_v39, %v3877_v54  ;;  %v3889_v38 = vrot.slane %v3647_v53, 2  ;;  %v2085_v39 = vld [vmem:[#allocation2 + $0x2c8] sm:$0x1]  ;;  %v2093_v11 = vld [vmem:[#allocation2 + $0x308] sm:$0xfe] }
 0x2dd   : > { %6410 = vmatmul.mubr.f32.gmra.mrb[34].mxu1 %v2281_v12  ;;  %v2073_v12 = vld [vmem:[#allocation2 + $0x268] sm:$0x1]  ;;  %v3885_v16 = vsel %vm1585_vm2, %v3883_v52, %v3884_v25  ;;  %v2332_v60 = vrot.slane %v2085_v39, 1 }
 0x2de   : > { %7438 = vmatmul.mubr.f32.gmra.mrb[34].mxu0 %v3850_v6  ;;  %6415 = vmatprep.mubr.f32.mxu1 %v2289_v56  ;;  %v2309_v6 = vsel %vm1104_vm1, %v2307_v13, %v2308_v41  ;;  %v3873_v56 = vrot.slane %v3637_v57, 2  ;;  %v2312_v15 = vrot.slane %v2073_v12, 1  ;;  %v3892_v13 = vsel %vm1585_vm2, %v3887_v30, %v3891_v10 }
 0x2df   : > { %7443 = vmatprep.mubr.f32.mxu0 %v3858_v47  ;;  %v3641_v47 = vld [vmem:[#allocation2 + $0x290] sm:$0x3]  ;;  %v2321_v57 = vsel %vm1104_vm1, %v2315_v49, %v2320_v46  ;;  %v2092_v46 = vld [vmem:[#allocation2 + $0x300] sm:$0xfe] }
 0x2e0   : > { %v3875_v55 = vsel %vm1585_vm2, %v3873_v56, %v3874_v14  ;;  %v2087_v56 = vld [vmem:[#allocation2 + $0x2d8] sm:$0xfe] }
 0x2e1   : > { %6416 = vmatmul.mubr.f32.gmra.mrb[36].mxu1 %v2286_v24  ;;  %v3644_v24 = vld [vmem:[#allocation2 + $0x2a8] sm:$0xfc]  ;;  %v2337_v45 = vrot.slane %v2087_v56, 1 }
 0x2e2   : > { %7444 = vmatmul.mubr.f32.gmra.mrb[36].mxu0 %v3855_v23  ;;  %6421 = vmatprep.mubr.f32.mxu1 %v2293_v44  ;;  %v3879_v23 = vrot.slane %v3641_v47, 2  ;;  %v2313_v44 = vsel %vm1104_vm1, %v2308_v41, %v2312_v15  ;;  %v3886_v43 = vrot.slane %v3644_v24, 2  ;;  %v3896_v41 = vrot.slane %v3650_v27, 2 }
 0x2e3   : > { %7449 = vmatprep.mubr.f32.mxu0 %v3862_v18  ;;  %v3882_v18 = vsel %vm1585_vm2, %v3877_v54, %v3881_v22  ;;  %v3654_v54 = vld [vmem:[#allocation2 + $0x2f8] sm:$0x3] }
 0x2e4   : > { %v3880_v9 = vsel %vm1585_vm2, %v3874_v14, %v3879_v23  ;;  %v3888_v17 = vsel %vm1585_vm2, %v3886_v43, %v3887_v30  ;;  %v3898_v14 = vsel %vm1585_vm2, %v3896_v41, %v3897_v3  ;;  %v3901_v15 = vrot.slane %v3654_v54, 2  ;;  %v11798_v22 = vld [vmem:[#allocation2 + $0x318] sm:$0xff]  ;;  %v3660_v30 = vld [vmem:[#allocation2 + $0x328] sm:$0x3] }
 0x2e5   : > { %6422 = vmatmul.mubr.f32.gmra.mrb[38].mxu1 %v2291_v26  ;;  %v2314_v26 = vrot.slane %v2074_v35, 1  ;;  %v2338_v23 = vrot.slane %v11716_v62, 1  ;;  %v3907_v8 = vrot.slane %v11798_v22, 2 }
 0x2e6   : > { %7450 = vmatmul.mubr.f32.gmra.mrb[38].mxu0 %v3860_v4  ;;  %6427 = vmatprep.mubr.f32.mxu1 %v2299_v58  ;;  %v2319_v4 = vsel %vm1104_vm1, %v2317_v20, %v2318_v29  ;;  %v2322_v58 = vrot.slane %v2079_v37, 1  ;;  %v11804_v20 = vld [vmem:[#allocation2 + $0x310] sm:$0xff] }
 0x2e7   : > { %7455 = vmatprep.mubr.f32.mxu0 %v3868_v5  ;;  %v2081_v5 = vld [vmem:[#allocation2 + $0x2a8] sm:$0xfe]  ;;  %v2316_v50 = vsel %vm1104_vm1, %v2314_v26, %v2315_v49  ;;  %v3904_v1 = vrot.slane %v11804_v20, 2  ;;  %v2339_v49 = vsel %vm1104_vm1, %v2337_v45, %v2338_v23 }
 0x2e8   : > { %v2327_v19 = vrot.slane %v2081_v5, 1 }
 0x2e9   : > { %6428 = vmatmul.mubr.f32.gmra.mrb[40].mxu1 %v2296_v34  ;;  %v2323_v34 = vsel %vm1104_vm1, %v2318_v29, %v2322_v58  ;;  %v3902_v29 = vsel %vm1585_vm2, %v3897_v3, %v3901_v15  ;;  %v3659_v58 = vld [vmem:[#allocation2 + $0x320] sm:$0x3]  ;;  %v2344_v3 = vrot.slane %v2092_v46, 1 }
 0x2ea   : > { %7456 = vmatmul.mubr.f32.gmra.mrb[40].mxu0 %v3865_v42  ;;  %6433 = vmatprep.mubr.f32.mxu1 %v2303_v51  ;;  %v2328_v42 = vrot.slane %v11704_v28, 1  ;;  %v2080_v51 = vld [vmem:[#allocation2 + $0x2a0] sm:$0xfe]  ;;  %v2084_v28 = vld [vmem:[#allocation2 + $0x2c0] sm:$0x1]  ;;  %v3909_v27 = vrot.slane %v3659_v58, 2 }
 0x2eb   : > { %7461 = vmatprep.mubr.f32.mxu0 %v3872_v36  ;;  %v3649_v36 = vld [vmem:[#allocation2 + $0x2d0] sm:$0xfc]  ;;  %v2324_v12 = vrot.slane %v2080_v51, 1  ;;  %v2330_v47 = vrot.slane %v2084_v28, 1  ;;  %v2097_v51 = vld [vmem:[#allocation2 + $0x328] sm:$0x1] }
 0x2ec   : > { %v2329_v32 = vsel %vm1104_vm1, %v2327_v19, %v2328_v42  ;;  %v3893_v21 = vrot.slane %v3649_v36, 2  ;;  %v3917_v19 = vrot.slane %v11614_v63, 2  ;;  %v2345_v36 = vrot.slane %v11804_v20, 1  ;;  %v3665_v28 = vld [vmem:[#allocation2 + $0x350] sm:$0x3] }
 0x2ed   : > { %6434 = vmatmul.mubr.f32.gmra.mrb[42].mxu1 %v2301_v7  ;;  %v3894_v7 = vrot.slane %v11721_v40, 2  ;;  %v2326_v48 = vsel %vm1104_vm1, %v2324_v12, %v2325_v31  ;;  %v2331_v43 = vsel %vm1104_vm1, %v2325_v31, %v2330_v47  ;;  %v3910_v39 = vsel %vm1585_vm2, %v3904_v1, %v3909_v27  ;;  %v2096_v31 = vld [vmem:[#allocation2 + $0x320] sm:$0x1]  ;;  %v7716_v58 = vld [vmem:[#allocation9 + $0x30] sm:$0xff] }
 0x2ee   : > { %7462 = vmatmul.mubr.f32.gmra.mrb[42].mxu0 %v3870_v61  ;;  %6439 = vmatprep.mubr.f32.mxu1 %v2309_v6  ;;  %v3890_v61 = vsel %vm1585_vm2, %v3884_v25, %v3889_v38  ;;  %v3653_v6 = vld [vmem:[#allocation2 + $0x2f0] sm:$0x3]  ;;  %v2352_v12 = vrot.slane %v2097_v51, 1  ;;  %v7718_v27 = vld [vmem:[#allocation9 + $0x40] sm:$0xff] }
 0x2ef   : > { %7467 = vmatprep.mubr.f32.mxu0 %v3878_v2  ;;  %v3656_v2 = vld [vmem:[#allocation2 + $0x308] sm:$0xfc]  ;;  %v3899_v0 = vrot.slane %v3653_v6, 2  ;;  %v3895_v24 = vsel %vm1585_vm2, %v3893_v21, %v3894_v7  ;;  %v2090_v25 = vld [vmem:[#allocation2 + $0x2f0] sm:$0x1]  ;;  %v3919_v6 = vrot.slane %v3665_v28, 2 }
 0x2f0   : > { %v3906_v35 = vrot.slane %v3656_v2, 2  ;;  %v2340_v53 = vrot.slane %v2090_v25, 1  ;;  %v7717_v25 = vld [vmem:[#allocation9 + $0x38] sm:$0xff]  ;;  %v7722_v51 = vld [vmem:[#allocation9 + $0x60] sm:$0xff] }
 0x2f1   : > { %6440 = vmatmul.mubr.f32.gmra.mrb[44].mxu1 %v2306_v33  ;;  %v2333_v33 = vsel %vm1104_vm1, %v2328_v42, %v2332_v60  ;;  %v3900_v26 = vsel %vm1585_vm2, %v3894_v7, %v3899_v0  ;;  %v3661_v42 = vld [vmem:[#allocation2 + $0x330] sm:$0xfc]  ;;  %v3920_v15 = vsel %vm1585_vm2, %v3917_v19, %v3919_v6  ;;  %v7730_v6 = vld [vmem:[#allocation9 + $0xa0] sm:$0xff] }
 0x2f2   : > { %7468 = vmatmul.mubr.f32.gmra.mrb[44].mxu0 %v3875_v55  ;;  %6445 = vmatprep.mubr.f32.mxu1 %v2313_v44  ;;  %v2086_v55 = vld [vmem:[#allocation2 + $0x2d0] sm:$0xfe]  ;;  %v3655_v44 = vld [vmem:[#allocation2 + $0x300] sm:$0xfc] }
 0x2f3   : > { %7473 = vmatprep.mubr.f32.mxu0 %v3882_v18  ;;  %v2091_v18 = vld [vmem:[#allocation2 + $0x2f8] sm:$0x1]  ;;  %v2334_v37 = vrot.slane %v2086_v55, 1  ;;  %v3903_v62 = vrot.slane %v3655_v44, 2 }
 0x2f4   : > { %v2342_v52 = vrot.slane %v2091_v18, 1 }
 0x2f5   : > { %6446 = vmatmul.mubr.f32.gmra.mrb[46].mxu1 %v2311_v59  ;;  %v2335_v59 = vrot.slane %v11721_v40, 1  ;;  %v3905_v10 = vsel %vm1585_vm2, %v3903_v62, %v3904_v1  ;;  %v7712_v62 = vld [vmem:[#allocation9 + $0x10] sm:$0xff] }
 0x2f6   : > { %7474 = vmatmul.mubr.f32.gmra.mrb[46].mxu0 %v3880_v9  ;;  %6451 = vmatprep.mubr.f32.mxu1 %v2319_v4  ;;  %v3908_v9 = vsel %vm1585_vm2, %v3906_v35, %v3907_v8  ;;  %v3911_v4 = vrot.slane %v3660_v30, 2  ;;  %v2343_v5 = vsel %vm1104_vm1, %v2338_v23, %v2342_v52  ;;  %v7713_v30 = vld [vmem:[#allocation9 + $0x18] sm:$0xff]  ;;  %v7715_v52 = vld [vmem:[#allocation9 + $0x28] sm:$0xff] }
 0x2f7   : > { %7479 = vmatprep.mubr.f32.mxu0 %v3888_v17  ;;  %v3662_v17 = vld [vmem:[#allocation2 + $0x338] sm:$0xfc]  ;;  %v2336_v40 = vsel %vm1104_vm1, %v2334_v37, %v2335_v59  ;;  %v2341_v41 = vsel %vm1104_vm1, %v2335_v59, %v2340_v53  ;;  %v7710_v59 = vld [vmem:[#allocation9] sm:$0xff] }
 0x2f8   : > { %v3916_v38 = vrot.slane %v3662_v17, 2  ;;  %v8797_v1 = vpack.c.bf16 %v7712_v62, %v7710_v59  ;;  %v7721_v53 = vld [vmem:[#allocation9 + $0x58] sm:$0xff] }
 0x2f9   : > { %6452 = vmatmul.mubr.f32.gmra.mrb[48].mxu1 %v2316_v50  ;;  %v2347_v50 = vrot.slane %v2093_v11, 1  ;;  %v7737_v59 = vld [vmem:[#allocation9 + $0xd8] sm:$0xff] }
 0x2fa   : > { %7480 = vmatmul.mubr.f32.gmra.mrb[48].mxu0 %v3885_v16  ;;  %6457 = vmatprep.mubr.f32.mxu1 %v2323_v34  ;;  %v2348_v16 = vrot.slane %v11798_v22, 1  ;;  %v3912_v34 = vsel %vm1585_vm2, %v3907_v8, %v3911_v4  ;;  %v3918_v63 = vsel %vm1585_vm2, %v3916_v38, %v3917_v19  ;;  %v7714_v4 = vld [vmem:[#allocation9 + $0x20] sm:$0xff]  ;;  %v7723_v38 = vld [vmem:[#allocation9 + $0x68] sm:$0xff] }
 0x2fb   : > { %7485 = vmatprep.mubr.f32.mxu0 %v3892_v13  ;;  %v3666_v13 = vld [vmem:[#allocation2 + $0x358] sm:$0x3]  ;;  %v8801_v11 = vpack.c.bf16 %v7716_v58, %v7714_v4 }
 0x2fc   : > { %v2349_v54 = vsel %vm1104_vm1, %v2347_v50, %v2348_v16  ;;  %v3921_v7 = vrot.slane %v3666_v13, 2  ;;  %v2353_v60 = vsel %vm1104_vm1, %v2348_v16, %v2352_v12  ;;  %v7720_v50 = vld [vmem:[#allocation9 + $0x50] sm:$0xff]  ;;  %v7726_v12 = vld [vmem:[#allocation9 + $0x80] sm:$0xff] }
 0x2fd   : > { %6458 = vmatmul.mubr.f32.gmra.mrb[50].mxu1 %v2321_v57  ;;  %v3913_v57 = vrot.slane %v3661_v42, 2  ;;  %v8805_v16 = vpack.c.bf16 %v7720_v50, %v7718_v27  ;;  %v7724_v13 = vld [vmem:[#allocation9 + $0x70] sm:$0xff]  ;;  %v7738_v50 = vld [vmem:[#allocation9 + $0xe0] sm:$0xff] }
 0x2fe   : > { %7486 = vmatmul.mubr.f32.gmra.mrb[50].mxu0 %v3890_v61  ;;  %6463 = vmatprep.mubr.f32.mxu1 %v2329_v32  ;;  %v2346_v61 = vsel %vm1104_vm1, %v2344_v3, %v2345_v36  ;;  %v2350_v32 = vrot.slane %v2096_v31, 1  ;;  %v3922_v56 = vsel %vm1585_vm2, %v3917_v19, %v3921_v7  ;;  %v7728_v31 = vld [vmem:[#allocation9 + $0x90] sm:$0xff]  ;;  %v5205_v7 = vlaneseq }
 0x2ff   : > { %7491 = vmatprep.mubr.f32.mxu0 %v3898_v14  ;;  %v3915_v21 = vsel %vm1585_vm2, %v3913_v57, %v3917_v19  ;;  %v7725_v19 = vld [vmem:[#allocation9 + $0x78] sm:$0xff] }
 0x300   : > { %v2351_v14 = vsel %vm1104_vm1, %v2345_v36, %v2350_v32  ;;  %v8807_v42 = vpack.c.bf16 %v7725_v19, %v7723_v38  ;;  %v7731_v32 = vld [vmem:[#allocation9 + $0xa8] sm:$0xff] }
 0x301   : > { %6464 = vmatmul.mubr.f32.gmra.mrb[52].mxu1 %v2326_v48 }
 0x302   : > { %7492 = vmatmul.mubr.f32.gmra.mrb[52].mxu0 %v3895_v24  ;;  %6469 = vmatprep.mubr.f32.mxu1 %v2333_v33 }
 0x303   : > { %7497 = vmatprep.mubr.f32.mxu0 %v3902_v29 }
 0x305   : > { %6470 = vmatmul.mubr.f32.gmra.mrb[54].mxu1 %v2331_v43  ;;  %v7711_v43 = vld [vmem:[#allocation9 + $0x8] sm:$0xff] }
 0x306   : > { %7498 = vmatmul.mubr.f32.gmra.mrb[54].mxu0 %v3900_v26  ;;  %6475 = vmatprep.mubr.f32.mxu1 %v2339_v49  ;;  %v8795_v37 = vpack.c.bf16 %v7713_v30, %v7711_v43 }
 0x307   : > { %7503 = vmatprep.mubr.f32.mxu0 %v3908_v9  ;;  %v8799_v9 = vpack.c.bf16 %v7717_v25, %v7715_v52  ;;  %v7736_v52 = vld [vmem:[#allocation9 + $0xd0] sm:$0xff] }
 0x308   : > { %8796 = vmatprep.subr.bf16.mxu1 %v8795_v37  ;;  %v7735_v37 = vld [vmem:[#allocation9 + $0xc8] sm:$0xff] }
 0x309   : > { %6476 = vmatmul.mubr.f32.gmra.mrb[56].mxu1 %v2336_v40  ;;  %v8819_v62 = vpack.c.bf16 %v7737_v59, %v7735_v37  ;;  %v7748_v37 = vld [vmem:[#allocation9 + $0x130] sm:$0xff] }
 0x30a   : > { %7504 = vmatmul.mubr.f32.gmra.mrb[56].mxu0 %v3905_v10  ;;  %6481 = vmatprep.mubr.f32.mxu1 %v2343_v5  ;;  %v7719_v10 = vld [vmem:[#allocation9 + $0x48] sm:$0xff] }
 0x30b   : > { %7509 = vmatprep.mubr.f32.mxu0 %v3912_v34  ;;  %8798 = vmatpush1.bf16.msra.mxu1 %v8797_v1  ;;  %v8803_v5 = vpack.c.bf16 %v7721_v53, %v7719_v10  ;;  %v7734_v1 = vld [vmem:[#allocation9 + $0xc0] sm:$0xff]  ;;  %v7739_v53 = vld [vmem:[#allocation9 + $0xe8] sm:$0xff] }
 0x30c   : > { %8800 = vmatprep.subr.bf16.mxu1 %v8799_v9  ;;  %v8821_v25 = vpack.c.bf16 %v7736_v52, %v7734_v1  ;;  %v5203_v9 = vld [vmem:[#allocation10] ss:$4 sm:$0x3]  ;;  %v7751_v52 = vld [vmem:[#allocation9 + $0x148] sm:$0xff] }
 0x30d   : > { %6482 = vmatmul.mubr.f32.gmra.mrb[58].mxu1 %v2341_v41  ;;  %v8809_v41 = vpack.c.bf16 %v7724_v13, %v7722_v51 }
 0x30e   : > { %7510 = vmatmul.mubr.f32.gmra.mrb[58].mxu0 %v3910_v39  ;;  %6487 = vmatprep.mubr.f32.mxu1 %v2349_v54  ;;  %v7727_v39 = vld [vmem:[#allocation9 + $0x88] sm:$0xff]  ;;  %v7729_v54 = vld [vmem:[#allocation9 + $0x98] sm:$0xff] }
 0x30f   : > { %7515 = vmatprep.mubr.f32.mxu0 %v3918_v63  ;;  %8802 = vmatpush1.bf16.msra.mxu1 %v8801_v11  ;;  %v8811_v57 = vpack.c.bf16 %v7729_v54, %v7727_v39  ;;  %v8813_v63 = vpack.c.bf16 %v7728_v31, %v7726_v12  ;;  %v7745_v39 = vld [vmem:[#allocation9 + $0x118] sm:$0xff]  ;;  %v7744_v12 = vld [vmem:[#allocation9 + $0x110] sm:$0xff] }
 0x310   : > { %8804 = vmatprep.subr.bf16.mxu1 %v8803_v5  ;;  %v7741_v5 = vld [vmem:[#allocation9 + $0xf8] sm:$0xff] }
 0x311   : > { %6488 = vmatmul.mubr.f32.gmra.mrb[60].mxu1 %v2346_v61  ;;  %v8823_v27 = vpack.c.bf16 %v7741_v5, %v7739_v53 }
 0x312   : > { %7516 = vmatmul.mubr.f32.gmra.mrb[60].mxu0 %v3915_v21  ;;  %6493 = vmatprep.mubr.f32.mxu1 %v2353_v60  ;;  %v7733_v21 = vld [vmem:[#allocation9 + $0xb8] sm:$0xff] }
 0x313   : > { %7521 = vmatprep.mubr.f32.mxu0 %v3922_v56  ;;  %8806 = vmatpush1.bf16.msra.mxu1 %v8805_v16  ;;  %v8815_v60 = vpack.c.bf16 %v7733_v21, %v7731_v32  ;;  %v7732_v56 = vld [vmem:[#allocation9 + $0xb0] sm:$0xff]  ;;  %v7747_v21 = vld [vmem:[#allocation9 + $0x128] sm:$0xff] }
 0x314   : > { %8808 = vmatprep.subr.bf16.mxu1 %v8807_v42  ;;  %v7740_v16 = vld [vmem:[#allocation9 + $0xf0] sm:$0xff] }
 0x315   : > { %6494 = vmatmul.mubr.f32.gmra.mrb[62].mxu1 %v2351_v14  ;;  %v8817_v14 = vpack.c.bf16 %v7732_v56, %v7730_v6  ;;  %v8825_v38 = vpack.c.bf16 %v7740_v16, %v7738_v50  ;;  %v7752_v50 = vld [vmem:[#allocation9 + $0x150] sm:$0xff] }
 0x316   : > { %7522 = vmatmul.mubr.f32.gmra.mrb[62].mxu0 %v3920_v15  ;;  %v5206_v15 = vshrl.u32 %v5205_v7, 7 }
 0x317   : > { %8810 = vmatpush1.bf16.msra.mxu1 %v8809_v41  ;;  %v7743_v41 = vld [vmem:[#allocation9 + $0x108] sm:$0xff] }
 0x318   : > { %8812 = vmatprep.subr.bf16.mxu1 %v8811_v57  ;;  %v11887_v4 = vsub.s32 0, %v5206_v15  ;;  %v11891_v11 = vsub.s32 1, %v5206_v15  ;;  %v8827_v54 = vpack.c.bf16 %v7745_v39, %v7743_v41  ;;  %v7742_v57 = vld [vmem:[#allocation9 + $0x100] sm:$0xff]  ;;  %v7755_v39 = vld [vmem:[#allocation9 + $0x168] sm:$0xff] }
 0x319   : > { %v8829_v31 = vpack.c.bf16 %v7744_v12, %v7742_v57  ;;  %v7746_v15 = vld [vmem:[#allocation9 + $0x120] sm:$0xff] }
 0x31a   : > { %v11896_v19 = vrot.slane %v5203_v9, %v11887_v4  ;;  %v11901_v51 = vrot.slane %v5203_v9, %v11891_v11 }
 0x31b   : > { %8814 = vmatpush1.bf16.msra.mxu1 %v8813_v63 }
 0x31c   : > { %8816 = vmatprep.subr.bf16.mxu1 %v8815_v60  ;;  %v7749_v60 = vld [vmem:[#allocation9 + $0x138] sm:$0xff] }
 0x31f   : > { %8818 = vmatpush1.bf16.msra.mxu1 %v8817_v14  ;;  %v8831_v14 = vpack.c.bf16 %v7749_v60, %v7747_v21 }
 0x320   : > { %8820 = vmatprep.subr.bf16.mxu1 %v8819_v62  ;;  %v8833_v62 = vpack.c.bf16 %v7748_v37, %v7746_v15 }
 0x323   : > { %8822 = vmatpush1.bf16.msra.mxu1 %v8821_v25  ;;  %v7753_v25 = vld [vmem:[#allocation9 + $0x158] sm:$0xff] }
 0x324   : > { %8824 = vmatprep.subr.bf16.mxu1 %v8823_v27  ;;  %v8835_v5 = vpack.c.bf16 %v7753_v25, %v7751_v52  ;;  %v7750_v27 = vld [vmem:[#allocation9 + $0x140] sm:$0xff] }
 0x327   : > { %8826 = vmatpush1.bf16.msra.mxu1 %v8825_v38  ;;  %v8837_v38 = vpack.c.bf16 %v7752_v50, %v7750_v27  ;;  %v7765_v50 = vld [vmem:[#allocation9 + $0x1b8] sm:$0xff] }
 0x328   : > { %8828 = vmatprep.subr.bf16.mxu1 %v8827_v54  ;;  %v7757_v54 = vld [vmem:[#allocation9 + $0x178] sm:$0xff] }
 0x32b   : > { %8830 = vmatpush1.bf16.msra.mxu1 %v8829_v31  ;;  %v8839_v31 = vpack.c.bf16 %v7757_v54, %v7755_v39 }
 0x32c   : > { %v11831_v47 = vpop.f32.mrb[0].mxu1  ;;  %8832 = vmatprep.subr.bf16.mxu1 %v8831_v14  ;;  %v7761_v14 = vld [vmem:[#allocation9 + $0x198] sm:$0xff] }
 0x32d   : > { %v11833_v2 = vpop.f32.mrb[1].mxu1  ;;  %v8891_v63 = vadd.f32 %v11831_v47, %v11896_v19 }
 0x32e   : > { %v8893_v7 = vadd.f32 %v11833_v2, %v11901_v51 }
 0x32f   : > { %8834 = vmatpush1.bf16.msra.mxu1 %v8833_v62 }
 0x330   : > { %v11835_v22 = vpop.f32.mrb[2].mxu1  ;;  %8836 = vmatprep.subr.bf16.mxu1 %v8835_v5 }
 0x331   : > { %v11837_v48 = vpop.f32.mrb[3].mxu1  ;;  %v8895_v47 = vadd.f32 %v11835_v22, %v11896_v19 }
 0x332   : > { %v8897_v2 = vadd.f32 %v11837_v48, %v11901_v51 }
 0x333   : > { %8838 = vmatpush1.bf16.msra.mxu1 %v8837_v38  ;;  %v7762_v38 = vld [vmem:[#allocation9 + $0x1a0] sm:$0xff] }
 0x334   : > { %v11839_v0 = vpop.f32.mrb[4].mxu1  ;;  %8840 = vmatprep.subr.bf16.mxu1 %v8839_v31  ;;  %v7769_v31 = vld [vmem:[#allocation9 + $0x1d8] sm:$0xff] }
 0x335   : > { %v11841_v45 = vpop.f32.mrb[5].mxu1  ;;  %v8899_v22 = vadd.f32 %v11839_v0, %v11896_v19 }
 0x336   : > { %v8901_v48 = vadd.f32 %v11841_v45, %v11901_v51 }
 0x338   : > { %v11843_v24 = vpop.f32.mrb[6].mxu1 }
 0x339   : > { %v11845_v33 = vpop.f32.mrb[7].mxu1  ;;  %v8903_v0 = vadd.f32 %v11843_v24, %v11896_v19 }
 0x33a   : > { %v8905_v45 = vadd.f32 %v11845_v33, %v11901_v51 }
 0x33c   : > { %v11847_v23 = vpop.f32.mrb[8].mxu1 }
 0x33d   : > { %v11849_v55 = vpop.f32.mrb[9].mxu1  ;;  %v8907_v24 = vadd.f32 %v11847_v23, %v11896_v19 }
 0x33e   : > { %v8909_v33 = vadd.f32 %v11849_v55, %v11901_v51 }
 0x340   : > { %v11851_v44 = vpop.f32.mrb[10].mxu1 }
 0x341   : > { %v11853_v20 = vpop.f32.mrb[11].mxu1  ;;  %v8911_v39 = vadd.f32 %v11851_v44, %v11896_v19 }
 0x342   : > { %v8913_v54 = vadd.f32 %v11853_v20, %v11901_v51 }
 0x344   : > { %v11855_v29 = vpop.f32.mrb[12].mxu1 }
 0x345   : > { %v11857_v35 = vpop.f32.mrb[13].mxu1  ;;  %v8915_v44 = vadd.f32 %v11855_v29, %v11896_v19 }
 0x346   : > { %v8917_v20 = vadd.f32 %v11857_v35, %v11901_v51 }
 0x348   : > { %v11859_v8 = vpop.f32.mrb[14].mxu1 }
 0x349   : > { %v11861_v18 = vpop.f32.mrb[15].mxu1  ;;  %v8919_v29 = vadd.f32 %v11859_v8, %v11896_v19 }
 0x34a   : > { %v8921_v35 = vadd.f32 %v11861_v18, %v11901_v51 }
 0x34c   : > { %v11863_v26 = vpop.f32.mrb[16].mxu1 }
 0x34d   : > { %v11865_v49 = vpop.f32.mrb[17].mxu1 }
 0x350   : > { %v11867_v17 = vpop.f32.mrb[18].mxu1 }
 0x351   : > { %v11869_v40 = vpop.f32.mrb[19].mxu1  ;;  %v8927_v18 = vadd.f32 %v11867_v17, %v11896_v19 }
 0x354   : > { %v11871_v46 = vpop.f32.mrb[20].mxu1 }
 0x355   : > { %v11873_v34 = vpop.f32.mrb[21].mxu1 }
 0x358   : > { %v11875_v3 = vpop.f32.mrb[22].mxu1 }
 0x359   : > { %v11877_v36 = vpop.f32.mrb[23].mxu1 }
 0x35c   : > { %v11879_v28 = vpop.f32.mrb[24].mxu1 }
 0x35d   : > { %v11881_v61 = vpop.f32.mrb[25].mxu1 }
 0x360   : > { %v11883_v43 = vpop.f32.mrb[26].mxu1 }
 0x361   : > { %v11885_v30 = vpop.f32.mrb[27].mxu1 }
 0x364   : > { %v11889_v58 = vpop.f32.mrb[28].mxu1 }
 0x365   : > { %v11893_v10 = vpop.f32.mrb[29].mxu1 }
 0x368   : > { %v11898_v42 = vpop.f32.mrb[30].mxu1 }
 0x369   : > { %v11903_v13 = vpop.f32.mrb[31].mxu1 }
 0x36d   : > { %v7337_v32 = vpop.f32.mrb[0].mxu0 }
 0x36e   : > { %v11909_v6 = vadd.f32 %v8891_v63, %v7337_v32  ;;  %v7339_v56 = vpop.f32.mrb[1].mxu0  ;;  %v7754_v63 = vld [vmem:[#allocation9 + $0x160] sm:$0xff] }
 0x36f   : > { %v11911_v59 = vadd.f32 %v8893_v7, %v7339_v56  ;;  %v7756_v7 = vld [vmem:[#allocation9 + $0x170] sm:$0xff]  ;;  %v7759_v56 = vld [vmem:[#allocation9 + $0x188] sm:$0xff] }
 0x370   : > { %v8841_v21 = vpack.c.bf16 %v7756_v7, %v7754_v63  ;;  %v8843_v62 = vpack.c.bf16 %v7761_v14, %v7759_v56 }
 0x371   : > { %v7343_v1 = vpop.f32.mrb[2].mxu0 }
 0x372   : > { %v11917_v9 = vadd.f32 %v8895_v47, %v7343_v1  ;;  %v7345_v53 = vpop.f32.mrb[3].mxu0  ;;  %8842 = vmatpush1.bf16.msra.mxu1 %v8841_v21  ;;  %v7758_v47 = vld [vmem:[#allocation9 + $0x180] sm:$0xff] }
 0x373   : > { %v11919_v16 = vadd.f32 %v8897_v2, %v7345_v53  ;;  %v7760_v2 = vld [vmem:[#allocation9 + $0x190] sm:$0xff]  ;;  %8844 = vmatprep.subr.bf16.mxu1 %v8843_v62  ;;  %v7763_v53 = vld [vmem:[#allocation9 + $0x1a8] sm:$0xff]  ;;  %v7773_v62 = vld [vmem:[#allocation9 + $0x1f8] sm:$0xff] }
 0x374   : > { %v8845_v52 = vpack.c.bf16 %v7760_v2, %v7758_v47  ;;  %v7770_v47 = vld [vmem:[#allocation9 + $0x1e0] sm:$0xff] }
 0x375   : > { %v7349_v41 = vpop.f32.mrb[4].mxu0 }
 0x376   : > { %v11925_v57 = vadd.f32 %v8899_v22, %v7349_v41  ;;  %v7351_v12 = vpop.f32.mrb[5].mxu0  ;;  %8846 = vmatpush1.bf16.msra.mxu1 %v8845_v52  ;;  %v7764_v41 = vld [vmem:[#allocation9 + $0x1b0] sm:$0xff] }
 0x377   : > { %v11927_v32 = vadd.f32 %v8901_v48, %v7351_v12  ;;  %v8847_v48 = vpack.c.bf16 %v7765_v50, %v7763_v53  ;;  %v8849_v23 = vpack.c.bf16 %v7764_v41, %v7762_v38  ;;  %v7767_v12 = vld [vmem:[#allocation9 + $0x1c8] sm:$0xff]  ;;  %v8923_v41 = vadd.f32 %v11863_v26, %v11896_v19 }
 0x378   : > { %v8851_v21 = vpack.c.bf16 %v7769_v31, %v7767_v12  ;;  %v8929_v12 = vadd.f32 %v11869_v40, %v11901_v51  ;;  %v8935_v40 = vadd.f32 %v11875_v3, %v11896_v19 }
 0x379   : > { %v7355_v60 = vpop.f32.mrb[6].mxu0  ;;  %8848 = vmatprep.subr.bf16.mxu1 %v8847_v48 }
 0x37a   : > { %v11933_v15 = vadd.f32 %v8903_v0, %v7355_v60  ;;  %v7357_v37 = vpop.f32.mrb[7].mxu0  ;;  %8850 = vmatpush1.bf16.msra.mxu1 %v8849_v23  ;;  %v7766_v0 = vld [vmem:[#allocation9 + $0x1c0] sm:$0xff] }
 0x37b   : > { %v11935_v1 = vadd.f32 %v8905_v45, %v7357_v37  ;;  %v7768_v45 = vld [vmem:[#allocation9 + $0x1d0] sm:$0xff]  ;;  %8852 = vmatprep.subr.bf16.mxu1 %v8851_v21  ;;  %v7771_v37 = vld [vmem:[#allocation9 + $0x1e8] sm:$0xff] }
 0x37c   : > { %v8853_v56 = vpack.c.bf16 %v7768_v45, %v7766_v0  ;;  %v8933_v0 = vadd.f32 %v11873_v34, %v11901_v51  ;;  %v8939_v34 = vadd.f32 %v11879_v28, %v11896_v19 }
 0x37d   : > { %v7361_v25 = vpop.f32.mrb[8].mxu0 }
 0x37e   : > { %v11941_v5 = vadd.f32 %v8907_v24, %v7361_v25  ;;  %v7363_v27 = vpop.f32.mrb[9].mxu0  ;;  %8854 = vmatpush1.bf16.msra.mxu1 %v8853_v56  ;;  %v8855_v24 = vpack.c.bf16 %v7773_v62, %v7771_v37 }
 0x37f   : > { %v11943_v22 = vadd.f32 %v8909_v33, %v7363_v27  ;;  %v7772_v33 = vld [vmem:[#allocation9 + $0x1f0] sm:$0xff] }
 0x380   : > { %v8857_v53 = vpack.c.bf16 %v7772_v33, %v7770_v47  ;;  %8856 = vmatprep.subr.bf16.mxu1 %v8855_v24  ;;  %v8941_v47 = vadd.f32 %v11881_v61, %v11901_v51  ;;  %v8947_v61 = vadd.f32 %v11889_v58, %v11896_v19 }
 0x381   : > { %v7367_v55 = vpop.f32.mrb[10].mxu0 }
 0x382   : > { %v11949_v63 = vadd.f32 %v8911_v39, %v7367_v55  ;;  %v7369_v7 = vpop.f32.mrb[11].mxu0  ;;  %8858 = vmatpush1.bf16.msra.mxu1 %v8857_v53  ;;  %v8925_v39 = vadd.f32 %v11865_v49, %v11901_v51  ;;  %v8931_v49 = vadd.f32 %v11871_v46, %v11896_v19  ;;  %v8945_v53 = vadd.f32 %v11885_v30, %v11901_v51 }
 0x383   : > { %v11951_v60 = vadd.f32 %v8913_v54, %v7369_v7  ;;  %v8951_v30 = vadd.f32 %v11898_v42, %v11896_v19 }
 0x385   : > { %v7373_v14 = vpop.f32.mrb[12].mxu0 }
 0x386   : > { %v11957_v2 = vadd.f32 %v8915_v44, %v7373_v14  ;;  %v7375_v52 = vpop.f32.mrb[13].mxu0 }
 0x387   : > { %v11959_v25 = vadd.f32 %v8917_v20, %v7375_v52  ;;  %v8937_v20 = vadd.f32 %v11877_v36, %v11901_v51  ;;  %v8943_v36 = vadd.f32 %v11883_v43, %v11896_v19 }
 0x389   : > { %v7379_v27 = vpop.f32.mrb[14].mxu0 }
 0x38a   : > { %v11965_v50 = vadd.f32 %v8919_v29, %v7379_v27  ;;  %v7381_v38 = vpop.f32.mrb[15].mxu0 }
 0x38b   : > { %v11967_v48 = vadd.f32 %v8921_v35, %v7381_v38  ;;  %v8949_v38 = vadd.f32 %v11893_v10, %v11901_v51 }
 0x38d   : > { %v7385_v23 = vpop.f32.mrb[16].mxu0 }
 0x38e   : > { %v11973_v54 = vadd.f32 %v8923_v41, %v7385_v23  ;;  %v7387_v8 = vpop.f32.mrb[17].mxu0 }
 0x38f   : > { %v11975_v55 = vadd.f32 %v8925_v39, %v7387_v8  ;;  %v8953_v8 = vadd.f32 %v11903_v13, %v11901_v51  ;;  %v12947_v13 = vmax.f32 %v11919_v16, 0.0 }
 0x391   : > { %v7391_v31 = vpop.f32.mrb[18].mxu0 }
 0x392   : > { %v11981_v7 = vadd.f32 %v8927_v18, %v7391_v31  ;;  %v7393_v21 = vpop.f32.mrb[19].mxu0 }
 0x393   : > { %v11983_v26 = vadd.f32 %v8929_v12, %v7393_v21 }
 0x394   : > { %13068 = vst [vmem:[#allocation17_spill] sm:$0xff] %v11981_v7 }
 0x395   : > { %v7397_v45 = vpop.f32.mrb[20].mxu0 }
 0x396   : > { %v11989_v56 = vadd.f32 %v8931_v49, %v7397_v45  ;;  %v7399_v44 = vpop.f32.mrb[21].mxu0 }
 0x397   : > { %v11991_v17 = vadd.f32 %v8933_v0, %v7399_v44 }
 0x398   : > { %13069 = vst [vmem:[#allocation18_spill] sm:$0xff] %v11989_v56 }
 0x399   : > { %v7403_v14 = vpop.f32.mrb[22].mxu0 }
 0x39a   : > { %v11997_v37 = vadd.f32 %v8935_v40, %v7403_v14  ;;  %v7405_v62 = vpop.f32.mrb[23].mxu0  ;;  %v12949_v40 = vmax.f32 %v11917_v9, 0.0 }
 0x39b   : > { %v11999_v46 = vadd.f32 %v8937_v20, %v7405_v62  ;;  %v12955_v62 = vmax.f32 %v11909_v6, 0.0 }
 0x39c   : > { %13070 = vst [vmem:[#allocation19_spill] sm:$0xff] %v11997_v37 }
 0x39d   : > { %v7409_v52 = vpop.f32.mrb[24].mxu0 }
 0x39e   : > { %v12005_v24 = vadd.f32 %v8939_v34, %v7409_v52  ;;  %v7411_v33 = vpop.f32.mrb[25].mxu0  ;;  %v12943_v34 = vmax.f32 %v11925_v57, 0.0 }
 0x39f   : > { %v12007_v3 = vadd.f32 %v8941_v47, %v7411_v33 }
 0x3a0   : > { %13071 = vst [vmem:[#allocation20_spill] sm:$0xff] %v12005_v24 }
 0x3a1   : > { %v7415_v29 = vpop.f32.mrb[26].mxu0 }
 0x3a2   : > { %v12013_v35 = vadd.f32 %v8943_v36, %v7415_v29  ;;  %v7417_v27 = vpop.f32.mrb[27].mxu0  ;;  %v12953_v36 = vmax.f32 %v11911_v59, 0.0 }
 0x3a3   : > { %v12015_v28 = vadd.f32 %v8945_v53, %v7417_v27  ;;  %v12942_v53 = vmax.f32 %v11927_v32, 0.0 }
 0x3a4   : > { %13072 = vst [vmem:[#allocation21_spill] sm:$0xff] %v12013_v35 }
 0x3a5   : > { %v7421_v41 = vpop.f32.mrb[28].mxu0 }
 0x3a6   : > { %v12021_v39 = vadd.f32 %v8947_v61, %v7421_v41  ;;  %v7423_v23 = vpop.f32.mrb[29].mxu0  ;;  %v7592_v61 = vadd.f32 %v12949_v40, %v12955_v62 }
 0x3a7   : > { %v12023_v43 = vadd.f32 %v8949_v38, %v7423_v23  ;;  %v12944_v38 = vmax.f32 %v11933_v15, 0.0  ;;  %v7629_v23 = vadd.f32 %v12947_v13, %v12953_v36 }
 0x3a8   : > { %13073 = vst [vmem:[#allocation22_spill] sm:$0xff] %v12021_v39 }
 0x3a9   : > { %v7427_v18 = vpop.f32.mrb[30].mxu0 }
 0x3aa   : > { %v12029_v12 = vadd.f32 %v8951_v30, %v7427_v18  ;;  %v7429_v31 = vpop.f32.mrb[31].mxu0  ;;  %v12945_v30 = vmax.f32 %v11935_v1, 0.0 }
 0x3ab   : > { %v12031_v58 = vadd.f32 %v8953_v8, %v7429_v31  ;;  %v7593_v31 = vadd.f32 %v7592_v61, %v12943_v34  ;;  %v12951_v61 = vmax.f32 %v11951_v60, 0.0 }
 0x3ac   : > { %13074 = vst [vmem:[#allocation23_spill] sm:$0xff] %v12029_v12  ;;  %v6405_v21 = vpop.f32.mrb[32].mxu1 }
 0x3ad   : > { %v8955_v10 = vadd.f32 %v6405_v21, %v11896_v19  ;;  %v7433_v49 = vpop.f32.mrb[32].mxu0  ;;  %v6407_v0 = vpop.f32.mrb[33].mxu1  ;;  %v12946_v21 = vmax.f32 %v11941_v5, 0.0 }
 0x3ae   : > { %v8957_v45 = vadd.f32 %v6407_v0, %v11901_v51  ;;  %v7435_v44 = vpop.f32.mrb[33].mxu0 }
 0x3af   : > { %v12036_v42 = vadd.f32 %v8955_v10, %v7433_v49 }
 0x3b0   : > { %v12039_v20 = vadd.f32 %v8957_v45, %v7435_v44  ;;  %v6411_v14 = vpop.f32.mrb[34].mxu1  ;;  %v7630_v45 = vadd.f32 %v7629_v23, %v12942_v53  ;;  %v12948_v44 = vmax.f32 %v11943_v22, 0.0 }
 0x3b1   : > { %13075 = vst [vmem:[#allocation24_spill] sm:$0xff] %v12036_v42  ;;  %v8959_v47 = vadd.f32 %v6411_v14, %v11896_v19  ;;  %v7439_v52 = vpop.f32.mrb[34].mxu0  ;;  %v6413_v33 = vpop.f32.mrb[35].mxu1 }
 0x3b2   : > { %v8961_v29 = vadd.f32 %v6413_v33, %v11901_v51  ;;  %v7441_v27 = vpop.f32.mrb[35].mxu0  ;;  %v12950_v33 = vmax.f32 %v11949_v63, 0.0 }
 0x3b3   : > { %v12052_v41 = vadd.f32 %v8959_v47, %v7439_v52  ;;  %v7594_v52 = vadd.f32 %v7593_v31, %v12944_v38 }
 0x3b4   : > { %v12059_v8 = vadd.f32 %v8961_v29, %v7441_v27  ;;  %v6417_v18 = vpop.f32.mrb[36].mxu1  ;;  %v7631_v27 = vadd.f32 %v7630_v45, %v12945_v30 }
 0x3b5   : > { %13076 = vst [vmem:[#allocation25_spill] sm:$0xff] %v12052_v41  ;;  %v8963_v10 = vadd.f32 %v6417_v18, %v11896_v19  ;;  %v7445_v49 = vpop.f32.mrb[36].mxu0  ;;  %v6419_v0 = vpop.f32.mrb[37].mxu1  ;;  %v7595_v53 = vadd.f32 %v7594_v52, %v12946_v21  ;;  %v12957_v21 = vmax.f32 %v11967_v48, 0.0 }
 0x3b6   : > { %v8965_v14 = vadd.f32 %v6419_v0, %v11901_v51  ;;  %v7447_v47 = vpop.f32.mrb[37].mxu0  ;;  %v12952_v0 = vmax.f32 %v11957_v2, 0.0 }
 0x3b7   : > { %v12072_v29 = vadd.f32 %v8963_v10, %v7445_v49  ;;  %v7632_v10 = vadd.f32 %v7631_v27, %v12948_v44  ;;  %v12954_v49 = vmax.f32 %v11959_v25, 0.0 }
 0x3b8   : > { %v12077_v18 = vadd.f32 %v8965_v14, %v7447_v47  ;;  %v6423_v23 = vpop.f32.mrb[38].mxu1  ;;  %v7596_v14 = vadd.f32 %v7595_v53, %v12950_v33  ;;  %v12956_v47 = vmax.f32 %v11965_v50, 0.0 }
 0x3b9   : > { %13077 = vst [vmem:[#allocation26_spill] sm:$0xff] %v12072_v29  ;;  %v8967_v34 = vadd.f32 %v6423_v23, %v11896_v19  ;;  %v7451_v31 = vpop.f32.mrb[38].mxu0  ;;  %v6425_v38 = vpop.f32.mrb[39].mxu1  ;;  %v7633_v23 = vadd.f32 %v7632_v10, %v12951_v61 }
 0x3ba   : > { %v8969_v45 = vadd.f32 %v6425_v38, %v11901_v51  ;;  %v7453_v30 = vpop.f32.mrb[39].mxu0  ;;  %v7597_v44 = vadd.f32 %v7596_v14, %v12952_v0  ;;  %v12958_v38 = vmax.f32 %v11973_v54, 0.0  ;;  %v12962_v0 = vmax.f32 %v11983_v26, 0.0 }
 0x3bb   : > { %v12090_v52 = vadd.f32 %v8967_v34, %v7451_v31  ;;  %v7634_v34 = vadd.f32 %v7633_v23, %v12954_v49  ;;  %v12959_v31 = vmax.f32 %v11975_v55, 0.0 }
 0x3bc   : > { %v12095_v13 = vadd.f32 %v8969_v45, %v7453_v30  ;;  %v6429_v27 = vpop.f32.mrb[40].mxu1  ;;  %v7598_v30 = vadd.f32 %v7597_v44, %v12956_v47  ;;  %v12961_v45 = vmax.f32 %v11981_v7, 0.0 }
 0x3bd   : > { %13078 = vst [vmem:[#allocation27_spill] sm:$0xff] %v12090_v52  ;;  %v8971_v40 = vadd.f32 %v6429_v27, %v11896_v19  ;;  %v7457_v53 = vpop.f32.mrb[40].mxu0  ;;  %v6431_v33 = vpop.f32.mrb[41].mxu1  ;;  %v7635_v27 = vadd.f32 %v7634_v34, %v12957_v21 }
 0x3be   : > { %v8973_v10 = vadd.f32 %v6431_v33, %v11901_v51  ;;  %v7459_v61 = vpop.f32.mrb[41].mxu0  ;;  %v7599_v49 = vadd.f32 %v7598_v30, %v12958_v38 }
 0x3bf   : > { %v12108_v14 = vadd.f32 %v8971_v40, %v7457_v53  ;;  %v7636_v40 = vadd.f32 %v7635_v27, %v12959_v31  ;;  %v13081_v31 = vmax.f32 %v11989_v56, 0.0 }
 0x3c0   : > { %v12113_v36 = vadd.f32 %v8973_v10, %v7459_v61  ;;  %v6435_v23 = vpop.f32.mrb[42].mxu1  ;;  %v7600_v61 = vadd.f32 %v7599_v49, %v12961_v45 }
 0x3c1   : > { %13079 = vst [vmem:[#allocation28_spill] sm:$0xff] %v12108_v14  ;;  %v8975_v62 = vadd.f32 %v6435_v23, %v11896_v19  ;;  %v7463_v44 = vpop.f32.mrb[42].mxu0  ;;  %v6437_v47 = vpop.f32.mrb[43].mxu1  ;;  %v7637_v23 = vadd.f32 %v7636_v40, %v12962_v0 }
 0x3c2   : > { %v8977_v34 = vadd.f32 %v6437_v47, %v11901_v51  ;;  %v7465_v21 = vpop.f32.mrb[43].mxu0  ;;  %v7601_v53 = vadd.f32 %v7600_v61, %v13081_v31  ;;  %v13085_v61 = vmax.f32 %v11999_v46, 0.0 }
 0x3c3   : > { %v12126_v30 = vadd.f32 %v8975_v62, %v7463_v44  ;;  %v13082_v62 = vmax.f32 %v11991_v17, 0.0 }
 0x3c4   : > { %v12131_v33 = vadd.f32 %v8977_v34, %v7465_v21  ;;  %v6441_v27 = vpop.f32.mrb[44].mxu1  ;;  %v13083_v21 = vmax.f32 %v11997_v37, 0.0 }
 0x3c5   : > { %13080 = vst [vmem:[#allocation29_spill] sm:$0xff] %v12126_v30  ;;  %v8979_v7 = vadd.f32 %v6441_v27, %v11896_v19  ;;  %v7469_v49 = vpop.f32.mrb[44].mxu0  ;;  %v6443_v45 = vpop.f32.mrb[45].mxu1  ;;  %v7638_v44 = vadd.f32 %v7637_v23, %v13082_v62  ;;  %v13086_v62 = vmax.f32 %v12005_v24, 0.0 }
 0x3c6   : > { %v8981_v40 = vadd.f32 %v6443_v45, %v11901_v51  ;;  %v7471_v0 = vpop.f32.mrb[45].mxu0  ;;  %v7602_v34 = vadd.f32 %v7601_v53, %v13083_v21 }
 0x3c7   : > { %v12144_v31 = vadd.f32 %v8979_v7, %v7469_v49  ;;  %v7639_v27 = vadd.f32 %v7638_v44, %v13085_v61  ;;  %v13087_v7 = vmax.f32 %v12007_v3, 0.0 }
 0x3c8   : > { %v12149_v56 = vadd.f32 %v8981_v40, %v7471_v0  ;;  %v6447_v23 = vpop.f32.mrb[46].mxu1  ;;  %v7603_v10 = vadd.f32 %v7602_v34, %v13086_v62  ;;  %v13088_v0 = vmax.f32 %v12013_v35, 0.0  ;;  %v13090_v62 = vmax.f32 %v12015_v28, 0.0 }
 0x3c9   : > { %13084 = vst [vmem:[#allocation30_spill] sm:$0xff] %v12144_v31  ;;  %v8983_v37 = vadd.f32 %v6447_v23, %v11896_v19  ;;  %v7475_v53 = vpop.f32.mrb[46].mxu0  ;;  %v6449_v21 = vpop.f32.mrb[47].mxu1  ;;  %v7640_v49 = vadd.f32 %v7639_v27, %v13087_v7  ;;  %v13091_v7 = vmax.f32 %v12021_v39, 0.0 }
 0x3ca   : > { %v8985_v44 = vadd.f32 %v6449_v21, %v11901_v51  ;;  %v7477_v61 = vpop.f32.mrb[47].mxu0  ;;  %v7604_v40 = vadd.f32 %v7603_v10, %v13088_v0 }
 0x3cb   : > { %v12162_v34 = vadd.f32 %v8983_v37, %v7475_v53  ;;  %v7641_v23 = vadd.f32 %v7640_v49, %v13090_v62  ;;  %v13092_v37 = vmax.f32 %v12023_v43, 0.0 }
 0x3cc   : > { %v12167_v24 = vadd.f32 %v8985_v44, %v7477_v61  ;;  %v6453_v27 = vpop.f32.mrb[48].mxu1  ;;  %v7605_v38 = vadd.f32 %v7604_v40, %v13091_v7  ;;  %v13093_v44 = vmax.f32 %v12029_v12, 0.0  ;;  %v13095_v7 = vmax.f32 %v12031_v58, 0.0 }
 0x3cd   : > { %13089 = vst [vmem:[#allocation31_spill] sm:$0xff] %v12162_v34  ;;  %v8987_v35 = vadd.f32 %v6453_v27, %v11896_v19  ;;  %v7481_v10 = vpop.f32.mrb[48].mxu0  ;;  %v6455_v0 = vpop.f32.mrb[49].mxu1  ;;  %v7642_v53 = vadd.f32 %v7641_v23, %v13092_v37  ;;  %v13096_v37 = vmax.f32 %v12036_v42, 0.0 }
 0x3ce   : > { %v8989_v49 = vadd.f32 %v6455_v0, %v11901_v51  ;;  %v7483_v62 = vpop.f32.mrb[49].mxu0  ;;  %v7606_v61 = vadd.f32 %v7605_v38, %v13093_v44 }
 0x3cf   : > { %v12180_v40 = vadd.f32 %v8987_v35, %v7481_v10  ;;  %v7643_v27 = vadd.f32 %v7642_v53, %v13095_v7  ;;  %v13097_v35 = vmax.f32 %v12039_v20, 0.0 }
 0x3d0   : > { %v12185_v39 = vadd.f32 %v8989_v49, %v7483_v62  ;;  %v6459_v23 = vpop.f32.mrb[50].mxu1  ;;  %v7607_v47 = vadd.f32 %v7606_v61, %v13096_v37  ;;  %v13098_v49 = vmax.f32 %v12052_v41, 0.0  ;;  %v13100_v37 = vmax.f32 %v12059_v8, 0.0 }
 0x3d1   : > { %13094 = vst [vmem:[#allocation32_spill] sm:$0xff] %v12180_v40  ;;  %v8991_v12 = vadd.f32 %v6459_v23, %v11896_v19  ;;  %v7487_v38 = vpop.f32.mrb[50].mxu0  ;;  %v6461_v44 = vpop.f32.mrb[51].mxu1  ;;  %v7644_v10 = vadd.f32 %v7643_v27, %v13097_v35  ;;  %v13101_v35 = vmax.f32 %v12072_v29, 0.0 }
 0x3d2   : > { %v8993_v53 = vadd.f32 %v6461_v44, %v11901_v51  ;;  %v7489_v7 = vpop.f32.mrb[51].mxu0  ;;  %v7608_v62 = vadd.f32 %v7607_v47, %v13098_v49 }
 0x3d3   : > { %v12198_v61 = vadd.f32 %v8991_v12, %v7487_v38  ;;  %v7645_v23 = vadd.f32 %v7644_v10, %v13100_v37  ;;  %v13102_v12 = vmax.f32 %v12077_v18, 0.0 }
 0x3d4   : > { %v12203_v42 = vadd.f32 %v8993_v53, %v7489_v7  ;;  %v6465_v27 = vpop.f32.mrb[52].mxu1  ;;  %v7609_v45 = vadd.f32 %v7608_v62, %v13101_v35  ;;  %v13103_v53 = vmax.f32 %v12090_v52, 0.0  ;;  %v13105_v35 = vmax.f32 %v12095_v13, 0.0 }
 0x3d5   : > { %13099 = vst [vmem:[#allocation33_spill] sm:$0xff] %v12198_v61  ;;  %v8995_v41 = vadd.f32 %v6465_v27, %v11896_v19  ;;  %v7493_v47 = vpop.f32.mrb[52].mxu0  ;;  %v6467_v49 = vpop.f32.mrb[53].mxu1  ;;  %v7646_v38 = vadd.f32 %v7645_v23, %v13102_v12  ;;  %v13106_v12 = vmax.f32 %v12108_v14, 0.0 }
 0x3d6   : > { %v8997_v10 = vadd.f32 %v6467_v49, %v11901_v51  ;;  %v7495_v37 = vpop.f32.mrb[53].mxu0  ;;  %v7610_v7 = vadd.f32 %v7609_v45, %v13103_v53 }
 0x3d7   : > { %v12216_v62 = vadd.f32 %v8995_v41, %v7493_v47  ;;  %v7647_v27 = vadd.f32 %v7646_v38, %v13105_v35  ;;  %v13107_v41 = vmax.f32 %v12113_v36, 0.0 }
 0x3d8   : > { %v12221_v29 = vadd.f32 %v8997_v10, %v7495_v37  ;;  %v6471_v23 = vpop.f32.mrb[54].mxu1  ;;  %v7611_v21 = vadd.f32 %v7610_v7, %v13106_v12  ;;  %v13108_v10 = vmax.f32 %v12126_v30, 0.0  ;;  %v13110_v12 = vmax.f32 %v12131_v33, 0.0 }
 0x3d9   : > { %13104 = vst [vmem:[#allocation34_spill] sm:$0xff] %v12216_v62  ;;  %v8999_v52 = vadd.f32 %v6471_v23, %v11896_v19  ;;  %v7499_v45 = vpop.f32.mrb[54].mxu0  ;;  %v6473_v53 = vpop.f32.mrb[55].mxu1  ;;  %v7648_v47 = vadd.f32 %v7647_v27, %v13107_v41  ;;  %v13111_v41 = vmax.f32 %v12144_v31, 0.0 }
 0x3da   : > { %v9001_v38 = vadd.f32 %v6473_v53, %v11901_v51  ;;  %v7501_v35 = vpop.f32.mrb[55].mxu0  ;;  %v7612_v37 = vadd.f32 %v7611_v21, %v13108_v10 }
 0x3db   : > { %v12234_v7 = vadd.f32 %v8999_v52, %v7499_v45  ;;  %v7649_v23 = vadd.f32 %v7648_v47, %v13110_v12  ;;  %v13112_v52 = vmax.f32 %v12149_v56, 0.0 }
 0x3dc   : > { %v12239_v14 = vadd.f32 %v9001_v38, %v7501_v35  ;;  %v6477_v27 = vpop.f32.mrb[56].mxu1  ;;  %v7613_v0 = vadd.f32 %v7612_v37, %v13111_v41  ;;  %v13113_v38 = vmax.f32 %v12162_v34, 0.0  ;;  %v13114_v41 = vmax.f32 %v12167_v24, 0.0 }
 0x3dd   : > { %13109 = vst [vmem:[#allocation35_spill] sm:$0xff] %v12234_v7  ;;  %v9003_v30 = vadd.f32 %v6477_v27, %v11896_v19  ;;  %v7505_v21 = vpop.f32.mrb[56].mxu0  ;;  %v6479_v10 = vpop.f32.mrb[57].mxu1  ;;  %v7650_v45 = vadd.f32 %v7649_v23, %v13112_v52  ;;  %v13115_v52 = vmax.f32 %v12180_v40, 0.0 }
 0x3de   : > { %v9005_v47 = vadd.f32 %v6479_v10, %v11901_v51  ;;  %v7507_v12 = vpop.f32.mrb[57].mxu0  ;;  %v7614_v35 = vadd.f32 %v7613_v0, %v13113_v38 }
 0x3df   : > { %v12252_v37 = vadd.f32 %v9003_v30, %v7505_v21  ;;  %v7651_v27 = vadd.f32 %v7650_v45, %v13114_v41  ;;  %v13116_v30 = vmax.f32 %v12185_v39, 0.0 }
 0x3e0   : > { %v12257_v31 = vadd.f32 %v9005_v47, %v7507_v12  ;;  %v6483_v23 = vpop.f32.mrb[58].mxu1  ;;  %v7615_v44 = vadd.f32 %v7614_v35, %v13115_v52  ;;  %v13117_v47 = vmax.f32 %v12198_v61, 0.0  ;;  %v13118_v52 = vmax.f32 %v12203_v42, 0.0 }
 0x3e1   : > { %v9007_v34 = vadd.f32 %v6483_v23, %v11896_v19  ;;  %v7511_v0 = vpop.f32.mrb[58].mxu0  ;;  %v6485_v38 = vpop.f32.mrb[59].mxu1  ;;  %v7652_v21 = vadd.f32 %v7651_v27, %v13116_v30  ;;  %v13120_v30 = vmax.f32 %v12216_v62, 0.0 }
 0x3e2   : > { %v9009_v45 = vadd.f32 %v6485_v38, %v11901_v51  ;;  %v7513_v41 = vpop.f32.mrb[59].mxu0  ;;  %v7616_v12 = vadd.f32 %v7615_v44, %v13117_v47 }
 0x3e3   : > { %v12270_v35 = vadd.f32 %v9007_v34, %v7511_v0  ;;  %v7653_v23 = vadd.f32 %v7652_v21, %v13118_v52  ;;  %v13121_v34 = vmax.f32 %v12221_v29, 0.0 }
 0x3e4   : > { %v12275_v40 = vadd.f32 %v9009_v45, %v7513_v41  ;;  %v6489_v27 = vpop.f32.mrb[60].mxu1  ;;  %v7617_v49 = vadd.f32 %v7616_v12, %v13120_v30  ;;  %v13122_v45 = vmax.f32 %v12234_v7, 0.0  ;;  %v13124_v30 = vmax.f32 %v12239_v14, 0.0 }
 0x3e5   : > { %v9011_v61 = vadd.f32 %v6489_v27, %v11896_v19  ;;  %v7517_v44 = vpop.f32.mrb[60].mxu0  ;;  %v6491_v47 = vpop.f32.mrb[61].mxu1  ;;  %v7654_v0 = vadd.f32 %v7653_v23, %v13121_v34  ;;  %v13126_v34 = vmax.f32 %v12252_v37, 0.0 }
 0x3e6   : > { %13119 = vst [vmem:[#allocation36_spill] sm:$0xff] %v12275_v40  ;;  %v9013_v21 = vadd.f32 %v6491_v47, %v11901_v51  ;;  %v7519_v52 = vpop.f32.mrb[61].mxu0  ;;  %v7618_v41 = vadd.f32 %v7617_v49, %v13122_v45 }
 0x3e7   : > { %v12288_v12 = vadd.f32 %v9011_v61, %v7517_v44  ;;  %v7655_v27 = vadd.f32 %v7654_v0, %v13124_v30  ;;  %v13127_v61 = vmax.f32 %v12257_v31, 0.0 }
 0x3e8   : > { %v12293_v62 = vadd.f32 %v9013_v21, %v7519_v52  ;;  %v6495_v23 = vpop.f32.mrb[62].mxu1  ;;  %v7619_v53 = vadd.f32 %v7618_v41, %v13126_v34  ;;  %v13128_v21 = vmax.f32 %v12270_v35, 0.0  ;;  %v13130_v41 = vmax.f32 %v12275_v40, 0.0 }
 0x3e9   : > { %13123 = vst [vmem:[#allocation37_spill] sm:$0xff] %v12288_v12  ;;  %v9015_v7 = vadd.f32 %v6495_v23, %v11896_v19  ;;  %v7523_v49 = vpop.f32.mrb[62].mxu0  ;;  %v6497_v45 = vpop.f32.mrb[63].mxu1  ;;  %v7656_v44 = vadd.f32 %v7655_v27, %v13127_v61  ;;  %v13132_v19 = vmax.f32 %v12288_v12, 0.0 }
 0x3ea   : > { %13125 = vst [vmem:[#allocation38_spill] sm:$0xff] %v12293_v62  ;;  %v12983_v10 = vmax.f32 %v12293_v62, 0.0  ;;  %v9017_v0 = vadd.f32 %v6497_v45, %v11901_v51  ;;  %v7525_v30 = vpop.f32.mrb[63].mxu0  ;;  %v7620_v52 = vadd.f32 %v7619_v53, %v13128_v21  ;;  %v7671_v62 = vld [vmem:[#allocation10 + $0x2] ss:$4 sm:$0x3] }
 0x3eb   : > { %v12305_v38 = vadd.f32 %v9015_v7, %v7523_v49  ;;  %v7657_v34 = vadd.f32 %v7656_v44, %v13130_v41  ;;  %v7669_v41 = vld [vmem:[#allocation10 + $0x1] ss:$4 sm:$0x3] }
 0x3ec   : > { %v12309_v47 = vadd.f32 %v9017_v0, %v7525_v30  ;;  %v7621_v23 = vadd.f32 %v7620_v52, %v13132_v19  ;;  %v7676_v40 = vrot.slane %v7669_v41, %v11887_v4 }
 0x3ed   : > { %13129 = vst [vmem:[#allocation39_spill] sm:$0xff] %v12305_v38  ;;  %v12986_v27 = vmax.f32 %v12305_v38, 0.0  ;;  %v7658_v61 = vadd.f32 %v7657_v34, %v12983_v10 }
 0x3ee   : > { %13131 = vst [vmem:[#allocation40_spill] sm:$0xff] %v12309_v47  ;;  %v12987_v51 = vmax.f32 %v12309_v47, 0.0 }
 0x3ef   : > { %v7622_v53 = vadd.f32 %v7621_v23, %v12986_v27  ;;  %v7680_v23 = vrot.slane %v7669_v41, %v11891_v11 }
 0x3f0   : > { %v7659_v7 = vadd.f32 %v7658_v61, %v12987_v51  ;;  %v7689_v61 = vrot.slane %v7671_v62, %v11887_v4 }
 0x3f1   : > { %v7623_v49 = vrot.slane %v7622_v53, 4 }
 0x3f2   : > { %v7660_v45 = vrot.slane %v7659_v7, 4 }
 0x3f3   : > { %v7624_v44 = vadd.f32 %v7623_v49, %v7622_v53  ;;  %v7693_v53 = vrot.slane %v7671_v62, %v11891_v11 }
 0x3f4   : > { %v7661_v0 = vadd.f32 %v7660_v45, %v7659_v7 }
 0x3f5   : > { %v7625_v30 = vrot.slane %v7624_v44, 2 }
 0x3f6   : > { %v7662_v21 = vrot.slane %v7661_v0, 2 }
 0x3f7   : > { %v7626_v52 = vadd.f32 %v7625_v30, %v7624_v44 }
 0x3f8   : > { %v7663_v19 = vadd.f32 %v7662_v21, %v7661_v0 }
 0x3f9   : > { %v7627_v12 = vrot.slane %v7626_v52, 1 }
 0x3fa   : > { %v7664_v34 = vrot.slane %v7663_v19, 1 }
 0x3fb   : > { %v7628_v10 = vadd.f32 %v7627_v12, %v7626_v52 }
 0x3fc   : > { %v7665_v38 = vadd.f32 %v7664_v34, %v7663_v19 }
 0x3fd   : > { %v7666_v27 = vmul.f32 0.00390625, %v7628_v10  ;;  %v7846_v10 = vld [vmem:[#allocation10 + $0x3] ss:$4 sm:$0x3] }
 0x3fe   : > { %v7667_v51 = vmul.f32 0.00390625, %v7665_v38  ;;  %v7851_v41 = vrot.slane %v7846_v10, %v11887_v4  ;;  %v7855_v38 = vrot.slane %v7846_v10, %v11891_v11 }
 0x3ff   : > { %v7683_v7 = vmul.f32 %v7676_v40, %v7666_v27 }
 0x400   : > { %v7684_v49 = vmul.f32 %v7680_v23, %v7667_v51 }
 0x401   : > { %v7696_v45 = vadd.f32 %v7689_v61, %v7683_v7 }
 0x402   : > { %v7697_v44 = vadd.f32 %v7693_v53, %v7684_v49 }
 0x403   : > { %v7698_v0 = vmax.f32 %v7696_v45, 0.0 }
 0x404   : > { %v7699_v30 = vmax.f32 %v7697_v44, 0.0 }
 0x405   : > { %v7700_v21 = vadd.f32 %v7698_v0, %v7666_v27 }
 0x406   : > { %v7701_v47 = vadd.f32 %v7699_v30, %v7667_v51 }
 0x407   : > { %v7705_v52 = vrot.slane %v7700_v21, %v11887_v4 }
 0x408   : > { %v7709_v12 = vrot.slane %v7701_v47, %v11887_v4 }
 0x40a   : > { %7838 = vmatprep.mubr.f32.mxu1 %v7709_v12 }
 0x40b   : > { %7839 = vmatmul.mubr.f32.vlgmr.msra.gmra.mrb[64].mxu1 %v7705_v52 }
 0x4de   : > { %v7840_v62 = vpop.f32.mrb[64].mxu1 }
 0x4df   : > { %v7858_v40 = vadd.f32 %v7851_v41, %v7840_v62  ;;  %v7842_v19 = vpop.f32.mrb[65].mxu1 }
 0x4e0   : > { %v7859_v34 = vadd.f32 %v7855_v38, %v7842_v19  ;;  %v13133_v19 = vmax.f32 %v11909_v6, 0.0  ;;  %v13137_v6 = vmax.f32 %v11925_v57, 0.0  ;;  %v13141_v57 = vmax.f32 %v11941_v5, 0.0 }
 0x4e1   : > { %v7860_v23 = vmax.f32 %v7858_v40, 0.0  ;;  %v13145_v5 = vmax.f32 %v11957_v2, 0.0  ;;  %v13149_v2 = vmax.f32 %v11973_v54, 0.0 }
 0x4e2   : > { %v7861_v61 = vmax.f32 %v7859_v34, 0.0 }
 0x4e3   : > { %v7862_v27 = vsel %vm494_vm0, %v7860_v23, -inf }
 0x4e4   : > { %v7863_v51 = vsel %vm494_vm0, %v7861_v61, -inf }
 0x4e5   : > { %v7864_v47 = vmax.f32 %v7862_v27, %v7863_v51  ;;  %v13135_v27 = vmax.f32 %v11917_v9, 0.0  ;;  %v13139_v9 = vmax.f32 %v11933_v15, 0.0  ;;  %v13143_v15 = vmax.f32 %v11949_v63, 0.0 }
 0x4e6   : > { %v13147_v63 = vmax.f32 %v11965_v50, 0.0 }
 0x4e7   : > { %7865 = vmax.xlane.f32.xlu0 %v7864_v47  ;;  %v13136_v47 = vmax.f32 %v11919_v16, 0.0  ;;  %v13140_v16 = vmax.f32 %v11935_v1, 0.0  ;;  %v13144_v1 = vmax.f32 %v11951_v60, 0.0  ;;  %v13148_v60 = vmax.f32 %v11967_v48, 0.0 }
 0x4e8   : > { %v13153_v48 = vmax.f32 %v11983_v26, 0.0  ;;  %v13159_v26 = vmax.f32 %v11999_v46, 0.0  ;;  %v13165_v46 = vmax.f32 %v12015_v28, 0.0  ;;  %v13171_v28 = vmax.f32 %v12031_v58, 0.0 }
 0x4e9   : > { %v13177_v58 = vmax.f32 %v12059_v8, 0.0  ;;  %v13183_v8 = vmax.f32 %v12095_v13, 0.0  ;;  %v13190_v13 = vmax.f32 %v12131_v33, 0.0  ;;  %v13198_v33 = vmax.f32 %v12167_v24, 0.0 }
 0x4ea   : > { %v13206_v24 = vmax.f32 %v12203_v42, 0.0  ;;  %v13213_v42 = vmax.f32 %v12239_v14, 0.0  ;;  %v13221_v14 = vld [vmem:[#allocation36_spill] sm:$0xff] }
 0x574   : > { %v7866_v53 = vpop.xlane.xlu0 %7865 }
 0x575   : > { %v7867_v7 = vsub.f32 %v7860_v23, %v7866_v53  ;;  %v7868_v49 = vsub.f32 %v7861_v61, %v7866_v53  ;;  %v13134_v23 = vmax.f32 %v11911_v59, 0.0  ;;  %v13138_v59 = vmax.f32 %v11927_v32, 0.0 }
 0x576   : > { %v13142_v32 = vmax.f32 %v11943_v22, 0.0  ;;  %v13146_v22 = vmax.f32 %v11959_v25, 0.0  ;;  %v13150_v25 = vmax.f32 %v11975_v55, 0.0  ;;  %v13156_v55 = vmax.f32 %v11991_v17, 0.0 }
 0x577   : > { %v7869_v45 = vmul.f32 1.442695, %v7867_v7  ;;  %v7871_v44 = vmul.f32 1.442695, %v7868_v49  ;;  %v13162_v17 = vmax.f32 %v12007_v3, 0.0  ;;  %v13168_v3 = vmax.f32 %v12023_v43, 0.0 }
 0x578   : > { %v13174_v43 = vmax.f32 %v12039_v20, 0.0  ;;  %v13180_v20 = vmax.f32 %v12077_v18, 0.0  ;;  %v13186_v18 = vmax.f32 %v12113_v36, 0.0  ;;  %v13194_v36 = vmax.f32 %v12149_v56, 0.0 }
 0x579   : > { %9549 = vpow2.f32 %v7869_v45  ;;  %v13202_v56 = vmax.f32 %v12185_v39, 0.0  ;;  %v13209_v39 = vmax.f32 %v12221_v29, 0.0  ;;  %v13217_v29 = vmax.f32 %v12257_v31, 0.0  ;;  %v13225_v31 = vld [vmem:[#allocation38_spill] sm:$0xff] }
 0x57a   : > { %9551 = vpow2.f32 %v7871_v44 }
 0x583   : > { %v9550_v11 = vpop.eup %9549 }
 0x584   : > { %v9552_v0 = vpop.eup %9551  ;;  %v7873_v30 = vsel %vm494_vm0, %v9550_v11, 0.0 }
 0x585   : > { %v7874_v21 = vsel %vm494_vm0, %v9552_v0, 0.0 }
 0x586   : > { %v7875_v12 = vadd.f32 %v7874_v21, %v7873_v30 }
 0x588   : > { %7876 = vadd.xlane.f32.xlu0 %v7875_v12 }
 0x615   : > { %v7877_v52 = vpop.xlane.xlu0 %7876 }
 0x616   : > { %9553 = vrcp.f32 %v7877_v52 }
 0x620   : > { %v9554_v10 = vpop.eup %9553 }
 0x621   : > { %v7879_v41 = vmul.f32 %v9554_v10, %v9550_v11  ;;  %v7880_v38 = vmul.f32 %v9554_v10, %v9552_v0 }
 0x623   : > { %v12334_v62 = vrot.slane %v7879_v41, %v11887_v4  ;;  %v12337_v40 = vrot.slane %v7880_v38, %v11887_v4 }
 0x625   : > { %v12342_v34 = vmul.f32 %v12334_v62, %v13133_v19  ;;  %v12347_v61 = vmul.f32 %v12337_v40, %v13134_v23  ;;  %v12352_v51 = vmul.f32 %v12334_v62, %v13135_v27  ;;  %v12357_v4 = vmul.f32 %v12337_v40, %v13136_v47  ;;  %v13151_v19 = vld [vmem:[#allocation17_spill] sm:$0xff]  ;;  %v13154_v47 = vld [vmem:[#allocation18_spill] sm:$0xff] }
 0x626   : > { %v12362_v53 = vmul.f32 %v12334_v62, %v13137_v6  ;;  %v12367_v7 = vmul.f32 %v12337_v40, %v13138_v59  ;;  %v12372_v49 = vmul.f32 %v12334_v62, %v13139_v9  ;;  %v12377_v45 = vmul.f32 %v12337_v40, %v13140_v16  ;;  %v13157_v9 = vld [vmem:[#allocation19_spill] sm:$0xff] }
 0x627   : > { %v12382_v44 = vmul.f32 %v12334_v62, %v13141_v57  ;;  %v12387_v11 = vmul.f32 %v12337_v40, %v13142_v32  ;;  %v12392_v0 = vmul.f32 %v12334_v62, %v13143_v15  ;;  %v12397_v30 = vmul.f32 %v12337_v40, %v13144_v1  ;;  %v13160_v15 = vld [vmem:[#allocation20_spill] sm:$0xff] }
 0x628   : > { %v12402_v21 = vmul.f32 %v12334_v62, %v13145_v5  ;;  %v12407_v12 = vmul.f32 %v12337_v40, %v13146_v22  ;;  %v12412_v52 = vmul.f32 %v12334_v62, %v13147_v63  ;;  %v12417_v10 = vmul.f32 %v12337_v40, %v13148_v60  ;;  %v13163_v63 = vld [vmem:[#allocation21_spill] sm:$0xff] }
 0x629   : > { %v12422_v41 = vmul.f32 %v12334_v62, %v13149_v2  ;;  %v12427_v38 = vmul.f32 %v12337_v40, %v13150_v25  ;;  %v13152_v50 = vmax.f32 %v13151_v19, 0.0  ;;  %v12437_v27 = vmul.f32 %v12337_v40, %v13153_v48  ;;  %v13166_v19 = vld [vmem:[#allocation22_spill] sm:$0xff] }
 0x62a   : > { %v13155_v54 = vmax.f32 %v13154_v47, 0.0  ;;  %v12447_v59 = vmul.f32 %v12337_v40, %v13156_v55  ;;  %v13158_v16 = vmax.f32 %v13157_v9, 0.0  ;;  %v12457_v32 = vmul.f32 %v12337_v40, %v13159_v26  ;;  %v13172_v26 = vld [vmem:[#allocation24_spill] sm:$0xff] }
 0x62b   : > { %v12432_v23 = vmul.f32 %v12334_v62, %v13152_v50  ;;  %v13161_v1 = vmax.f32 %v13160_v15, 0.0  ;;  %v12467_v22 = vmul.f32 %v12337_v40, %v13162_v17  ;;  %v13164_v60 = vmax.f32 %v13163_v63, 0.0  ;;  %v13175_v63 = vld [vmem:[#allocation25_spill] sm:$0xff] }
 0x62c   : > { %v12442_v6 = vmul.f32 %v12334_v62, %v13155_v54  ;;  %v12452_v57 = vmul.f32 %v12334_v62, %v13158_v16  ;;  %v12477_v25 = vmul.f32 %v12337_v40, %v13165_v46  ;;  %v13167_v50 = vmax.f32 %v13166_v19, 0.0  ;;  %v13169_v54 = vld [vmem:[#allocation23_spill] sm:$0xff] }
 0x62d   : > { %v12462_v5 = vmul.f32 %v12334_v62, %v13161_v1  ;;  %v12472_v2 = vmul.f32 %v12334_v62, %v13164_v60  ;;  %v12487_v47 = vmul.f32 %v12337_v40, %v13168_v3  ;;  %v13170_v55 = vmax.f32 %v13169_v54, 0.0 }
 0x62e   : > { %v12482_v48 = vmul.f32 %v12334_v62, %v13167_v50  ;;  %v12497_v16 = vmul.f32 %v12337_v40, %v13171_v28  ;;  %v13173_v15 = vmax.f32 %v13172_v26, 0.0  ;;  %v12507_v17 = vmul.f32 %v12337_v40, %v13174_v43  ;;  %v13178_v50 = vld [vmem:[#allocation26_spill] sm:$0xff]  ;;  %v13181_v28 = vld [vmem:[#allocation27_spill] sm:$0xff] }
 0x62f   : > { %v12492_v9 = vmul.f32 %v12334_v62, %v13170_v55  ;;  %v13176_v60 = vmax.f32 %v13175_v63, 0.0  ;;  %v12517_v19 = vmul.f32 %v12337_v40, %v13177_v58  ;;  %v13179_v3 = vmax.f32 %v13178_v50, 0.0  ;;  %v13184_v63 = vld [vmem:[#allocation28_spill] sm:$0xff] }
 0x630   : > { %v12502_v1 = vmul.f32 %v12334_v62, %v13173_v15  ;;  %v12527_v55 = vmul.f32 %v12337_v40, %v13180_v20  ;;  %v13182_v26 = vmax.f32 %v13181_v28, 0.0  ;;  %v12537_v43 = vmul.f32 %v12337_v40, %v13183_v8  ;;  %v13192_v8 = vld [vmem:[#allocation30_spill] sm:$0xff] }
 0x631   : > { %v12512_v46 = vmul.f32 %v12334_v62, %v13176_v60  ;;  %v12522_v54 = vmul.f32 %v12334_v62, %v13179_v3  ;;  %v13185_v60 = vmax.f32 %v13184_v63, 0.0  ;;  %v12547_v50 = vmul.f32 %v12337_v40, %v13186_v18  ;;  %v13188_v3 = vld [vmem:[#allocation29_spill] sm:$0xff] }
 0x632   : > { %v12532_v15 = vmul.f32 %v12334_v62, %v13182_v26  ;;  %v13189_v20 = vmax.f32 %v13188_v3, 0.0  ;;  %v12557_v26 = vmul.f32 %v12337_v40, %v13190_v13  ;;  %v13193_v63 = vmax.f32 %v13192_v8, 0.0 }
 0x633   : > { %v12542_v58 = vmul.f32 %v12334_v62, %v13185_v60  ;;  %13187 = vst [vmem:[#allocation17_spill] sm:$0xff] %v12547_v50  ;;  %v12567_v18 = vmul.f32 %v12337_v40, %v13194_v36  ;;  %v13196_v50 = vld [vmem:[#allocation31_spill] sm:$0xff]  ;;  %v12577_v13 = vmul.f32 %v12337_v40, %v13198_v33  ;;  %v12587_v36 = vmul.f32 %v12337_v40, %v13202_v56 }
 0x634   : > { %v12552_v28 = vmul.f32 %v12334_v62, %v13189_v20  ;;  %13191 = vst [vmem:[#allocation18_spill] sm:$0xff] %v12557_v26  ;;  %v12562_v60 = vmul.f32 %v12334_v62, %v13193_v63  ;;  %v13197_v3 = vmax.f32 %v13196_v50, 0.0  ;;  %v13199_v26 = vld [vmem:[#allocation32_spill] sm:$0xff]  ;;  %v13203_v50 = vld [vmem:[#allocation33_spill] sm:$0xff]  ;;  %v12597_v33 = vmul.f32 %v12337_v40, %v13206_v24 }
 0x635   : > { %13195 = vst [vmem:[#allocation19_spill] sm:$0xff] %v12567_v18  ;;  %v13200_v8 = vmax.f32 %v13199_v26, 0.0  ;;  %v13204_v18 = vmax.f32 %v13203_v50, 0.0  ;;  %v13207_v26 = vld [vmem:[#allocation34_spill] sm:$0xff]  ;;  %v12607_v56 = vmul.f32 %v12337_v40, %v13209_v39  ;;  %v13210_v50 = vld [vmem:[#allocation35_spill] sm:$0xff]  ;;  %v12617_v24 = vmul.f32 %v12337_v40, %v13213_v42 }
 0x636   : > { %v12572_v20 = vmul.f32 %v12334_v62, %v13197_v3  ;;  %v12627_v39 = vmul.f32 %v12337_v40, %v13217_v29 }
 0x637   : > { %v12582_v63 = vmul.f32 %v12334_v62, %v13200_v8  ;;  %v12592_v3 = vmul.f32 %v12334_v62, %v13204_v18  ;;  %v13208_v8 = vmax.f32 %v13207_v26, 0.0  ;;  %v13211_v18 = vmax.f32 %v13210_v50, 0.0  ;;  %13214 = vst [vmem:[#allocation23_spill] sm:$0xff] %v12617_v24 }
 0x638   : > { %v13215_v26 = vmax.f32 %v12252_v37, 0.0  ;;  %13218 = vst [vmem:[#allocation25_spill] sm:$0xff] %v12627_v39  ;;  %v13219_v50 = vmax.f32 %v12270_v35, 0.0  ;;  %v13223_v37 = vld [vmem:[#allocation37_spill] sm:$0xff]  ;;  %v13226_v24 = vmax.f32 %v13225_v31, 0.0  ;;  %v13228_v35 = vld [vmem:[#allocation39_spill] sm:$0xff] }
 0x639   : > { %13201 = vst [vmem:[#allocation20_spill] sm:$0xff] %v12582_v63  ;;  %13205 = vst [vmem:[#allocation21_spill] sm:$0xff] %v12592_v3  ;;  %v12602_v63 = vmul.f32 %v12334_v62, %v13208_v8  ;;  %v12612_v3 = vmul.f32 %v12334_v62, %v13211_v18  ;;  %v9577_v31 = vld [vmem:[%s10073_s9 + $0x8] sm:$0xff] }
 0x63a   : > { %v12622_v8 = vmul.f32 %v12334_v62, %v13215_v26  ;;  %v12632_v18 = vmul.f32 %v12334_v62, %v13219_v50  ;;  %v13224_v26 = vmax.f32 %v13223_v37, 0.0  ;;  %v12647_v29 = vmul.f32 %v12337_v40, %v13226_v24  ;;  %v9576_v37 = vld [vmem:[%s10073_s9] sm:$0xff] }
 0x63b   : > { %13212 = vst [vmem:[#allocation22_spill] sm:$0xff] %v12612_v3  ;;  %v13222_v3 = vmax.f32 %v13221_v14, 0.0  ;;  %v13229_v50 = vmax.f32 %v13228_v35, 0.0  ;;  %v13230_v14 = vld [vmem:[#allocation40_spill] sm:$0xff]  ;;  %v7954_v24 = vadd.f32 %v9577_v31, %v12347_v61  ;;  %v9583_v61 = vld [vmem:[%s10073_s9 + $0x38] sm:$0xff] }
 0x63c   : > { %13216 = vst [vmem:[#allocation24_spill] sm:$0xff] %v12622_v8  ;;  %13220 = vst [vmem:[#allocation26_spill] sm:$0xff] %v12632_v18  ;;  %v12642_v8 = vmul.f32 %v12334_v62, %v13224_v26  ;;  %v13231_v39 = vmax.f32 %v13230_v14, 0.0  ;;  %v7953_v26 = vadd.f32 %v9576_v37, %v12342_v34  ;;  %v9580_v14 = vld [vmem:[%s10073_s9 + $0x20] sm:$0xff]  ;;  %v9582_v34 = vld [vmem:[%s10073_s9 + $0x30] sm:$0xff]  ;;  %v7960_v31 = vadd.f32 %v9583_v61, %v12377_v45 }
 0x63d   : > { %v12637_v42 = vmul.f32 %v12337_v40, %v13222_v3  ;;  %13227 = vst [vmem:[#allocation27_spill] sm:$0xff] %v12647_v29  ;;  %v12652_v18 = vmul.f32 %v12334_v62, %v13229_v50  ;;  %v9578_v29 = vld [vmem:[%s10073_s9 + $0x10] sm:$0xff]  ;;  %v9579_v62 = vld [vmem:[%s10073_s9 + $0x18] sm:$0xff]  ;;  %v7959_v37 = vadd.f32 %v9582_v34, %v12372_v49  ;;  %8018 = vst [vmem:[%s12685_s21 + $0x8] sm:$0xff] %v7954_v24 }
 0x63e   : > { %v12657_v3 = vmul.f32 %v12337_v40, %v13231_v39  ;;  %v7955_v35 = vadd.f32 %v9578_v29, %v12352_v51  ;;  %v7956_v50 = vadd.f32 %v9579_v62, %v12357_v4  ;;  %v7957_v40 = vadd.f32 %v9580_v14, %v12362_v53  ;;  %v9581_v39 = vld [vmem:[%s10073_s9 + $0x28] sm:$0xff]  ;;  %v9584_v51 = vld [vmem:[%s10073_s9 + $0x40] sm:$0xff]  ;;  %v9586_v53 = vld [vmem:[%s10073_s9 + $0x50] sm:$0xff]  ;;  %8017 = vst [vmem:[%s12685_s21] sm:$0xff] %v7953_v26 }
 0x63f   : > { %v7961_v29 = vadd.f32 %v9584_v51, %v12382_v44  ;;  %v9585_v4 = vld [vmem:[%s10073_s9 + $0x48] sm:$0xff]  ;;  %v7963_v14 = vadd.f32 %v9586_v53, %v12392_v0  ;;  %v9588_v49 = vld [vmem:[%s10073_s9 + $0x60] sm:$0xff]  ;;  %v9590_v0 = vld [vmem:[%s10073_s9 + $0x70] sm:$0xff]  ;;  %8023 = vst [vmem:[%s12685_s21 + $0x30] sm:$0xff] %v7959_v37 }
 0x640   : > { %13232 = vst [vmem:[#allocation28_spill] sm:$0xff] %v12657_v3  ;;  %v7958_v3 = vadd.f32 %v9581_v39, %v12367_v7  ;;  %v7962_v62 = vadd.f32 %v9585_v4, %v12387_v11  ;;  %v9587_v7 = vld [vmem:[%s10073_s9 + $0x58] sm:$0xff]  ;;  %8019 = vst [vmem:[%s12685_s21 + $0x10] sm:$0xff] %v7955_v35  ;;  %v7965_v45 = vadd.f32 %v9588_v49, %v12402_v21  ;;  %v9589_v44 = vld [vmem:[%s10073_s9 + $0x68] sm:$0xff] }
 0x641   : > { %v7964_v39 = vadd.f32 %v9587_v7, %v12397_v30  ;;  %8020 = vst [vmem:[%s12685_s21 + $0x18] sm:$0xff] %v7956_v50  ;;  %v7966_v11 = vadd.f32 %v9589_v44, %v12407_v12  ;;  %v7967_v30 = vadd.f32 %v9590_v0, %v12412_v52  ;;  %v9591_v34 = vld [vmem:[%s10073_s9 + $0x78] sm:$0xff]  ;;  %8021 = vst [vmem:[%s12685_s21 + $0x20] sm:$0xff] %v7957_v40  ;;  %v9592_v21 = vld [vmem:[%s10073_s9 + $0x80] sm:$0xff] }
 0x642   : > { %v7968_v26 = vadd.f32 %v9591_v34, %v12417_v10  ;;  %8022 = vst [vmem:[%s12685_s21 + $0x28] sm:$0xff] %v7958_v3  ;;  %8024 = vst [vmem:[%s12685_s21 + $0x38] sm:$0xff] %v7960_v31  ;;  %v7969_v12 = vadd.f32 %v9592_v21, %v12422_v41  ;;  %v9593_v24 = vld [vmem:[%s10073_s9 + $0x88] sm:$0xff]  ;;  %v9594_v35 = vld [vmem:[%s10073_s9 + $0x90] sm:$0xff] }
 0x643   : > { %v7970_v52 = vadd.f32 %v9593_v24, %v12427_v38  ;;  %v7971_v50 = vadd.f32 %v9594_v35, %v12432_v23  ;;  %v9595_v10 = vld [vmem:[%s10073_s9 + $0x98] sm:$0xff]  ;;  %8025 = vst [vmem:[%s12685_s21 + $0x40] sm:$0xff] %v7961_v29  ;;  %8026 = vst [vmem:[%s12685_s21 + $0x48] sm:$0xff] %v7962_v62  ;;  %v9596_v41 = vld [vmem:[%s10073_s9 + $0xa0] sm:$0xff] }
 0x644   : > { %v7972_v3 = vadd.f32 %v9595_v10, %v12437_v27  ;;  %8027 = vst [vmem:[%s12685_s21 + $0x50] sm:$0xff] %v7963_v14  ;;  %8028 = vst [vmem:[%s12685_s21 + $0x58] sm:$0xff] %v7964_v39  ;;  %v7973_v38 = vadd.f32 %v9596_v41, %v12442_v6  ;;  %v9597_v40 = vld [vmem:[%s10073_s9 + $0xa8] sm:$0xff]  ;;  %v9598_v37 = vld [vmem:[%s10073_s9 + $0xb0] sm:$0xff] }
 0x645   : > { %v7974_v23 = vadd.f32 %v9597_v40, %v12447_v59  ;;  %v7975_v61 = vadd.f32 %v9598_v37, %v12452_v57  ;;  %v9599_v27 = vld [vmem:[%s10073_s9 + $0xb8] sm:$0xff]  ;;  %8029 = vst [vmem:[%s12685_s21 + $0x60] sm:$0xff] %v7965_v45  ;;  %8030 = vst [vmem:[%s12685_s21 + $0x68] sm:$0xff] %v7966_v11  ;;  %v9600_v6 = vld [vmem:[%s10073_s9 + $0xc0] sm:$0xff] }
 0x646   : > { %v7976_v31 = vadd.f32 %v9599_v27, %v12457_v32  ;;  %8031 = vst [vmem:[%s12685_s21 + $0x70] sm:$0xff] %v7967_v30  ;;  %8032 = vst [vmem:[%s12685_s21 + $0x78] sm:$0xff] %v7968_v26  ;;  %v7977_v59 = vadd.f32 %v9600_v6, %v12462_v5  ;;  %v9601_v51 = vld [vmem:[%s10073_s9 + $0xc8] sm:$0xff]  ;;  %v9602_v29 = vld [vmem:[%s10073_s9 + $0xd0] sm:$0xff] }
 0x647   : > { %v7978_v57 = vadd.f32 %v9601_v51, %v12467_v22  ;;  %v7979_v4 = vadd.f32 %v9602_v29, %v12472_v2  ;;  %v9603_v32 = vld [vmem:[%s10073_s9 + $0xd8] sm:$0xff]  ;;  %8033 = vst [vmem:[%s12685_s21 + $0x80] sm:$0xff] %v7969_v12  ;;  %8034 = vst [vmem:[%s12685_s21 + $0x88] sm:$0xff] %v7970_v52  ;;  %v9604_v5 = vld [vmem:[%s10073_s9 + $0xe0] sm:$0xff] }
 0x648   : > { %v7980_v62 = vadd.f32 %v9603_v32, %v12477_v25  ;;  %8035 = vst [vmem:[%s12685_s21 + $0x90] sm:$0xff] %v7971_v50  ;;  %8036 = vst [vmem:[%s12685_s21 + $0x98] sm:$0xff] %v7972_v3  ;;  %v7981_v22 = vadd.f32 %v9604_v5, %v12482_v48  ;;  %v9605_v53 = vld [vmem:[%s10073_s9 + $0xe8] sm:$0xff]  ;;  %v9606_v14 = vld [vmem:[%s10073_s9 + $0xf0] sm:$0xff] }
 0x649   : > { %v7982_v2 = vadd.f32 %v9605_v53, %v12487_v47  ;;  %v7983_v7 = vadd.f32 %v9606_v14, %v12492_v9  ;;  %v9607_v25 = vld [vmem:[%s10073_s9 + $0xf8] sm:$0xff]  ;;  %8037 = vst [vmem:[%s12685_s21 + $0xa0] sm:$0xff] %v7973_v38  ;;  %8038 = vst [vmem:[%s12685_s21 + $0xa8] sm:$0xff] %v7974_v23  ;;  %v9608_v48 = vld [vmem:[%s10073_s9 + $0x100] sm:$0xff] }
 0x64a   : > { %v7984_v39 = vadd.f32 %v9607_v25, %v12497_v16  ;;  %8039 = vst [vmem:[%s12685_s21 + $0xb0] sm:$0xff] %v7975_v61  ;;  %8040 = vst [vmem:[%s12685_s21 + $0xb8] sm:$0xff] %v7976_v31  ;;  %v7985_v47 = vadd.f32 %v9608_v48, %v12502_v1  ;;  %v9609_v49 = vld [vmem:[%s10073_s9 + $0x108] sm:$0xff]  ;;  %v9610_v45 = vld [vmem:[%s10073_s9 + $0x110] sm:$0xff] }
 0x64b   : > { %v7986_v9 = vadd.f32 %v9609_v49, %v12507_v17  ;;  %v7987_v44 = vadd.f32 %v9610_v45, %v12512_v46  ;;  %v9611_v16 = vld [vmem:[%s10073_s9 + $0x118] sm:$0xff]  ;;  %8041 = vst [vmem:[%s12685_s21 + $0xc0] sm:$0xff] %v7977_v59  ;;  %8042 = vst [vmem:[%s12685_s21 + $0xc8] sm:$0xff] %v7978_v57  ;;  %v9612_v1 = vld [vmem:[%s10073_s9 + $0x120] sm:$0xff] }
 0x64c   : > { %v7988_v11 = vadd.f32 %v9611_v16, %v12517_v19  ;;  %8043 = vst [vmem:[%s12685_s21 + $0xd0] sm:$0xff] %v7979_v4  ;;  %8044 = vst [vmem:[%s12685_s21 + $0xd8] sm:$0xff] %v7980_v62  ;;  %v7989_v17 = vadd.f32 %v9612_v1, %v12522_v54  ;;  %v9613_v0 = vld [vmem:[%s10073_s9 + $0x128] sm:$0xff]  ;;  %v9614_v30 = vld [vmem:[%s10073_s9 + $0x130] sm:$0xff] }
 0x64d   : > { %v7990_v46 = vadd.f32 %v9613_v0, %v12527_v55  ;;  %v7991_v34 = vadd.f32 %v9614_v30, %v12532_v15  ;;  %v9615_v19 = vld [vmem:[%s10073_s9 + $0x138] sm:$0xff]  ;;  %8045 = vst [vmem:[%s12685_s21 + $0xe0] sm:$0xff] %v7981_v22  ;;  %8046 = vst [vmem:[%s12685_s21 + $0xe8] sm:$0xff] %v7982_v2  ;;  %v9616_v54 = vld [vmem:[%s10073_s9 + $0x140] sm:$0xff] }
 0x64e   : > { %v7992_v26 = vadd.f32 %v9615_v19, %v12537_v43  ;;  %8047 = vst [vmem:[%s12685_s21 + $0xf0] sm:$0xff] %v7983_v7  ;;  %8048 = vst [vmem:[%s12685_s21 + $0xf8] sm:$0xff] %v7984_v39  ;;  %v7993_v55 = vadd.f32 %v9616_v54, %v12542_v58  ;;  %v9617_v21 = vld [vmem:[%s10073_s9 + $0x148] sm:$0xff]  ;;  %v9618_v24 = vld [vmem:[%s10073_s9 + $0x150] sm:$0xff] }
 0x64f   : > { %v13233_v12 = vld [vmem:[#allocation17_spill] sm:$0xff]  ;;  %v7995_v52 = vadd.f32 %v9618_v24, %v12552_v28  ;;  %v9619_v43 = vld [vmem:[%s10073_s9 + $0x158] sm:$0xff]  ;;  %v13234_v35 = vld [vmem:[#allocation18_spill] sm:$0xff]  ;;  %8049 = vst [vmem:[%s12685_s21 + $0x100] sm:$0xff] %v7985_v47 }
 0x650   : > { %v7994_v15 = vadd.f32 %v9617_v21, %v13233_v12  ;;  %v7996_v50 = vadd.f32 %v9619_v43, %v13234_v35  ;;  %8050 = vst [vmem:[%s12685_s21 + $0x108] sm:$0xff] %v7986_v9  ;;  %8051 = vst [vmem:[%s12685_s21 + $0x110] sm:$0xff] %v7987_v44  ;;  %v9620_v58 = vld [vmem:[%s10073_s9 + $0x160] sm:$0xff]  ;;  %v9621_v3 = vld [vmem:[%s10073_s9 + $0x168] sm:$0xff] }
 0x651   : > { %8052 = vst [vmem:[%s12685_s21 + $0x118] sm:$0xff] %v7988_v11  ;;  %v7997_v10 = vadd.f32 %v9620_v58, %v12562_v60  ;;  %v13235_v41 = vld [vmem:[#allocation19_spill] sm:$0xff]  ;;  %v9622_v38 = vld [vmem:[%s10073_s9 + $0x170] sm:$0xff]  ;;  %8053 = vst [vmem:[%s12685_s21 + $0x120] sm:$0xff] %v7989_v17 }
 0x652   : > { %v7998_v28 = vadd.f32 %v9621_v3, %v13235_v41  ;;  %v7999_v40 = vadd.f32 %v9622_v38, %v12572_v20  ;;  %v9623_v23 = vld [vmem:[%s10073_s9 + $0x178] sm:$0xff]  ;;  %8054 = vst [vmem:[%s12685_s21 + $0x128] sm:$0xff] %v7990_v46  ;;  %8055 = vst [vmem:[%s12685_s21 + $0x130] sm:$0xff] %v7991_v34  ;;  %v9624_v60 = vld [vmem:[%s10073_s9 + $0x180] sm:$0xff] }
 0x653   : > { %v8000_v37 = vadd.f32 %v9623_v23, %v12577_v13  ;;  %8056 = vst [vmem:[%s12685_s21 + $0x138] sm:$0xff] %v7992_v26  ;;  %v13236_v61 = vld [vmem:[#allocation20_spill] sm:$0xff]  ;;  %v9625_v20 = vld [vmem:[%s10073_s9 + $0x188] sm:$0xff]  ;;  %v9626_v13 = vld [vmem:[%s10073_s9 + $0x190] sm:$0xff] }
 0x654   : > { %v8001_v27 = vadd.f32 %v9624_v60, %v13236_v61  ;;  %v8002_v31 = vadd.f32 %v9625_v20, %v12587_v36  ;;  %v13237_v6 = vld [vmem:[#allocation21_spill] sm:$0xff]  ;;  %v9627_v51 = vld [vmem:[%s10073_s9 + $0x198] sm:$0xff]  ;;  %8057 = vst [vmem:[%s12685_s21 + $0x140] sm:$0xff] %v7993_v55  ;;  %8058 = vst [vmem:[%s12685_s21 + $0x148] sm:$0xff] %v7994_v15 }
 0x655   : > { %v8003_v59 = vadd.f32 %v9626_v13, %v13237_v6  ;;  %v8004_v57 = vadd.f32 %v9627_v51, %v12597_v33  ;;  %8059 = vst [vmem:[%s12685_s21 + $0x150] sm:$0xff] %v7995_v52  ;;  %8060 = vst [vmem:[%s12685_s21 + $0x158] sm:$0xff] %v7996_v50  ;;  %v9628_v29 = vld [vmem:[%s10073_s9 + $0x1a0] sm:$0xff]  ;;  %v9629_v4 = vld [vmem:[%s10073_s9 + $0x1a8] sm:$0xff] }
 0x656   : > { %v8005_v36 = vadd.f32 %v9628_v29, %v12602_v63  ;;  %v8006_v32 = vadd.f32 %v9629_v4, %v12607_v56  ;;  %v9630_v62 = vld [vmem:[%s10073_s9 + $0x1b0] sm:$0xff]  ;;  %v9631_v33 = vld [vmem:[%s10073_s9 + $0x1b8] sm:$0xff]  ;;  %8061 = vst [vmem:[%s12685_s21 + $0x160] sm:$0xff] %v7997_v10  ;;  %8062 = vst [vmem:[%s12685_s21 + $0x168] sm:$0xff] %v7998_v28 }
 0x657   : > { %v13238_v5 = vld [vmem:[#allocation22_spill] sm:$0xff]  ;;  %v13239_v53 = vld [vmem:[#allocation23_spill] sm:$0xff]  ;;  %8063 = vst [vmem:[%s12685_s21 + $0x170] sm:$0xff] %v7999_v40  ;;  %8064 = vst [vmem:[%s12685_s21 + $0x178] sm:$0xff] %v8000_v37 }
 0x658   : > { %v8007_v22 = vadd.f32 %v9630_v62, %v13238_v5  ;;  %v8008_v2 = vadd.f32 %v9631_v33, %v13239_v53  ;;  %v9632_v63 = vld [vmem:[%s10073_s9 + $0x1c0] sm:$0xff]  ;;  %v9633_v7 = vld [vmem:[%s10073_s9 + $0x1c8] sm:$0xff]  ;;  %v9634_v48 = vld [vmem:[%s10073_s9 + $0x1d0] sm:$0xff]  ;;  %8065 = vst [vmem:[%s12685_s21 + $0x180] sm:$0xff] %v8001_v27 }
 0x659   : > { %v13240_v14 = vld [vmem:[#allocation24_spill] sm:$0xff]  ;;  %v13241_v25 = vld [vmem:[#allocation25_spill] sm:$0xff]  ;;  %v13242_v47 = vld [vmem:[#allocation26_spill] sm:$0xff]  ;;  %8066 = vst [vmem:[%s12685_s21 + $0x188] sm:$0xff] %v8002_v31 }
 0x65a   : > { %v8009_v56 = vadd.f32 %v9632_v63, %v13240_v14  ;;  %v8010_v39 = vadd.f32 %v9633_v7, %v13241_v25  ;;  %v8011_v49 = vadd.f32 %v9634_v48, %v13242_v47  ;;  %v9635_v9 = vld [vmem:[%s10073_s9 + $0x1d8] sm:$0xff]  ;;  %8067 = vst [vmem:[%s12685_s21 + $0x190] sm:$0xff] %v8003_v59  ;;  %8068 = vst [vmem:[%s12685_s21 + $0x198] sm:$0xff] %v8004_v57  ;;  %v9637_v16 = vld [vmem:[%s10073_s9 + $0x1e8] sm:$0xff] }
 0x65b   : > { %v8012_v45 = vadd.f32 %v9635_v9, %v12637_v42  ;;  %v9636_v42 = vld [vmem:[%s10073_s9 + $0x1e0] sm:$0xff]  ;;  %v13243_v11 = vld [vmem:[#allocation27_spill] sm:$0xff]  ;;  %v9638_v17 = vld [vmem:[%s10073_s9 + $0x1f0] sm:$0xff]  ;;  %8069 = vst [vmem:[%s12685_s21 + $0x1a0] sm:$0xff] %v8005_v36 }
 0x65c   : > { %v8013_v44 = vadd.f32 %v9636_v42, %v12642_v8  ;;  %v8014_v1 = vadd.f32 %v9637_v16, %v13243_v11  ;;  %v8015_v0 = vadd.f32 %v9638_v17, %v12652_v18  ;;  %v9639_v46 = vld [vmem:[%s10073_s9 + $0x1f8] sm:$0xff]  ;;  %v13244_v30 = vld [vmem:[#allocation28_spill] sm:$0xff]  ;;  %8070 = vst [vmem:[%s12685_s21 + $0x1a8] sm:$0xff] %v8006_v32  ;;  %8071 = vst [vmem:[%s12685_s21 + $0x1b0] sm:$0xff] %v8007_v22 }
 0x65d   : > { %v8016_v34 = vadd.f32 %v9639_v46, %v13244_v30  ;;  %8072 = vst [vmem:[%s12685_s21 + $0x1b8] sm:$0xff] %v8008_v2  ;;  %8073 = vst [vmem:[%s12685_s21 + $0x1c0] sm:$0xff] %v8009_v56 }
 0x65e   : > { %8074 = vst [vmem:[%s12685_s21 + $0x1c8] sm:$0xff] %v8010_v39  ;;  %8075 = vst [vmem:[%s12685_s21 + $0x1d0] sm:$0xff] %v8011_v49 }
 0x65f   : > { %8076 = vst [vmem:[%s12685_s21 + $0x1d8] sm:$0xff] %v8012_v45  ;;  %8077 = vst [vmem:[%s12685_s21 + $0x1e0] sm:$0xff] %v8013_v44 }
 0x660   : > { %8078 = vst [vmem:[%s12685_s21 + $0x1e8] sm:$0xff] %v8014_v1  ;;  %8079 = vst [vmem:[%s12685_s21 + $0x1f0] sm:$0xff] %v8015_v0 }
 0x661   : > { %8080 = vst [vmem:[%s12685_s21 + $0x1f8] sm:$0xff] %v8016_v34 }
 0x662   : > { %9767 = shalt.err (!%p9764_p4)
}
 0x663   : > { %s9768_s5 = scalar_lea.hbm %s12842_s8, 8192  ;;  %s9772_s26 = scalar_lea.hbm %s12914_s4, 16384 }
 0x664   : > { %p9769_p9 = scmp.ne.s32.totalorder %s12842_s8, %s9768_s5  ;;  %p9773_p8 = scmp.lt.u32.totalorder %s12842_s8, %s12914_s4 }
 0x665   : > { %p9774_p13 = scmp.lt.u32.totalorder %s9772_s26, %s9768_s5  ;;  %p9776_p10 = scmp.lt.u32.totalorder %s9768_s5, %s12842_s8 }
 0x666   : > { %p9770_p0 = pnand %p9769_p9, %p10016_p5 }
 0x667   : > { %p9775_p6 = por %p9774_p13, %p9773_p8 }
 0x668   : > { %p9771_p11 = pneg %p9770_p0 }
 0x669   : > { %p9777_p3 = por %p9776_p10, %p9775_p6 }
 0x66b   : > { %p9778_p7 = pnand %p9777_p3, %p9771_p11 }
 0x66d   : > { %9781 = shalt.err (!%p9778_p7)
}
 0x66e   : > { %s9838_s21 = smov 256   ;;  %s9839_s23 = smov 16  }
 0x66f   : > { %9481 = dma.vmem_to_hbm [thread:$0]  (%p10016_p5), %s12846_s14, 8192, %s12842_s8, %s8082_s19, %s9838_s21, %s9838_s21, %s9839_s23  }
 0x670 PF: > { %s8110_s20 = sand.u32 1, %s9816_s15   ;;  %p13245_p12 = scmp.ne.s32.totalorder %s12990_s22, 0 }
 0x671   : > { %p13246_p1 = scmp.ge.s32.totalorder %s9828_s18, 2  ;;  %s8111_s6 = scalar_lea.sflag [#allocation6], %s8110_s20 }
 0x673   : > { %p9498_p2 = pnand %p13246_p1, %p13245_p12 }
 0x675   : > { %9811 = dma.done.wait (!%p9498_p2), %s8111_s6, 8192  }
 0x676   : > { %9813 = vsyncadd (!%p9498_p2), %s8111_s6, 4294959104  ;;  %p19_p4 = scmp.ge.s32.totalorder %s10002_s10, 4   ;;  %s13247_s15 = smov %s9820_s16 }
 0x677   : > { %s13248_s16 = smov %s9824_s17  ;;  %s13249_s17 = smov %s10012_s12 }
 0x678   : > { %s13250_s18 = smov %s10002_s10  ;;  %21 = sbr.rel (!%p19_p4) target bundleno = 7 (0x7), region = 98 }
 0x67f   :  { %8116 = vsyncpa [#allocation5], 1 }
 0x680   :  { %8118 = vsyncpa [#allocation5 + $0x1], 1 }
 0x681   :  { %8119 = vsyncpa [#allocation8], 1 }
 0x682   :  { %8120 = vsyncpa [#allocation11], 1 }
 0x683   :  { %8121 = vsyncpa [#allocation6], 1 }
 0x684   :  { %8123 = vsyncpa [#allocation6 + $0x1], 1 }

</bundles_post_ra>
